<compile_context>
chip_gen: v5e
topology: v5e:2x2
jax: 0.10.0
libtpu: 0.0.40
codegen_flags: <defaults>
</compile_context>

<pallas_src>
import functools

import jax
import jax.numpy as jnp
from jax.experimental import pallas as pl
from jax.experimental.pallas import tpu as pltpu

NEG_SLOPE = 0.1
D_IN, D_H0, D_H1, D_H2 = 2048, 1024, 512, 512
D_OUT_PAD = 128  # last layer (512 -> 1) zero-padded to 128 lanes


def _leaky_relu(h, slope=NEG_SLOPE):
    return jnp.where(h > 0, h, slope * h)


def classblock_kernel(x_ref,
                      w0_ref, b0_ref,
                      w1_ref, b1_ref,
                      w2_ref, b2_ref,
                      w3_ref, b3_ref,
                      o_ref):
    # Dropout is identity in eval mode; Sigmoid (re2) is unused in the PyTorch
    # forward, so neither appears here.
    # TODO(synk): train-mode dropout (p=0.5) not implemented.
    h = jnp.dot(x_ref[...], w0_ref[...], preferred_element_type=jnp.float32)
    h = _leaky_relu(h + b0_ref[...])                                  # (TB, 1024) f32
    h = jnp.dot(h.astype(jnp.bfloat16), w1_ref[...],
                preferred_element_type=jnp.float32)
    h = _leaky_relu(h + b1_ref[...])                                  # (TB, 512) f32
    h = jnp.dot(h.astype(jnp.bfloat16), w2_ref[...],
                preferred_element_type=jnp.float32)
    h = _leaky_relu(h + b2_ref[...])                                  # (TB, 512) f32
    h = jnp.dot(h.astype(jnp.bfloat16), w3_ref[...],
                preferred_element_type=jnp.float32)
    o_ref[...] = (h + b3_ref[...]).astype(o_ref.dtype)                # (TB, 128) f32


def prepare_params(params):
    """One-time conversion from PyTorch layout (W=(out,in) f32, b=(out,) f32)
    to kernel layout: W=(in,out) bf16, b=(1,out) f32, with the final layer
    zero-padded from out=1 to out=128 for lane-dense output stores."""
    prep = {}
    for idx in range(4):
        w = jnp.asarray(params[f"w{idx}"], jnp.float32).T       # (in, out)
        b = jnp.asarray(params[f"b{idx}"], jnp.float32)[None]   # (1, out)
        if idx == 3:
            w = jnp.pad(w, ((0, 0), (0, D_OUT_PAD - w.shape[1])))
            b = jnp.pad(b, ((0, 0), (0, D_OUT_PAD - b.shape[1])))
        prep[f"w{idx}"] = w.astype(jnp.bfloat16)
        prep[f"b{idx}"] = b
    return prep


@functools.partial(jax.jit, static_argnames=("block_b",))
def classblock_forward(x, prepared, block_b=256):
    """x: (B, 2048) float32. prepared: output of prepare_params().
    Returns (B, 1) float32."""
    B = x.shape[0]
    tb = B if B <= block_b else block_b        # block_b is a multiple of 8
    grid = (pl.cdiv(B, tb),)

    x_bf16 = x.astype(jnp.bfloat16)

    def resident(a):
        # Full-array block with a constant index_map: the block index never
        # changes across the grid, so Pallas keeps it resident in VMEM
        # (no re-DMA per batch tile).
        nd = a.ndim
        return pl.BlockSpec(a.shape, lambda i, _nd=nd: (0,) * _nd)

    in_specs = [pl.BlockSpec((tb, D_IN), lambda i: (i, 0))]
    operands = [x_bf16]
    for idx in range(4):
        w = prepared[f"w{idx}"]
        b = prepared[f"b{idx}"]
        in_specs += [resident(w), resident(b)]
        operands += [w, b]

    flops = 2 * B * (D_IN * D_H0 + D_H0 * D_H1 + D_H1 * D_H2 + D_H2 * D_OUT_PAD)
    param_bytes = sum(int(v.size) * v.dtype.itemsize for v in prepared.values())
    io_bytes = B * D_IN * 2 + B * D_OUT_PAD * 4
    cost = pl.CostEstimate(flops=flops, transcendentals=0,
                           bytes_accessed=param_bytes + io_bytes)

    out = pl.pallas_call(
        classblock_kernel,
        out_shape=jax.ShapeDtypeStruct((B, D_OUT_PAD), jnp.float32),
        grid=grid,
        in_specs=in_specs,
        out_specs=pl.BlockSpec((tb, D_OUT_PAD), lambda i: (i, 0)),
        compiler_params=pltpu.CompilerParams(
            dimension_semantics=("parallel",),
            vmem_limit_bytes=32 << 20,
        ),
        cost_estimate=cost,
    )(*operands)
    return out[:, :1]


def init_params(key):
    """Deterministic synthetic parameters matching nn.Linear shapes."""
    dims = [(1024, 2048), (512, 1024), (512, 512), (1, 512)]
    params = {}
    for idx, (out_d, in_d) in enumerate(dims):
        kw, kb, key = jax.random.split(key, 3)
        scale = 1.0 / jnp.sqrt(jnp.float32(in_d))
        params[f"w{idx}"] = jax.random.uniform(
            kw, (out_d, in_d), jnp.float32, -scale, scale)
        params[f"b{idx}"] = jax.random.uniform(
            kb, (out_d,), jnp.float32, -scale, scale)
    return params


def reference_forward_f32(x, params):
    """Pure f32 reference in the original PyTorch layout."""
    h = x
    for idx in range(4):
        h = h @ params[f"w{idx}"].T + params[f"b{idx}"][None, :]
        if idx < 3:
            h = jnp.where(h > 0, h, NEG_SLOPE * h)
    return h


def reference_forward_bf16(x, prepared):
    """Reference that mirrors the kernel's bf16-weight quantization exactly."""
    h = x.astype(jnp.bfloat16)
    for idx in range(4):
        h = jnp.dot(h, prepared[f"w{idx}"],
                    preferred_element_type=jnp.float32) + prepared[f"b{idx}"]
        if idx < 3:
            h = jnp.where(h > 0, h, NEG_SLOPE * h).astype(jnp.bfloat16)
    return h[:, :1]


if __name__ == "__main__":
    key = jax.random.PRNGKey(0)
    kx, kp = jax.random.split(key)

    B = 8
    x = jax.random.normal(kx, (B, D_IN), jnp.float32)
    params = init_params(kp)
    prepared = prepare_params(params)

    out = classblock_forward(x, prepared)
    out = jax.block_until_ready(out)
    assert out.shape == (B, 1)

    ref_bf16 = reference_forward_bf16(x, prepared)
    ref_f32 = reference_forward_f32(x, params)

    assert jnp.allclose(out, ref_bf16, atol=1e-3, rtol=1e-3), \
        "mismatch vs bf16 reference"
    assert float(jnp.max(jnp.abs(out - ref_f32))) < 5e-2, \
        "mismatch vs f32 reference (bf16 quantization error too large)"

    print("KERNEL_OK")
</pallas_src>

<mosaic_0001>
module attributes {stable_mosaic.version = 11 : i64} {
  func.func @classblock_kernel(%arg0: i32, %arg1: memref<8x2048xbf16, #tpu.memory_space<vmem>>, %arg2: memref<2048x1024xbf16, #tpu.memory_space<vmem>>, %arg3: memref<1x1024xf32, #tpu.memory_space<vmem>>, %arg4: memref<1024x512xbf16, #tpu.memory_space<vmem>>, %arg5: memref<1x512xf32, #tpu.memory_space<vmem>>, %arg6: memref<512x512xbf16, #tpu.memory_space<vmem>>, %arg7: memref<1x512xf32, #tpu.memory_space<vmem>>, %arg8: memref<512x128xbf16, #tpu.memory_space<vmem>>, %arg9: memref<1x128xf32, #tpu.memory_space<vmem>>, %arg10: memref<8x128xf32, #tpu.memory_space<vmem>>) attributes {dimension_semantics = [#tpu.dimension_semantics<parallel>], iteration_bounds = array<i64: 1>, scalar_prefetch = 0 : i64, scratch_operands = 0 : i64, tpu.core_type = #tpu.core_type<tc>, window_params = [{transform_indices = @transform_0, window_bounds = array<i64: 8, 2048>}, {pipeline_mode = #tpu.pipeline_mode<synchronous>, transform_indices = @transform_1, window_bounds = array<i64: 2048, 1024>}, {pipeline_mode = #tpu.pipeline_mode<synchronous>, transform_indices = @transform_2, window_bounds = array<i64: 1, 1024>}, {pipeline_mode = #tpu.pipeline_mode<synchronous>, transform_indices = @transform_3, window_bounds = array<i64: 1024, 512>}, {pipeline_mode = #tpu.pipeline_mode<synchronous>, transform_indices = @transform_4, window_bounds = array<i64: 1, 512>}, {pipeline_mode = #tpu.pipeline_mode<synchronous>, transform_indices = @transform_5, window_bounds = array<i64: 512, 512>}, {pipeline_mode = #tpu.pipeline_mode<synchronous>, transform_indices = @transform_6, window_bounds = array<i64: 1, 512>}, {pipeline_mode = #tpu.pipeline_mode<synchronous>, transform_indices = @transform_7, window_bounds = array<i64: 512, 128>}, {pipeline_mode = #tpu.pipeline_mode<synchronous>, transform_indices = @transform_8, window_bounds = array<i64: 1, 128>}, {transform_indices = @transform_9, window_bounds = array<i64: 8, 128>}]} {
    %c0 = arith.constant 0 : index
    %c0_0 = arith.constant 0 : index
    %0 = vector.load %arg1[%c0, %c0_0] : memref<8x2048xbf16, #tpu.memory_space<vmem>>, vector<8x2048xbf16>
    %c0_1 = arith.constant 0 : index
    %c0_2 = arith.constant 0 : index
    %1 = vector.load %arg2[%c0_1, %c0_2] : memref<2048x1024xbf16, #tpu.memory_space<vmem>>, vector<2048x1024xbf16>
    %cst = arith.constant dense<0.000000e+00> : vector<8x1024xf32>
    %2 = tpu.matmul %0, %1, %cst {dimension_numbers = #tpu.dot_dimension_numbers<[1], [0], [0], [1], [0, 0, 1, 1], [], []>} : vector<8x2048xbf16>, vector<2048x1024xbf16>, vector<8x1024xf32> -> vector<8x1024xf32>
    %c0_3 = arith.constant 0 : index
    %c0_4 = arith.constant 0 : index
    %3 = vector.load %arg3[%c0_3, %c0_4] : memref<1x1024xf32, #tpu.memory_space<vmem>>, vector<1x1024xf32>
    %4 = vector.broadcast %3 : vector<1x1024xf32> to vector<8x1024xf32>
    %5 = arith.addf %2, %4 : vector<8x1024xf32>
    %cst_5 = arith.constant 0.000000e+00 : f32
    %6 = vector.broadcast %cst_5 : f32 to vector<8x1024xf32>
    %7 = arith.cmpf ogt, %5, %6 : vector<8x1024xf32>
    %cst_6 = arith.constant 1.000000e-01 : f32
    %8 = vector.broadcast %cst_6 : f32 to vector<8x1024xf32>
    %9 = arith.mulf %8, %5 : vector<8x1024xf32>
    %10 = arith.select %7, %5, %9 : vector<8x1024xi1>, vector<8x1024xf32>
    %11 = arith.truncf %10 : vector<8x1024xf32> to vector<8x1024xbf16>
    %c0_7 = arith.constant 0 : index
    %c0_8 = arith.constant 0 : index
    %12 = vector.load %arg4[%c0_7, %c0_8] : memref<1024x512xbf16, #tpu.memory_space<vmem>>, vector<1024x512xbf16>
    %cst_9 = arith.constant dense<0.000000e+00> : vector<8x512xf32>
    %13 = tpu.matmul %11, %12, %cst_9 {dimension_numbers = #tpu.dot_dimension_numbers<[1], [0], [0], [1], [0, 0, 1, 1], [], []>} : vector<8x1024xbf16>, vector<1024x512xbf16>, vector<8x512xf32> -> vector<8x512xf32>
    %c0_10 = arith.constant 0 : index
    %c0_11 = arith.constant 0 : index
    %14 = vector.load %arg5[%c0_10, %c0_11] : memref<1x512xf32, #tpu.memory_space<vmem>>, vector<1x512xf32>
    %15 = vector.broadcast %14 : vector<1x512xf32> to vector<8x512xf32>
    %16 = arith.addf %13, %15 : vector<8x512xf32>
    %cst_12 = arith.constant 0.000000e+00 : f32
    %17 = vector.broadcast %cst_12 : f32 to vector<8x512xf32>
    %18 = arith.cmpf ogt, %16, %17 : vector<8x512xf32>
    %cst_13 = arith.constant 1.000000e-01 : f32
    %19 = vector.broadcast %cst_13 : f32 to vector<8x512xf32>
    %20 = arith.mulf %19, %16 : vector<8x512xf32>
    %21 = arith.select %18, %16, %20 : vector<8x512xi1>, vector<8x512xf32>
    %22 = arith.truncf %21 : vector<8x512xf32> to vector<8x512xbf16>
    %c0_14 = arith.constant 0 : index
    %c0_15 = arith.constant 0 : index
    %23 = vector.load %arg6[%c0_14, %c0_15] : memref<512x512xbf16, #tpu.memory_space<vmem>>, vector<512x512xbf16>
    %cst_16 = arith.constant dense<0.000000e+00> : vector<8x512xf32>
    %24 = tpu.matmul %22, %23, %cst_16 {dimension_numbers = #tpu.dot_dimension_numbers<[1], [0], [0], [1], [0, 0, 1, 1], [], []>} : vector<8x512xbf16>, vector<512x512xbf16>, vector<8x512xf32> -> vector<8x512xf32>
    %c0_17 = arith.constant 0 : index
    %c0_18 = arith.constant 0 : index
    %25 = vector.load %arg7[%c0_17, %c0_18] : memref<1x512xf32, #tpu.memory_space<vmem>>, vector<1x512xf32>
    %26 = vector.broadcast %25 : vector<1x512xf32> to vector<8x512xf32>
    %27 = arith.addf %24, %26 : vector<8x512xf32>
    %cst_19 = arith.constant 0.000000e+00 : f32
    %28 = vector.broadcast %cst_19 : f32 to vector<8x512xf32>
    %29 = arith.cmpf ogt, %27, %28 : vector<8x512xf32>
    %cst_20 = arith.constant 1.000000e-01 : f32
    %30 = vector.broadcast %cst_20 : f32 to vector<8x512xf32>
    %31 = arith.mulf %30, %27 : vector<8x512xf32>
    %32 = arith.select %29, %27, %31 : vector<8x512xi1>, vector<8x512xf32>
    %33 = arith.truncf %32 : vector<8x512xf32> to vector<8x512xbf16>
    %c0_21 = arith.constant 0 : index
    %c0_22 = arith.constant 0 : index
    %34 = vector.load %arg8[%c0_21, %c0_22] : memref<512x128xbf16, #tpu.memory_space<vmem>>, vector<512x128xbf16>
    %cst_23 = arith.constant dense<0.000000e+00> : vector<8x128xf32>
    %35 = tpu.matmul %33, %34, %cst_23 {dimension_numbers = #tpu.dot_dimension_numbers<[1], [0], [0], [1], [0, 0, 1, 1], [], []>} : vector<8x512xbf16>, vector<512x128xbf16>, vector<8x128xf32> -> vector<8x128xf32>
    %c0_24 = arith.constant 0 : index
    %c0_25 = arith.constant 0 : index
    %36 = vector.load %arg9[%c0_24, %c0_25] : memref<1x128xf32, #tpu.memory_space<vmem>>, vector<1x128xf32>
    %37 = vector.broadcast %36 : vector<1x128xf32> to vector<8x128xf32>
    %38 = arith.addf %35, %37 : vector<8x128xf32>
    %c0_26 = arith.constant 0 : index
    %c0_27 = arith.constant 0 : index
    %39 = vector.load %arg10[%c0_26, %c0_27] : memref<8x128xf32, #tpu.memory_space<vmem>>, vector<8x128xf32>
    tpu.vector_store %arg10[%c0_26, %c0_27], %38 {strides = array<i32>} : memref<8x128xf32, #tpu.memory_space<vmem>>, vector<8x128xf32>,
    return
  }
  func.func @transform_0(%arg0: i32) -> (i32, i32) {
    %c0_i32 = arith.constant 0 : i32
    %c0_i32_0 = arith.constant 0 : i32
    return %arg0, %c0_i32 : i32, i32
  }
  func.func @transform_1(%arg0: i32) -> (i32, i32) {
    %c0_i32 = arith.constant 0 : i32
    %c0_i32_0 = arith.constant 0 : i32
    %c0_i32_1 = arith.constant 0 : i32
    return %c0_i32, %c0_i32_0 : i32, i32
  }
  func.func @transform_2(%arg0: i32) -> (i32, i32) {
    %c0_i32 = arith.constant 0 : i32
    %c0_i32_0 = arith.constant 0 : i32
    %c0_i32_1 = arith.constant 0 : i32
    return %c0_i32, %c0_i32_0 : i32, i32
  }
  func.func @transform_3(%arg0: i32) -> (i32, i32) {
    %c0_i32 = arith.constant 0 : i32
    %c0_i32_0 = arith.constant 0 : i32
    %c0_i32_1 = arith.constant 0 : i32
    return %c0_i32, %c0_i32_0 : i32, i32
  }
  func.func @transform_4(%arg0: i32) -> (i32, i32) {
    %c0_i32 = arith.constant 0 : i32
    %c0_i32_0 = arith.constant 0 : i32
    %c0_i32_1 = arith.constant 0 : i32
    return %c0_i32, %c0_i32_0 : i32, i32
  }
  func.func @transform_5(%arg0: i32) -> (i32, i32) {
    %c0_i32 = arith.constant 0 : i32
    %c0_i32_0 = arith.constant 0 : i32
    %c0_i32_1 = arith.constant 0 : i32
    return %c0_i32, %c0_i32_0 : i32, i32
  }
  func.func @transform_6(%arg0: i32) -> (i32, i32) {
    %c0_i32 = arith.constant 0 : i32
    %c0_i32_0 = arith.constant 0 : i32
    %c0_i32_1 = arith.constant 0 : i32
    return %c0_i32, %c0_i32_0 : i32, i32
  }
  func.func @transform_7(%arg0: i32) -> (i32, i32) {
    %c0_i32 = arith.constant 0 : i32
    %c0_i32_0 = arith.constant 0 : i32
    %c0_i32_1 = arith.constant 0 : i32
    return %c0_i32, %c0_i32_0 : i32, i32
  }
  func.func @transform_8(%arg0: i32) -> (i32, i32) {
    %c0_i32 = arith.constant 0 : i32
    %c0_i32_0 = arith.constant 0 : i32
    %c0_i32_1 = arith.constant 0 : i32
    return %c0_i32, %c0_i32_0 : i32, i32
  }
  func.func @transform_9(%arg0: i32) -> (i32, i32) {
    %c0_i32 = arith.constant 0 : i32
    %c0_i32_0 = arith.constant 0 : i32
    return %arg0, %c0_i32 : i32, i32
  }
}

</mosaic_0001>

<bundles_post_ra>
// kernel: classblock_forward.1
= control target key start
LH: loop header
LB: loop body
LE: loop exit
PB: predicated region body
PF: predicated region fallthrough
CT: control target
= control target key end

     0   :  { %14 = vsyncpa [#allocation3], 0  ;;  %s19364_s0 = inlined_call_operand.vmem [shape: bf16[8,2048], index: 0, kind: input, shape index: {}]   ;;  %s19365_s1 = inlined_call_operand.hbm [shape: bf16[2048,1024], index: 1, kind: input, shape index: {}]   ;;  %s19366_s2 = inlined_call_operand.hbm [shape: f32[1,1024], index: 2, kind: input, shape index: {}]   ;;  %s19367_s3 = inlined_call_operand.hbm [shape: bf16[1024,512], index: 3, kind: input, shape index: {}]   ;;  %s19368_s4 = inlined_call_operand.hbm [shape: f32[1,512], index: 4, kind: input, shape index: {}]   ;;  %s19369_s5 = inlined_call_operand.hbm [shape: bf16[512,512], index: 5, kind: input, shape index: {}]   ;;  %s19370_s6 = inlined_call_operand.hbm [shape: f32[1,512], index: 6, kind: input, shape index: {}]   ;;  %s19371_s7 = inlined_call_operand.hbm [shape: bf16[512,128], index: 7, kind: input, shape index: {}]   ;;  %s19372_s8 = inlined_call_operand.hbm [shape: f32[1,128], index: 8, kind: input, shape index: {}]   ;;  %s19373_s9 = inlined_call_operand.vmem [shape: f32[8,128], index: 9, kind: output, shape index: {}]  }
   0x1   :  { %15 = vsyncpa [#allocation5], 0 }
   0x2   :  { %16 = vsyncpa [#allocation8], 0 }
   0x3   :  { %17 = vsyncpa [#allocation11], 0  ;;  %s39_s11 = sshll.u32 %s19366_s2, 4  ;;  %s40_s11 = int_to_ptr.hbm [resolvable:$true] %s39_s11 }
   0x4   :  { %18 = vsyncpa [#allocation14], 0  ;;  %s18798_s12 = smov [#allocation4]   ;;  %s63_s16 = sshll.u32 %s19368_s4, 4  ;;  %s64_s16 = int_to_ptr.hbm [resolvable:$true] %s63_s16 }
   0x5   :  { %s41_s13 = sshll.u32 %s18798_s12, 4  ;;  %s18799_s17 = smov [#allocation7]   ;;  %s42_s13 = int_to_ptr.vmem [resolvable:$true] %s41_s13 }
   0x6   :  { %44 = dma.hbm_to_vmem [thread:$0]  %s40_s11, 128, %s42_s13, [#allocation5]  }
   0x7   :  { %s65_s18 = sshll.u32 %s18799_s17, 4  ;;  %s87_s21 = sshll.u32 %s19370_s6, 4  ;;  %s66_s18 = int_to_ptr.vmem [resolvable:$true] %s65_s18  ;;  %s88_s21 = int_to_ptr.hbm [resolvable:$true] %s87_s21 }
   0x8   :  { %68 = dma.hbm_to_vmem [thread:$0]  %s64_s16, 64, %s66_s18, [#allocation8]  }
   0x9   :  { %s25_s23 = sshll.u32 %s19365_s1, 4  ;;  %s18800_s24 = smov [#allocation10]   ;;  %s26_s23 = int_to_ptr.hbm [resolvable:$true] %s25_s23 }
   0xa   :  { %s89_s25 = sshll.u32 %s18800_s24, 4  ;;  %s18801_s4 = smov [#allocation2]   ;;  %s90_s25 = int_to_ptr.vmem [resolvable:$true] %s89_s25 }
   0xb   :  { %92 = dma.hbm_to_vmem [thread:$0]  %s88_s21, 64, %s90_s25, [#allocation11]  }
   0xc   :  { %s27_s26 = sshll.u32 %s18801_s4, 4  ;;  %s18802_s27 = smov 512   ;;  %s28_s26 = int_to_ptr.vmem [resolvable:$true] %s27_s26 }
   0xd   :  { %s18803_s28 = smov 32   ;;  %s49_s30 = sshll.u32 %s19367_s3, 4  ;;  %s50_s30 = int_to_ptr.hbm [resolvable:$true] %s49_s30 }
   0xe   :  { %33 = dma.hbm_to_vmem [thread:$0]  %s26_s23, 131072, %s28_s26, [#allocation3], %s18802_s27, %s18802_s27, %s18803_s28  }
   0xf   :  { %s18804_s10 = smov [#allocation6]   ;;  %s73_s13 = sshll.u32 %s19369_s5, 4  ;;  %s74_s13 = int_to_ptr.hbm [resolvable:$true] %s73_s13 }
  0x10   :  { %s51_s11 = sshll.u32 %s18804_s10, 4  ;;  %s18805_s14 = smov 256   ;;  %s52_s11 = int_to_ptr.vmem [resolvable:$true] %s51_s11 }
  0x11   :  { %s18806_s15 = smov 16   ;;  %s18807_s16 = smov [#allocation9]  }
  0x12   :  { %57 = dma.hbm_to_vmem [thread:$0]  %s50_s30, 32768, %s52_s11, [#allocation5], %s18805_s14, %s18805_s14, %s18806_s15  }
  0x13   :  { %s75_s17 = sshll.u32 %s18807_s16, 4  ;;  %s97_s20 = sshll.u32 %s19371_s7, 4  ;;  %s76_s17 = int_to_ptr.vmem [resolvable:$true] %s75_s17  ;;  %s98_s20 = int_to_ptr.hbm [resolvable:$true] %s97_s20 }
  0x14   :  { %81 = dma.hbm_to_vmem [thread:$0]  %s74_s13, 16384, %s76_s17, [#allocation8], %s18805_s14, %s18805_s14, %s18806_s15  }
  0x15   :  { %s18808_s3 = smov [#allocation12]   ;;  %s111_s5 = sshll.u32 %s19372_s8, 4  ;;  %s112_s5 = int_to_ptr.hbm [resolvable:$true] %s111_s5 }
  0x16   :  { %s99_s21 = sshll.u32 %s18808_s3, 4  ;;  %s18809_s23 = smov 64   ;;  %s100_s21 = int_to_ptr.vmem [resolvable:$true] %s99_s21 }
  0x17   :  { %s18810_s24 = smov 4   ;;  %s18811_s25 = smov [#allocation13]  }
  0x18   :  { %105 = dma.hbm_to_vmem [thread:$0]  %s98_s20, 4096, %s100_s21, [#allocation11], %s18809_s23, %s18809_s23, %s18810_s24  }
  0x19   :  { %s113_s4 = sshll.u32 %s18811_s25, 4  ;;  %s114_s4 = int_to_ptr.vmem [resolvable:$true] %s113_s4 }
  0x1a   :  { %116 = dma.hbm_to_vmem [thread:$0]  %s112_s5, 16, %s114_s4, [#allocation14]  }
  0x1b   :  { %18788 = dma.done.wait [#allocation3], 131072  }
  0x1c   :  { %18789 = vsyncadd [#allocation3], 4294836224 }
  0x1d   :  { %18790 = dma.done.wait [#allocation5], 32896  }
  0x1e   :  { %18791 = vsyncadd [#allocation5], 4294934400 }
  0x1f   :  { %18792 = dma.done.wait [#allocation8], 16448  }
  0x20   :  { %18793 = vsyncadd [#allocation8], 4294950848 }
  0x21   :  { %18794 = dma.done.wait [#allocation11], 4160  }
  0x22   :  { %18795 = vsyncadd [#allocation11], 4294963136 }
  0x23   :  { %18796 = dma.done.wait [#allocation14], 16  }
  0x24   :  { %18797 = vsyncadd [#allocation14], 4294967280  ;;  %v11599_v0 = vld [vmem:[#allocation2 + $0x1c0] sm:$0xf] }
  0x25   :  { %v17193_v1 = vld [vmem:[#allocation2 + $0x1dc] sm:$0xf0] }
  0x26   :  { %v11855_v2 = vld [vmem:[#allocation2 + $0x3c0] sm:$0xf]  ;;  %v11600_v3 = vor.u32 %v17193_v1, %v11599_v0 }
  0x27   :  { %v17257_v4 = vld [vmem:[#allocation2 + $0x3dc] sm:$0xf0] }
  0x28   :  { %v12111_v5 = vld [vmem:[#allocation2 + $0x5c0] sm:$0xf]  ;;  %v11856_v7 = vor.u32 %v17257_v4, %v11855_v2  ;;  %6375 = vmatpush.bf16.msra.mxu0 %v11600_v3 }
  0x29   :  { %v17321_v6 = vld [vmem:[#allocation2 + $0x5dc] sm:$0xf0] }
  0x2a   :  { %v12112_v8 = vor.u32 %v17321_v6, %v12111_v5  ;;  %v12367_v9 = vld [vmem:[#allocation2 + $0x7c0] sm:$0xf]  ;;  %6388 = vmatpush.bf16.msra.mxu1 %v11856_v7 }
  0x2b   :  { %v17385_v10 = vld [vmem:[#allocation2 + $0x7dc] sm:$0xf0] }
  0x2c   :  { %v11567_v11 = vld [vmem:[#allocation2 + $0x180] sm:$0xf]  ;;  %v12368_v12 = vor.u32 %v17385_v10, %v12367_v9  ;;  %6401 = vmatpush.bf16.msra.mxu2 %v12112_v8 }
  0x2d   :  { %v17185_v13 = vld [vmem:[#allocation2 + $0x19c] sm:$0xf0] }
  0x2e   :  { %v11823_v14 = vld [vmem:[#allocation2 + $0x380] sm:$0xf]  ;;  %v11568_v16 = vor.u32 %v17185_v13, %v11567_v11  ;;  %6414 = vmatpush.bf16.msra.mxu3 %v12368_v12 }
  0x2f   :  { %v17249_v15 = vld [vmem:[#allocation2 + $0x39c] sm:$0xf0] }
  0x30   :  { %v11824_v17 = vor.u32 %v17249_v15, %v11823_v14  ;;  %v12079_v18 = vld [vmem:[#allocation2 + $0x580] sm:$0xf]  ;;  %6376 = vmatpush.bf16.msra.mxu0 %v11568_v16 }
  0x31   :  { %v17313_v19 = vld [vmem:[#allocation2 + $0x59c] sm:$0xf0] }
  0x32   :  { %v12335_v20 = vld [vmem:[#allocation2 + $0x780] sm:$0xf]  ;;  %v12080_v21 = vor.u32 %v17313_v19, %v12079_v18  ;;  %6389 = vmatpush.bf16.msra.mxu1 %v11824_v17 }
  0x33   :  { %v17377_v22 = vld [vmem:[#allocation2 + $0x79c] sm:$0xf0] }
  0x34   :  { %v11535_v23 = vld [vmem:[#allocation2 + $0x140] sm:$0xf]  ;;  %v12336_v25 = vor.u32 %v17377_v22, %v12335_v20  ;;  %6402 = vmatpush.bf16.msra.mxu2 %v12080_v21 }
  0x35   :  { %v17177_v24 = vld [vmem:[#allocation2 + $0x15c] sm:$0xf0] }
  0x36   :  { %v11791_v26 = vld [vmem:[#allocation2 + $0x340] sm:$0xf]  ;;  %v11536_v29 = vor.u32 %v17177_v24, %v11535_v23  ;;  %6415 = vmatpush.bf16.msra.mxu3 %v12336_v25 }
  0x37   :  { %v17241_v27 = vld [vmem:[#allocation2 + $0x35c] sm:$0xf0] }
  0x38   :  { %v12047_v28 = vld [vmem:[#allocation2 + $0x540] sm:$0xf]  ;;  %v11792_v33 = vor.u32 %v17241_v27, %v11791_v26  ;;  %6377 = vmatpush.bf16.msra.mxu0 %v11536_v29 }
  0x39   :  { %v17305_v30 = vld [vmem:[#allocation2 + $0x55c] sm:$0xf0] }
  0x3a   :  { %v12303_v31 = vld [vmem:[#allocation2 + $0x740] sm:$0xf]  ;;  %v12048_v34 = vor.u32 %v17305_v30, %v12047_v28  ;;  %6390 = vmatpush.bf16.msra.mxu1 %v11792_v33 }
  0x3b   :  { %v17369_v32 = vld [vmem:[#allocation2 + $0x75c] sm:$0xf0] }
  0x3c   :  { %v11503_v35 = vld [vmem:[#allocation2 + $0x100] sm:$0xf]  ;;  %v12304_v38 = vor.u32 %v17369_v32, %v12303_v31  ;;  %6403 = vmatpush.bf16.msra.mxu2 %v12048_v34 }
  0x3d   :  { %v17169_v36 = vld [vmem:[#allocation2 + $0x11c] sm:$0xf0] }
  0x3e   :  { %v11759_v37 = vld [vmem:[#allocation2 + $0x300] sm:$0xf]  ;;  %v11504_v44 = vor.u32 %v17169_v36, %v11503_v35  ;;  %6416 = vmatpush.bf16.msra.mxu3 %v12304_v38 }
  0x3f   :  { %v17233_v39 = vld [vmem:[#allocation2 + $0x31c] sm:$0xf0] }
  0x40   :  { %v12015_v40 = vld [vmem:[#allocation2 + $0x500] sm:$0xf]  ;;  %v11760_v45 = vor.u32 %v17233_v39, %v11759_v37  ;;  %6378 = vmatpush.bf16.msra.mxu0 %v11504_v44 }
  0x41   :  { %v17297_v41 = vld [vmem:[#allocation2 + $0x51c] sm:$0xf0] }
  0x42   :  { %v12271_v42 = vld [vmem:[#allocation2 + $0x700] sm:$0xf]  ;;  %v12016_v46 = vor.u32 %v17297_v41, %v12015_v40  ;;  %6391 = vmatpush.bf16.msra.mxu1 %v11760_v45 }
  0x43   :  { %v17361_v43 = vld [vmem:[#allocation2 + $0x71c] sm:$0xf0] }
  0x44   :  { %v11471_v47 = vld [vmem:[#allocation2 + $0xc0] sm:$0xf]  ;;  %v12272_v50 = vor.u32 %v17361_v43, %v12271_v42  ;;  %6404 = vmatpush.bf16.msra.mxu2 %v12016_v46 }
  0x45   :  { %v17161_v48 = vld [vmem:[#allocation2 + $0xdc] sm:$0xf0] }
  0x46   :  { %v11727_v49 = vld [vmem:[#allocation2 + $0x2c0] sm:$0xf]  ;;  %v11472_v56 = vor.u32 %v17161_v48, %v11471_v47  ;;  %6417 = vmatpush.bf16.msra.mxu3 %v12272_v50 }
  0x47   :  { %v17225_v51 = vld [vmem:[#allocation2 + $0x2dc] sm:$0xf0] }
  0x48   :  { %v11983_v52 = vld [vmem:[#allocation2 + $0x4c0] sm:$0xf]  ;;  %v11728_v57 = vor.u32 %v17225_v51, %v11727_v49  ;;  %6379 = vmatpush.bf16.msra.mxu0 %v11472_v56 }
  0x49   :  { %v17289_v53 = vld [vmem:[#allocation2 + $0x4dc] sm:$0xf0] }
  0x4a   :  { %v12239_v54 = vld [vmem:[#allocation2 + $0x6c0] sm:$0xf]  ;;  %v11984_v58 = vor.u32 %v17289_v53, %v11983_v52  ;;  %6392 = vmatpush.bf16.msra.mxu1 %v11728_v57 }
  0x4b   :  { %v17353_v55 = vld [vmem:[#allocation2 + $0x6dc] sm:$0xf0] }
  0x4c   :  { %v11439_v59 = vld [vmem:[#allocation2 + $0x80] sm:$0xf]  ;;  %v12240_v62 = vor.u32 %v17353_v55, %v12239_v54  ;;  %6405 = vmatpush.bf16.msra.mxu2 %v11984_v58 }
  0x4d   :  { %v17153_v60 = vld [vmem:[#allocation2 + $0x9c] sm:$0xf0] }
  0x4e   :  { %v11695_v61 = vld [vmem:[#allocation2 + $0x280] sm:$0xf]  ;;  %v11440_v4 = vor.u32 %v17153_v60, %v11439_v59  ;;  %6418 = vmatpush.bf16.msra.mxu3 %v12240_v62 }
  0x4f   :  { %v17217_v63 = vld [vmem:[#allocation2 + $0x29c] sm:$0xf0] }
  0x50   :  { %v11951_v0 = vld [vmem:[#allocation2 + $0x480] sm:$0xf]  ;;  %v11696_v5 = vor.u32 %v17217_v63, %v11695_v61  ;;  %6380 = vmatpush.bf16.msra.mxu0 %v11440_v4 }
  0x51   :  { %v17281_v1 = vld [vmem:[#allocation2 + $0x49c] sm:$0xf0] }
  0x52   :  { %v12207_v2 = vld [vmem:[#allocation2 + $0x680] sm:$0xf]  ;;  %v11952_v6 = vor.u32 %v17281_v1, %v11951_v0  ;;  %6393 = vmatpush.bf16.msra.mxu1 %v11696_v5 }
  0x53   :  { %v17345_v3 = vld [vmem:[#allocation2 + $0x69c] sm:$0xf0] }
  0x54   :  { %v11407_v7 = vld [vmem:[#allocation2 + $0x40] sm:$0xf]  ;;  %v12208_v10 = vor.u32 %v17345_v3, %v12207_v2  ;;  %6406 = vmatpush.bf16.msra.mxu2 %v11952_v6  ;;  %v150_v2 = vld [vmem:[%s19364_s0 + $0x8] sm:$0xff] }
  0x55   :  { %v17145_v8 = vld [vmem:[#allocation2 + $0x5c] sm:$0xf0] }
  0x56   :  { %v11663_v9 = vld [vmem:[#allocation2 + $0x240] sm:$0xf]  ;;  %v11408_v16 = vor.u32 %v17145_v8, %v11407_v7  ;;  %6419 = vmatpush.bf16.msra.mxu3 %v12208_v10  ;;  %v1209_v8 = vunpack.c.l.b16 %v150_v2  ;;  %v1210_v10 = vunpack.c.h.b16 %v150_v2 }
  0x57   :  { %v17209_v11 = vld [vmem:[#allocation2 + $0x25c] sm:$0xf0] }
  0x58   :  { %v11919_v12 = vld [vmem:[#allocation2 + $0x440] sm:$0xf]  ;;  %v11664_v19 = vor.u32 %v17209_v11, %v11663_v9  ;;  %6381 = vmatpush.bf16.msra.mxu0 %v11408_v16 }
  0x59   :  { %v17273_v13 = vld [vmem:[#allocation2 + $0x45c] sm:$0xf0] }
  0x5a   :  { %v12175_v14 = vld [vmem:[#allocation2 + $0x640] sm:$0xf]  ;;  %v11920_v20 = vor.u32 %v17273_v13, %v11919_v12  ;;  %6394 = vmatpush.bf16.msra.mxu1 %v11664_v19 }
  0x5b   :  { %v17337_v15 = vld [vmem:[#allocation2 + $0x65c] sm:$0xf0] }
  0x5c   :  { %v11375_v17 = vld [vmem:[#allocation2] sm:$0xf]  ;;  %v12176_v24 = vor.u32 %v17337_v15, %v12175_v14  ;;  %6407 = vmatpush.bf16.msra.mxu2 %v11920_v20  ;;  %v18896_v20 = vpack.c.b16 %v1210_v10, %v1210_v10 }
  0x5d   :  { %v17137_v18 = vld [vmem:[#allocation2 + $0x1c] sm:$0xf0] }
  0x5e   :  { %v11631_v21 = vld [vmem:[#allocation2 + $0x200] sm:$0xf]  ;;  %v11376_v31 = vor.u32 %v17137_v18, %v11375_v17  ;;  %6420 = vmatpush.bf16.msra.mxu3 %v12176_v24  ;;  %v18892_v18 = vpack.c.b16 %v1209_v8, %v1209_v8 }
  0x5f   :  { %v17201_v22 = vld [vmem:[#allocation2 + $0x21c] sm:$0xf0] }
  0x60   :  { %v11887_v23 = vld [vmem:[#allocation2 + $0x400] sm:$0xf]  ;;  %v11632_v35 = vor.u32 %v17201_v22, %v11631_v21  ;;  %6382 = vmatpush.bf16.msra.mxu0 %v11376_v31 }
  0x61   :  { %v17265_v25 = vld [vmem:[#allocation2 + $0x41c] sm:$0xf0] }
  0x62   :  { %v12143_v26 = vld [vmem:[#allocation2 + $0x600] sm:$0xf]  ;;  %v11888_v36 = vor.u32 %v17265_v25, %v11887_v23  ;;  %6395 = vmatpush.bf16.msra.mxu1 %v11632_v35 }
  0x63   :  { %v17329_v27 = vld [vmem:[#allocation2 + $0x61c] sm:$0xf0] }
  0x64   :  { %v12623_v28 = vld [vmem:[#allocation2 + $0x9c0] sm:$0xf]  ;;  %v12144_v39 = vor.u32 %v17329_v27, %v12143_v26  ;;  %6408 = vmatpush.bf16.msra.mxu2 %v11888_v36 }
  0x65   :  { %v17449_v29 = vld [vmem:[#allocation2 + $0x9dc] sm:$0xf0] }
  0x66   :  { %v12879_v30 = vld [vmem:[#allocation2 + $0xbc0] sm:$0xf]  ;;  %v12624_v40 = vor.u32 %v17449_v29, %v12623_v28  ;;  %6421 = vmatpush.bf16.msra.mxu3 %v12144_v39 }
  0x67   :  { %v17513_v32 = vld [vmem:[#allocation2 + $0xbdc] sm:$0xf0]  ;;  %6409 = vmatmul.bf16.vlgmr.msra.gmra.mxu2 %v18892_v18 }
  0x68   :  { %v13135_v33 = vld [vmem:[#allocation2 + $0xdc0] sm:$0xf]  ;;  %v12880_v41 = vor.u32 %v17513_v32, %v12879_v30  ;;  %6427 = vmatpush.bf16.msrb.mxu0 %v12624_v40 }
  0x69   :  { %v17577_v34 = vld [vmem:[#allocation2 + $0xddc] sm:$0xf0]  ;;  %6422 = vmatmul.bf16.vlgmr.msra.gmra.mxu3 %v18896_v20 }
  0x6a   :  { %v13391_v37 = vld [vmem:[#allocation2 + $0xfc0] sm:$0xf]  ;;  %v13136_v42 = vor.u32 %v17577_v34, %v13135_v33  ;;  %6440 = vmatpush.bf16.msrb.mxu1 %v12880_v41 }
  0x6b   :  { %v17641_v38 = vld [vmem:[#allocation2 + $0xfdc] sm:$0xf0] }
  0x6c   :  { %v12591_v43 = vld [vmem:[#allocation2 + $0x980] sm:$0xf]  ;;  %v13392_v46 = vor.u32 %v17641_v38, %v13391_v37  ;;  %6453 = vmatpush.bf16.msrb.mxu2 %v13136_v42 }
  0x6d   :  { %v17441_v44 = vld [vmem:[#allocation2 + $0x99c] sm:$0xf0] }
  0x6e   :  { %v12847_v45 = vld [vmem:[#allocation2 + $0xb80] sm:$0xf]  ;;  %v12592_v52 = vor.u32 %v17441_v44, %v12591_v43  ;;  %6466 = vmatpush.bf16.msrb.mxu3 %v13392_v46 }
  0x6f   :  { %v17505_v47 = vld [vmem:[#allocation2 + $0xb9c] sm:$0xf0] }
  0x70   :  { %v13103_v48 = vld [vmem:[#allocation2 + $0xd80] sm:$0xf]  ;;  %v12848_v54 = vor.u32 %v17505_v47, %v12847_v45  ;;  %6428 = vmatpush.bf16.msrb.mxu0 %v12592_v52 }
  0x71   :  { %v17569_v49 = vld [vmem:[#allocation2 + $0xd9c] sm:$0xf0] }
  0x72   :  { %v13359_v50 = vld [vmem:[#allocation2 + $0xf80] sm:$0xf]  ;;  %v13104_v55 = vor.u32 %v17569_v49, %v13103_v48  ;;  %6441 = vmatpush.bf16.msrb.mxu1 %v12848_v54 }
  0x73   :  { %v17633_v51 = vld [vmem:[#allocation2 + $0xf9c] sm:$0xf0] }
  0x74   :  { %v12559_v53 = vld [vmem:[#allocation2 + $0x940] sm:$0xf]  ;;  %v13360_v59 = vor.u32 %v17633_v51, %v13359_v50  ;;  %6454 = vmatpush.bf16.msrb.mxu2 %v13104_v55 }
  0x75   :  { %v17433_v56 = vld [vmem:[#allocation2 + $0x95c] sm:$0xf0] }
  0x76   :  { %v12815_v57 = vld [vmem:[#allocation2 + $0xb40] sm:$0xf]  ;;  %v12560_v0 = vor.u32 %v17433_v56, %v12559_v53  ;;  %6467 = vmatpush.bf16.msrb.mxu3 %v13360_v59 }
  0x77   :  { %v17497_v58 = vld [vmem:[#allocation2 + $0xb5c] sm:$0xf0] }
  0x78   :  { %v13071_v60 = vld [vmem:[#allocation2 + $0xd40] sm:$0xf]  ;;  %v12816_v1 = vor.u32 %v17497_v58, %v12815_v57  ;;  %6429 = vmatpush.bf16.msrb.mxu0 %v12560_v0 }
  0x79   :  { %v17561_v61 = vld [vmem:[#allocation2 + $0xd5c] sm:$0xf0] }
  0x7a   :  { %v13327_v62 = vld [vmem:[#allocation2 + $0xf40] sm:$0xf]  ;;  %v13072_v4 = vor.u32 %v17561_v61, %v13071_v60  ;;  %6442 = vmatpush.bf16.msrb.mxu1 %v12816_v1 }
  0x7b   :  { %v17625_v63 = vld [vmem:[#allocation2 + $0xf5c] sm:$0xf0] }
  0x7c   :  { %v149_v3 = vld [vmem:[%s19364_s0] sm:$0xff]  ;;  %v13328_v11 = vor.u32 %v17625_v63, %v13327_v62  ;;  %6455 = vmatpush.bf16.msrb.mxu2 %v13072_v4 }
  0x7d   :  { %v12527_v5 = vld [vmem:[#allocation2 + $0x900] sm:$0xf]  ;;  %v1207_v9 = vunpack.c.l.b16 %v149_v3  ;;  %v1208_v15 = vunpack.c.h.b16 %v149_v3  ;;  %v152_v3 = vld [vmem:[%s19364_s0 + $0x18] sm:$0xff] }
  0x7e   :  { %v17425_v6 = vld [vmem:[#allocation2 + $0x91c] sm:$0xf0]  ;;  %6468 = vmatpush.bf16.msrb.mxu3 %v13328_v11 }
  0x7f   :  { %v12783_v7 = vld [vmem:[#allocation2 + $0xb00] sm:$0xf]  ;;  %v18894_v19 = vpack.c.b16 %v1207_v9, %v1207_v9  ;;  %v12528_v21 = vor.u32 %v17425_v6, %v12527_v5  ;;  %v18898_v22 = vpack.c.b16 %v1208_v15, %v1208_v15  ;;  %v1213_v15 = vunpack.c.l.b16 %v152_v3 }
  0x80   :  { %v17489_v12 = vld [vmem:[#allocation2 + $0xb1c] sm:$0xf0] }
  0x81   :  { %v13039_v13 = vld [vmem:[#allocation2 + $0xd00] sm:$0xf]  ;;  %v12784_v23 = vor.u32 %v17489_v12, %v12783_v7  ;;  %6383 = vmatmul.bf16.vlgmr.msra.gmra.mxu0 %v18894_v19  ;;  %6396 = vmatmul.bf16.vlgmr.msra.gmra.mxu1 %v18898_v22  ;;  %v151_v7 = vld [vmem:[%s19364_s0 + $0x10] sm:$0xff] }
  0x82   :  { %v17553_v14 = vld [vmem:[#allocation2 + $0xd1c] sm:$0xf0]  ;;  %6430 = vmatpush.bf16.msrb.mxu0 %v12528_v21 }
  0x83   :  { %v13295_v16 = vld [vmem:[#allocation2 + $0xf00] sm:$0xf]  ;;  %v13040_v24 = vor.u32 %v17553_v14, %v13039_v13  ;;  %6443 = vmatpush.bf16.msrb.mxu1 %v12784_v23 }
  0x84   :  { %v17617_v17 = vld [vmem:[#allocation2 + $0xf1c] sm:$0xf0] }
  0x85   :  { %v12495_v25 = vld [vmem:[#allocation2 + $0x8c0] sm:$0xf]  ;;  %v13296_v28 = vor.u32 %v17617_v17, %v13295_v16  ;;  %6456 = vmatpush.bf16.msrb.mxu2 %v13040_v24  ;;  %v1211_v24 = vunpack.c.l.b16 %v151_v7 }
  0x86   :  { %v17417_v26 = vld [vmem:[#allocation2 + $0x8dc] sm:$0xf0] }
  0x87   :  { %v12751_v27 = vld [vmem:[#allocation2 + $0xac0] sm:$0xf]  ;;  %v12496_v34 = vor.u32 %v17417_v26, %v12495_v25  ;;  %6469 = vmatpush.bf16.msrb.mxu3 %v13296_v28  ;;  %v1214_v25 = vunpack.c.h.b16 %v152_v3  ;;  %v1212_v28 = vunpack.c.h.b16 %v151_v7 }
  0x88   :  { %v17481_v29 = vld [vmem:[#allocation2 + $0xadc] sm:$0xf0] }
  0x89   :  { %v13007_v30 = vld [vmem:[#allocation2 + $0xcc0] sm:$0xf]  ;;  %v12752_v35 = vor.u32 %v17481_v29, %v12751_v27  ;;  %6431 = vmatpush.bf16.msrb.mxu0 %v12496_v34 }
  0x8a   :  { %v17545_v31 = vld [vmem:[#allocation2 + $0xcdc] sm:$0xf0] }
  0x8b   :  { %v13263_v32 = vld [vmem:[#allocation2 + $0xec0] sm:$0xf]  ;;  %v13008_v36 = vor.u32 %v17545_v31, %v13007_v30  ;;  %6444 = vmatpush.bf16.msrb.mxu1 %v12752_v35 }
  0x8c   :  { %v17609_v33 = vld [vmem:[#allocation2 + $0xedc] sm:$0xf0] }
  0x8d   :  { %v12463_v37 = vld [vmem:[#allocation2 + $0x880] sm:$0xf]  ;;  %v13264_v40 = vor.u32 %v17609_v33, %v13263_v32  ;;  %6457 = vmatpush.bf16.msrb.mxu2 %v13008_v36 }
  0x8e   :  { %v17409_v38 = vld [vmem:[#allocation2 + $0x89c] sm:$0xf0] }
  0x8f   :  { %v12719_v39 = vld [vmem:[#allocation2 + $0xa80] sm:$0xf]  ;;  %v12464_v46 = vor.u32 %v17409_v38, %v12463_v37  ;;  %6470 = vmatpush.bf16.msrb.mxu3 %v13264_v40  ;;  %v18910_v38 = vpack.c.b16 %v1213_v15, %v1213_v15 }
  0x90   :  { %v17473_v41 = vld [vmem:[#allocation2 + $0xa9c] sm:$0xf0] }
  0x91   :  { %v12975_v42 = vld [vmem:[#allocation2 + $0xc80] sm:$0xf]  ;;  %v12720_v47 = vor.u32 %v17473_v41, %v12719_v39  ;;  %6432 = vmatpush.bf16.msrb.mxu0 %v12464_v46  ;;  %v18912_v41 = vpack.c.b16 %v1211_v24, %v1211_v24 }
  0x92   :  { %v17537_v43 = vld [vmem:[#allocation2 + $0xc9c] sm:$0xf0] }
  0x93   :  { %v13231_v44 = vld [vmem:[#allocation2 + $0xe80] sm:$0xf]  ;;  %v12976_v48 = vor.u32 %v17537_v43, %v12975_v42  ;;  %6445 = vmatpush.bf16.msrb.mxu1 %v12720_v47  ;;  %v18914_v42 = vpack.c.b16 %v1214_v25, %v1214_v25 }
  0x94   :  { %v17601_v45 = vld [vmem:[#allocation2 + $0xe9c] sm:$0xf0] }
  0x95   :  { %v12431_v49 = vld [vmem:[#allocation2 + $0x840] sm:$0xf]  ;;  %v13232_v52 = vor.u32 %v17601_v45, %v13231_v44  ;;  %6458 = vmatpush.bf16.msrb.mxu2 %v12976_v48  ;;  %v18916_v44 = vpack.c.b16 %v1212_v28, %v1212_v28 }
  0x96   :  { %v17401_v50 = vld [vmem:[#allocation2 + $0x85c] sm:$0xf0] }
  0x97   :  { %v12687_v51 = vld [vmem:[#allocation2 + $0xa40] sm:$0xf]  ;;  %v12432_v59 = vor.u32 %v17401_v50, %v12431_v49  ;;  %6471 = vmatpush.bf16.msrb.mxu3 %v13232_v52 }
  0x98   :  { %v17465_v53 = vld [vmem:[#allocation2 + $0xa5c] sm:$0xf0] }
  0x99   :  { %v12943_v54 = vld [vmem:[#allocation2 + $0xc40] sm:$0xf]  ;;  %v12688_v63 = vor.u32 %v17465_v53, %v12687_v51  ;;  %6433 = vmatpush.bf16.msrb.mxu0 %v12432_v59 }
  0x9a   :  { %v17529_v55 = vld [vmem:[#allocation2 + $0xc5c] sm:$0xf0] }
  0x9b   :  { %v13199_v56 = vld [vmem:[#allocation2 + $0xe40] sm:$0xf]  ;;  %v12944_v0 = vor.u32 %v17529_v55, %v12943_v54  ;;  %6446 = vmatpush.bf16.msrb.mxu1 %v12688_v63 }
  0x9c   :  { %v17593_v57 = vld [vmem:[#allocation2 + $0xe5c] sm:$0xf0] }
  0x9d   :  { %v12399_v58 = vld [vmem:[#allocation2 + $0x800] sm:$0xf]  ;;  %v13200_v4 = vor.u32 %v17593_v57, %v13199_v56  ;;  %6459 = vmatpush.bf16.msrb.mxu2 %v12944_v0 }
  0x9e   :  { %v17393_v60 = vld [vmem:[#allocation2 + $0x81c] sm:$0xf0] }
  0x9f   :  { %v12655_v61 = vld [vmem:[#allocation2 + $0xa00] sm:$0xf]  ;;  %v12400_v11 = vor.u32 %v17393_v60, %v12399_v58  ;;  %6472 = vmatpush.bf16.msrb.mxu3 %v13200_v4 }
  0xa0   :  { %v17457_v62 = vld [vmem:[#allocation2 + $0xa1c] sm:$0xf0] }
  0xa1   :  { %v12911_v1 = vld [vmem:[#allocation2 + $0xc00] sm:$0xf]  ;;  %v12656_v16 = vor.u32 %v17457_v62, %v12655_v61  ;;  %6434 = vmatpush.bf16.msrb.mxu0 %v12400_v11 }
  0xa2   :  { %v17521_v2 = vld [vmem:[#allocation2 + $0xc1c] sm:$0xf0] }
  0xa3   :  { %v13167_v5 = vld [vmem:[#allocation2 + $0xe00] sm:$0xf]  ;;  %v12912_v17 = vor.u32 %v17521_v2, %v12911_v1  ;;  %6447 = vmatpush.bf16.msrb.mxu1 %v12656_v16 }
  0xa4   :  { %v17585_v6 = vld [vmem:[#allocation2 + $0xe1c] sm:$0xf0]  ;;  %6435 = vmatmul.bf16.vlgmr.msrb.gmra.mxu0 %v18912_v41 }
  0xa5   :  { %v13647_v8 = vld [vmem:[#allocation2 + $0x11c0] sm:$0xf]  ;;  %v13168_v26 = vor.u32 %v17585_v6, %v13167_v5  ;;  %6460 = vmatpush.bf16.msrb.mxu2 %v12912_v17 }
  0xa6   :  { %v17705_v9 = vld [vmem:[#allocation2 + $0x11dc] sm:$0xf0]  ;;  %6448 = vmatmul.bf16.vlgmr.msrb.gmra.mxu1 %v18916_v44 }
  0xa7   :  { %v13903_v10 = vld [vmem:[#allocation2 + $0x13c0] sm:$0xf]  ;;  %v13648_v27 = vor.u32 %v17705_v9, %v13647_v8  ;;  %6473 = vmatpush.bf16.msrb.mxu3 %v13168_v26 }
  0xa8   :  { %v17769_v12 = vld [vmem:[#allocation2 + $0x13dc] sm:$0xf0]  ;;  %6461 = vmatmul.bf16.vlgmr.msrb.gmra.mxu2 %v18910_v38 }
  0xa9   :  { %v14159_v13 = vld [vmem:[#allocation2 + $0x15c0] sm:$0xf]  ;;  %v13904_v29 = vor.u32 %v17769_v12, %v13903_v10  ;;  %6479 = vmatpush.bf16.msra.mxu0 %v13648_v27 }
  0xaa   :  { %v17833_v14 = vld [vmem:[#allocation2 + $0x15dc] sm:$0xf0]  ;;  %6474 = vmatmul.bf16.vlgmr.msrb.gmra.mxu3 %v18914_v42 }
  0xab   :  { %v14415_v21 = vld [vmem:[#allocation2 + $0x17c0] sm:$0xf]  ;;  %v14160_v30 = vor.u32 %v17833_v14, %v14159_v13  ;;  %6492 = vmatpush.bf16.msra.mxu1 %v13904_v29 }
  0xac   :  { %v17897_v23 = vld [vmem:[#allocation2 + $0x17dc] sm:$0xf0] }
  0xad   :  { %v13615_v31 = vld [vmem:[#allocation2 + $0x1180] sm:$0xf]  ;;  %v14416_v34 = vor.u32 %v17897_v23, %v14415_v21  ;;  %6505 = vmatpush.bf16.msra.mxu2 %v14160_v30 }
  0xae   :  { %v17697_v32 = vld [vmem:[#allocation2 + $0x119c] sm:$0xf0] }
  0xaf   :  { %v13871_v33 = vld [vmem:[#allocation2 + $0x1380] sm:$0xf]  ;;  %v13616_v43 = vor.u32 %v17697_v32, %v13615_v31  ;;  %6518 = vmatpush.bf16.msra.mxu3 %v14416_v34 }
  0xb0   :  { %v17761_v35 = vld [vmem:[#allocation2 + $0x139c] sm:$0xf0] }
  0xb1   :  { %v14127_v36 = vld [vmem:[#allocation2 + $0x1580] sm:$0xf]  ;;  %v13872_v45 = vor.u32 %v17761_v35, %v13871_v33  ;;  %6480 = vmatpush.bf16.msra.mxu0 %v13616_v43 }
  0xb2   :  { %v17825_v37 = vld [vmem:[#allocation2 + $0x159c] sm:$0xf0] }
  0xb3   :  { %v14383_v39 = vld [vmem:[#allocation2 + $0x1780] sm:$0xf]  ;;  %v14128_v46 = vor.u32 %v17825_v37, %v14127_v36  ;;  %6493 = vmatpush.bf16.msra.mxu1 %v13872_v45 }
  0xb4   :  { %v17889_v40 = vld [vmem:[#allocation2 + $0x179c] sm:$0xf0] }
  0xb5   :  { %v13583_v47 = vld [vmem:[#allocation2 + $0x1140] sm:$0xf]  ;;  %v14384_v50 = vor.u32 %v17889_v40, %v14383_v39  ;;  %6506 = vmatpush.bf16.msra.mxu2 %v14128_v46 }
  0xb6   :  { %v17689_v48 = vld [vmem:[#allocation2 + $0x115c] sm:$0xf0] }
  0xb7   :  { %v13839_v49 = vld [vmem:[#allocation2 + $0x1340] sm:$0xf]  ;;  %v13584_v56 = vor.u32 %v17689_v48, %v13583_v47  ;;  %6519 = vmatpush.bf16.msra.mxu3 %v14384_v50 }
  0xb8   :  { %v17753_v51 = vld [vmem:[#allocation2 + $0x135c] sm:$0xf0] }
  0xb9   :  { %v14095_v52 = vld [vmem:[#allocation2 + $0x1540] sm:$0xf]  ;;  %v13840_v57 = vor.u32 %v17753_v51, %v13839_v49  ;;  %6481 = vmatpush.bf16.msra.mxu0 %v13584_v56 }
  0xba   :  { %v17817_v53 = vld [vmem:[#allocation2 + $0x155c] sm:$0xf0] }
  0xbb   :  { %v14351_v54 = vld [vmem:[#allocation2 + $0x1740] sm:$0xf]  ;;  %v14096_v58 = vor.u32 %v17817_v53, %v14095_v52  ;;  %6494 = vmatpush.bf16.msra.mxu1 %v13840_v57 }
  0xbc   :  { %v17881_v55 = vld [vmem:[#allocation2 + $0x175c] sm:$0xf0] }
  0xbd   :  { %v13551_v59 = vld [vmem:[#allocation2 + $0x1100] sm:$0xf]  ;;  %v14352_v62 = vor.u32 %v17881_v55, %v14351_v54  ;;  %6507 = vmatpush.bf16.msra.mxu2 %v14096_v58 }
  0xbe   :  { %v17681_v60 = vld [vmem:[#allocation2 + $0x111c] sm:$0xf0] }
  0xbf   :  { %v13807_v61 = vld [vmem:[#allocation2 + $0x1300] sm:$0xf]  ;;  %v13552_v4 = vor.u32 %v17681_v60, %v13551_v59  ;;  %6520 = vmatpush.bf16.msra.mxu3 %v14352_v62 }
  0xc0   :  { %v17745_v63 = vld [vmem:[#allocation2 + $0x131c] sm:$0xf0] }
  0xc1   :  { %v14063_v0 = vld [vmem:[#allocation2 + $0x1500] sm:$0xf]  ;;  %v13808_v5 = vor.u32 %v17745_v63, %v13807_v61  ;;  %6482 = vmatpush.bf16.msra.mxu0 %v13552_v4  ;;  %v154_v61 = vld [vmem:[%s19364_s0 + $0x28] sm:$0xff] }
  0xc2   :  { %v17809_v1 = vld [vmem:[#allocation2 + $0x151c] sm:$0xf0] }
  0xc3   :  { %v14319_v2 = vld [vmem:[#allocation2 + $0x1700] sm:$0xf]  ;;  %v14064_v6 = vor.u32 %v17809_v1, %v14063_v0  ;;  %6495 = vmatpush.bf16.msra.mxu1 %v13808_v5 }
  0xc4   :  { %v17873_v3 = vld [vmem:[#allocation2 + $0x171c] sm:$0xf0] }
  0xc5   :  { %v13519_v7 = vld [vmem:[#allocation2 + $0x10c0] sm:$0xf]  ;;  %v14320_v10 = vor.u32 %v17873_v3, %v14319_v2  ;;  %6508 = vmatpush.bf16.msra.mxu2 %v14064_v6 }
  0xc6   :  { %v17673_v8 = vld [vmem:[#allocation2 + $0x10dc] sm:$0xf0] }
  0xc7   :  { %v13775_v9 = vld [vmem:[#allocation2 + $0x12c0] sm:$0xf]  ;;  %v13520_v16 = vor.u32 %v17673_v8, %v13519_v7  ;;  %6521 = vmatpush.bf16.msra.mxu3 %v14320_v10  ;;  %v1217_v10 = vunpack.c.l.b16 %v154_v61 }
  0xc8   :  { %v17737_v11 = vld [vmem:[#allocation2 + $0x12dc] sm:$0xf0] }
  0xc9   :  { %v14031_v12 = vld [vmem:[#allocation2 + $0x14c0] sm:$0xf]  ;;  %v13776_v17 = vor.u32 %v17737_v11, %v13775_v9  ;;  %6483 = vmatpush.bf16.msra.mxu0 %v13520_v16 }
  0xca   :  { %v17801_v13 = vld [vmem:[#allocation2 + $0x14dc] sm:$0xf0] }
  0xcb   :  { %v14287_v14 = vld [vmem:[#allocation2 + $0x16c0] sm:$0xf]  ;;  %v14032_v21 = vor.u32 %v17801_v13, %v14031_v12  ;;  %6496 = vmatpush.bf16.msra.mxu1 %v13776_v17 }
  0xcc   :  { %v17865_v15 = vld [vmem:[#allocation2 + $0x16dc] sm:$0xf0] }
  0xcd   :  { %v13487_v23 = vld [vmem:[#allocation2 + $0x1080] sm:$0xf]  ;;  %v14288_v26 = vor.u32 %v17865_v15, %v14287_v14  ;;  %6509 = vmatpush.bf16.msra.mxu2 %v14032_v21  ;;  %v1218_v14 = vunpack.c.h.b16 %v154_v61 }
  0xce   :  { %v17665_v24 = vld [vmem:[#allocation2 + $0x109c] sm:$0xf0] }
  0xcf   :  { %v13743_v25 = vld [vmem:[#allocation2 + $0x1280] sm:$0xf]  ;;  %v13488_v32 = vor.u32 %v17665_v24, %v13487_v23  ;;  %6522 = vmatpush.bf16.msra.mxu3 %v14288_v26 }
  0xd0   :  { %v17729_v27 = vld [vmem:[#allocation2 + $0x129c] sm:$0xf0] }
  0xd1   :  { %v13999_v28 = vld [vmem:[#allocation2 + $0x1480] sm:$0xf]  ;;  %v13744_v34 = vor.u32 %v17729_v27, %v13743_v25  ;;  %6484 = vmatpush.bf16.msra.mxu0 %v13488_v32 }
  0xd2   :  { %v17793_v29 = vld [vmem:[#allocation2 + $0x149c] sm:$0xf0] }
  0xd3   :  { %v14255_v30 = vld [vmem:[#allocation2 + $0x1680] sm:$0xf]  ;;  %v14000_v35 = vor.u32 %v17793_v29, %v13999_v28  ;;  %6497 = vmatpush.bf16.msra.mxu1 %v13744_v34  ;;  %v18930_v29 = vpack.c.b16 %v1217_v10, %v1217_v10 }
  0xd4   :  { %v17857_v31 = vld [vmem:[#allocation2 + $0x169c] sm:$0xf0] }
  0xd5   :  { %v13455_v33 = vld [vmem:[#allocation2 + $0x1040] sm:$0xf]  ;;  %v14256_v40 = vor.u32 %v17857_v31, %v14255_v30  ;;  %6510 = vmatpush.bf16.msra.mxu2 %v14000_v35 }
  0xd6   :  { %v17657_v36 = vld [vmem:[#allocation2 + $0x105c] sm:$0xf0] }
  0xd7   :  { %v13711_v37 = vld [vmem:[#allocation2 + $0x1240] sm:$0xf]  ;;  %v13456_v49 = vor.u32 %v17657_v36, %v13455_v33  ;;  %6523 = vmatpush.bf16.msra.mxu3 %v14256_v40  ;;  %v18934_v33 = vpack.c.b16 %v1218_v14, %v1218_v14 }
  0xd8   :  { %v17721_v39 = vld [vmem:[#allocation2 + $0x125c] sm:$0xf0] }
  0xd9   :  { %v13967_v43 = vld [vmem:[#allocation2 + $0x1440] sm:$0xf]  ;;  %v13712_v53 = vor.u32 %v17721_v39, %v13711_v37  ;;  %6485 = vmatpush.bf16.msra.mxu0 %v13456_v49 }
  0xda   :  { %v17785_v45 = vld [vmem:[#allocation2 + $0x145c] sm:$0xf0] }
  0xdb   :  { %v14223_v46 = vld [vmem:[#allocation2 + $0x1640] sm:$0xf]  ;;  %v13968_v54 = vor.u32 %v17785_v45, %v13967_v43  ;;  %6498 = vmatpush.bf16.msra.mxu1 %v13712_v53 }
  0xdc   :  { %v17849_v47 = vld [vmem:[#allocation2 + $0x165c] sm:$0xf0] }
  0xdd   :  { %v13423_v48 = vld [vmem:[#allocation2 + $0x1000] sm:$0xf]  ;;  %v14224_v58 = vor.u32 %v17849_v47, %v14223_v46  ;;  %6511 = vmatpush.bf16.msra.mxu2 %v13968_v54 }
  0xde   :  { %v17649_v50 = vld [vmem:[#allocation2 + $0x101c] sm:$0xf0] }
  0xdf   :  { %v13679_v51 = vld [vmem:[#allocation2 + $0x1200] sm:$0xf]  ;;  %v13424_v1 = vor.u32 %v17649_v50, %v13423_v48  ;;  %6524 = vmatpush.bf16.msra.mxu3 %v14224_v58 }
  0xe0   :  { %v17713_v52 = vld [vmem:[#allocation2 + $0x121c] sm:$0xf0] }
  0xe1   :  { %v13935_v55 = vld [vmem:[#allocation2 + $0x1400] sm:$0xf]  ;;  %v13680_v6 = vor.u32 %v17713_v52, %v13679_v51  ;;  %6486 = vmatpush.bf16.msra.mxu0 %v13424_v1 }
  0xe2   :  { %v17777_v56 = vld [vmem:[#allocation2 + $0x141c] sm:$0xf0] }
  0xe3   :  { %v153_v57 = vld [vmem:[%s19364_s0 + $0x20] sm:$0xff]  ;;  %v13936_v7 = vor.u32 %v17777_v56, %v13935_v55  ;;  %6499 = vmatpush.bf16.msra.mxu1 %v13680_v6 }
  0xe4   :  { %v14191_v59 = vld [vmem:[#allocation2 + $0x1600] sm:$0xf]  ;;  %v1215_v5 = vunpack.c.l.b16 %v153_v57  ;;  %v1216_v11 = vunpack.c.h.b16 %v153_v57 }
  0xe5   :  { %v17841_v60 = vld [vmem:[#allocation2 + $0x161c] sm:$0xf0]  ;;  %6512 = vmatpush.bf16.msra.mxu2 %v13936_v7 }
  0xe6   :  { %v14671_v62 = vld [vmem:[#allocation2 + $0x19c0] sm:$0xf]  ;;  %v14192_v12 = vor.u32 %v17841_v60, %v14191_v59  ;;  %v18928_v25 = vpack.c.b16 %v1215_v5, %v1215_v5  ;;  %v18932_v30 = vpack.c.b16 %v1216_v11, %v1216_v11 }
  0xe7   :  { %v17961_v63 = vld [vmem:[#allocation2 + $0x19dc] sm:$0xf0] }
  0xe8   :  { %v14927_v0 = vld [vmem:[#allocation2 + $0x1bc0] sm:$0xf]  ;;  %v14672_v13 = vor.u32 %v17961_v63, %v14671_v62  ;;  %6525 = vmatpush.bf16.msra.mxu3 %v14192_v12  ;;  %6487 = vmatmul.bf16.vlgmr.msra.gmra.mxu0 %v18928_v25 }
  0xe9   :  { %v18025_v2 = vld [vmem:[#allocation2 + $0x1bdc] sm:$0xf0]  ;;  %6513 = vmatmul.bf16.vlgmr.msra.gmra.mxu2 %v18930_v29  ;;  %6500 = vmatmul.bf16.vlgmr.msra.gmra.mxu1 %v18932_v30 }
  0xea   :  { %v15183_v3 = vld [vmem:[#allocation2 + $0x1dc0] sm:$0xf]  ;;  %v14928_v15 = vor.u32 %v18025_v2, %v14927_v0  ;;  %6531 = vmatpush.bf16.msrb.mxu0 %v14672_v13 }
  0xeb   :  { %v18089_v4 = vld [vmem:[#allocation2 + $0x1ddc] sm:$0xf0]  ;;  %6526 = vmatmul.bf16.vlgmr.msra.gmra.mxu3 %v18934_v33 }
  0xec   :  { %v15439_v8 = vld [vmem:[#allocation2 + $0x1fc0] sm:$0xf]  ;;  %v15184_v16 = vor.u32 %v18089_v4, %v15183_v3  ;;  %6544 = vmatpush.bf16.msrb.mxu1 %v14928_v15 }
  0xed   :  { %v18153_v9 = vld [vmem:[#allocation2 + $0x1fdc] sm:$0xf0] }
  0xee   :  { %v14639_v17 = vld [vmem:[#allocation2 + $0x1980] sm:$0xf]  ;;  %v15440_v24 = vor.u32 %v18153_v9, %v15439_v8  ;;  %6557 = vmatpush.bf16.msrb.mxu2 %v15184_v16 }
  0xef   :  { %v17953_v21 = vld [vmem:[#allocation2 + $0x199c] sm:$0xf0] }
  0xf0   :  { %v14895_v23 = vld [vmem:[#allocation2 + $0x1b80] sm:$0xf]  ;;  %v14640_v34 = vor.u32 %v17953_v21, %v14639_v17  ;;  %6570 = vmatpush.bf16.msrb.mxu3 %v15440_v24 }
  0xf1   :  { %v18017_v26 = vld [vmem:[#allocation2 + $0x1b9c] sm:$0xf0] }
  0xf2   :  { %v15151_v27 = vld [vmem:[#allocation2 + $0x1d80] sm:$0xf]  ;;  %v14896_v35 = vor.u32 %v18017_v26, %v14895_v23  ;;  %6532 = vmatpush.bf16.msrb.mxu0 %v14640_v34 }
  0xf3   :  { %v18081_v28 = vld [vmem:[#allocation2 + $0x1d9c] sm:$0xf0] }
  0xf4   :  { %v15407_v31 = vld [vmem:[#allocation2 + $0x1f80] sm:$0xf]  ;;  %v15152_v36 = vor.u32 %v18081_v28, %v15151_v27  ;;  %6545 = vmatpush.bf16.msrb.mxu1 %v14896_v35 }
  0xf5   :  { %v18145_v32 = vld [vmem:[#allocation2 + $0x1f9c] sm:$0xf0] }
  0xf6   :  { %v14607_v37 = vld [vmem:[#allocation2 + $0x1940] sm:$0xf]  ;;  %v15408_v43 = vor.u32 %v18145_v32, %v15407_v31  ;;  %6558 = vmatpush.bf16.msrb.mxu2 %v15152_v36 }
  0xf7   :  { %v17945_v39 = vld [vmem:[#allocation2 + $0x195c] sm:$0xf0] }
  0xf8   :  { %v14863_v40 = vld [vmem:[#allocation2 + $0x1b40] sm:$0xf]  ;;  %v14608_v50 = vor.u32 %v17945_v39, %v14607_v37  ;;  %6571 = vmatpush.bf16.msrb.mxu3 %v15408_v43 }
  0xf9   :  { %v18009_v45 = vld [vmem:[#allocation2 + $0x1b5c] sm:$0xf0] }
  0xfa   :  { %v15119_v46 = vld [vmem:[#allocation2 + $0x1d40] sm:$0xf]  ;;  %v14864_v51 = vor.u32 %v18009_v45, %v14863_v40  ;;  %6533 = vmatpush.bf16.msrb.mxu0 %v14608_v50 }
  0xfb   :  { %v18073_v47 = vld [vmem:[#allocation2 + $0x1d5c] sm:$0xf0] }
  0xfc   :  { %v15375_v48 = vld [vmem:[#allocation2 + $0x1f40] sm:$0xf]  ;;  %v15120_v52 = vor.u32 %v18073_v47, %v15119_v46  ;;  %6546 = vmatpush.bf16.msrb.mxu1 %v14864_v51 }
  0xfd   :  { %v18137_v49 = vld [vmem:[#allocation2 + $0x1f5c] sm:$0xf0] }
  0xfe   :  { %v14575_v53 = vld [vmem:[#allocation2 + $0x1900] sm:$0xf]  ;;  %v15376_v56 = vor.u32 %v18137_v49, %v15375_v48  ;;  %6559 = vmatpush.bf16.msrb.mxu2 %v15120_v52 }
  0xff   :  { %v17937_v54 = vld [vmem:[#allocation2 + $0x191c] sm:$0xf0] }
 0x100   :  { %v14831_v55 = vld [vmem:[#allocation2 + $0x1b00] sm:$0xf]  ;;  %v14576_v62 = vor.u32 %v17937_v54, %v14575_v53  ;;  %6572 = vmatpush.bf16.msrb.mxu3 %v15376_v56 }
 0x101   :  { %v18001_v57 = vld [vmem:[#allocation2 + $0x1b1c] sm:$0xf0] }
 0x102   :  { %v15087_v58 = vld [vmem:[#allocation2 + $0x1d00] sm:$0xf]  ;;  %v14832_v63 = vor.u32 %v18001_v57, %v14831_v55  ;;  %6534 = vmatpush.bf16.msrb.mxu0 %v14576_v62  ;;  %v155_v55 = vld [vmem:[%s19364_s0 + $0x30] sm:$0xff]  ;;  %v17253_v62 = vld [vmem:[#allocation2 + $0x3c4] sm:$0xf] }
 0x103   :  { %v18065_v59 = vld [vmem:[#allocation2 + $0x1d1c] sm:$0xf0] }
 0x104   :  { %v15343_v60 = vld [vmem:[#allocation2 + $0x1f00] sm:$0xf]  ;;  %v15088_v0 = vor.u32 %v18065_v59, %v15087_v58  ;;  %6547 = vmatpush.bf16.msrb.mxu1 %v14832_v63  ;;  %v156_v59 = vld [vmem:[%s19364_s0 + $0x38] sm:$0xff] }
 0x105   :  { %v18129_v61 = vld [vmem:[#allocation2 + $0x1f1c] sm:$0xf0] }
 0x106   :  { %v14543_v1 = vld [vmem:[#allocation2 + $0x18c0] sm:$0xf]  ;;  %v15344_v4 = vor.u32 %v18129_v61, %v15343_v60  ;;  %6560 = vmatpush.bf16.msrb.mxu2 %v15088_v0  ;;  %v17189_v60 = vld [vmem:[#allocation2 + $0x1c4] sm:$0xf] }
 0x107   :  { %v17929_v2 = vld [vmem:[#allocation2 + $0x18dc] sm:$0xf0]  ;;  %v11601_v61 = vld [vmem:[#allocation2 + $0x1e0] sm:$0xf0] }
 0x108   :  { %v14799_v3 = vld [vmem:[#allocation2 + $0x1ac0] sm:$0xf]  ;;  %v14544_v10 = vor.u32 %v17929_v2, %v14543_v1  ;;  %6573 = vmatpush.bf16.msrb.mxu3 %v15344_v4  ;;  %v11857_v0 = vld [vmem:[#allocation2 + $0x3e0] sm:$0xf0] }
 0x109   :  { %v17993_v5 = vld [vmem:[#allocation2 + $0x1adc] sm:$0xf0]  ;;  %v17317_v1 = vld [vmem:[#allocation2 + $0x5c4] sm:$0xf] }
 0x10a   :  { %v15055_v6 = vld [vmem:[#allocation2 + $0x1cc0] sm:$0xf]  ;;  %v14800_v11 = vor.u32 %v17993_v5, %v14799_v3  ;;  %6535 = vmatpush.bf16.msrb.mxu0 %v14544_v10  ;;  %v12113_v2 = vld [vmem:[#allocation2 + $0x5e0] sm:$0xf0]  ;;  %v1219_v3 = vunpack.c.l.b16 %v155_v55 }
 0x10b   :  { %v18057_v7 = vld [vmem:[#allocation2 + $0x1cdc] sm:$0xf0] }
 0x10c   :  { %v15311_v8 = vld [vmem:[#allocation2 + $0x1ec0] sm:$0xf]  ;;  %v15056_v12 = vor.u32 %v18057_v7, %v15055_v6  ;;  %6548 = vmatpush.bf16.msrb.mxu1 %v14800_v11  ;;  %v17381_v6 = vld [vmem:[#allocation2 + $0x7c4] sm:$0xf]  ;;  %v11604_v11 = vor.u32 %v17189_v60, %v11601_v61 }
 0x10d   :  { %v18121_v9 = vld [vmem:[#allocation2 + $0x1edc] sm:$0xf0]  ;;  %v12369_v7 = vld [vmem:[#allocation2 + $0x7e0] sm:$0xf0] }
 0x10e   :  { %v14511_v13 = vld [vmem:[#allocation2 + $0x1880] sm:$0xf]  ;;  %v15312_v16 = vor.u32 %v18121_v9, %v15311_v8  ;;  %6561 = vmatpush.bf16.msrb.mxu2 %v15056_v12  ;;  %v1221_v8 = vunpack.c.l.b16 %v156_v59  ;;  %v1220_v9 = vunpack.c.h.b16 %v155_v55  ;;  %v1222_v12 = vunpack.c.h.b16 %v156_v59  ;;  %v17165_v55 = vld [vmem:[#allocation2 + $0x104] sm:$0xf] }
 0x10f   :  { %v17921_v14 = vld [vmem:[#allocation2 + $0x189c] sm:$0xf0]  ;;  %v11761_v59 = vld [vmem:[#allocation2 + $0x320] sm:$0xf0] }
 0x110   :  { %v14767_v15 = vld [vmem:[#allocation2 + $0x1a80] sm:$0xf]  ;;  %v14512_v27 = vor.u32 %v17921_v14, %v14511_v13  ;;  %6574 = vmatpush.bf16.msrb.mxu3 %v15312_v16  ;;  %v11860_v13 = vor.u32 %v17253_v62, %v11857_v0  ;;  %v12116_v14 = vor.u32 %v17317_v1, %v12113_v2  ;;  %v11569_v16 = vld [vmem:[#allocation2 + $0x1a0] sm:$0xf0] }
 0x111   :  { %v17985_v17 = vld [vmem:[#allocation2 + $0x1a9c] sm:$0xf0]  ;;  %v17293_v60 = vld [vmem:[#allocation2 + $0x504] sm:$0xf] }
 0x112   :  { %v15023_v21 = vld [vmem:[#allocation2 + $0x1c80] sm:$0xf]  ;;  %v14768_v28 = vor.u32 %v17985_v17, %v14767_v15  ;;  %6536 = vmatpush.bf16.msrb.mxu0 %v14512_v27  ;;  %v17181_v15 = vld [vmem:[#allocation2 + $0x184] sm:$0xf] }
 0x113   :  { %v18049_v23 = vld [vmem:[#allocation2 + $0x1c9c] sm:$0xf0]  ;;  %v17245_v17 = vld [vmem:[#allocation2 + $0x384] sm:$0xf] }
 0x114   :  { %v15279_v24 = vld [vmem:[#allocation2 + $0x1e80] sm:$0xf]  ;;  %v15024_v31 = vor.u32 %v18049_v23, %v15023_v21  ;;  %6549 = vmatpush.bf16.msrb.mxu1 %v14768_v28  ;;  %v12372_v21 = vor.u32 %v17381_v6, %v12369_v7  ;;  %v18946_v23 = vpack.c.b16 %v1219_v3, %v1219_v3  ;;  %v12081_v27 = vld [vmem:[#allocation2 + $0x5a0] sm:$0xf0]  ;;  %v18948_v28 = vpack.c.b16 %v1221_v8, %v1221_v8 }
 0x115   :  { %v18113_v26 = vld [vmem:[#allocation2 + $0x1e9c] sm:$0xf0]  ;;  %v12017_v61 = vld [vmem:[#allocation2 + $0x520] sm:$0xf0] }
 0x116   :  { %v14479_v32 = vld [vmem:[#allocation2 + $0x1840] sm:$0xf]  ;;  %v15280_v36 = vor.u32 %v18113_v26, %v15279_v24  ;;  %6562 = vmatpush.bf16.msrb.mxu2 %v15024_v31  ;;  %v11825_v24 = vld [vmem:[#allocation2 + $0x3a0] sm:$0xf0]  ;;  %v18950_v31 = vpack.c.b16 %v1220_v9, %v1220_v9  ;;  %v12020_v2 = vor.u32 %v17293_v60, %v12017_v61 }
 0x117   :  { %v17913_v34 = vld [vmem:[#allocation2 + $0x185c] sm:$0xf0]  ;;  %v17309_v26 = vld [vmem:[#allocation2 + $0x584] sm:$0xf] }
 0x118   :  { %v14735_v35 = vld [vmem:[#allocation2 + $0x1a40] sm:$0xf]  ;;  %v14480_v47 = vor.u32 %v17913_v34, %v14479_v32  ;;  %6575 = vmatpush.bf16.msrb.mxu3 %v15280_v36  ;;  %v17373_v32 = vld [vmem:[#allocation2 + $0x784] sm:$0xf]  ;;  %v11572_v36 = vor.u32 %v17181_v15, %v11569_v16 }
 0x119   :  { %v17977_v37 = vld [vmem:[#allocation2 + $0x1a5c] sm:$0xf0]  ;;  %v12337_v34 = vld [vmem:[#allocation2 + $0x7a0] sm:$0xf0] }
 0x11a   :  { %v14991_v39 = vld [vmem:[#allocation2 + $0x1c40] sm:$0xf]  ;;  %v14736_v51 = vor.u32 %v17977_v37, %v14735_v35  ;;  %6537 = vmatpush.bf16.msrb.mxu0 %v14480_v47  ;;  %v18952_v35 = vpack.c.b16 %v1222_v12, %v1222_v12  ;;  %v11828_v37 = vor.u32 %v17245_v17, %v11825_v24  ;;  %v11793_v47 = vld [vmem:[#allocation2 + $0x360] sm:$0xf0] }
 0x11b   :  { %v18041_v40 = vld [vmem:[#allocation2 + $0x1c5c] sm:$0xf0]  ;;  %v17357_v62 = vld [vmem:[#allocation2 + $0x704] sm:$0xf] }
 0x11c   :  { %v15247_v43 = vld [vmem:[#allocation2 + $0x1e40] sm:$0xf]  ;;  %v14992_v52 = vor.u32 %v18041_v40, %v14991_v39  ;;  %6550 = vmatpush.bf16.msrb.mxu1 %v14736_v51  ;;  %v12084_v39 = vor.u32 %v17309_v26, %v12081_v27  ;;  %v17173_v40 = vld [vmem:[#allocation2 + $0x144] sm:$0xf] }
 0x11d   :  { %v18105_v45 = vld [vmem:[#allocation2 + $0x1e5c] sm:$0xf0]  ;;  %v12305_v51 = vld [vmem:[#allocation2 + $0x760] sm:$0xf0] }
 0x11e   :  { %v14447_v46 = vld [vmem:[#allocation2 + $0x1800] sm:$0xf]  ;;  %v15248_v56 = vor.u32 %v18105_v45, %v15247_v43  ;;  %6563 = vmatpush.bf16.msrb.mxu2 %v14992_v52  ;;  %v11537_v43 = vld [vmem:[#allocation2 + $0x160] sm:$0xf0] }
 0x11f   :  { %v17905_v48 = vld [vmem:[#allocation2 + $0x181c] sm:$0xf0]  ;;  %v17237_v45 = vld [vmem:[#allocation2 + $0x344] sm:$0xf]  ;;  %v11540_v52 = vor.u32 %v17173_v40, %v11537_v43 }
 0x120   :  { %v14703_v49 = vld [vmem:[#allocation2 + $0x1a00] sm:$0xf]  ;;  %v14448_v63 = vor.u32 %v17905_v48, %v14447_v46  ;;  %6576 = vmatpush.bf16.msrb.mxu3 %v15248_v56  ;;  %v12340_v46 = vor.u32 %v17373_v32, %v12337_v34  ;;  %v17301_v48 = vld [vmem:[#allocation2 + $0x544] sm:$0xf] }
 0x121   :  { %v17969_v50 = vld [vmem:[#allocation2 + $0x1a1c] sm:$0xf0]  ;;  %v11505_v56 = vld [vmem:[#allocation2 + $0x120] sm:$0xf0] }
 0x122   :  { %v14959_v53 = vld [vmem:[#allocation2 + $0x1c00] sm:$0xf]  ;;  %v14704_v4 = vor.u32 %v17969_v50, %v14703_v49  ;;  %6538 = vmatpush.bf16.msrb.mxu0 %v14448_v63  ;;  %v12049_v49 = vld [vmem:[#allocation2 + $0x560] sm:$0xf0]  ;;  %v11508_v0 = vor.u32 %v17165_v55, %v11505_v56 }
 0x123   :  { %v18033_v54 = vld [vmem:[#allocation2 + $0x1c1c] sm:$0xf0]  ;;  %v17365_v50 = vld [vmem:[#allocation2 + $0x744] sm:$0xf] }
 0x124   :  { %v15215_v57 = vld [vmem:[#allocation2 + $0x1e00] sm:$0xf]  ;;  %v14960_v5 = vor.u32 %v18033_v54, %v14959_v53  ;;  %6551 = vmatpush.bf16.msrb.mxu1 %v14704_v4  ;;  %v11796_v53 = vor.u32 %v17237_v45, %v11793_v47  ;;  %v12052_v54 = vor.u32 %v17301_v48, %v12049_v49  ;;  %v12273_v63 = vld [vmem:[#allocation2 + $0x720] sm:$0xf0] }
 0x125   :  { %v18097_v58 = vld [vmem:[#allocation2 + $0x1e1c] sm:$0xf0]  ;;  %6539 = vmatmul.bf16.vlgmr.msrb.gmra.mxu0 %v18946_v23  ;;  %v17157_v3 = vld [vmem:[#allocation2 + $0xc4] sm:$0xf]  ;;  %v12276_v6 = vor.u32 %v17357_v62, %v12273_v63 }
 0x126   :  { %v15216_v10 = vor.u32 %v18097_v58, %v15215_v57  ;;  %6564 = vmatpush.bf16.msrb.mxu2 %v14960_v5  ;;  %6583 = vmatpush.bf16.msra.mxu0 %v11604_v11  ;;  %v17229_v57 = vld [vmem:[#allocation2 + $0x304] sm:$0xf]  ;;  %v12308_v58 = vor.u32 %v17365_v50, %v12305_v51 }
 0x127   :  { %6552 = vmatmul.bf16.vlgmr.msrb.gmra.mxu1 %v18950_v31  ;;  %v11764_v1 = vor.u32 %v17229_v57, %v11761_v59  ;;  %v11473_v4 = vld [vmem:[#allocation2 + $0xe0] sm:$0xf0] }
 0x128   :  { %6577 = vmatpush.bf16.msrb.mxu3 %v15216_v10  ;;  %6596 = vmatpush.bf16.msra.mxu1 %v11860_v13  ;;  %v17221_v5 = vld [vmem:[#allocation2 + $0x2c4] sm:$0xf]  ;;  %v11476_v12 = vor.u32 %v17157_v3, %v11473_v4 }
 0x129   :  { %6565 = vmatmul.bf16.vlgmr.msrb.gmra.mxu2 %v18948_v28  ;;  %v11729_v7 = vld [vmem:[#allocation2 + $0x2e0] sm:$0xf0] }
 0x12a   :  { %6609 = vmatpush.bf16.msra.mxu2 %v12116_v14  ;;  %6584 = vmatpush.bf16.msra.mxu0 %v11572_v36  ;;  %v17285_v8 = vld [vmem:[#allocation2 + $0x4c4] sm:$0xf]  ;;  %v11732_v13 = vor.u32 %v17221_v5, %v11729_v7 }
 0x12b   :  { %6578 = vmatmul.bf16.vlgmr.msrb.gmra.mxu3 %v18952_v35  ;;  %v11985_v9 = vld [vmem:[#allocation2 + $0x4e0] sm:$0xf0] }
 0x12c   :  { %6622 = vmatpush.bf16.msra.mxu3 %v12372_v21  ;;  %6597 = vmatpush.bf16.msra.mxu1 %v11828_v37  ;;  %v17349_v10 = vld [vmem:[#allocation2 + $0x6c4] sm:$0xf]  ;;  %v11988_v14 = vor.u32 %v17285_v8, %v11985_v9 }
 0x12d   :  { %v12241_v11 = vld [vmem:[#allocation2 + $0x6e0] sm:$0xf0] }
 0x12e   :  { %6610 = vmatpush.bf16.msra.mxu2 %v12084_v39  ;;  %6585 = vmatpush.bf16.msra.mxu0 %v11540_v52  ;;  %v17149_v15 = vld [vmem:[#allocation2 + $0x84] sm:$0xf]  ;;  %v12244_v21 = vor.u32 %v17349_v10, %v12241_v11 }
 0x12f   :  { %v11441_v16 = vld [vmem:[#allocation2 + $0xa0] sm:$0xf0] }
 0x130   :  { %6623 = vmatpush.bf16.msra.mxu3 %v12340_v46  ;;  %6598 = vmatpush.bf16.msra.mxu1 %v11796_v53  ;;  %v17213_v17 = vld [vmem:[#allocation2 + $0x284] sm:$0xf]  ;;  %v11444_v36 = vor.u32 %v17149_v15, %v11441_v16 }
 0x131   :  { %v11697_v24 = vld [vmem:[#allocation2 + $0x2a0] sm:$0xf0] }
 0x132   :  { %6611 = vmatpush.bf16.msra.mxu2 %v12052_v54  ;;  %6586 = vmatpush.bf16.msra.mxu0 %v11508_v0  ;;  %v17277_v26 = vld [vmem:[#allocation2 + $0x484] sm:$0xf]  ;;  %v11700_v37 = vor.u32 %v17213_v17, %v11697_v24 }
 0x133   :  { %v11953_v27 = vld [vmem:[#allocation2 + $0x4a0] sm:$0xf0] }
 0x134   :  { %6624 = vmatpush.bf16.msra.mxu3 %v12308_v58  ;;  %6599 = vmatpush.bf16.msra.mxu1 %v11764_v1  ;;  %v17341_v32 = vld [vmem:[#allocation2 + $0x684] sm:$0xf]  ;;  %v11956_v39 = vor.u32 %v17277_v26, %v11953_v27 }
 0x135   :  { %v12209_v34 = vld [vmem:[#allocation2 + $0x6a0] sm:$0xf0] }
 0x136   :  { %6612 = vmatpush.bf16.msra.mxu2 %v12020_v2  ;;  %6587 = vmatpush.bf16.msra.mxu0 %v11476_v12  ;;  %v17141_v40 = vld [vmem:[#allocation2 + $0x44] sm:$0xf]  ;;  %v12212_v46 = vor.u32 %v17341_v32, %v12209_v34 }
 0x137   :  { %v11409_v43 = vld [vmem:[#allocation2 + $0x60] sm:$0xf0] }
 0x138   :  { %6625 = vmatpush.bf16.msra.mxu3 %v12276_v6  ;;  %6600 = vmatpush.bf16.msra.mxu1 %v11732_v13  ;;  %v17205_v45 = vld [vmem:[#allocation2 + $0x244] sm:$0xf]  ;;  %v11412_v52 = vor.u32 %v17141_v40, %v11409_v43 }
 0x139   :  { %v11665_v47 = vld [vmem:[#allocation2 + $0x260] sm:$0xf0] }
 0x13a   :  { %6613 = vmatpush.bf16.msra.mxu2 %v11988_v14  ;;  %v17269_v48 = vld [vmem:[#allocation2 + $0x444] sm:$0xf]  ;;  %6588 = vmatpush.bf16.msra.mxu0 %v11444_v36  ;;  %v11668_v55 = vor.u32 %v17205_v45, %v11665_v47 }
 0x13b   :  { %v11921_v49 = vld [vmem:[#allocation2 + $0x460] sm:$0xf0] }
 0x13c   :  { %6626 = vmatpush.bf16.msra.mxu3 %v12244_v21  ;;  %v17333_v50 = vld [vmem:[#allocation2 + $0x644] sm:$0xf]  ;;  %6601 = vmatpush.bf16.msra.mxu1 %v11700_v37  ;;  %v11924_v56 = vor.u32 %v17269_v48, %v11921_v49 }
 0x13d   :  { %v12177_v51 = vld [vmem:[#allocation2 + $0x660] sm:$0xf0] }
 0x13e   :  { %v17133_v53 = vld [vmem:[#allocation2 + $0x4] sm:$0xf]  ;;  %6614 = vmatpush.bf16.msra.mxu2 %v11956_v39  ;;  %v12180_v60 = vor.u32 %v17333_v50, %v12177_v51  ;;  %6589 = vmatpush.bf16.msra.mxu0 %v11412_v52 }
 0x13f   :  { %v11377_v54 = vld [vmem:[#allocation2 + $0x20] sm:$0xf0] }
 0x140   :  { %v17197_v57 = vld [vmem:[#allocation2 + $0x204] sm:$0xf]  ;;  %6627 = vmatpush.bf16.msra.mxu3 %v12212_v46  ;;  %v11380_v3 = vor.u32 %v17133_v53, %v11377_v54  ;;  %6602 = vmatpush.bf16.msra.mxu1 %v11668_v55 }
 0x141   :  { %v11633_v58 = vld [vmem:[#allocation2 + $0x220] sm:$0xf0] }
 0x142   :  { %v17261_v59 = vld [vmem:[#allocation2 + $0x404] sm:$0xf]  ;;  %6615 = vmatpush.bf16.msra.mxu2 %v11924_v56  ;;  %v11636_v7 = vor.u32 %v17197_v57, %v11633_v58  ;;  %6590 = vmatpush.bf16.msra.mxu0 %v11380_v3 }
 0x143   :  { %v11889_v61 = vld [vmem:[#allocation2 + $0x420] sm:$0xf0] }
 0x144   :  { %v17325_v62 = vld [vmem:[#allocation2 + $0x604] sm:$0xf]  ;;  %v11892_v8 = vor.u32 %v17261_v59, %v11889_v61  ;;  %6628 = vmatpush.bf16.msra.mxu3 %v12180_v60  ;;  %6603 = vmatpush.bf16.msra.mxu1 %v11636_v7 }
 0x145   :  { %v12145_v63 = vld [vmem:[#allocation2 + $0x620] sm:$0xf0]  ;;  %6591 = vmatmul.bf16.vlgmr.msra.gmra.mxu0 %v18894_v19 }
 0x146   :  { %v17445_v0 = vld [vmem:[#allocation2 + $0x9c4] sm:$0xf]  ;;  %v12148_v11 = vor.u32 %v17325_v62, %v12145_v63  ;;  %6616 = vmatpush.bf16.msra.mxu2 %v11892_v8 }
 0x147   :  { %v12625_v1 = vld [vmem:[#allocation2 + $0x9e0] sm:$0xf0]  ;;  %6604 = vmatmul.bf16.vlgmr.msra.gmra.mxu1 %v18898_v22 }
 0x148   :  { %v17509_v2 = vld [vmem:[#allocation2 + $0xbc4] sm:$0xf]  ;;  %v12628_v12 = vor.u32 %v17445_v0, %v12625_v1  ;;  %6629 = vmatpush.bf16.msra.mxu3 %v12148_v11 }
 0x149   :  { %v12881_v4 = vld [vmem:[#allocation2 + $0xbe0] sm:$0xf0]  ;;  %6617 = vmatmul.bf16.vlgmr.msra.gmra.mxu2 %v18892_v18 }
 0x14a   :  { %v17573_v5 = vld [vmem:[#allocation2 + $0xdc4] sm:$0xf]  ;;  %v12884_v13 = vor.u32 %v17509_v2, %v12881_v4  ;;  %6635 = vmatpush.bf16.msrb.mxu0 %v12628_v12 }
 0x14b   :  { %v13137_v6 = vld [vmem:[#allocation2 + $0xde0] sm:$0xf0]  ;;  %6630 = vmatmul.bf16.vlgmr.msra.gmra.mxu3 %v18896_v20 }
 0x14c   :  { %v17637_v9 = vld [vmem:[#allocation2 + $0xfc4] sm:$0xf]  ;;  %v13140_v14 = vor.u32 %v17573_v5, %v13137_v6  ;;  %6648 = vmatpush.bf16.msrb.mxu1 %v12884_v13 }
 0x14d   :  { %v13393_v10 = vld [vmem:[#allocation2 + $0xfe0] sm:$0xf0] }
 0x14e   :  { %v17437_v15 = vld [vmem:[#allocation2 + $0x984] sm:$0xf]  ;;  %v13396_v21 = vor.u32 %v17637_v9, %v13393_v10  ;;  %6661 = vmatpush.bf16.msrb.mxu2 %v13140_v14 }
 0x14f   :  { %v12593_v16 = vld [vmem:[#allocation2 + $0x9a0] sm:$0xf0] }
 0x150   :  { %v17501_v17 = vld [vmem:[#allocation2 + $0xb84] sm:$0xf]  ;;  %v12596_v36 = vor.u32 %v17437_v15, %v12593_v16  ;;  %6674 = vmatpush.bf16.msrb.mxu3 %v13396_v21 }
 0x151   :  { %v12849_v24 = vld [vmem:[#allocation2 + $0xba0] sm:$0xf0] }
 0x152   :  { %v17565_v26 = vld [vmem:[#allocation2 + $0xd84] sm:$0xf]  ;;  %v12852_v37 = vor.u32 %v17501_v17, %v12849_v24  ;;  %6636 = vmatpush.bf16.msrb.mxu0 %v12596_v36 }
 0x153   :  { %v13105_v27 = vld [vmem:[#allocation2 + $0xda0] sm:$0xf0] }
 0x154   :  { %v17629_v32 = vld [vmem:[#allocation2 + $0xf84] sm:$0xf]  ;;  %v13108_v39 = vor.u32 %v17565_v26, %v13105_v27  ;;  %6649 = vmatpush.bf16.msrb.mxu1 %v12852_v37 }
 0x155   :  { %v13361_v34 = vld [vmem:[#allocation2 + $0xfa0] sm:$0xf0] }
 0x156   :  { %v17429_v40 = vld [vmem:[#allocation2 + $0x944] sm:$0xf]  ;;  %v13364_v46 = vor.u32 %v17629_v32, %v13361_v34  ;;  %6662 = vmatpush.bf16.msrb.mxu2 %v13108_v39 }
 0x157   :  { %v12561_v43 = vld [vmem:[#allocation2 + $0x960] sm:$0xf0] }
 0x158   :  { %v17493_v45 = vld [vmem:[#allocation2 + $0xb44] sm:$0xf]  ;;  %v12564_v52 = vor.u32 %v17429_v40, %v12561_v43  ;;  %6675 = vmatpush.bf16.msrb.mxu3 %v13364_v46  ;;  %v6384_v40 = vpop.f32.mrf.mxu0 }
 0x159   :  { %v12817_v47 = vld [vmem:[#allocation2 + $0xb60] sm:$0xf0] }
 0x15a   :  { %v17557_v48 = vld [vmem:[#allocation2 + $0xd44] sm:$0xf]  ;;  %v12820_v53 = vor.u32 %v17493_v45, %v12817_v47  ;;  %6637 = vmatpush.bf16.msrb.mxu0 %v12564_v52 }
 0x15b   :  { %v13073_v49 = vld [vmem:[#allocation2 + $0xd60] sm:$0xf0] }
 0x15c   :  { %v17621_v50 = vld [vmem:[#allocation2 + $0xf44] sm:$0xf]  ;;  %v13076_v54 = vor.u32 %v17557_v48, %v13073_v49  ;;  %6650 = vmatpush.bf16.msrb.mxu1 %v12820_v53 }
 0x15d   :  { %v13329_v51 = vld [vmem:[#allocation2 + $0xf60] sm:$0xf0] }
 0x15e   :  { %v17421_v55 = vld [vmem:[#allocation2 + $0x904] sm:$0xf]  ;;  %v13332_v58 = vor.u32 %v17621_v50, %v13329_v51  ;;  %6663 = vmatpush.bf16.msrb.mxu2 %v13076_v54  ;;  %v6397_v50 = vpop.f32.mrf.mxu1 }
 0x15f   :  { %v12529_v56 = vld [vmem:[#allocation2 + $0x920] sm:$0xf0] }
 0x160   :  { %v17485_v57 = vld [vmem:[#allocation2 + $0xb04] sm:$0xf]  ;;  %v12532_v0 = vor.u32 %v17421_v55, %v12529_v56  ;;  %6676 = vmatpush.bf16.msrb.mxu3 %v13332_v58 }
 0x161   :  { %v12785_v59 = vld [vmem:[#allocation2 + $0xb20] sm:$0xf0] }
 0x162   :  { %v17549_v60 = vld [vmem:[#allocation2 + $0xd04] sm:$0xf]  ;;  %v12788_v2 = vor.u32 %v17485_v57, %v12785_v59  ;;  %6638 = vmatpush.bf16.msrb.mxu0 %v12532_v0 }
 0x163   :  { %v13041_v61 = vld [vmem:[#allocation2 + $0xd20] sm:$0xf0] }
 0x164   :  { %v17613_v62 = vld [vmem:[#allocation2 + $0xf04] sm:$0xf]  ;;  %v13044_v3 = vor.u32 %v17549_v60, %v13041_v61  ;;  %6651 = vmatpush.bf16.msrb.mxu1 %v12788_v2  ;;  %v6410_v2 = vpop.f32.mrf.mxu2 }
 0x165   :  { %v13297_v63 = vld [vmem:[#allocation2 + $0xf20] sm:$0xf0] }
 0x166   :  { %v17413_v1 = vld [vmem:[#allocation2 + $0x8c4] sm:$0xf]  ;;  %v13300_v7 = vor.u32 %v17613_v62, %v13297_v63  ;;  %6664 = vmatpush.bf16.msrb.mxu2 %v13044_v3 }
 0x167   :  { %v12497_v4 = vld [vmem:[#allocation2 + $0x8e0] sm:$0xf0] }
 0x168   :  { %v17477_v5 = vld [vmem:[#allocation2 + $0xac4] sm:$0xf]  ;;  %v12500_v13 = vor.u32 %v17413_v1, %v12497_v4  ;;  %6677 = vmatpush.bf16.msrb.mxu3 %v13300_v7 }
 0x169   :  { %v12753_v6 = vld [vmem:[#allocation2 + $0xae0] sm:$0xf0] }
 0x16a   :  { %v17541_v8 = vld [vmem:[#allocation2 + $0xcc4] sm:$0xf]  ;;  %v12756_v15 = vor.u32 %v17477_v5, %v12753_v6  ;;  %6639 = vmatpush.bf16.msrb.mxu0 %v12500_v13 }
 0x16b   :  { %v13009_v9 = vld [vmem:[#allocation2 + $0xce0] sm:$0xf0] }
 0x16c   :  { %v1181_v10 = vld [vmem:[#allocation4] sm:$0xff]  ;;  %v13012_v16 = vor.u32 %v17541_v8, %v13009_v9  ;;  %6652 = vmatpush.bf16.msrb.mxu1 %v12756_v15  ;;  %v6423_v8 = vpop.f32.mrf.mxu3 }
 0x16d   :  { %v17605_v11 = vld [vmem:[#allocation2 + $0xec4] sm:$0xf]  ;;  %v1183_v24 = vperm.slane %v1181_v10, 0 }
 0x16e   :  { %v13265_v12 = vld [vmem:[#allocation2 + $0xee0] sm:$0xf0]  ;;  %6665 = vmatpush.bf16.msrb.mxu2 %v13012_v16 }
 0x16f   :  { %v17405_v14 = vld [vmem:[#allocation2 + $0x884] sm:$0xf]  ;;  %v13268_v26 = vor.u32 %v17605_v11, %v13265_v12  ;;  %v6385_v49 = vadd.f32 %v6384_v40, %v1183_v24 }
 0x170   :  { %v12465_v17 = vld [vmem:[#allocation2 + $0x8a0] sm:$0xf0] }
 0x171   :  { %v17469_v21 = vld [vmem:[#allocation2 + $0xa84] sm:$0xf]  ;;  %v12468_v39 = vor.u32 %v17405_v14, %v12465_v17  ;;  %6678 = vmatpush.bf16.msrb.mxu3 %v13268_v26  ;;  %v6398_v57 = vadd.f32 %v6397_v50, %v6385_v49  ;;  %v6386_v17 = vpop.f32.mrf.mxu0 }
 0x172   :  { %v12721_v27 = vld [vmem:[#allocation2 + $0xaa0] sm:$0xf0] }
 0x173   :  { %v17533_v32 = vld [vmem:[#allocation2 + $0xc84] sm:$0xf]  ;;  %v12724_v43 = vor.u32 %v17469_v21, %v12721_v27  ;;  %6640 = vmatpush.bf16.msrb.mxu0 %v12468_v39  ;;  %v6411_v7 = vadd.f32 %v6410_v2, %v6398_v57 }
 0x174   :  { %v12977_v34 = vld [vmem:[#allocation2 + $0xca0] sm:$0xf0] }
 0x175   :  { %v17597_v36 = vld [vmem:[#allocation2 + $0xe84] sm:$0xf]  ;;  %v12980_v45 = vor.u32 %v17533_v32, %v12977_v34  ;;  %6653 = vmatpush.bf16.msrb.mxu1 %v12724_v43  ;;  %v18962_v16 = vadd.f32 %v6423_v8, %v6411_v7  ;;  %v6399_v32 = vpop.f32.mrf.mxu1 }
 0x176   :  { %v13233_v37 = vld [vmem:[#allocation2 + $0xea0] sm:$0xf0] }
 0x177   :  { %v17397_v46 = vld [vmem:[#allocation2 + $0x844] sm:$0xf]  ;;  %v13236_v51 = vor.u32 %v17597_v36, %v13233_v37  ;;  %6666 = vmatpush.bf16.msrb.mxu2 %v12980_v45 }
 0x178   :  { %v12433_v47 = vld [vmem:[#allocation2 + $0x860] sm:$0xf0] }
 0x179   :  { %v17461_v48 = vld [vmem:[#allocation2 + $0xa44] sm:$0xf]  ;;  %v12436_v58 = vor.u32 %v17397_v46, %v12433_v47  ;;  %6679 = vmatpush.bf16.msrb.mxu3 %v13236_v51 }
 0x17a   :  { %v12689_v52 = vld [vmem:[#allocation2 + $0xa60] sm:$0xf0] }
 0x17b   :  { %v17525_v53 = vld [vmem:[#allocation2 + $0xc44] sm:$0xf]  ;;  %v12692_v61 = vor.u32 %v17461_v48, %v12689_v52  ;;  %6641 = vmatpush.bf16.msrb.mxu0 %v12436_v58  ;;  %v6412_v52 = vpop.f32.mrf.mxu2 }
 0x17c   :  { %v12945_v54 = vld [vmem:[#allocation2 + $0xc60] sm:$0xf0] }
 0x17d   :  { %v17589_v55 = vld [vmem:[#allocation2 + $0xe44] sm:$0xf]  ;;  %v12948_v62 = vor.u32 %v17525_v53, %v12945_v54  ;;  %6654 = vmatpush.bf16.msrb.mxu1 %v12692_v61  ;;  %v6425_v54 = vpop.f32.mrf.mxu3 }
 0x17e   :  { %v13201_v56 = vld [vmem:[#allocation2 + $0xe60] sm:$0xf0] }
 0x17f   :  { %v17389_v59 = vld [vmem:[#allocation2 + $0x804] sm:$0xf]  ;;  %v13204_v3 = vor.u32 %v17589_v55, %v13201_v56  ;;  %6667 = vmatpush.bf16.msrb.mxu2 %v12948_v62 }
 0x180   :  { %v12401_v60 = vld [vmem:[#allocation2 + $0x820] sm:$0xf0] }
 0x181   :  { %v17453_v63 = vld [vmem:[#allocation2 + $0xa04] sm:$0xf]  ;;  %v12404_v12 = vor.u32 %v17389_v59, %v12401_v60  ;;  %6680 = vmatpush.bf16.msrb.mxu3 %v13204_v3 }
 0x182   :  { %v12657_v0 = vld [vmem:[#allocation2 + $0xa20] sm:$0xf0] }
 0x183   :  { %v17517_v1 = vld [vmem:[#allocation2 + $0xc04] sm:$0xf]  ;;  %v12660_v21 = vor.u32 %v17453_v63, %v12657_v0  ;;  %6642 = vmatpush.bf16.msrb.mxu0 %v12404_v12 }
 0x184   :  { %v12913_v4 = vld [vmem:[#allocation2 + $0xc20] sm:$0xf0] }
 0x185   :  { %v17581_v5 = vld [vmem:[#allocation2 + $0xe04] sm:$0xf]  ;;  %v12916_v24 = vor.u32 %v17517_v1, %v12913_v4  ;;  %6655 = vmatpush.bf16.msrb.mxu1 %v12660_v21 }
 0x186   :  { %v13169_v6 = vld [vmem:[#allocation2 + $0xe20] sm:$0xf0]  ;;  %6643 = vmatmul.bf16.vlgmr.msrb.gmra.mxu0 %v18912_v41 }
 0x187   :  { %v17701_v9 = vld [vmem:[#allocation2 + $0x11c4] sm:$0xf]  ;;  %v13172_v34 = vor.u32 %v17581_v5, %v13169_v6  ;;  %6668 = vmatpush.bf16.msrb.mxu2 %v12916_v24 }
 0x188   :  { %v13649_v10 = vld [vmem:[#allocation2 + $0x11e0] sm:$0xf0]  ;;  %6656 = vmatmul.bf16.vlgmr.msrb.gmra.mxu1 %v18916_v44 }
 0x189   :  { %v17765_v11 = vld [vmem:[#allocation2 + $0x13c4] sm:$0xf]  ;;  %v13652_v36 = vor.u32 %v17701_v9, %v13649_v10  ;;  %6681 = vmatpush.bf16.msrb.mxu3 %v13172_v34  ;;  %v6449_v34 = vpop.f32.mrf.mxu1 }
 0x18a   :  { %v13905_v13 = vld [vmem:[#allocation2 + $0x13e0] sm:$0xf0]  ;;  %6669 = vmatmul.bf16.vlgmr.msrb.gmra.mxu2 %v18910_v38 }
 0x18b   :  { %v17829_v14 = vld [vmem:[#allocation2 + $0x15c4] sm:$0xf]  ;;  %v13908_v37 = vor.u32 %v17765_v11, %v13905_v13  ;;  %6687 = vmatpush.bf16.msra.mxu0 %v13652_v36 }
 0x18c   :  { %v14161_v15 = vld [vmem:[#allocation2 + $0x15e0] sm:$0xf0]  ;;  %6682 = vmatmul.bf16.vlgmr.msrb.gmra.mxu3 %v18914_v42 }
 0x18d   :  { %v17893_v26 = vld [vmem:[#allocation2 + $0x17c4] sm:$0xf]  ;;  %v14164_v39 = vor.u32 %v17829_v14, %v14161_v15  ;;  %6700 = vmatpush.bf16.msra.mxu1 %v13908_v37  ;;  %v6436_v15 = vpop.f32.mrf.mxu0 }
 0x18e   :  { %v14417_v27 = vld [vmem:[#allocation2 + $0x17e0] sm:$0xf0]  ;;  %v6437_v32 = vadd.f32 %v6436_v15, %v18962_v16 }
 0x18f   :  { %v17693_v40 = vld [vmem:[#allocation2 + $0x1184] sm:$0xf]  ;;  %v14420_v46 = vor.u32 %v17893_v26, %v14417_v27  ;;  %6713 = vmatpush.bf16.msra.mxu2 %v14164_v39 }
 0x190   :  { %v13617_v43 = vld [vmem:[#allocation2 + $0x11a0] sm:$0xf0] }
 0x191   :  { %v17757_v45 = vld [vmem:[#allocation2 + $0x1384] sm:$0xf]  ;;  %v13620_v53 = vor.u32 %v17693_v40, %v13617_v43  ;;  %6726 = vmatpush.bf16.msra.mxu3 %v14420_v46  ;;  %v6450_v46 = vadd.f32 %v6449_v34, %v6437_v32 }
 0x192   :  { %v13873_v47 = vld [vmem:[#allocation2 + $0x13a0] sm:$0xf0] }
 0x193   :  { %v17821_v48 = vld [vmem:[#allocation2 + $0x1584] sm:$0xf]  ;;  %v13876_v55 = vor.u32 %v17757_v45, %v13873_v47  ;;  %6688 = vmatpush.bf16.msra.mxu0 %v13620_v53  ;;  %v6462_v53 = vpop.f32.mrf.mxu2 }
 0x194   :  { %v14129_v49 = vld [vmem:[#allocation2 + $0x15a0] sm:$0xf0] }
 0x195   :  { %v17885_v50 = vld [vmem:[#allocation2 + $0x1784] sm:$0xf]  ;;  %v14132_v56 = vor.u32 %v17821_v48, %v14129_v49  ;;  %6701 = vmatpush.bf16.msra.mxu1 %v13876_v55 }
 0x196   :  { %v14385_v51 = vld [vmem:[#allocation2 + $0x17a0] sm:$0xf0] }
 0x197   :  { %v17685_v57 = vld [vmem:[#allocation2 + $0x1144] sm:$0xf]  ;;  %v14388_v60 = vor.u32 %v17885_v50, %v14385_v51  ;;  %6714 = vmatpush.bf16.msra.mxu2 %v14132_v56 }
 0x198   :  { %v13585_v58 = vld [vmem:[#allocation2 + $0x1160] sm:$0xf0] }
 0x199   :  { %v17749_v59 = vld [vmem:[#allocation2 + $0x1344] sm:$0xf]  ;;  %v13588_v2 = vor.u32 %v17685_v57, %v13585_v58  ;;  %6727 = vmatpush.bf16.msra.mxu3 %v14388_v60  ;;  %v6463_v57 = vadd.f32 %v6462_v53, %v6450_v46  ;;  %v6475_v58 = vpop.f32.mrf.mxu3 }
 0x19a   :  { %v13841_v61 = vld [vmem:[#allocation2 + $0x1360] sm:$0xf0] }
 0x19b   :  { %v17813_v62 = vld [vmem:[#allocation2 + $0x1544] sm:$0xf]  ;;  %v13844_v3 = vor.u32 %v17749_v59, %v13841_v61  ;;  %6689 = vmatpush.bf16.msra.mxu0 %v13588_v2 }
 0x19c   :  { %v14097_v63 = vld [vmem:[#allocation2 + $0x1560] sm:$0xf0] }
 0x19d   :  { %v17877_v0 = vld [vmem:[#allocation2 + $0x1744] sm:$0xf]  ;;  %v14100_v4 = vor.u32 %v17813_v62, %v14097_v63  ;;  %6702 = vmatpush.bf16.msra.mxu1 %v13844_v3  ;;  %v18969_v62 = vadd.f32 %v6475_v58, %v6463_v57  ;;  %v6438_v63 = vpop.f32.mrf.mxu0 }
 0x19e   :  { %v14353_v1 = vld [vmem:[#allocation2 + $0x1760] sm:$0xf0] }
 0x19f   :  { %v17677_v5 = vld [vmem:[#allocation2 + $0x1104] sm:$0xf]  ;;  %v14356_v8 = vor.u32 %v17877_v0, %v14353_v1  ;;  %6715 = vmatpush.bf16.msra.mxu2 %v14100_v4 }
 0x1a0   :  { %v13553_v6 = vld [vmem:[#allocation2 + $0x1120] sm:$0xf0] }
 0x1a1   :  { %v17741_v7 = vld [vmem:[#allocation2 + $0x1304] sm:$0xf]  ;;  %v13556_v14 = vor.u32 %v17677_v5, %v13553_v6  ;;  %6728 = vmatpush.bf16.msra.mxu3 %v14356_v8  ;;  %v6451_v5 = vpop.f32.mrf.mxu1 }
 0x1a2   :  { %v13809_v9 = vld [vmem:[#allocation2 + $0x1320] sm:$0xf0] }
 0x1a3   :  { %v17805_v10 = vld [vmem:[#allocation2 + $0x1504] sm:$0xf]  ;;  %v13812_v17 = vor.u32 %v17741_v7, %v13809_v9  ;;  %6690 = vmatpush.bf16.msra.mxu0 %v13556_v14 }
 0x1a4   :  { %v14065_v11 = vld [vmem:[#allocation2 + $0x1520] sm:$0xf0] }
 0x1a5   :  { %v17869_v12 = vld [vmem:[#allocation2 + $0x1704] sm:$0xf]  ;;  %v14068_v21 = vor.u32 %v17805_v10, %v14065_v11  ;;  %6703 = vmatpush.bf16.msra.mxu1 %v13812_v17 }
 0x1a6   :  { %v14321_v13 = vld [vmem:[#allocation2 + $0x1720] sm:$0xf0] }
 0x1a7   :  { %v17669_v24 = vld [vmem:[#allocation2 + $0x10c4] sm:$0xf]  ;;  %v14324_v36 = vor.u32 %v17869_v12, %v14321_v13  ;;  %6716 = vmatpush.bf16.msra.mxu2 %v14068_v21 }
 0x1a8   :  { %v13521_v26 = vld [vmem:[#allocation2 + $0x10e0] sm:$0xf0] }
 0x1a9   :  { %v17733_v27 = vld [vmem:[#allocation2 + $0x12c4] sm:$0xf]  ;;  %v13524_v47 = vor.u32 %v17669_v24, %v13521_v26  ;;  %6729 = vmatpush.bf16.msra.mxu3 %v14324_v36 }
 0x1aa   :  { %v13777_v37 = vld [vmem:[#allocation2 + $0x12e0] sm:$0xf0] }
 0x1ab   :  { %v17797_v39 = vld [vmem:[#allocation2 + $0x14c4] sm:$0xf]  ;;  %v13780_v48 = vor.u32 %v17733_v27, %v13777_v37  ;;  %6691 = vmatpush.bf16.msra.mxu0 %v13524_v47  ;;  %v6464_v27 = vpop.f32.mrf.mxu2 }
 0x1ac   :  { %v14033_v40 = vld [vmem:[#allocation2 + $0x14e0] sm:$0xf0] }
 0x1ad   :  { %v17861_v43 = vld [vmem:[#allocation2 + $0x16c4] sm:$0xf]  ;;  %v14036_v49 = vor.u32 %v17797_v39, %v14033_v40  ;;  %6704 = vmatpush.bf16.msra.mxu1 %v13780_v48  ;;  %v6477_v39 = vpop.f32.mrf.mxu3 }
 0x1ae   :  { %v14289_v45 = vld [vmem:[#allocation2 + $0x16e0] sm:$0xf0]  ;;  %v6488_v39 = vpop.f32.mrf.mxu0 }
 0x1af   :  { %v17661_v50 = vld [vmem:[#allocation2 + $0x1084] sm:$0xf]  ;;  %v14292_v16 = vor.u32 %v17861_v43, %v14289_v45  ;;  %6717 = vmatpush.bf16.msra.mxu2 %v14036_v49 }
 0x1b0   :  { %v13489_v51 = vld [vmem:[#allocation2 + $0x10a0] sm:$0xf0] }
 0x1b1   :  { %v17725_v52 = vld [vmem:[#allocation2 + $0x1284] sm:$0xf]  ;;  %v13492_v61 = vor.u32 %v17661_v50, %v13489_v51  ;;  %6730 = vmatpush.bf16.msra.mxu3 %v14292_v16 }
 0x1b2   :  { %v13745_v54 = vld [vmem:[#allocation2 + $0x12a0] sm:$0xf0] }
 0x1b3   :  { %v17789_v55 = vld [vmem:[#allocation2 + $0x1484] sm:$0xf]  ;;  %v13748_v0 = vor.u32 %v17725_v52, %v13745_v54  ;;  %6692 = vmatpush.bf16.msra.mxu0 %v13492_v61 }
 0x1b4   :  { %v14001_v56 = vld [vmem:[#allocation2 + $0x14a0] sm:$0xf0] }
 0x1b5   :  { %v17853_v59 = vld [vmem:[#allocation2 + $0x1684] sm:$0xf]  ;;  %v14004_v1 = vor.u32 %v17789_v55, %v14001_v56  ;;  %6705 = vmatpush.bf16.msra.mxu1 %v13748_v0 }
 0x1b6   :  { %v14257_v60 = vld [vmem:[#allocation2 + $0x16a0] sm:$0xf0] }
 0x1b7   :  { %v17653_v2 = vld [vmem:[#allocation2 + $0x1044] sm:$0xf]  ;;  %v14260_v6 = vor.u32 %v17853_v59, %v14257_v60  ;;  %6718 = vmatpush.bf16.msra.mxu2 %v14004_v1 }
 0x1b8   :  { %v13457_v3 = vld [vmem:[#allocation2 + $0x1060] sm:$0xf0] }
 0x1b9   :  { %v17717_v4 = vld [vmem:[#allocation2 + $0x1244] sm:$0xf]  ;;  %v13460_v12 = vor.u32 %v17653_v2, %v13457_v3  ;;  %6731 = vmatpush.bf16.msra.mxu3 %v14260_v6 }
 0x1ba   :  { %v13713_v7 = vld [vmem:[#allocation2 + $0x1260] sm:$0xf0] }
 0x1bb   :  { %v17781_v8 = vld [vmem:[#allocation2 + $0x1444] sm:$0xf]  ;;  %v13716_v15 = vor.u32 %v17717_v4, %v13713_v7  ;;  %6693 = vmatpush.bf16.msra.mxu0 %v13460_v12 }
 0x1bc   :  { %v13969_v9 = vld [vmem:[#allocation2 + $0x1460] sm:$0xf0] }
 0x1bd   :  { %v17845_v10 = vld [vmem:[#allocation2 + $0x1644] sm:$0xf]  ;;  %v13972_v17 = vor.u32 %v17781_v8, %v13969_v9  ;;  %6706 = vmatpush.bf16.msra.mxu1 %v13716_v15 }
 0x1be   :  { %v14225_v11 = vld [vmem:[#allocation2 + $0x1660] sm:$0xf0] }
 0x1bf   :  { %v17645_v13 = vld [vmem:[#allocation2 + $0x1004] sm:$0xf]  ;;  %v14228_v32 = vor.u32 %v17845_v10, %v14225_v11  ;;  %6719 = vmatpush.bf16.msra.mxu2 %v13972_v17 }
 0x1c0   :  { %v13425_v14 = vld [vmem:[#allocation2 + $0x1020] sm:$0xf0] }
 0x1c1   :  { %v17709_v21 = vld [vmem:[#allocation2 + $0x1204] sm:$0xf]  ;;  %v13428_v46 = vor.u32 %v17645_v13, %v13425_v14  ;;  %6732 = vmatpush.bf16.msra.mxu3 %v14228_v32 }
 0x1c2   :  { %v13681_v24 = vld [vmem:[#allocation2 + $0x1220] sm:$0xf0] }
 0x1c3   :  { %v17773_v26 = vld [vmem:[#allocation2 + $0x1404] sm:$0xf]  ;;  %v13684_v50 = vor.u32 %v17709_v21, %v13681_v24  ;;  %6694 = vmatpush.bf16.msra.mxu0 %v13428_v46 }
 0x1c4   :  { %v13937_v34 = vld [vmem:[#allocation2 + $0x1420] sm:$0xf0] }
 0x1c5   :  { %v17837_v36 = vld [vmem:[#allocation2 + $0x1604] sm:$0xf]  ;;  %v13940_v51 = vor.u32 %v17773_v26, %v13937_v34  ;;  %6707 = vmatpush.bf16.msra.mxu1 %v13684_v50 }
 0x1c6   :  { %v14193_v37 = vld [vmem:[#allocation2 + $0x1620] sm:$0xf0]  ;;  %6695 = vmatmul.bf16.vlgmr.msra.gmra.mxu0 %v18928_v25 }
 0x1c7   :  { %v17957_v40 = vld [vmem:[#allocation2 + $0x19c4] sm:$0xf]  ;;  %v14196_v16 = vor.u32 %v17837_v36, %v14193_v37  ;;  %6720 = vmatpush.bf16.msra.mxu2 %v13940_v51 }
 0x1c8   :  { %v14673_v43 = vld [vmem:[#allocation2 + $0x19e0] sm:$0xf0]  ;;  %6708 = vmatmul.bf16.vlgmr.msra.gmra.mxu1 %v18932_v30 }
 0x1c9   :  { %v18021_v45 = vld [vmem:[#allocation2 + $0x1bc4] sm:$0xf]  ;;  %v14676_v54 = vor.u32 %v17957_v40, %v14673_v43  ;;  %6733 = vmatpush.bf16.msra.mxu3 %v14196_v16 }
 0x1ca   :  { %v14929_v47 = vld [vmem:[#allocation2 + $0x1be0] sm:$0xf0]  ;;  %6721 = vmatmul.bf16.vlgmr.msra.gmra.mxu2 %v18930_v29 }
 0x1cb   :  { %v18085_v48 = vld [vmem:[#allocation2 + $0x1dc4] sm:$0xf]  ;;  %v14932_v55 = vor.u32 %v18021_v45, %v14929_v47  ;;  %6739 = vmatpush.bf16.msrb.mxu0 %v14676_v54  ;;  %v6489_v45 = vadd.f32 %v6488_v39, %v18969_v62  ;;  %v6501_v47 = vpop.f32.mrf.mxu1 }
 0x1cc   :  { %v15185_v49 = vld [vmem:[#allocation2 + $0x1de0] sm:$0xf0]  ;;  %6734 = vmatmul.bf16.vlgmr.msra.gmra.mxu3 %v18934_v33 }
 0x1cd   :  { %v18149_v52 = vld [vmem:[#allocation2 + $0x1fc4] sm:$0xf]  ;;  %v15188_v56 = vor.u32 %v18085_v48, %v15185_v49  ;;  %6752 = vmatpush.bf16.msrb.mxu1 %v14932_v55  ;;  %v6502_v16 = vadd.f32 %v6501_v47, %v6489_v45 }
 0x1ce   :  { %v15441_v53 = vld [vmem:[#allocation2 + $0x1fe0] sm:$0xf0] }
 0x1cf   :  { %v17949_v57 = vld [vmem:[#allocation2 + $0x1984] sm:$0xf]  ;;  %v15444_v60 = vor.u32 %v18149_v52, %v15441_v53  ;;  %6765 = vmatpush.bf16.msrb.mxu2 %v15188_v56 }
 0x1d0   :  { %v14641_v58 = vld [vmem:[#allocation2 + $0x19a0] sm:$0xf0] }
 0x1d1   :  { %v18013_v59 = vld [vmem:[#allocation2 + $0x1b84] sm:$0xf]  ;;  %v14644_v3 = vor.u32 %v17949_v57, %v14641_v58  ;;  %6778 = vmatpush.bf16.msrb.mxu3 %v15444_v60 }
 0x1d2   :  { %v14897_v61 = vld [vmem:[#allocation2 + $0x1ba0] sm:$0xf0] }
 0x1d3   :  { %v18077_v63 = vld [vmem:[#allocation2 + $0x1d84] sm:$0xf]  ;;  %v14900_v4 = vor.u32 %v18013_v59, %v14897_v61  ;;  %6740 = vmatpush.bf16.msrb.mxu0 %v14644_v3 }
 0x1d4   :  { %v15153_v0 = vld [vmem:[#allocation2 + $0x1da0] sm:$0xf0] }
 0x1d5   :  { %v18141_v1 = vld [vmem:[#allocation2 + $0x1f84] sm:$0xf]  ;;  %v15156_v5 = vor.u32 %v18077_v63, %v15153_v0  ;;  %6753 = vmatpush.bf16.msrb.mxu1 %v14900_v4 }
 0x1d6   :  { %v15409_v2 = vld [vmem:[#allocation2 + $0x1fa0] sm:$0xf0] }
 0x1d7   :  { %v17941_v6 = vld [vmem:[#allocation2 + $0x1944] sm:$0xf]  ;;  %v15412_v9 = vor.u32 %v18141_v1, %v15409_v2  ;;  %6766 = vmatpush.bf16.msrb.mxu2 %v15156_v5  ;;  %v6514_v2 = vpop.f32.mrf.mxu2 }
 0x1d8   :  { %v14609_v7 = vld [vmem:[#allocation2 + $0x1960] sm:$0xf0] }
 0x1d9   :  { %v18005_v8 = vld [vmem:[#allocation2 + $0x1b44] sm:$0xf]  ;;  %v14612_v15 = vor.u32 %v17941_v6, %v14609_v7  ;;  %6779 = vmatpush.bf16.msrb.mxu3 %v15412_v9  ;;  %v6515_v6 = vadd.f32 %v6514_v2, %v6502_v16  ;;  %v6527_v7 = vpop.f32.mrf.mxu3 }
 0x1da   :  { %v14865_v10 = vld [vmem:[#allocation2 + $0x1b60] sm:$0xf0] }
 0x1db   :  { %v18069_v11 = vld [vmem:[#allocation2 + $0x1d44] sm:$0xf]  ;;  %v14868_v17 = vor.u32 %v18005_v8, %v14865_v10  ;;  %6741 = vmatpush.bf16.msrb.mxu0 %v14612_v15  ;;  %v6490_v10 = vpop.f32.mrf.mxu0 }
 0x1dc   :  { %v15121_v12 = vld [vmem:[#allocation2 + $0x1d60] sm:$0xf0]  ;;  %v17250_v10 = vld [vmem:[#allocation2 + $0x3a4] sm:$0xf0] }
 0x1dd   :  { %v18133_v13 = vld [vmem:[#allocation2 + $0x1f44] sm:$0xf]  ;;  %v15124_v21 = vor.u32 %v18069_v11, %v15121_v12  ;;  %6754 = vmatpush.bf16.msrb.mxu1 %v14868_v17  ;;  %v6503_v12 = vpop.f32.mrf.mxu1 }
 0x1de   :  { %v15377_v14 = vld [vmem:[#allocation2 + $0x1f60] sm:$0xf0]  ;;  %v17314_v12 = vld [vmem:[#allocation2 + $0x5a4] sm:$0xf0] }
 0x1df   :  { %v17933_v24 = vld [vmem:[#allocation2 + $0x1904] sm:$0xf]  ;;  %v15380_v32 = vor.u32 %v18133_v13, %v15377_v14  ;;  %6767 = vmatpush.bf16.msrb.mxu2 %v15124_v21  ;;  %v18976_v13 = vadd.f32 %v6527_v7, %v6515_v6  ;;  %v6516_v16 = vpop.f32.mrf.mxu2  ;;  %v11575_v6 = vld [vmem:[#allocation2 + $0x188] sm:$0xf] }
 0x1e0   :  { %v14577_v26 = vld [vmem:[#allocation2 + $0x1920] sm:$0xf0]  ;;  %v17186_v7 = vld [vmem:[#allocation2 + $0x1a4] sm:$0xf0] }
 0x1e1   :  { %v17997_v27 = vld [vmem:[#allocation2 + $0x1b04] sm:$0xf]  ;;  %v14580_v46 = vor.u32 %v17933_v24, %v14577_v26  ;;  %6780 = vmatpush.bf16.msrb.mxu3 %v15380_v32  ;;  %v17298_v16 = vld [vmem:[#allocation2 + $0x524] sm:$0xf0] }
 0x1e2   :  { %v14833_v34 = vld [vmem:[#allocation2 + $0x1b20] sm:$0xf0] }
 0x1e3   :  { %v18061_v36 = vld [vmem:[#allocation2 + $0x1d04] sm:$0xf]  ;;  %v14836_v48 = vor.u32 %v17997_v27, %v14833_v34  ;;  %6742 = vmatpush.bf16.msrb.mxu0 %v14580_v46 }
 0x1e4   :  { %v15089_v37 = vld [vmem:[#allocation2 + $0x1d20] sm:$0xf0] }
 0x1e5   :  { %v18125_v40 = vld [vmem:[#allocation2 + $0x1f04] sm:$0xf]  ;;  %v15092_v49 = vor.u32 %v18061_v36, %v15089_v37  ;;  %6755 = vmatpush.bf16.msrb.mxu1 %v14836_v48 }
 0x1e6   :  { %v15345_v43 = vld [vmem:[#allocation2 + $0x1f20] sm:$0xf0] }
 0x1e7   :  { %v17925_v50 = vld [vmem:[#allocation2 + $0x18c4] sm:$0xf]  ;;  %v15348_v53 = vor.u32 %v18125_v40, %v15345_v43  ;;  %6768 = vmatpush.bf16.msrb.mxu2 %v15092_v49 }
 0x1e8   :  { %v14545_v51 = vld [vmem:[#allocation2 + $0x18e0] sm:$0xf0] }
 0x1e9   :  { %v17989_v52 = vld [vmem:[#allocation2 + $0x1ac4] sm:$0xf]  ;;  %v14548_v59 = vor.u32 %v17925_v50, %v14545_v51  ;;  %6781 = vmatpush.bf16.msrb.mxu3 %v15348_v53 }
 0x1ea   :  { %v14801_v54 = vld [vmem:[#allocation2 + $0x1ae0] sm:$0xf0] }
 0x1eb   :  { %v18053_v55 = vld [vmem:[#allocation2 + $0x1cc4] sm:$0xf]  ;;  %v14804_v62 = vor.u32 %v17989_v52, %v14801_v54  ;;  %6743 = vmatpush.bf16.msrb.mxu0 %v14548_v59  ;;  %v11607_v54 = vld [vmem:[#allocation2 + $0x1c8] sm:$0xf] }
 0x1ec   :  { %v15057_v56 = vld [vmem:[#allocation2 + $0x1ce0] sm:$0xf0]  ;;  %v17258_v59 = vld [vmem:[#allocation2 + $0x3e4] sm:$0xf0] }
 0x1ed   :  { %v18117_v57 = vld [vmem:[#allocation2 + $0x1ec4] sm:$0xf]  ;;  %v15060_v60 = vor.u32 %v18053_v55, %v15057_v56  ;;  %6756 = vmatpush.bf16.msrb.mxu1 %v14804_v62  ;;  %v17194_v55 = vld [vmem:[#allocation2 + $0x1e4] sm:$0xf0] }
 0x1ee   :  { %v15313_v58 = vld [vmem:[#allocation2 + $0x1ee0] sm:$0xf0]  ;;  %v11863_v56 = vld [vmem:[#allocation2 + $0x3c8] sm:$0xf] }
 0x1ef   :  { %v17917_v61 = vld [vmem:[#allocation2 + $0x1884] sm:$0xf]  ;;  %v15316_v1 = vor.u32 %v18117_v57, %v15313_v58  ;;  %6769 = vmatpush.bf16.msrb.mxu2 %v15060_v60  ;;  %v6529_v57 = vpop.f32.mrf.mxu3  ;;  %v12119_v62 = vld [vmem:[#allocation2 + $0x5c8] sm:$0xf] }
 0x1f0   :  { %v14513_v63 = vld [vmem:[#allocation2 + $0x18a0] sm:$0xf0]  ;;  %v17322_v60 = vld [vmem:[#allocation2 + $0x5e4] sm:$0xf0] }
 0x1f1   :  { %v17981_v0 = vld [vmem:[#allocation2 + $0x1a84] sm:$0xf]  ;;  %v14516_v11 = vor.u32 %v17917_v61, %v14513_v63  ;;  %6782 = vmatpush.bf16.msrb.mxu3 %v15316_v1  ;;  %v17386_v1 = vld [vmem:[#allocation2 + $0x7e4] sm:$0xf0] }
 0x1f2   :  { %v14769_v3 = vld [vmem:[#allocation2 + $0x1aa0] sm:$0xf0] }
 0x1f3   :  { %v18045_v4 = vld [vmem:[#allocation2 + $0x1c84] sm:$0xf]  ;;  %v14772_v14 = vor.u32 %v17981_v0, %v14769_v3  ;;  %6744 = vmatpush.bf16.msrb.mxu0 %v14516_v11  ;;  %v12375_v0 = vld [vmem:[#allocation2 + $0x7c8] sm:$0xf]  ;;  %v11608_v3 = vor.u32 %v17194_v55, %v11607_v54  ;;  %v6540_v54 = vpop.f32.mrf.mxu0 }
 0x1f4   :  { %v15025_v5 = vld [vmem:[#allocation2 + $0x1ca0] sm:$0xf0]  ;;  %v12087_v11 = vld [vmem:[#allocation2 + $0x588] sm:$0xf]  ;;  %v6541_v57 = vadd.f32 %v6540_v54, %v18976_v13 }
 0x1f5   :  { %v18109_v8 = vld [vmem:[#allocation2 + $0x1e84] sm:$0xf]  ;;  %v15028_v15 = vor.u32 %v18045_v4, %v15025_v5  ;;  %6757 = vmatpush.bf16.msrb.mxu1 %v14772_v14  ;;  %v11864_v4 = vor.u32 %v17258_v59, %v11863_v56  ;;  %v12120_v5 = vor.u32 %v17322_v60, %v12119_v62  ;;  %v12343_v14 = vld [vmem:[#allocation2 + $0x788] sm:$0xf]  ;;  %v6553_v59 = vpop.f32.mrf.mxu1 }
 0x1f6   :  { %v15281_v9 = vld [vmem:[#allocation2 + $0x1ea0] sm:$0xf0]  ;;  %v12279_v55 = vld [vmem:[#allocation2 + $0x708] sm:$0xf] }
 0x1f7   :  { %v17909_v17 = vld [vmem:[#allocation2 + $0x1844] sm:$0xf]  ;;  %v15284_v26 = vor.u32 %v18109_v8, %v15281_v9  ;;  %6770 = vmatpush.bf16.msrb.mxu2 %v15028_v15  ;;  %v11831_v8 = vld [vmem:[#allocation2 + $0x388] sm:$0xf]  ;;  %v12376_v9 = vor.u32 %v17386_v1, %v12375_v0 }
 0x1f8   :  { %v14481_v21 = vld [vmem:[#allocation2 + $0x1860] sm:$0xf0]  ;;  %v17378_v15 = vld [vmem:[#allocation2 + $0x7a4] sm:$0xf0] }
 0x1f9   :  { %v17973_v24 = vld [vmem:[#allocation2 + $0x1a44] sm:$0xf]  ;;  %v14484_v39 = vor.u32 %v17909_v17, %v14481_v21  ;;  %6783 = vmatpush.bf16.msrb.mxu3 %v15284_v26  ;;  %v11576_v17 = vor.u32 %v17186_v7, %v11575_v6  ;;  %v11832_v21 = vor.u32 %v17250_v10, %v11831_v8  ;;  %v11543_v26 = vld [vmem:[#allocation2 + $0x148] sm:$0xf] }
 0x1fa   :  { %v14737_v27 = vld [vmem:[#allocation2 + $0x1a60] sm:$0xf0]  ;;  %v17362_v56 = vld [vmem:[#allocation2 + $0x724] sm:$0xf0] }
 0x1fb   :  { %v18037_v32 = vld [vmem:[#allocation2 + $0x1c44] sm:$0xf]  ;;  %v14740_v45 = vor.u32 %v17973_v24, %v14737_v27  ;;  %6745 = vmatpush.bf16.msrb.mxu0 %v14484_v39  ;;  %v12088_v24 = vor.u32 %v17314_v12, %v12087_v11  ;;  %v17178_v27 = vld [vmem:[#allocation2 + $0x164] sm:$0xf0]  ;;  %v12280_v1 = vor.u32 %v17362_v56, %v12279_v55 }
 0x1fc   :  { %v14993_v34 = vld [vmem:[#allocation2 + $0x1c60] sm:$0xf0]  ;;  %v17306_v39 = vld [vmem:[#allocation2 + $0x564] sm:$0xf0] }
 0x1fd   :  { %v18101_v36 = vld [vmem:[#allocation2 + $0x1e44] sm:$0xf]  ;;  %v14996_v46 = vor.u32 %v18037_v32, %v14993_v34  ;;  %6758 = vmatpush.bf16.msrb.mxu1 %v14740_v45  ;;  %v11799_v32 = vld [vmem:[#allocation2 + $0x348] sm:$0xf]  ;;  %v12344_v34 = vor.u32 %v17378_v15, %v12343_v14  ;;  %v11544_v45 = vor.u32 %v17178_v27, %v11543_v26  ;;  %v6566_v15 = vpop.f32.mrf.mxu2  ;;  %v6579_v27 = vpop.f32.mrf.mxu3 }
 0x1fe   :  { %v15249_v37 = vld [vmem:[#allocation2 + $0x1e60] sm:$0xf0]  ;;  %v11735_v0 = vld [vmem:[#allocation2 + $0x2c8] sm:$0xf] }
 0x1ff   :  { %v17901_v40 = vld [vmem:[#allocation2 + $0x1804] sm:$0xf]  ;;  %v15252_v50 = vor.u32 %v18101_v36, %v15249_v37  ;;  %6771 = vmatpush.bf16.msrb.mxu2 %v14996_v46  ;;  %v17242_v36 = vld [vmem:[#allocation2 + $0x364] sm:$0xf0] }
 0x200   :  { %v14449_v43 = vld [vmem:[#allocation2 + $0x1820] sm:$0xf0]  ;;  %v12055_v37 = vld [vmem:[#allocation2 + $0x548] sm:$0xf]  ;;  %v11800_v46 = vor.u32 %v17242_v36, %v11799_v32  ;;  %v6542_v36 = vpop.f32.mrf.mxu0 }
 0x201   :  { %v17965_v47 = vld [vmem:[#allocation2 + $0x1a04] sm:$0xf]  ;;  %v14452_v58 = vor.u32 %v17901_v40, %v14449_v43  ;;  %6784 = vmatpush.bf16.msrb.mxu3 %v15252_v50  ;;  %v12311_v40 = vld [vmem:[#allocation2 + $0x748] sm:$0xf] }
 0x202   :  { %v14705_v48 = vld [vmem:[#allocation2 + $0x1a20] sm:$0xf0]  ;;  %v17370_v43 = vld [vmem:[#allocation2 + $0x764] sm:$0xf0] }
 0x203   :  { %v18029_v49 = vld [vmem:[#allocation2 + $0x1c04] sm:$0xf]  ;;  %v14708_v61 = vor.u32 %v17965_v47, %v14705_v48  ;;  %6746 = vmatpush.bf16.msrb.mxu0 %v14452_v58  ;;  %v12056_v47 = vor.u32 %v17306_v39, %v12055_v37  ;;  %v11511_v48 = vld [vmem:[#allocation2 + $0x108] sm:$0xf]  ;;  %v6555_v39 = vpop.f32.mrf.mxu1 }
 0x204   :  { %v14961_v51 = vld [vmem:[#allocation2 + $0x1c20] sm:$0xf0]  ;;  %v11767_v50 = vld [vmem:[#allocation2 + $0x308] sm:$0xf] }
 0x205   :  { %v18093_v52 = vld [vmem:[#allocation2 + $0x1e04] sm:$0xf]  ;;  %v14964_v63 = vor.u32 %v18029_v49, %v14961_v51  ;;  %6759 = vmatpush.bf16.msrb.mxu1 %v14708_v61  ;;  %v17170_v49 = vld [vmem:[#allocation2 + $0x124] sm:$0xf0]  ;;  %v12312_v51 = vor.u32 %v17370_v43, %v12311_v40 }
 0x206   :  { %v15217_v53 = vld [vmem:[#allocation2 + $0x1e20] sm:$0xf0]  ;;  %6747 = vmatmul.bf16.vlgmr.msrb.gmra.mxu0 %v18946_v23  ;;  %v11512_v58 = vor.u32 %v17170_v49, %v11511_v48  ;;  %v11479_v61 = vld [vmem:[#allocation2 + $0xc8] sm:$0xf] }
 0x207   :  { %v15220_v2 = vor.u32 %v18093_v52, %v15217_v53  ;;  %6772 = vmatpush.bf16.msrb.mxu2 %v14964_v63  ;;  %6791 = vmatpush.bf16.msra.mxu0 %v11608_v3  ;;  %v17234_v52 = vld [vmem:[#allocation2 + $0x324] sm:$0xf0] }
 0x208   :  { %6760 = vmatmul.bf16.vlgmr.msrb.gmra.mxu1 %v18950_v31  ;;  %v12023_v53 = vld [vmem:[#allocation2 + $0x508] sm:$0xf]  ;;  %v11768_v62 = vor.u32 %v17234_v52, %v11767_v50 }
 0x209   :  { %6785 = vmatpush.bf16.msrb.mxu3 %v15220_v2  ;;  %6804 = vmatpush.bf16.msra.mxu1 %v11864_v4  ;;  %v12024_v60 = vor.u32 %v17298_v16, %v12023_v53  ;;  %v17162_v63 = vld [vmem:[#allocation2 + $0xe4] sm:$0xf0]  ;;  %v6554_v2 = vadd.f32 %v6553_v59, %v6541_v57 }
 0x20a   :  { %6773 = vmatmul.bf16.vlgmr.msrb.gmra.mxu2 %v18948_v28  ;;  %v17226_v3 = vld [vmem:[#allocation2 + $0x2e4] sm:$0xf0]  ;;  %v11480_v8 = vor.u32 %v17162_v63, %v11479_v61 }
 0x20b   :  { %6817 = vmatpush.bf16.msra.mxu2 %v12120_v5  ;;  %6792 = vmatpush.bf16.msra.mxu0 %v11576_v17  ;;  %v11991_v4 = vld [vmem:[#allocation2 + $0x4c8] sm:$0xf]  ;;  %v11736_v13 = vor.u32 %v17226_v3, %v11735_v0  ;;  %v6567_v26 = vadd.f32 %v6566_v15, %v6554_v2  ;;  %v6568_v2 = vpop.f32.mrf.mxu2 }
 0x20c   :  { %6786 = vmatmul.bf16.vlgmr.msrb.gmra.mxu3 %v18952_v35  ;;  %v17290_v5 = vld [vmem:[#allocation2 + $0x4e4] sm:$0xf0] }
 0x20d   :  { %6830 = vmatpush.bf16.msra.mxu3 %v12376_v9  ;;  %6805 = vmatpush.bf16.msra.mxu1 %v11832_v21  ;;  %v12247_v6 = vld [vmem:[#allocation2 + $0x6c8] sm:$0xf]  ;;  %v11992_v9 = vor.u32 %v17290_v5, %v11991_v4  ;;  %v18983_v40 = vadd.f32 %v6579_v27, %v6567_v26 }
 0x20e   :  { %v17354_v7 = vld [vmem:[#allocation2 + $0x6e4] sm:$0xf0] }
 0x20f   :  { %6818 = vmatpush.bf16.msra.mxu2 %v12088_v24  ;;  %6793 = vmatpush.bf16.msra.mxu0 %v11544_v45  ;;  %v11447_v10 = vld [vmem:[#allocation2 + $0x88] sm:$0xf]  ;;  %v12248_v14 = vor.u32 %v17354_v7, %v12247_v6  ;;  %v6581_v6 = vpop.f32.mrf.mxu3  ;;  %vm8039_vm0 = vcmp.gt.f32.partialorder %v18983_v40, 0.0 }
 0x210   :  { %v17154_v11 = vld [vmem:[#allocation2 + $0xa4] sm:$0xf0] }
 0x211   :  { %6831 = vmatpush.bf16.msra.mxu3 %v12344_v34  ;;  %6806 = vmatpush.bf16.msra.mxu1 %v11800_v46  ;;  %v11703_v12 = vld [vmem:[#allocation2 + $0x288] sm:$0xf]  ;;  %v11448_v37 = vor.u32 %v17154_v11, %v11447_v10 }
 0x212   :  { %v17218_v17 = vld [vmem:[#allocation2 + $0x2a4] sm:$0xf0] }
 0x213   :  { %6819 = vmatpush.bf16.msra.mxu2 %v12056_v47  ;;  %6794 = vmatpush.bf16.msra.mxu0 %v11512_v58  ;;  %v11959_v21 = vld [vmem:[#allocation2 + $0x488] sm:$0xf]  ;;  %v11704_v43 = vor.u32 %v17218_v17, %v11703_v12 }
 0x214   :  { %v17282_v24 = vld [vmem:[#allocation2 + $0x4a4] sm:$0xf0] }
 0x215   :  { %6832 = vmatpush.bf16.msra.mxu3 %v12312_v51  ;;  %6807 = vmatpush.bf16.msra.mxu1 %v11768_v62  ;;  %v12215_v32 = vld [vmem:[#allocation2 + $0x688] sm:$0xf]  ;;  %v11960_v45 = vor.u32 %v17282_v24, %v11959_v21 }
 0x216   :  { %v17346_v34 = vld [vmem:[#allocation2 + $0x6a4] sm:$0xf0] }
 0x217   :  { %6820 = vmatpush.bf16.msra.mxu2 %v12024_v60  ;;  %6795 = vmatpush.bf16.msra.mxu0 %v11480_v8  ;;  %v11415_v46 = vld [vmem:[#allocation2 + $0x48] sm:$0xf]  ;;  %v12216_v49 = vor.u32 %v17346_v34, %v12215_v32 }
 0x218   :  { %v17146_v47 = vld [vmem:[#allocation2 + $0x64] sm:$0xf0] }
 0x219   :  { %6833 = vmatpush.bf16.msra.mxu3 %v12280_v1  ;;  %6808 = vmatpush.bf16.msra.mxu1 %v11736_v13  ;;  %v11671_v48 = vld [vmem:[#allocation2 + $0x248] sm:$0xf]  ;;  %v11416_v54 = vor.u32 %v17146_v47, %v11415_v46 }
 0x21a   :  { %v17210_v50 = vld [vmem:[#allocation2 + $0x264] sm:$0xf0] }
 0x21b   :  { %6821 = vmatpush.bf16.msra.mxu2 %v11992_v9  ;;  %v11927_v51 = vld [vmem:[#allocation2 + $0x448] sm:$0xf]  ;;  %6796 = vmatpush.bf16.msra.mxu0 %v11448_v37  ;;  %v11672_v57 = vor.u32 %v17210_v50, %v11671_v48 }
 0x21c   :  { %v17274_v52 = vld [vmem:[#allocation2 + $0x464] sm:$0xf0] }
 0x21d   :  { %6834 = vmatpush.bf16.msra.mxu3 %v12248_v14  ;;  %v12183_v53 = vld [vmem:[#allocation2 + $0x648] sm:$0xf]  ;;  %6809 = vmatpush.bf16.msra.mxu1 %v11704_v43  ;;  %v11928_v58 = vor.u32 %v17274_v52, %v11927_v51 }
 0x21e   :  { %v17338_v16 = vld [vmem:[#allocation2 + $0x664] sm:$0xf0] }
 0x21f   :  { %v11383_v55 = vld [vmem:[#allocation2 + $0x8] sm:$0xf]  ;;  %6822 = vmatpush.bf16.msra.mxu2 %v11960_v45  ;;  %v12184_v61 = vor.u32 %v17338_v16, %v12183_v53  ;;  %6797 = vmatpush.bf16.msra.mxu0 %v11416_v54 }
 0x220   :  { %v17138_v56 = vld [vmem:[#allocation2 + $0x24] sm:$0xf0] }
 0x221   :  { %v11639_v59 = vld [vmem:[#allocation2 + $0x208] sm:$0xf]  ;;  %6835 = vmatpush.bf16.msra.mxu3 %v12216_v49  ;;  %v11384_v7 = vor.u32 %v17138_v56, %v11383_v55  ;;  %6810 = vmatpush.bf16.msra.mxu1 %v11672_v57 }
 0x222   :  { %v17202_v62 = vld [vmem:[#allocation2 + $0x224] sm:$0xf0] }
 0x223   :  { %v11895_v60 = vld [vmem:[#allocation2 + $0x408] sm:$0xf]  ;;  %6823 = vmatpush.bf16.msra.mxu2 %v11928_v58  ;;  %v11640_v10 = vor.u32 %v17202_v62, %v11639_v59  ;;  %6798 = vmatpush.bf16.msra.mxu0 %v11384_v7 }
 0x224   :  { %v17266_v63 = vld [vmem:[#allocation2 + $0x424] sm:$0xf0] }
 0x225   :  { %v12151_v0 = vld [vmem:[#allocation2 + $0x608] sm:$0xf]  ;;  %v11896_v11 = vor.u32 %v17266_v63, %v11895_v60  ;;  %6836 = vmatpush.bf16.msra.mxu3 %v12184_v61  ;;  %6811 = vmatpush.bf16.msra.mxu1 %v11640_v10  ;;  %v18588_v63 = vld [vmem:[#allocation4] sm:$0xff] }
 0x226   :  { %v17330_v1 = vld [vmem:[#allocation2 + $0x624] sm:$0xf0]  ;;  %6799 = vmatmul.bf16.vlgmr.msra.gmra.mxu0 %v18894_v19 }
 0x227   :  { %v12631_v3 = vld [vmem:[#allocation2 + $0x9c8] sm:$0xf]  ;;  %v12152_v15 = vor.u32 %v17330_v1, %v12151_v0  ;;  %6824 = vmatpush.bf16.msra.mxu2 %v11896_v11  ;;  %v1184_v0 = vperm.slane %v18588_v63, 1 }
 0x228   :  { %v17450_v4 = vld [vmem:[#allocation2 + $0x9e4] sm:$0xf0]  ;;  %6812 = vmatmul.bf16.vlgmr.msra.gmra.mxu1 %v18898_v22 }
 0x229   :  { %v12887_v5 = vld [vmem:[#allocation2 + $0xbc8] sm:$0xf]  ;;  %v12632_v17 = vor.u32 %v17450_v4, %v12631_v3  ;;  %6837 = vmatpush.bf16.msra.mxu3 %v12152_v15  ;;  %v6605_v15 = vpop.f32.mrf.mxu1 }
 0x22a   :  { %v17514_v8 = vld [vmem:[#allocation2 + $0xbe4] sm:$0xf0]  ;;  %6825 = vmatmul.bf16.vlgmr.msra.gmra.mxu2 %v18892_v18 }
 0x22b   :  { %v13143_v13 = vld [vmem:[#allocation2 + $0xdc8] sm:$0xf]  ;;  %v12888_v21 = vor.u32 %v17514_v8, %v12887_v5  ;;  %6843 = vmatpush.bf16.msrb.mxu0 %v12632_v17  ;;  %v6592_v8 = vpop.f32.mrf.mxu0 }
 0x22c   :  { %v17578_v9 = vld [vmem:[#allocation2 + $0xde4] sm:$0xf0]  ;;  %6838 = vmatmul.bf16.vlgmr.msra.gmra.mxu3 %v18896_v20 }
 0x22d   :  { %v13399_v12 = vld [vmem:[#allocation2 + $0xfc8] sm:$0xf]  ;;  %v13144_v24 = vor.u32 %v17578_v9, %v13143_v13  ;;  %6856 = vmatpush.bf16.msrb.mxu1 %v12888_v21 }
 0x22e   :  { %v17642_v14 = vld [vmem:[#allocation2 + $0xfe4] sm:$0xf0] }
 0x22f   :  { %v12599_v26 = vld [vmem:[#allocation2 + $0x988] sm:$0xf]  ;;  %v13400_v34 = vor.u32 %v17642_v14, %v13399_v12  ;;  %6869 = vmatpush.bf16.msrb.mxu2 %v13144_v24  ;;  %v6593_v14 = vadd.f32 %v6592_v8, %v1184_v0 }
 0x230   :  { %v17442_v27 = vld [vmem:[#allocation2 + $0x9a4] sm:$0xf0] }
 0x231   :  { %v12855_v32 = vld [vmem:[#allocation2 + $0xb88] sm:$0xf]  ;;  %v12600_v46 = vor.u32 %v17442_v27, %v12599_v26  ;;  %6882 = vmatpush.bf16.msrb.mxu3 %v13400_v34  ;;  %v6606_v34 = vadd.f32 %v6605_v15, %v6593_v14  ;;  %v6607_v63 = vpop.f32.mrf.mxu1 }
 0x232   :  { %v17506_v36 = vld [vmem:[#allocation2 + $0xba4] sm:$0xf0] }
 0x233   :  { %v13111_v37 = vld [vmem:[#allocation2 + $0xd88] sm:$0xf]  ;;  %v12856_v47 = vor.u32 %v17506_v36, %v12855_v32  ;;  %6844 = vmatpush.bf16.msrb.mxu0 %v12600_v46 }
 0x234   :  { %v17570_v39 = vld [vmem:[#allocation2 + $0xda4] sm:$0xf0] }
 0x235   :  { %v13367_v43 = vld [vmem:[#allocation2 + $0xf88] sm:$0xf]  ;;  %v13112_v48 = vor.u32 %v17570_v39, %v13111_v37  ;;  %6857 = vmatpush.bf16.msrb.mxu1 %v12856_v47  ;;  %v6618_v47 = vpop.f32.mrf.mxu2 }
 0x236   :  { %v17634_v45 = vld [vmem:[#allocation2 + $0xfa4] sm:$0xf0] }
 0x237   :  { %v12567_v49 = vld [vmem:[#allocation2 + $0x948] sm:$0xf]  ;;  %v13368_v52 = vor.u32 %v17634_v45, %v13367_v43  ;;  %6870 = vmatpush.bf16.msrb.mxu2 %v13112_v48 }
 0x238   :  { %v17434_v50 = vld [vmem:[#allocation2 + $0x964] sm:$0xf0] }
 0x239   :  { %v12823_v51 = vld [vmem:[#allocation2 + $0xb48] sm:$0xf]  ;;  %v12568_v57 = vor.u32 %v17434_v50, %v12567_v49  ;;  %6883 = vmatpush.bf16.msrb.mxu3 %v13368_v52  ;;  %v6619_v52 = vadd.f32 %v6618_v47, %v6606_v34 }
 0x23a   :  { %v17498_v53 = vld [vmem:[#allocation2 + $0xb64] sm:$0xf0] }
 0x23b   :  { %v13079_v16 = vld [vmem:[#allocation2 + $0xd48] sm:$0xf]  ;;  %v12824_v59 = vor.u32 %v17498_v53, %v12823_v51  ;;  %6845 = vmatpush.bf16.msrb.mxu0 %v12568_v57  ;;  %v6631_v53 = vpop.f32.mrf.mxu3  ;;  %v6594_v57 = vpop.f32.mrf.mxu0 }
 0x23c   :  { %v17562_v54 = vld [vmem:[#allocation2 + $0xd64] sm:$0xf0] }
 0x23d   :  { %v13335_v55 = vld [vmem:[#allocation2 + $0xf48] sm:$0xf]  ;;  %v13080_v62 = vor.u32 %v17562_v54, %v13079_v16  ;;  %6858 = vmatpush.bf16.msrb.mxu1 %v12824_v59  ;;  %v6620_v14 = vpop.f32.mrf.mxu2 }
 0x23e   :  { %v17626_v56 = vld [vmem:[#allocation2 + $0xf64] sm:$0xf0] }
 0x23f   :  { %v12535_v58 = vld [vmem:[#allocation2 + $0x908] sm:$0xf]  ;;  %v13336_v1 = vor.u32 %v17626_v56, %v13335_v55  ;;  %6871 = vmatpush.bf16.msrb.mxu2 %v13080_v62  ;;  %v18989_v56 = vadd.f32 %v6631_v53, %v6619_v52 }
 0x240   :  { %v17426_v60 = vld [vmem:[#allocation2 + $0x924] sm:$0xf0] }
 0x241   :  { %v12791_v61 = vld [vmem:[#allocation2 + $0xb08] sm:$0xf]  ;;  %v12536_v7 = vor.u32 %v17426_v60, %v12535_v58  ;;  %6884 = vmatpush.bf16.msrb.mxu3 %v13336_v1 }
 0x242   :  { %v17490_v2 = vld [vmem:[#allocation2 + $0xb24] sm:$0xf0] }
 0x243   :  { %v13047_v3 = vld [vmem:[#allocation2 + $0xd08] sm:$0xf]  ;;  %v12792_v13 = vor.u32 %v17490_v2, %v12791_v61  ;;  %6846 = vmatpush.bf16.msrb.mxu0 %v12536_v7 }
 0x244   :  { %v17554_v4 = vld [vmem:[#allocation2 + $0xd24] sm:$0xf0] }
 0x245   :  { %v13303_v5 = vld [vmem:[#allocation2 + $0xf08] sm:$0xf]  ;;  %v13048_v9 = vor.u32 %v17554_v4, %v13047_v3  ;;  %6859 = vmatpush.bf16.msrb.mxu1 %v12792_v13 }
 0x246   :  { %v17618_v6 = vld [vmem:[#allocation2 + $0xf24] sm:$0xf0] }
 0x247   :  { %v12503_v10 = vld [vmem:[#allocation2 + $0x8c8] sm:$0xf]  ;;  %v13304_v17 = vor.u32 %v17618_v6, %v13303_v5  ;;  %6872 = vmatpush.bf16.msrb.mxu2 %v13048_v9 }
 0x248   :  { %v17418_v11 = vld [vmem:[#allocation2 + $0x8e4] sm:$0xf0] }
 0x249   :  { %v12759_v12 = vld [vmem:[#allocation2 + $0xac8] sm:$0xf]  ;;  %v12504_v36 = vor.u32 %v17418_v11, %v12503_v10  ;;  %6885 = vmatpush.bf16.msrb.mxu3 %v13304_v17 }
 0x24a   :  { %v17482_v21 = vld [vmem:[#allocation2 + $0xae4] sm:$0xf0] }
 0x24b   :  { %v13015_v24 = vld [vmem:[#allocation2 + $0xcc8] sm:$0xf]  ;;  %v12760_v37 = vor.u32 %v17482_v21, %v12759_v12  ;;  %6847 = vmatpush.bf16.msrb.mxu0 %v12504_v36 }
 0x24c   :  { %v17546_v26 = vld [vmem:[#allocation2 + $0xce4] sm:$0xf0] }
 0x24d   :  { %v13271_v27 = vld [vmem:[#allocation2 + $0xec8] sm:$0xf]  ;;  %v13016_v39 = vor.u32 %v17546_v26, %v13015_v24  ;;  %6860 = vmatpush.bf16.msrb.mxu1 %v12760_v37  ;;  %v6633_v26 = vpop.f32.mrf.mxu3 }
 0x24e   :  { %v17610_v32 = vld [vmem:[#allocation2 + $0xee4] sm:$0xf0] }
 0x24f   :  { %v12471_v43 = vld [vmem:[#allocation2 + $0x888] sm:$0xf]  ;;  %v13272_v48 = vor.u32 %v17610_v32, %v13271_v27  ;;  %6873 = vmatpush.bf16.msrb.mxu2 %v13016_v39 }
 0x250   :  { %v17410_v45 = vld [vmem:[#allocation2 + $0x8a4] sm:$0xf0] }
 0x251   :  { %v12727_v46 = vld [vmem:[#allocation2 + $0xa88] sm:$0xf]  ;;  %v12472_v55 = vor.u32 %v17410_v45, %v12471_v43  ;;  %6886 = vmatpush.bf16.msrb.mxu3 %v13272_v48 }
 0x252   :  { %v17474_v49 = vld [vmem:[#allocation2 + $0xaa4] sm:$0xf0] }
 0x253   :  { %v12983_v50 = vld [vmem:[#allocation2 + $0xc88] sm:$0xf]  ;;  %v12728_v58 = vor.u32 %v17474_v49, %v12727_v46  ;;  %6848 = vmatpush.bf16.msrb.mxu0 %v12472_v55 }
 0x254   :  { %v17538_v51 = vld [vmem:[#allocation2 + $0xca4] sm:$0xf0] }
 0x255   :  { %v13239_v16 = vld [vmem:[#allocation2 + $0xe88] sm:$0xf]  ;;  %v12984_v59 = vor.u32 %v17538_v51, %v12983_v50  ;;  %6861 = vmatpush.bf16.msrb.mxu1 %v12728_v58 }
 0x256   :  { %v17602_v54 = vld [vmem:[#allocation2 + $0xea4] sm:$0xf0] }
 0x257   :  { %v12439_v62 = vld [vmem:[#allocation2 + $0x848] sm:$0xf]  ;;  %v13240_v0 = vor.u32 %v17602_v54, %v13239_v16  ;;  %6874 = vmatpush.bf16.msrb.mxu2 %v12984_v59 }
 0x258   :  { %v17402_v60 = vld [vmem:[#allocation2 + $0x864] sm:$0xf0] }
 0x259   :  { %v12695_v61 = vld [vmem:[#allocation2 + $0xa48] sm:$0xf]  ;;  %v12440_v6 = vor.u32 %v17402_v60, %v12439_v62  ;;  %6887 = vmatpush.bf16.msrb.mxu3 %v13240_v0 }
 0x25a   :  { %v17466_v1 = vld [vmem:[#allocation2 + $0xa64] sm:$0xf0] }
 0x25b   :  { %v12951_v2 = vld [vmem:[#allocation2 + $0xc48] sm:$0xf]  ;;  %v12696_v13 = vor.u32 %v17466_v1, %v12695_v61  ;;  %6849 = vmatpush.bf16.msrb.mxu0 %v12440_v6 }
 0x25c   :  { %v17530_v3 = vld [vmem:[#allocation2 + $0xc64] sm:$0xf0] }
 0x25d   :  { %v13207_v4 = vld [vmem:[#allocation2 + $0xe48] sm:$0xf]  ;;  %v12952_v9 = vor.u32 %v17530_v3, %v12951_v2  ;;  %6862 = vmatpush.bf16.msrb.mxu1 %v12696_v13 }
 0x25e   :  { %v17594_v5 = vld [vmem:[#allocation2 + $0xe64] sm:$0xf0] }
 0x25f   :  { %v12407_v7 = vld [vmem:[#allocation2 + $0x808] sm:$0xf]  ;;  %v13208_v15 = vor.u32 %v17594_v5, %v13207_v4  ;;  %6875 = vmatpush.bf16.msrb.mxu2 %v12952_v9 }
 0x260   :  { %v17394_v8 = vld [vmem:[#allocation2 + $0x824] sm:$0xf0] }
 0x261   :  { %v12663_v10 = vld [vmem:[#allocation2 + $0xa08] sm:$0xf]  ;;  %v12408_v36 = vor.u32 %v17394_v8, %v12407_v7  ;;  %6888 = vmatpush.bf16.msrb.mxu3 %v13208_v15 }
 0x262   :  { %v17458_v11 = vld [vmem:[#allocation2 + $0xa24] sm:$0xf0] }
 0x263   :  { %v12919_v12 = vld [vmem:[#allocation2 + $0xc08] sm:$0xf]  ;;  %v12664_v45 = vor.u32 %v17458_v11, %v12663_v10  ;;  %6850 = vmatpush.bf16.msrb.mxu0 %v12408_v36  ;;  %v6644_v36 = vpop.f32.mrf.mxu0 }
 0x264   :  { %v17522_v17 = vld [vmem:[#allocation2 + $0xc24] sm:$0xf0] }
 0x265   :  { %v13175_v21 = vld [vmem:[#allocation2 + $0xe08] sm:$0xf]  ;;  %v12920_v46 = vor.u32 %v17522_v17, %v12919_v12  ;;  %6863 = vmatpush.bf16.msrb.mxu1 %v12664_v45 }
 0x266   :  { %v17586_v24 = vld [vmem:[#allocation2 + $0xe24] sm:$0xf0]  ;;  %6851 = vmatmul.bf16.vlgmr.msrb.gmra.mxu0 %v18912_v41 }
 0x267   :  { %v13655_v27 = vld [vmem:[#allocation2 + $0x11c8] sm:$0xf]  ;;  %v13176_v49 = vor.u32 %v17586_v24, %v13175_v21  ;;  %6876 = vmatpush.bf16.msrb.mxu2 %v12920_v46 }
 0x268   :  { %v17706_v32 = vld [vmem:[#allocation2 + $0x11e4] sm:$0xf0]  ;;  %6864 = vmatmul.bf16.vlgmr.msrb.gmra.mxu1 %v18916_v44 }
 0x269   :  { %v13911_v34 = vld [vmem:[#allocation2 + $0x13c8] sm:$0xf]  ;;  %v13656_v50 = vor.u32 %v17706_v32, %v13655_v27  ;;  %6889 = vmatpush.bf16.msrb.mxu3 %v13176_v49 }
 0x26a   :  { %v17770_v37 = vld [vmem:[#allocation2 + $0x13e4] sm:$0xf0]  ;;  %6877 = vmatmul.bf16.vlgmr.msrb.gmra.mxu2 %v18910_v38 }
 0x26b   :  { %v14167_v39 = vld [vmem:[#allocation2 + $0x15c8] sm:$0xf]  ;;  %v13912_v51 = vor.u32 %v17770_v37, %v13911_v34  ;;  %6895 = vmatpush.bf16.msra.mxu0 %v13656_v50 }
 0x26c   :  { %v17834_v43 = vld [vmem:[#allocation2 + $0x15e4] sm:$0xf0]  ;;  %6890 = vmatmul.bf16.vlgmr.msrb.gmra.mxu3 %v18914_v42 }
 0x26d   :  { %v14423_v47 = vld [vmem:[#allocation2 + $0x17c8] sm:$0xf]  ;;  %v14168_v52 = vor.u32 %v17834_v43, %v14167_v39  ;;  %6908 = vmatpush.bf16.msra.mxu1 %v13912_v51 }
 0x26e   :  { %v17898_v48 = vld [vmem:[#allocation2 + $0x17e4] sm:$0xf0] }
 0x26f   :  { %v13623_v53 = vld [vmem:[#allocation2 + $0x1188] sm:$0xf]  ;;  %v14424_v55 = vor.u32 %v17898_v48, %v14423_v47  ;;  %6921 = vmatpush.bf16.msra.mxu2 %v14168_v52  ;;  %v6645_v47 = vadd.f32 %v6644_v36, %v18989_v56  ;;  %v6657_v48 = vpop.f32.mrf.mxu1 }
 0x270   :  { %v17698_v16 = vld [vmem:[#allocation2 + $0x11a4] sm:$0xf0] }
 0x271   :  { %v13879_v54 = vld [vmem:[#allocation2 + $0x1388] sm:$0xf]  ;;  %v13624_v61 = vor.u32 %v17698_v16, %v13623_v53  ;;  %6934 = vmatpush.bf16.msra.mxu3 %v14424_v55 }
 0x272   :  { %v17762_v57 = vld [vmem:[#allocation2 + $0x13a4] sm:$0xf0] }
 0x273   :  { %v14135_v58 = vld [vmem:[#allocation2 + $0x1588] sm:$0xf]  ;;  %v13880_v63 = vor.u32 %v17762_v57, %v13879_v54  ;;  %6896 = vmatpush.bf16.msra.mxu0 %v13624_v61  ;;  %v6658_v54 = vadd.f32 %v6657_v48, %v6645_v47  ;;  %v6670_v61 = vpop.f32.mrf.mxu2 }
 0x274   :  { %v17826_v59 = vld [vmem:[#allocation2 + $0x15a4] sm:$0xf0] }
 0x275   :  { %v14391_v62 = vld [vmem:[#allocation2 + $0x1788] sm:$0xf]  ;;  %v14136_v0 = vor.u32 %v17826_v59, %v14135_v58  ;;  %6909 = vmatpush.bf16.msra.mxu1 %v13880_v63 }
 0x276   :  { %v17890_v60 = vld [vmem:[#allocation2 + $0x17a4] sm:$0xf0] }
 0x277   :  { %v13591_v1 = vld [vmem:[#allocation2 + $0x1148] sm:$0xf]  ;;  %v14392_v4 = vor.u32 %v17890_v60, %v14391_v62  ;;  %6922 = vmatpush.bf16.msra.mxu2 %v14136_v0 }
 0x278   :  { %v17690_v2 = vld [vmem:[#allocation2 + $0x1164] sm:$0xf0] }
 0x279   :  { %v13847_v3 = vld [vmem:[#allocation2 + $0x1348] sm:$0xf]  ;;  %v13592_v9 = vor.u32 %v17690_v2, %v13591_v1  ;;  %6935 = vmatpush.bf16.msra.mxu3 %v14392_v4  ;;  %v6671_v2 = vadd.f32 %v6670_v61, %v6658_v54 }
 0x27a   :  { %v17754_v5 = vld [vmem:[#allocation2 + $0x1364] sm:$0xf0] }
 0x27b   :  { %v14103_v6 = vld [vmem:[#allocation2 + $0x1548] sm:$0xf]  ;;  %v13848_v10 = vor.u32 %v17754_v5, %v13847_v3  ;;  %6897 = vmatpush.bf16.msra.mxu0 %v13592_v9  ;;  %v6683_v3 = vpop.f32.mrf.mxu3  ;;  %v6672_v47 = vpop.f32.mrf.mxu2 }
 0x27c   :  { %v17818_v7 = vld [vmem:[#allocation2 + $0x1564] sm:$0xf0] }
 0x27d   :  { %v14359_v8 = vld [vmem:[#allocation2 + $0x1748] sm:$0xf]  ;;  %v14104_v11 = vor.u32 %v17818_v7, %v14103_v6  ;;  %6910 = vmatpush.bf16.msra.mxu1 %v13848_v10  ;;  %v18996_v7 = vadd.f32 %v6683_v3, %v6671_v2 }
 0x27e   :  { %v17882_v13 = vld [vmem:[#allocation2 + $0x1764] sm:$0xf0] }
 0x27f   :  { %v13559_v12 = vld [vmem:[#allocation2 + $0x1108] sm:$0xf]  ;;  %v14360_v17 = vor.u32 %v17882_v13, %v14359_v8  ;;  %6923 = vmatpush.bf16.msra.mxu2 %v14104_v11  ;;  %v6646_v8 = vpop.f32.mrf.mxu0 }
 0x280   :  { %v17682_v14 = vld [vmem:[#allocation2 + $0x1124] sm:$0xf0] }
 0x281   :  { %v13815_v15 = vld [vmem:[#allocation2 + $0x1308] sm:$0xf]  ;;  %v13560_v34 = vor.u32 %v17682_v14, %v13559_v12  ;;  %6936 = vmatpush.bf16.msra.mxu3 %v14360_v17  ;;  %v6659_v14 = vpop.f32.mrf.mxu1 }
 0x282   :  { %v17746_v21 = vld [vmem:[#allocation2 + $0x1324] sm:$0xf0] }
 0x283   :  { %v14071_v24 = vld [vmem:[#allocation2 + $0x1508] sm:$0xf]  ;;  %v13816_v37 = vor.u32 %v17746_v21, %v13815_v15  ;;  %6898 = vmatpush.bf16.msra.mxu0 %v13560_v34 }
 0x284   :  { %v17810_v26 = vld [vmem:[#allocation2 + $0x1524] sm:$0xf0] }
 0x285   :  { %v14327_v27 = vld [vmem:[#allocation2 + $0x1708] sm:$0xf]  ;;  %v14072_v39 = vor.u32 %v17810_v26, %v14071_v24  ;;  %6911 = vmatpush.bf16.msra.mxu1 %v13816_v37 }
 0x286   :  { %v17874_v32 = vld [vmem:[#allocation2 + $0x1724] sm:$0xf0] }
 0x287   :  { %v13527_v43 = vld [vmem:[#allocation2 + $0x10c8] sm:$0xf]  ;;  %v14328_v49 = vor.u32 %v17874_v32, %v14327_v27  ;;  %6924 = vmatpush.bf16.msra.mxu2 %v14072_v39 }
 0x288   :  { %v17674_v45 = vld [vmem:[#allocation2 + $0x10e4] sm:$0xf0] }
 0x289   :  { %v13783_v46 = vld [vmem:[#allocation2 + $0x12c8] sm:$0xf]  ;;  %v13528_v55 = vor.u32 %v17674_v45, %v13527_v43  ;;  %6937 = vmatpush.bf16.msra.mxu3 %v14328_v49 }
 0x28a   :  { %v17738_v50 = vld [vmem:[#allocation2 + $0x12e4] sm:$0xf0] }
 0x28b   :  { %v14039_v51 = vld [vmem:[#allocation2 + $0x14c8] sm:$0xf]  ;;  %v13784_v57 = vor.u32 %v17738_v50, %v13783_v46  ;;  %6899 = vmatpush.bf16.msra.mxu0 %v13528_v55 }
 0x28c   :  { %v17802_v52 = vld [vmem:[#allocation2 + $0x14e4] sm:$0xf0] }
 0x28d   :  { %v14295_v53 = vld [vmem:[#allocation2 + $0x16c8] sm:$0xf]  ;;  %v14040_v58 = vor.u32 %v17802_v52, %v14039_v51  ;;  %6912 = vmatpush.bf16.msra.mxu1 %v13784_v57  ;;  %v6685_v52 = vpop.f32.mrf.mxu3 }
 0x28e   :  { %v17866_v16 = vld [vmem:[#allocation2 + $0x16e4] sm:$0xf0] }
 0x28f   :  { %v13495_v59 = vld [vmem:[#allocation2 + $0x1088] sm:$0xf]  ;;  %v14296_v56 = vor.u32 %v17866_v16, %v14295_v53  ;;  %6925 = vmatpush.bf16.msra.mxu2 %v14040_v58 }
 0x290   :  { %v17666_v62 = vld [vmem:[#allocation2 + $0x10a4] sm:$0xf0] }
 0x291   :  { %v13751_v60 = vld [vmem:[#allocation2 + $0x1288] sm:$0xf]  ;;  %v13496_v6 = vor.u32 %v17666_v62, %v13495_v59  ;;  %6938 = vmatpush.bf16.msra.mxu3 %v14296_v56 }
 0x292   :  { %v17730_v63 = vld [vmem:[#allocation2 + $0x12a4] sm:$0xf0] }
 0x293   :  { %v14007_v0 = vld [vmem:[#allocation2 + $0x1488] sm:$0xf]  ;;  %v13752_v13 = vor.u32 %v17730_v63, %v13751_v60  ;;  %6900 = vmatpush.bf16.msra.mxu0 %v13496_v6 }
 0x294   :  { %v17794_v1 = vld [vmem:[#allocation2 + $0x14a4] sm:$0xf0] }
 0x295   :  { %v14263_v4 = vld [vmem:[#allocation2 + $0x1688] sm:$0xf]  ;;  %v14008_v9 = vor.u32 %v17794_v1, %v14007_v0  ;;  %6913 = vmatpush.bf16.msra.mxu1 %v13752_v13 }
 0x296   :  { %v17858_v5 = vld [vmem:[#allocation2 + $0x16a4] sm:$0xf0] }
 0x297   :  { %v13463_v10 = vld [vmem:[#allocation2 + $0x1048] sm:$0xf]  ;;  %v14264_v15 = vor.u32 %v17858_v5, %v14263_v4  ;;  %6926 = vmatpush.bf16.msra.mxu2 %v14008_v9 }
 0x298   :  { %v17658_v11 = vld [vmem:[#allocation2 + $0x1064] sm:$0xf0] }
 0x299   :  { %v13719_v12 = vld [vmem:[#allocation2 + $0x1248] sm:$0xf]  ;;  %v13464_v32 = vor.u32 %v17658_v11, %v13463_v10  ;;  %6939 = vmatpush.bf16.msra.mxu3 %v14264_v15 }
 0x29a   :  { %v17722_v17 = vld [vmem:[#allocation2 + $0x1264] sm:$0xf0] }
 0x29b   :  { %v13975_v21 = vld [vmem:[#allocation2 + $0x1448] sm:$0xf]  ;;  %v13720_v37 = vor.u32 %v17722_v17, %v13719_v12  ;;  %6901 = vmatpush.bf16.msra.mxu0 %v13464_v32 }
 0x29c   :  { %v17786_v24 = vld [vmem:[#allocation2 + $0x1464] sm:$0xf0] }
 0x29d   :  { %v14231_v26 = vld [vmem:[#allocation2 + $0x1648] sm:$0xf]  ;;  %v13976_v39 = vor.u32 %v17786_v24, %v13975_v21  ;;  %6914 = vmatpush.bf16.msra.mxu1 %v13720_v37 }
 0x29e   :  { %v17850_v27 = vld [vmem:[#allocation2 + $0x1664] sm:$0xf0] }
 0x29f   :  { %v13431_v34 = vld [vmem:[#allocation2 + $0x1008] sm:$0xf]  ;;  %v14232_v48 = vor.u32 %v17850_v27, %v14231_v26  ;;  %6927 = vmatpush.bf16.msra.mxu2 %v13976_v39 }
 0x2a0   :  { %v17650_v36 = vld [vmem:[#allocation2 + $0x1024] sm:$0xf0] }
 0x2a1   :  { %v13687_v43 = vld [vmem:[#allocation2 + $0x1208] sm:$0xf]  ;;  %v13432_v55 = vor.u32 %v17650_v36, %v13431_v34  ;;  %6940 = vmatpush.bf16.msra.mxu3 %v14232_v48 }
 0x2a2   :  { %v17714_v45 = vld [vmem:[#allocation2 + $0x1224] sm:$0xf0] }
 0x2a3   :  { %v13943_v46 = vld [vmem:[#allocation2 + $0x1408] sm:$0xf]  ;;  %v13688_v62 = vor.u32 %v17714_v45, %v13687_v43  ;;  %6902 = vmatpush.bf16.msra.mxu0 %v13432_v55 }
 0x2a4   :  { %v17778_v49 = vld [vmem:[#allocation2 + $0x1424] sm:$0xf0] }
 0x2a5   :  { %v14199_v50 = vld [vmem:[#allocation2 + $0x1608] sm:$0xf]  ;;  %v13944_v60 = vor.u32 %v17778_v49, %v13943_v46  ;;  %6915 = vmatpush.bf16.msra.mxu1 %v13688_v62 }
 0x2a6   :  { %v17842_v51 = vld [vmem:[#allocation2 + $0x1624] sm:$0xf0]  ;;  %6903 = vmatmul.bf16.vlgmr.msra.gmra.mxu0 %v18928_v25 }
 0x2a7   :  { %v14679_v53 = vld [vmem:[#allocation2 + $0x19c8] sm:$0xf]  ;;  %v14200_v63 = vor.u32 %v17842_v51, %v14199_v50  ;;  %6928 = vmatpush.bf16.msra.mxu2 %v13944_v60 }
 0x2a8   :  { %v17962_v16 = vld [vmem:[#allocation2 + $0x19e4] sm:$0xf0]  ;;  %6916 = vmatmul.bf16.vlgmr.msra.gmra.mxu1 %v18932_v30 }
 0x2a9   :  { %v14935_v54 = vld [vmem:[#allocation2 + $0x1bc8] sm:$0xf]  ;;  %v14680_v0 = vor.u32 %v17962_v16, %v14679_v53  ;;  %6941 = vmatpush.bf16.msra.mxu3 %v14200_v63  ;;  %v6696_v53 = vpop.f32.mrf.mxu0 }
 0x2aa   :  { %v18026_v57 = vld [vmem:[#allocation2 + $0x1be4] sm:$0xf0]  ;;  %6929 = vmatmul.bf16.vlgmr.msra.gmra.mxu2 %v18930_v29  ;;  %v6697_v55 = vadd.f32 %v6696_v53, %v18996_v7 }
 0x2ab   :  { %v15191_v58 = vld [vmem:[#allocation2 + $0x1dc8] sm:$0xf]  ;;  %v14936_v1 = vor.u32 %v18026_v57, %v14935_v54  ;;  %6947 = vmatpush.bf16.msrb.mxu0 %v14680_v0 }
 0x2ac   :  { %v18090_v59 = vld [vmem:[#allocation2 + $0x1de4] sm:$0xf0]  ;;  %6942 = vmatmul.bf16.vlgmr.msra.gmra.mxu3 %v18934_v33 }
 0x2ad   :  { %v15447_v61 = vld [vmem:[#allocation2 + $0x1fc8] sm:$0xf]  ;;  %v15192_v2 = vor.u32 %v18090_v59, %v15191_v58  ;;  %6960 = vmatpush.bf16.msrb.mxu1 %v14936_v1  ;;  %v6709_v58 = vpop.f32.mrf.mxu1 }
 0x2ae   :  { %v18154_v56 = vld [vmem:[#allocation2 + $0x1fe4] sm:$0xf0]  ;;  %v6710_v0 = vadd.f32 %v6709_v58, %v6697_v55 }
 0x2af   :  { %v14647_v3 = vld [vmem:[#allocation2 + $0x1988] sm:$0xf]  ;;  %v15448_v6 = vor.u32 %v18154_v56, %v15447_v61  ;;  %6973 = vmatpush.bf16.msrb.mxu2 %v15192_v2 }
 0x2b0   :  { %v17954_v4 = vld [vmem:[#allocation2 + $0x19a4] sm:$0xf0] }
 0x2b1   :  { %v14903_v5 = vld [vmem:[#allocation2 + $0x1b88] sm:$0xf]  ;;  %v14648_v12 = vor.u32 %v17954_v4, %v14647_v3  ;;  %6986 = vmatpush.bf16.msrb.mxu3 %v15448_v6 }
 0x2b2   :  { %v18018_v8 = vld [vmem:[#allocation2 + $0x1ba4] sm:$0xf0] }
 0x2b3   :  { %v15159_v13 = vld [vmem:[#allocation2 + $0x1d88] sm:$0xf]  ;;  %v14904_v14 = vor.u32 %v18018_v8, %v14903_v5  ;;  %6948 = vmatpush.bf16.msrb.mxu0 %v14648_v12  ;;  %v6722_v12 = vpop.f32.mrf.mxu2 }
 0x2b4   :  { %v18082_v9 = vld [vmem:[#allocation2 + $0x1da4] sm:$0xf0] }
 0x2b5   :  { %v15415_v10 = vld [vmem:[#allocation2 + $0x1f88] sm:$0xf]  ;;  %v15160_v15 = vor.u32 %v18082_v9, %v15159_v13  ;;  %6961 = vmatpush.bf16.msrb.mxu1 %v14904_v14 }
 0x2b6   :  { %v18146_v11 = vld [vmem:[#allocation2 + $0x1fa4] sm:$0xf0] }
 0x2b7   :  { %v14615_v17 = vld [vmem:[#allocation2 + $0x1948] sm:$0xf]  ;;  %v15416_v26 = vor.u32 %v18146_v11, %v15415_v10  ;;  %6974 = vmatpush.bf16.msrb.mxu2 %v15160_v15 }
 0x2b8   :  { %v17946_v21 = vld [vmem:[#allocation2 + $0x1964] sm:$0xf0] }
 0x2b9   :  { %v14871_v24 = vld [vmem:[#allocation2 + $0x1b48] sm:$0xf]  ;;  %v14616_v39 = vor.u32 %v17946_v21, %v14615_v17  ;;  %6987 = vmatpush.bf16.msrb.mxu3 %v15416_v26  ;;  %v6723_v21 = vadd.f32 %v6722_v12, %v6710_v0  ;;  %v12377_v12 = vld [vmem:[#allocation2 + $0x7e8] sm:$0xf0] }
 0x2ba   :  { %v18010_v27 = vld [vmem:[#allocation2 + $0x1b64] sm:$0xf0] }
 0x2bb   :  { %v15127_v32 = vld [vmem:[#allocation2 + $0x1d48] sm:$0xf]  ;;  %v14872_v43 = vor.u32 %v18010_v27, %v14871_v24  ;;  %6949 = vmatpush.bf16.msrb.mxu0 %v14616_v39  ;;  %v6735_v24 = vpop.f32.mrf.mxu3 }
 0x2bc   :  { %v18074_v34 = vld [vmem:[#allocation2 + $0x1d64] sm:$0xf0] }
 0x2bd   :  { %v15383_v36 = vld [vmem:[#allocation2 + $0x1f48] sm:$0xf]  ;;  %v15128_v45 = vor.u32 %v18074_v34, %v15127_v32  ;;  %6962 = vmatpush.bf16.msrb.mxu1 %v14872_v43  ;;  %v6698_v32 = vpop.f32.mrf.mxu0 }
 0x2be   :  { %v18138_v37 = vld [vmem:[#allocation2 + $0x1f64] sm:$0xf0] }
 0x2bf   :  { %v14583_v46 = vld [vmem:[#allocation2 + $0x1908] sm:$0xf]  ;;  %v15384_v49 = vor.u32 %v18138_v37, %v15383_v36  ;;  %6975 = vmatpush.bf16.msrb.mxu2 %v15128_v45  ;;  %v6711_v36 = vpop.f32.mrf.mxu1  ;;  %v19003_v37 = vadd.f32 %v6735_v24, %v6723_v21  ;;  %v17182_v24 = vld [vmem:[#allocation2 + $0x18c] sm:$0xf] }
 0x2c0   :  { %v17938_v47 = vld [vmem:[#allocation2 + $0x1924] sm:$0xf0]  ;;  %v17310_v36 = vld [vmem:[#allocation2 + $0x58c] sm:$0xf] }
 0x2c1   :  { %v14839_v48 = vld [vmem:[#allocation2 + $0x1b08] sm:$0xf]  ;;  %v14584_v57 = vor.u32 %v17938_v47, %v14583_v46  ;;  %6988 = vmatpush.bf16.msrb.mxu3 %v15384_v49 }
 0x2c2   :  { %v18002_v50 = vld [vmem:[#allocation2 + $0x1b24] sm:$0xf0] }
 0x2c3   :  { %v15095_v51 = vld [vmem:[#allocation2 + $0x1d08] sm:$0xf]  ;;  %v14840_v59 = vor.u32 %v18002_v50, %v14839_v48  ;;  %6950 = vmatpush.bf16.msrb.mxu0 %v14584_v57 }
 0x2c4   :  { %v18066_v52 = vld [vmem:[#allocation2 + $0x1d24] sm:$0xf0] }
 0x2c5   :  { %v15351_v16 = vld [vmem:[#allocation2 + $0x1f08] sm:$0xf]  ;;  %v15096_v62 = vor.u32 %v18066_v52, %v15095_v51  ;;  %6963 = vmatpush.bf16.msrb.mxu1 %v14840_v59 }
 0x2c6   :  { %v18130_v54 = vld [vmem:[#allocation2 + $0x1f24] sm:$0xf0] }
 0x2c7   :  { %v14551_v60 = vld [vmem:[#allocation2 + $0x18c8] sm:$0xf]  ;;  %v15352_v63 = vor.u32 %v18130_v54, %v15351_v16  ;;  %6976 = vmatpush.bf16.msrb.mxu2 %v15096_v62 }
 0x2c8   :  { %v17930_v61 = vld [vmem:[#allocation2 + $0x18e4] sm:$0xf0] }
 0x2c9   :  { %v14807_v56 = vld [vmem:[#allocation2 + $0x1ac8] sm:$0xf]  ;;  %v14552_v6 = vor.u32 %v17930_v61, %v14551_v60  ;;  %6989 = vmatpush.bf16.msrb.mxu3 %v15352_v63 }
 0x2ca   :  { %v17994_v1 = vld [vmem:[#allocation2 + $0x1ae4] sm:$0xf0] }
 0x2cb   :  { %v15063_v2 = vld [vmem:[#allocation2 + $0x1cc8] sm:$0xf]  ;;  %v14808_v7 = vor.u32 %v17994_v1, %v14807_v56  ;;  %6951 = vmatpush.bf16.msrb.mxu0 %v14552_v6  ;;  %v6724_v1 = vpop.f32.mrf.mxu2 }
 0x2cc   :  { %v18058_v3 = vld [vmem:[#allocation2 + $0x1ce4] sm:$0xf0]  ;;  %v17294_v1 = vld [vmem:[#allocation2 + $0x50c] sm:$0xf] }
 0x2cd   :  { %v15319_v4 = vld [vmem:[#allocation2 + $0x1ec8] sm:$0xf]  ;;  %v15064_v8 = vor.u32 %v18058_v3, %v15063_v2  ;;  %6964 = vmatpush.bf16.msrb.mxu1 %v14808_v7  ;;  %v17190_v2 = vld [vmem:[#allocation2 + $0x1cc] sm:$0xf] }
 0x2ce   :  { %v18122_v5 = vld [vmem:[#allocation2 + $0x1ee4] sm:$0xf0]  ;;  %v11609_v3 = vld [vmem:[#allocation2 + $0x1e8] sm:$0xf0] }
 0x2cf   :  { %v14519_v13 = vld [vmem:[#allocation2 + $0x1888] sm:$0xf]  ;;  %v15320_v11 = vor.u32 %v18122_v5, %v15319_v4  ;;  %6977 = vmatpush.bf16.msrb.mxu2 %v15064_v8  ;;  %v17254_v4 = vld [vmem:[#allocation2 + $0x3cc] sm:$0xf]  ;;  %v6737_v5 = vpop.f32.mrf.mxu3 }
 0x2d0   :  { %v17922_v9 = vld [vmem:[#allocation2 + $0x18a4] sm:$0xf0]  ;;  %v11865_v7 = vld [vmem:[#allocation2 + $0x3e8] sm:$0xf0] }
 0x2d1   :  { %v14775_v10 = vld [vmem:[#allocation2 + $0x1a88] sm:$0xf]  ;;  %v14520_v34 = vor.u32 %v17922_v9, %v14519_v13  ;;  %6990 = vmatpush.bf16.msrb.mxu3 %v15320_v11  ;;  %v17318_v8 = vld [vmem:[#allocation2 + $0x5cc] sm:$0xf] }
 0x2d2   :  { %v17986_v14 = vld [vmem:[#allocation2 + $0x1aa4] sm:$0xf0]  ;;  %v12121_v13 = vld [vmem:[#allocation2 + $0x5e8] sm:$0xf0] }
 0x2d3   :  { %v15031_v15 = vld [vmem:[#allocation2 + $0x1c88] sm:$0xf]  ;;  %v14776_v39 = vor.u32 %v17986_v14, %v14775_v10  ;;  %6952 = vmatpush.bf16.msrb.mxu0 %v14520_v34  ;;  %v17382_v11 = vld [vmem:[#allocation2 + $0x7cc] sm:$0xf]  ;;  %v12124_v21 = vor.u32 %v17318_v8, %v12121_v13  ;;  %v6761_v8 = vpop.f32.mrf.mxu1 }
 0x2d4   :  { %v18050_v17 = vld [vmem:[#allocation2 + $0x1ca4] sm:$0xf0]  ;;  %v12380_v32 = vor.u32 %v17382_v11, %v12377_v12  ;;  %v11833_v34 = vld [vmem:[#allocation2 + $0x3a8] sm:$0xf0] }
 0x2d5   :  { %v15287_v26 = vld [vmem:[#allocation2 + $0x1e88] sm:$0xf]  ;;  %v15032_v43 = vor.u32 %v18050_v17, %v15031_v15  ;;  %6965 = vmatpush.bf16.msrb.mxu1 %v14776_v39  ;;  %v11612_v15 = vor.u32 %v17190_v2, %v11609_v3  ;;  %v11868_v17 = vor.u32 %v17254_v4, %v11865_v7  ;;  %v12089_v39 = vld [vmem:[#allocation2 + $0x5a8] sm:$0xf0]  ;;  %v6748_v3 = vpop.f32.mrf.mxu0 }
 0x2d6   :  { %v18114_v27 = vld [vmem:[#allocation2 + $0x1ea4] sm:$0xf0]  ;;  %v12025_v2 = vld [vmem:[#allocation2 + $0x528] sm:$0xf0] }
 0x2d7   :  { %v14487_v45 = vld [vmem:[#allocation2 + $0x1848] sm:$0xf]  ;;  %v15288_v48 = vor.u32 %v18114_v27, %v15287_v26  ;;  %6978 = vmatpush.bf16.msrb.mxu2 %v15032_v43  ;;  %v11577_v26 = vld [vmem:[#allocation2 + $0x1a8] sm:$0xf0] }
 0x2d8   :  { %v17914_v46 = vld [vmem:[#allocation2 + $0x1864] sm:$0xf0]  ;;  %v17246_v27 = vld [vmem:[#allocation2 + $0x38c] sm:$0xf] }
 0x2d9   :  { %v14743_v47 = vld [vmem:[#allocation2 + $0x1a48] sm:$0xf]  ;;  %v14488_v16 = vor.u32 %v17914_v46, %v14487_v45  ;;  %6991 = vmatpush.bf16.msrb.mxu3 %v15288_v48  ;;  %v17374_v43 = vld [vmem:[#allocation2 + $0x78c] sm:$0xf]  ;;  %v11580_v46 = vor.u32 %v17182_v24, %v11577_v26  ;;  %v12092_v48 = vor.u32 %v17310_v36, %v12089_v39 }
 0x2da   :  { %v17978_v49 = vld [vmem:[#allocation2 + $0x1a64] sm:$0xf0]  ;;  %v12345_v45 = vld [vmem:[#allocation2 + $0x7a8] sm:$0xf0] }
 0x2db   :  { %v14999_v50 = vld [vmem:[#allocation2 + $0x1c48] sm:$0xf]  ;;  %v14744_v57 = vor.u32 %v17978_v49, %v14743_v47  ;;  %6953 = vmatpush.bf16.msrb.mxu0 %v14488_v16  ;;  %v11836_v47 = vor.u32 %v17246_v27, %v11833_v34  ;;  %v17174_v49 = vld [vmem:[#allocation2 + $0x14c] sm:$0xf] }
 0x2dc   :  { %v18042_v51 = vld [vmem:[#allocation2 + $0x1c64] sm:$0xf0]  ;;  %v17302_v16 = vld [vmem:[#allocation2 + $0x54c] sm:$0xf] }
 0x2dd   :  { %v15255_v52 = vld [vmem:[#allocation2 + $0x1e48] sm:$0xf]  ;;  %v15000_v58 = vor.u32 %v18042_v51, %v14999_v50  ;;  %6966 = vmatpush.bf16.msrb.mxu1 %v14744_v57  ;;  %v11545_v50 = vld [vmem:[#allocation2 + $0x168] sm:$0xf0] }
 0x2de   :  { %v18106_v53 = vld [vmem:[#allocation2 + $0x1e64] sm:$0xf0]  ;;  %v17238_v51 = vld [vmem:[#allocation2 + $0x34c] sm:$0xf] }
 0x2df   :  { %v14455_v54 = vld [vmem:[#allocation2 + $0x1808] sm:$0xf]  ;;  %v15256_v61 = vor.u32 %v18106_v53, %v15255_v52  ;;  %6979 = vmatpush.bf16.msrb.mxu2 %v15000_v58  ;;  %v12348_v52 = vor.u32 %v17374_v43, %v12345_v45  ;;  %v11801_v53 = vld [vmem:[#allocation2 + $0x368] sm:$0xf0]  ;;  %v11548_v58 = vor.u32 %v17174_v49, %v11545_v50 }
 0x2e0   :  { %v17906_v55 = vld [vmem:[#allocation2 + $0x1824] sm:$0xf0]  ;;  %v12313_v57 = vld [vmem:[#allocation2 + $0x768] sm:$0xf0] }
 0x2e1   :  { %v14711_v59 = vld [vmem:[#allocation2 + $0x1a08] sm:$0xf]  ;;  %v14456_v6 = vor.u32 %v17906_v55, %v14455_v54  ;;  %6992 = vmatpush.bf16.msrb.mxu3 %v15256_v61  ;;  %v12057_v54 = vld [vmem:[#allocation2 + $0x568] sm:$0xf0] }
 0x2e2   :  { %v17970_v62 = vld [vmem:[#allocation2 + $0x1a24] sm:$0xf0]  ;;  %v17366_v55 = vld [vmem:[#allocation2 + $0x74c] sm:$0xf] }
 0x2e3   :  { %v14967_v60 = vld [vmem:[#allocation2 + $0x1c08] sm:$0xf]  ;;  %v14712_v9 = vor.u32 %v17970_v62, %v14711_v59  ;;  %6954 = vmatpush.bf16.msrb.mxu0 %v14456_v6  ;;  %v11804_v59 = vor.u32 %v17238_v51, %v11801_v53  ;;  %v12060_v62 = vor.u32 %v17302_v16, %v12057_v54  ;;  %v11513_v61 = vld [vmem:[#allocation2 + $0x128] sm:$0xf0]  ;;  %v6749_v6 = vadd.f32 %v6748_v3, %v19003_v37  ;;  %v6787_v51 = vpop.f32.mrf.mxu3  ;;  %v6750_v16 = vpop.f32.mrf.mxu0 }
 0x2e4   :  { %v18034_v56 = vld [vmem:[#allocation2 + $0x1c24] sm:$0xf0]  ;;  %v17358_v4 = vld [vmem:[#allocation2 + $0x70c] sm:$0xf] }
 0x2e5   :  { %v15223_v63 = vld [vmem:[#allocation2 + $0x1e08] sm:$0xf]  ;;  %v14968_v10 = vor.u32 %v18034_v56, %v14967_v60  ;;  %6967 = vmatpush.bf16.msrb.mxu1 %v14712_v9  ;;  %v17166_v60 = vld [vmem:[#allocation2 + $0x10c] sm:$0xf]  ;;  %v12028_v9 = vor.u32 %v17294_v1, %v12025_v2 }
 0x2e6   :  { %v18098_v0 = vld [vmem:[#allocation2 + $0x1e24] sm:$0xf0]  ;;  %6955 = vmatmul.bf16.vlgmr.msrb.gmra.mxu0 %v18946_v23  ;;  %v17230_v56 = vld [vmem:[#allocation2 + $0x30c] sm:$0xf]  ;;  %v11516_v7 = vor.u32 %v17166_v60, %v11513_v61 }
 0x2e7   :  { %v15224_v14 = vor.u32 %v18098_v0, %v15223_v63  ;;  %6980 = vmatpush.bf16.msrb.mxu2 %v14968_v10  ;;  %6999 = vmatpush.bf16.msra.mxu0 %v11612_v15  ;;  %v12316_v63 = vor.u32 %v17366_v55, %v12313_v57  ;;  %v11769_v0 = vld [vmem:[#allocation2 + $0x328] sm:$0xf0]  ;;  %v6762_v15 = vadd.f32 %v6761_v8, %v6749_v6  ;;  %v6763_v55 = vpop.f32.mrf.mxu1 }
 0x2e8   :  { %6968 = vmatmul.bf16.vlgmr.msrb.gmra.mxu1 %v18950_v31  ;;  %v12281_v5 = vld [vmem:[#allocation2 + $0x728] sm:$0xf0]  ;;  %v11772_v13 = vor.u32 %v17230_v56, %v11769_v0 }
 0x2e9   :  { %6993 = vmatpush.bf16.msrb.mxu3 %v15224_v14  ;;  %7012 = vmatpush.bf16.msra.mxu1 %v11868_v17  ;;  %v17158_v10 = vld [vmem:[#allocation2 + $0xcc] sm:$0xf]  ;;  %v12284_v14 = vor.u32 %v17358_v4, %v12281_v5 }
 0x2ea   :  { %6981 = vmatmul.bf16.vlgmr.msrb.gmra.mxu2 %v18948_v28  ;;  %v11481_v11 = vld [vmem:[#allocation2 + $0xe8] sm:$0xf0] }
 0x2eb   :  { %7025 = vmatpush.bf16.msra.mxu2 %v12124_v21  ;;  %7000 = vmatpush.bf16.msra.mxu0 %v11580_v46  ;;  %v17222_v12 = vld [vmem:[#allocation2 + $0x2cc] sm:$0xf]  ;;  %v6774_v46 = vpop.f32.mrf.mxu2 }
 0x2ec   :  { %6994 = vmatmul.bf16.vlgmr.msrb.gmra.mxu3 %v18952_v35  ;;  %v11737_v17 = vld [vmem:[#allocation2 + $0x2e8] sm:$0xf0]  ;;  %v6775_v50 = vadd.f32 %v6774_v46, %v6762_v15 }
 0x2ed   :  { %7038 = vmatpush.bf16.msra.mxu3 %v12380_v32  ;;  %7013 = vmatpush.bf16.msra.mxu1 %v11836_v47  ;;  %v17286_v21 = vld [vmem:[#allocation2 + $0x4cc] sm:$0xf]  ;;  %v11484_v32 = vor.u32 %v17158_v10, %v11481_v11  ;;  %v11740_v37 = vor.u32 %v17222_v12, %v11737_v17 }
 0x2ee   :  { %v11993_v24 = vld [vmem:[#allocation2 + $0x4e8] sm:$0xf0]  ;;  %v19010_v57 = vadd.f32 %v6787_v51, %v6775_v50 }
 0x2ef   :  { %7026 = vmatpush.bf16.msra.mxu2 %v12092_v48  ;;  %7001 = vmatpush.bf16.msra.mxu0 %v11548_v58  ;;  %v17350_v26 = vld [vmem:[#allocation2 + $0x6cc] sm:$0xf]  ;;  %v11996_v34 = vor.u32 %v17286_v21, %v11993_v24 }
 0x2f0   :  { %v12249_v27 = vld [vmem:[#allocation2 + $0x6e8] sm:$0xf0]  ;;  %vm8040_vm1 = vcmp.gt.f32.partialorder %v19010_v57, 0.0 }
 0x2f1   :  { %7039 = vmatpush.bf16.msra.mxu3 %v12348_v52  ;;  %7014 = vmatpush.bf16.msra.mxu1 %v11804_v59  ;;  %v17150_v36 = vld [vmem:[#allocation2 + $0x8c] sm:$0xf]  ;;  %v12252_v45 = vor.u32 %v17350_v26, %v12249_v27  ;;  %v6789_v27 = vpop.f32.mrf.mxu3 }
 0x2f2   :  { %v11449_v39 = vld [vmem:[#allocation2 + $0xa8] sm:$0xf0] }
 0x2f3   :  { %7027 = vmatpush.bf16.msra.mxu2 %v12060_v62  ;;  %7002 = vmatpush.bf16.msra.mxu0 %v11516_v7  ;;  %v17214_v43 = vld [vmem:[#allocation2 + $0x28c] sm:$0xf]  ;;  %v11452_v54 = vor.u32 %v17150_v36, %v11449_v39  ;;  %v6776_v17 = vpop.f32.mrf.mxu2 }
 0x2f4   :  { %v11705_v47 = vld [vmem:[#allocation2 + $0x2a8] sm:$0xf0] }
 0x2f5   :  { %7040 = vmatpush.bf16.msra.mxu3 %v12316_v63  ;;  %7015 = vmatpush.bf16.msra.mxu1 %v11772_v13  ;;  %v17278_v48 = vld [vmem:[#allocation2 + $0x48c] sm:$0xf]  ;;  %v11708_v58 = vor.u32 %v17214_v43, %v11705_v47 }
 0x2f6   :  { %v11961_v49 = vld [vmem:[#allocation2 + $0x4a8] sm:$0xf0] }
 0x2f7   :  { %7028 = vmatpush.bf16.msra.mxu2 %v12028_v9  ;;  %v17342_v52 = vld [vmem:[#allocation2 + $0x68c] sm:$0xf]  ;;  %7003 = vmatpush.bf16.msra.mxu0 %v11484_v32  ;;  %v11964_v59 = vor.u32 %v17278_v48, %v11961_v49 }
 0x2f8   :  { %v12217_v53 = vld [vmem:[#allocation2 + $0x6a8] sm:$0xf0] }
 0x2f9   :  { %7041 = vmatpush.bf16.msra.mxu3 %v12284_v14  ;;  %7016 = vmatpush.bf16.msra.mxu1 %v11740_v37  ;;  %v17142_v62 = vld [vmem:[#allocation2 + $0x4c] sm:$0xf]  ;;  %v12220_v56 = vor.u32 %v17342_v52, %v12217_v53 }
 0x2fa   :  { %v11417_v60 = vld [vmem:[#allocation2 + $0x68] sm:$0xf0] }
 0x2fb   :  { %7029 = vmatpush.bf16.msra.mxu2 %v11996_v34  ;;  %v17206_v61 = vld [vmem:[#allocation2 + $0x24c] sm:$0xf]  ;;  %7004 = vmatpush.bf16.msra.mxu0 %v11452_v54  ;;  %v11420_v4 = vor.u32 %v17142_v62, %v11417_v60 }
 0x2fc   :  { %v11673_v63 = vld [vmem:[#allocation2 + $0x268] sm:$0xf0] }
 0x2fd   :  { %7042 = vmatpush.bf16.msra.mxu3 %v12252_v45  ;;  %v17270_v0 = vld [vmem:[#allocation2 + $0x44c] sm:$0xf]  ;;  %7017 = vmatpush.bf16.msra.mxu1 %v11708_v58  ;;  %v11676_v7 = vor.u32 %v17206_v61, %v11673_v63 }
 0x2fe   :  { %v11929_v1 = vld [vmem:[#allocation2 + $0x468] sm:$0xf0] }
 0x2ff   :  { %v17334_v2 = vld [vmem:[#allocation2 + $0x64c] sm:$0xf]  ;;  %7030 = vmatpush.bf16.msra.mxu2 %v11964_v59  ;;  %v11932_v8 = vor.u32 %v17270_v0, %v11929_v1  ;;  %7005 = vmatpush.bf16.msra.mxu0 %v11420_v4 }
 0x300   :  { %v12185_v3 = vld [vmem:[#allocation2 + $0x668] sm:$0xf0] }
 0x301   :  { %v17134_v5 = vld [vmem:[#allocation2 + $0xc] sm:$0xf]  ;;  %7043 = vmatpush.bf16.msra.mxu3 %v12220_v56  ;;  %v12188_v11 = vor.u32 %v17334_v2, %v12185_v3  ;;  %7018 = vmatpush.bf16.msra.mxu1 %v11676_v7 }
 0x302   :  { %v11385_v6 = vld [vmem:[#allocation2 + $0x28] sm:$0xf0] }
 0x303   :  { %v17198_v13 = vld [vmem:[#allocation2 + $0x20c] sm:$0xf]  ;;  %v11388_v32 = vor.u32 %v17134_v5, %v11385_v6  ;;  %7031 = vmatpush.bf16.msra.mxu2 %v11932_v8 }
 0x304   :  { %v11641_v9 = vld [vmem:[#allocation2 + $0x228] sm:$0xf0] }
 0x305   :  { %v17262_v10 = vld [vmem:[#allocation2 + $0x40c] sm:$0xf]  ;;  %v11644_v39 = vor.u32 %v17198_v13, %v11641_v9  ;;  %7044 = vmatpush.bf16.msra.mxu3 %v12188_v11  ;;  %7006 = vmatpush.bf16.msra.mxu0 %v11388_v32 }
 0x306   :  { %v11897_v12 = vld [vmem:[#allocation2 + $0x428] sm:$0xf0] }
 0x307   :  { %v17326_v14 = vld [vmem:[#allocation2 + $0x60c] sm:$0xf]  ;;  %v11900_v43 = vor.u32 %v17262_v10, %v11897_v12  ;;  %7019 = vmatpush.bf16.msra.mxu1 %v11644_v39 }
 0x308   :  { %v12153_v15 = vld [vmem:[#allocation2 + $0x628] sm:$0xf0]  ;;  %7007 = vmatmul.bf16.vlgmr.msra.gmra.mxu0 %v18894_v19 }
 0x309   :  { %v17446_v21 = vld [vmem:[#allocation2 + $0x9cc] sm:$0xf]  ;;  %v12156_v47 = vor.u32 %v17326_v14, %v12153_v15  ;;  %7032 = vmatpush.bf16.msra.mxu2 %v11900_v43  ;;  %v18589_v14 = vld [vmem:[#allocation4] sm:$0xff] }
 0x30a   :  { %v12633_v24 = vld [vmem:[#allocation2 + $0x9e8] sm:$0xf0]  ;;  %7020 = vmatmul.bf16.vlgmr.msra.gmra.mxu1 %v18898_v22  ;;  %v1185_v15 = vperm.slane %v18589_v14, 2 }
 0x30b   :  { %v17510_v26 = vld [vmem:[#allocation2 + $0xbcc] sm:$0xf]  ;;  %v12636_v48 = vor.u32 %v17446_v21, %v12633_v24  ;;  %7045 = vmatpush.bf16.msra.mxu3 %v12156_v47 }
 0x30c   :  { %v12889_v37 = vld [vmem:[#allocation2 + $0xbe8] sm:$0xf0]  ;;  %7033 = vmatmul.bf16.vlgmr.msra.gmra.mxu2 %v18892_v18 }
 0x30d   :  { %v17574_v34 = vld [vmem:[#allocation2 + $0xdcc] sm:$0xf]  ;;  %v12892_v49 = vor.u32 %v17510_v26, %v12889_v37  ;;  %7051 = vmatpush.bf16.msrb.mxu0 %v12636_v48  ;;  %v6813_v48 = vpop.f32.mrf.mxu1 }
 0x30e   :  { %v13145_v36 = vld [vmem:[#allocation2 + $0xde8] sm:$0xf0]  ;;  %7046 = vmatmul.bf16.vlgmr.msra.gmra.mxu3 %v18896_v20 }
 0x30f   :  { %v17638_v45 = vld [vmem:[#allocation2 + $0xfcc] sm:$0xf]  ;;  %v13148_v50 = vor.u32 %v17574_v34, %v13145_v36  ;;  %7064 = vmatpush.bf16.msrb.mxu1 %v12892_v49  ;;  %v6800_v34 = vpop.f32.mrf.mxu0 }
 0x310   :  { %v13401_v46 = vld [vmem:[#allocation2 + $0xfe8] sm:$0xf0]  ;;  %v6801_v47 = vadd.f32 %v6800_v34, %v1185_v15 }
 0x311   :  { %v17438_v51 = vld [vmem:[#allocation2 + $0x98c] sm:$0xf]  ;;  %v13404_v16 = vor.u32 %v17638_v45, %v13401_v46  ;;  %7077 = vmatpush.bf16.msrb.mxu2 %v13148_v50 }
 0x312   :  { %v12601_v52 = vld [vmem:[#allocation2 + $0x9a8] sm:$0xf0] }
 0x313   :  { %v17502_v53 = vld [vmem:[#allocation2 + $0xb8c] sm:$0xf]  ;;  %v12604_v60 = vor.u32 %v17438_v51, %v12601_v52  ;;  %7090 = vmatpush.bf16.msrb.mxu3 %v13404_v16 }
 0x314   :  { %v12857_v54 = vld [vmem:[#allocation2 + $0xba8] sm:$0xf0] }
 0x315   :  { %v17566_v55 = vld [vmem:[#allocation2 + $0xd8c] sm:$0xf]  ;;  %v12860_v61 = vor.u32 %v17502_v53, %v12857_v54  ;;  %7052 = vmatpush.bf16.msrb.mxu0 %v12604_v60  ;;  %v6814_v54 = vadd.f32 %v6813_v48, %v6801_v47  ;;  %v6815_v15 = vpop.f32.mrf.mxu1 }
 0x316   :  { %v13113_v58 = vld [vmem:[#allocation2 + $0xda8] sm:$0xf0] }
 0x317   :  { %v17630_v59 = vld [vmem:[#allocation2 + $0xf8c] sm:$0xf]  ;;  %v13116_v56 = vor.u32 %v17566_v55, %v13113_v58  ;;  %7065 = vmatpush.bf16.msrb.mxu1 %v12860_v61 }
 0x318   :  { %v13369_v62 = vld [vmem:[#allocation2 + $0xfa8] sm:$0xf0] }
 0x319   :  { %v17430_v63 = vld [vmem:[#allocation2 + $0x94c] sm:$0xf]  ;;  %v13372_v2 = vor.u32 %v17630_v59, %v13369_v62  ;;  %7078 = vmatpush.bf16.msrb.mxu2 %v13116_v56  ;;  %v6826_v56 = vpop.f32.mrf.mxu2 }
 0x31a   :  { %v12569_v0 = vld [vmem:[#allocation2 + $0x968] sm:$0xf0] }
 0x31b   :  { %v17494_v1 = vld [vmem:[#allocation2 + $0xb4c] sm:$0xf]  ;;  %v12572_v8 = vor.u32 %v17430_v63, %v12569_v0  ;;  %7091 = vmatpush.bf16.msrb.mxu3 %v13372_v2 }
 0x31c   :  { %v12825_v3 = vld [vmem:[#allocation2 + $0xb68] sm:$0xf0] }
 0x31d   :  { %v17558_v4 = vld [vmem:[#allocation2 + $0xd4c] sm:$0xf]  ;;  %v12828_v9 = vor.u32 %v17494_v1, %v12825_v3  ;;  %7053 = vmatpush.bf16.msrb.mxu0 %v12572_v8  ;;  %v6827_v3 = vadd.f32 %v6826_v56, %v6814_v54 }
 0x31e   :  { %v13081_v5 = vld [vmem:[#allocation2 + $0xd68] sm:$0xf0] }
 0x31f   :  { %v17622_v6 = vld [vmem:[#allocation2 + $0xf4c] sm:$0xf]  ;;  %v13084_v10 = vor.u32 %v17558_v4, %v13081_v5  ;;  %7066 = vmatpush.bf16.msrb.mxu1 %v12828_v9  ;;  %v6839_v4 = vpop.f32.mrf.mxu3 }
 0x320   :  { %v13337_v7 = vld [vmem:[#allocation2 + $0xf68] sm:$0xf0]  ;;  %v19016_v8 = vadd.f32 %v6839_v4, %v6827_v3 }
 0x321   :  { %v17422_v13 = vld [vmem:[#allocation2 + $0x90c] sm:$0xf]  ;;  %v13340_v17 = vor.u32 %v17622_v6, %v13337_v7  ;;  %7079 = vmatpush.bf16.msrb.mxu2 %v13084_v10  ;;  %v6828_v48 = vpop.f32.mrf.mxu2 }
 0x322   :  { %v12537_v11 = vld [vmem:[#allocation2 + $0x928] sm:$0xf0] }
 0x323   :  { %v17486_v12 = vld [vmem:[#allocation2 + $0xb0c] sm:$0xf]  ;;  %v12540_v37 = vor.u32 %v17422_v13, %v12537_v11  ;;  %7092 = vmatpush.bf16.msrb.mxu3 %v13340_v17  ;;  %v6802_v13 = vpop.f32.mrf.mxu0 }
 0x324   :  { %v12793_v21 = vld [vmem:[#allocation2 + $0xb28] sm:$0xf0] }
 0x325   :  { %v17550_v24 = vld [vmem:[#allocation2 + $0xd0c] sm:$0xf]  ;;  %v12796_v36 = vor.u32 %v17486_v12, %v12793_v21  ;;  %7054 = vmatpush.bf16.msrb.mxu0 %v12540_v37 }
 0x326   :  { %v13049_v26 = vld [vmem:[#allocation2 + $0xd28] sm:$0xf0] }
 0x327   :  { %v17614_v27 = vld [vmem:[#allocation2 + $0xf0c] sm:$0xf]  ;;  %v13052_v39 = vor.u32 %v17550_v24, %v13049_v26  ;;  %7067 = vmatpush.bf16.msrb.mxu1 %v12796_v36 }
 0x328   :  { %v13305_v32 = vld [vmem:[#allocation2 + $0xf28] sm:$0xf0] }
 0x329   :  { %v17414_v43 = vld [vmem:[#allocation2 + $0x8cc] sm:$0xf]  ;;  %v13308_v49 = vor.u32 %v17614_v27, %v13305_v32  ;;  %7080 = vmatpush.bf16.msrb.mxu2 %v13052_v39 }
 0x32a   :  { %v12505_v45 = vld [vmem:[#allocation2 + $0x8e8] sm:$0xf0] }
 0x32b   :  { %v17478_v46 = vld [vmem:[#allocation2 + $0xacc] sm:$0xf]  ;;  %v12508_v55 = vor.u32 %v17414_v43, %v12505_v45  ;;  %7093 = vmatpush.bf16.msrb.mxu3 %v13308_v49 }
 0x32c   :  { %v12761_v50 = vld [vmem:[#allocation2 + $0xae8] sm:$0xf0] }
 0x32d   :  { %v17542_v51 = vld [vmem:[#allocation2 + $0xccc] sm:$0xf]  ;;  %v12764_v58 = vor.u32 %v17478_v46, %v12761_v50  ;;  %7055 = vmatpush.bf16.msrb.mxu0 %v12508_v55 }
 0x32e   :  { %v13017_v52 = vld [vmem:[#allocation2 + $0xce8] sm:$0xf0] }
 0x32f   :  { %v17606_v53 = vld [vmem:[#allocation2 + $0xecc] sm:$0xf]  ;;  %v13020_v59 = vor.u32 %v17542_v51, %v13017_v52  ;;  %7068 = vmatpush.bf16.msrb.mxu1 %v12764_v58 }
 0x330   :  { %v13273_v16 = vld [vmem:[#allocation2 + $0xee8] sm:$0xf0] }
 0x331   :  { %v17406_v62 = vld [vmem:[#allocation2 + $0x88c] sm:$0xf]  ;;  %v13276_v63 = vor.u32 %v17606_v53, %v13273_v16  ;;  %7081 = vmatpush.bf16.msrb.mxu2 %v13020_v59  ;;  %v6841_v53 = vpop.f32.mrf.mxu3 }
 0x332   :  { %v12473_v60 = vld [vmem:[#allocation2 + $0x8a8] sm:$0xf0] }
 0x333   :  { %v17470_v61 = vld [vmem:[#allocation2 + $0xa8c] sm:$0xf]  ;;  %v12476_v7 = vor.u32 %v17406_v62, %v12473_v60  ;;  %7094 = vmatpush.bf16.msrb.mxu3 %v13276_v63 }
 0x334   :  { %v12729_v0 = vld [vmem:[#allocation2 + $0xaa8] sm:$0xf0] }
 0x335   :  { %v17534_v1 = vld [vmem:[#allocation2 + $0xc8c] sm:$0xf]  ;;  %v12732_v9 = vor.u32 %v17470_v61, %v12729_v0  ;;  %7056 = vmatpush.bf16.msrb.mxu0 %v12476_v7 }
 0x336   :  { %v12985_v2 = vld [vmem:[#allocation2 + $0xca8] sm:$0xf0] }
 0x337   :  { %v17598_v5 = vld [vmem:[#allocation2 + $0xe8c] sm:$0xf]  ;;  %v12988_v10 = vor.u32 %v17534_v1, %v12985_v2  ;;  %7069 = vmatpush.bf16.msrb.mxu1 %v12732_v9 }
 0x338   :  { %v13241_v6 = vld [vmem:[#allocation2 + $0xea8] sm:$0xf0] }
 0x339   :  { %v17398_v11 = vld [vmem:[#allocation2 + $0x84c] sm:$0xf]  ;;  %v13244_v17 = vor.u32 %v17598_v5, %v13241_v6  ;;  %7082 = vmatpush.bf16.msrb.mxu2 %v12988_v10 }
 0x33a   :  { %v12441_v12 = vld [vmem:[#allocation2 + $0x868] sm:$0xf0] }
 0x33b   :  { %v17462_v14 = vld [vmem:[#allocation2 + $0xa4c] sm:$0xf]  ;;  %v12444_v37 = vor.u32 %v17398_v11, %v12441_v12  ;;  %7095 = vmatpush.bf16.msrb.mxu3 %v13244_v17 }
 0x33c   :  { %v12697_v21 = vld [vmem:[#allocation2 + $0xa68] sm:$0xf0] }
 0x33d   :  { %v17526_v24 = vld [vmem:[#allocation2 + $0xc4c] sm:$0xf]  ;;  %v12700_v39 = vor.u32 %v17462_v14, %v12697_v21  ;;  %7057 = vmatpush.bf16.msrb.mxu0 %v12444_v37 }
 0x33e   :  { %v12953_v26 = vld [vmem:[#allocation2 + $0xc68] sm:$0xf0] }
 0x33f   :  { %v17590_v27 = vld [vmem:[#allocation2 + $0xe4c] sm:$0xf]  ;;  %v12956_v43 = vor.u32 %v17526_v24, %v12953_v26  ;;  %7070 = vmatpush.bf16.msrb.mxu1 %v12700_v39 }
 0x340   :  { %v13209_v32 = vld [vmem:[#allocation2 + $0xe68] sm:$0xf0] }
 0x341   :  { %v17390_v34 = vld [vmem:[#allocation2 + $0x80c] sm:$0xf]  ;;  %v13212_v49 = vor.u32 %v17590_v27, %v13209_v32  ;;  %7083 = vmatpush.bf16.msrb.mxu2 %v12956_v43 }
 0x342   :  { %v12409_v36 = vld [vmem:[#allocation2 + $0x828] sm:$0xf0] }
 0x343   :  { %v17454_v45 = vld [vmem:[#allocation2 + $0xa0c] sm:$0xf]  ;;  %v12412_v58 = vor.u32 %v17390_v34, %v12409_v36  ;;  %7096 = vmatpush.bf16.msrb.mxu3 %v13212_v49 }
 0x344   :  { %v12665_v46 = vld [vmem:[#allocation2 + $0xa28] sm:$0xf0] }
 0x345   :  { %v17518_v47 = vld [vmem:[#allocation2 + $0xc0c] sm:$0xf]  ;;  %v12668_v61 = vor.u32 %v17454_v45, %v12665_v46  ;;  %7058 = vmatpush.bf16.msrb.mxu0 %v12412_v58 }
 0x346   :  { %v12921_v50 = vld [vmem:[#allocation2 + $0xc28] sm:$0xf0] }
 0x347   :  { %v17582_v51 = vld [vmem:[#allocation2 + $0xe0c] sm:$0xf]  ;;  %v12924_v56 = vor.u32 %v17518_v47, %v12921_v50  ;;  %7071 = vmatpush.bf16.msrb.mxu1 %v12668_v61 }
 0x348   :  { %v13177_v52 = vld [vmem:[#allocation2 + $0xe28] sm:$0xf0]  ;;  %7059 = vmatmul.bf16.vlgmr.msrb.gmra.mxu0 %v18912_v41 }
 0x349   :  { %v17702_v16 = vld [vmem:[#allocation2 + $0x11cc] sm:$0xf]  ;;  %v13180_v1 = vor.u32 %v17582_v51, %v13177_v52  ;;  %7084 = vmatpush.bf16.msrb.mxu2 %v12924_v56 }
 0x34a   :  { %v13657_v54 = vld [vmem:[#allocation2 + $0x11e8] sm:$0xf0]  ;;  %7072 = vmatmul.bf16.vlgmr.msrb.gmra.mxu1 %v18916_v44 }
 0x34b   :  { %v17766_v55 = vld [vmem:[#allocation2 + $0x13cc] sm:$0xf]  ;;  %v13660_v2 = vor.u32 %v17702_v16, %v13657_v54  ;;  %7097 = vmatpush.bf16.msrb.mxu3 %v13180_v1  ;;  %v6865_v1 = vpop.f32.mrf.mxu1 }
 0x34c   :  { %v13913_v59 = vld [vmem:[#allocation2 + $0x13e8] sm:$0xf0]  ;;  %7085 = vmatmul.bf16.vlgmr.msrb.gmra.mxu2 %v18910_v38 }
 0x34d   :  { %v17830_v62 = vld [vmem:[#allocation2 + $0x15cc] sm:$0xf]  ;;  %v13916_v3 = vor.u32 %v17766_v55, %v13913_v59  ;;  %7103 = vmatpush.bf16.msra.mxu0 %v13660_v2  ;;  %v6852_v59 = vpop.f32.mrf.mxu0 }
 0x34e   :  { %v14169_v60 = vld [vmem:[#allocation2 + $0x15e8] sm:$0xf0]  ;;  %7098 = vmatmul.bf16.vlgmr.msrb.gmra.mxu3 %v18914_v42 }
 0x34f   :  { %v17894_v63 = vld [vmem:[#allocation2 + $0x17cc] sm:$0xf]  ;;  %v14172_v4 = vor.u32 %v17830_v62, %v14169_v60  ;;  %7116 = vmatpush.bf16.msra.mxu1 %v13916_v3 }
 0x350   :  { %v14425_v0 = vld [vmem:[#allocation2 + $0x17e8] sm:$0xf0] }
 0x351   :  { %v17694_v5 = vld [vmem:[#allocation2 + $0x118c] sm:$0xf]  ;;  %v14428_v13 = vor.u32 %v17894_v63, %v14425_v0  ;;  %7129 = vmatpush.bf16.msra.mxu2 %v14172_v4  ;;  %v6853_v0 = vadd.f32 %v6852_v59, %v19016_v8 }
 0x352   :  { %v13625_v6 = vld [vmem:[#allocation2 + $0x11a8] sm:$0xf0] }
 0x353   :  { %v17758_v7 = vld [vmem:[#allocation2 + $0x138c] sm:$0xf]  ;;  %v13628_v15 = vor.u32 %v17694_v5, %v13625_v6  ;;  %7142 = vmatpush.bf16.msra.mxu3 %v14428_v13  ;;  %v6866_v13 = vadd.f32 %v6865_v1, %v6853_v0 }
 0x354   :  { %v13881_v9 = vld [vmem:[#allocation2 + $0x13a8] sm:$0xf0] }
 0x355   :  { %v17822_v10 = vld [vmem:[#allocation2 + $0x158c] sm:$0xf]  ;;  %v13884_v17 = vor.u32 %v17758_v7, %v13881_v9  ;;  %7104 = vmatpush.bf16.msra.mxu0 %v13628_v15 }
 0x356   :  { %v14137_v11 = vld [vmem:[#allocation2 + $0x15a8] sm:$0xf0] }
 0x357   :  { %v17886_v12 = vld [vmem:[#allocation2 + $0x178c] sm:$0xf]  ;;  %v14140_v21 = vor.u32 %v17822_v10, %v14137_v11  ;;  %7117 = vmatpush.bf16.msra.mxu1 %v13884_v17  ;;  %v6878_v17 = vpop.f32.mrf.mxu2 }
 0x358   :  { %v14393_v14 = vld [vmem:[#allocation2 + $0x17a8] sm:$0xf0] }
 0x359   :  { %v17686_v24 = vld [vmem:[#allocation2 + $0x114c] sm:$0xf]  ;;  %v14396_v32 = vor.u32 %v17886_v12, %v14393_v14  ;;  %7130 = vmatpush.bf16.msra.mxu2 %v14140_v21 }
 0x35a   :  { %v13593_v26 = vld [vmem:[#allocation2 + $0x1168] sm:$0xf0] }
 0x35b   :  { %v17750_v27 = vld [vmem:[#allocation2 + $0x134c] sm:$0xf]  ;;  %v13596_v45 = vor.u32 %v17686_v24, %v13593_v26  ;;  %7143 = vmatpush.bf16.msra.mxu3 %v14396_v32  ;;  %v6891_v32 = vpop.f32.mrf.mxu3 }
 0x35c   :  { %v13849_v37 = vld [vmem:[#allocation2 + $0x1368] sm:$0xf0] }
 0x35d   :  { %v17814_v34 = vld [vmem:[#allocation2 + $0x154c] sm:$0xf]  ;;  %v13852_v46 = vor.u32 %v17750_v27, %v13849_v37  ;;  %7105 = vmatpush.bf16.msra.mxu0 %v13596_v45  ;;  %v6879_v27 = vadd.f32 %v6878_v17, %v6866_v13 }
 0x35e   :  { %v14105_v36 = vld [vmem:[#allocation2 + $0x1568] sm:$0xf0] }
 0x35f   :  { %v17878_v39 = vld [vmem:[#allocation2 + $0x174c] sm:$0xf]  ;;  %v14108_v47 = vor.u32 %v17814_v34, %v14105_v36  ;;  %7118 = vmatpush.bf16.msra.mxu1 %v13852_v46  ;;  %v6880_v1 = vpop.f32.mrf.mxu2 }
 0x360   :  { %v14361_v43 = vld [vmem:[#allocation2 + $0x1768] sm:$0xf0] }
 0x361   :  { %v17678_v48 = vld [vmem:[#allocation2 + $0x110c] sm:$0xf]  ;;  %v14364_v51 = vor.u32 %v17878_v39, %v14361_v43  ;;  %7131 = vmatpush.bf16.msra.mxu2 %v14108_v47  ;;  %v19023_v39 = vadd.f32 %v6891_v32, %v6879_v27  ;;  %v6854_v43 = vpop.f32.mrf.mxu0 }
 0x362   :  { %v13561_v49 = vld [vmem:[#allocation2 + $0x1128] sm:$0xf0] }
 0x363   :  { %v17742_v50 = vld [vmem:[#allocation2 + $0x130c] sm:$0xf]  ;;  %v13564_v58 = vor.u32 %v17678_v48, %v13561_v49  ;;  %7144 = vmatpush.bf16.msra.mxu3 %v14364_v51 }
 0x364   :  { %v13817_v52 = vld [vmem:[#allocation2 + $0x1328] sm:$0xf0] }
 0x365   :  { %v17806_v53 = vld [vmem:[#allocation2 + $0x150c] sm:$0xf]  ;;  %v13820_v62 = vor.u32 %v17742_v50, %v13817_v52  ;;  %7106 = vmatpush.bf16.msra.mxu0 %v13564_v58  ;;  %v6867_v50 = vpop.f32.mrf.mxu1 }
 0x366   :  { %v14073_v16 = vld [vmem:[#allocation2 + $0x1528] sm:$0xf0] }
 0x367   :  { %v17870_v54 = vld [vmem:[#allocation2 + $0x170c] sm:$0xf]  ;;  %v14076_v60 = vor.u32 %v17806_v53, %v14073_v16  ;;  %7119 = vmatpush.bf16.msra.mxu1 %v13820_v62 }
 0x368   :  { %v14329_v55 = vld [vmem:[#allocation2 + $0x1728] sm:$0xf0] }
 0x369   :  { %v17670_v61 = vld [vmem:[#allocation2 + $0x10cc] sm:$0xf]  ;;  %v14332_v2 = vor.u32 %v17870_v54, %v14329_v55  ;;  %7132 = vmatpush.bf16.msra.mxu2 %v14076_v60 }
 0x36a   :  { %v13529_v56 = vld [vmem:[#allocation2 + $0x10e8] sm:$0xf0] }
 0x36b   :  { %v17734_v63 = vld [vmem:[#allocation2 + $0x12cc] sm:$0xf]  ;;  %v13532_v9 = vor.u32 %v17670_v61, %v13529_v56  ;;  %7145 = vmatpush.bf16.msra.mxu3 %v14332_v2 }
 0x36c   :  { %v13785_v3 = vld [vmem:[#allocation2 + $0x12e8] sm:$0xf0] }
 0x36d   :  { %v17798_v4 = vld [vmem:[#allocation2 + $0x14cc] sm:$0xf]  ;;  %v13788_v10 = vor.u32 %v17734_v63, %v13785_v3  ;;  %7107 = vmatpush.bf16.msra.mxu0 %v13532_v9 }
 0x36e   :  { %v14041_v5 = vld [vmem:[#allocation2 + $0x14e8] sm:$0xf0] }
 0x36f   :  { %v17862_v6 = vld [vmem:[#allocation2 + $0x16cc] sm:$0xf]  ;;  %v14044_v11 = vor.u32 %v17798_v4, %v14041_v5  ;;  %7120 = vmatpush.bf16.msra.mxu1 %v13788_v10 }
 0x370   :  { %v14297_v7 = vld [vmem:[#allocation2 + $0x16e8] sm:$0xf0] }
 0x371   :  { %v17662_v12 = vld [vmem:[#allocation2 + $0x108c] sm:$0xf]  ;;  %v14300_v8 = vor.u32 %v17862_v6, %v14297_v7  ;;  %7133 = vmatpush.bf16.msra.mxu2 %v14044_v11  ;;  %v6893_v6 = vpop.f32.mrf.mxu3 }
 0x372   :  { %v13497_v14 = vld [vmem:[#allocation2 + $0x10a8] sm:$0xf0] }
 0x373   :  { %v17726_v15 = vld [vmem:[#allocation2 + $0x128c] sm:$0xf]  ;;  %v13500_v36 = vor.u32 %v17662_v12, %v13497_v14  ;;  %7146 = vmatpush.bf16.msra.mxu3 %v14300_v8 }
 0x374   :  { %v13753_v21 = vld [vmem:[#allocation2 + $0x12a8] sm:$0xf0] }
 0x375   :  { %v17790_v24 = vld [vmem:[#allocation2 + $0x148c] sm:$0xf]  ;;  %v13756_v45 = vor.u32 %v17726_v15, %v13753_v21  ;;  %7108 = vmatpush.bf16.msra.mxu0 %v13500_v36 }
 0x376   :  { %v14009_v26 = vld [vmem:[#allocation2 + $0x14a8] sm:$0xf0] }
 0x377   :  { %v17854_v37 = vld [vmem:[#allocation2 + $0x168c] sm:$0xf]  ;;  %v14012_v46 = vor.u32 %v17790_v24, %v14009_v26  ;;  %7121 = vmatpush.bf16.msra.mxu1 %v13756_v45 }
 0x378   :  { %v14265_v34 = vld [vmem:[#allocation2 + $0x16a8] sm:$0xf0] }
 0x379   :  { %v17654_v47 = vld [vmem:[#allocation2 + $0x104c] sm:$0xf]  ;;  %v14268_v51 = vor.u32 %v17854_v37, %v14265_v34  ;;  %7134 = vmatpush.bf16.msra.mxu2 %v14012_v46 }
 0x37a   :  { %v13465_v48 = vld [vmem:[#allocation2 + $0x1068] sm:$0xf0] }
 0x37b   :  { %v17718_v49 = vld [vmem:[#allocation2 + $0x124c] sm:$0xf]  ;;  %v13468_v58 = vor.u32 %v17654_v47, %v13465_v48  ;;  %7147 = vmatpush.bf16.msra.mxu3 %v14268_v51 }
 0x37c   :  { %v13721_v52 = vld [vmem:[#allocation2 + $0x1268] sm:$0xf0] }
 0x37d   :  { %v17782_v53 = vld [vmem:[#allocation2 + $0x144c] sm:$0xf]  ;;  %v13724_v60 = vor.u32 %v17718_v49, %v13721_v52  ;;  %7109 = vmatpush.bf16.msra.mxu0 %v13468_v58 }
 0x37e   :  { %v13977_v16 = vld [vmem:[#allocation2 + $0x1468] sm:$0xf0] }
 0x37f   :  { %v17846_v54 = vld [vmem:[#allocation2 + $0x164c] sm:$0xf]  ;;  %v13980_v61 = vor.u32 %v17782_v53, %v13977_v16  ;;  %7122 = vmatpush.bf16.msra.mxu1 %v13724_v60 }
 0x380   :  { %v14233_v55 = vld [vmem:[#allocation2 + $0x1668] sm:$0xf0] }
 0x381   :  { %v17646_v59 = vld [vmem:[#allocation2 + $0x100c] sm:$0xf]  ;;  %v14236_v2 = vor.u32 %v17846_v54, %v14233_v55  ;;  %7135 = vmatpush.bf16.msra.mxu2 %v13980_v61 }
 0x382   :  { %v13433_v62 = vld [vmem:[#allocation2 + $0x1028] sm:$0xf0] }
 0x383   :  { %v17710_v56 = vld [vmem:[#allocation2 + $0x120c] sm:$0xf]  ;;  %v13436_v10 = vor.u32 %v17646_v59, %v13433_v62  ;;  %7148 = vmatpush.bf16.msra.mxu3 %v14236_v2 }
 0x384   :  { %v13689_v63 = vld [vmem:[#allocation2 + $0x1228] sm:$0xf0] }
 0x385   :  { %v17774_v0 = vld [vmem:[#allocation2 + $0x140c] sm:$0xf]  ;;  %v13692_v15 = vor.u32 %v17710_v56, %v13689_v63  ;;  %7110 = vmatpush.bf16.msra.mxu0 %v13436_v10 }
 0x386   :  { %v13945_v3 = vld [vmem:[#allocation2 + $0x1428] sm:$0xf0] }
 0x387   :  { %v17838_v4 = vld [vmem:[#allocation2 + $0x160c] sm:$0xf]  ;;  %v13948_v17 = vor.u32 %v17774_v0, %v13945_v3  ;;  %7123 = vmatpush.bf16.msra.mxu1 %v13692_v15 }
 0x388   :  { %v14201_v5 = vld [vmem:[#allocation2 + $0x1628] sm:$0xf0]  ;;  %7111 = vmatmul.bf16.vlgmr.msra.gmra.mxu0 %v18928_v25 }
 0x389   :  { %v17958_v7 = vld [vmem:[#allocation2 + $0x19cc] sm:$0xf]  ;;  %v14204_v24 = vor.u32 %v17838_v4, %v14201_v5  ;;  %7136 = vmatpush.bf16.msra.mxu2 %v13948_v17 }
 0x38a   :  { %v14681_v13 = vld [vmem:[#allocation2 + $0x19e8] sm:$0xf0]  ;;  %7124 = vmatmul.bf16.vlgmr.msra.gmra.mxu1 %v18932_v30 }
 0x38b   :  { %v18022_v9 = vld [vmem:[#allocation2 + $0x1bcc] sm:$0xf]  ;;  %v14684_v26 = vor.u32 %v17958_v7, %v14681_v13  ;;  %7149 = vmatpush.bf16.msra.mxu3 %v14204_v24  ;;  %v6904_v13 = vpop.f32.mrf.mxu0 }
 0x38c   :  { %v14937_v11 = vld [vmem:[#allocation2 + $0x1be8] sm:$0xf0]  ;;  %7137 = vmatmul.bf16.vlgmr.msra.gmra.mxu2 %v18930_v29 }
 0x38d   :  { %v18086_v12 = vld [vmem:[#allocation2 + $0x1dcc] sm:$0xf]  ;;  %v14940_v27 = vor.u32 %v18022_v9, %v14937_v11  ;;  %7155 = vmatpush.bf16.msrb.mxu0 %v14684_v26  ;;  %v6905_v11 = vadd.f32 %v6904_v13, %v19023_v39 }
 0x38e   :  { %v15193_v14 = vld [vmem:[#allocation2 + $0x1de8] sm:$0xf0]  ;;  %7150 = vmatmul.bf16.vlgmr.msra.gmra.mxu3 %v18934_v33 }
 0x38f   :  { %v18150_v8 = vld [vmem:[#allocation2 + $0x1fcc] sm:$0xf]  ;;  %v15196_v32 = vor.u32 %v18086_v12, %v15193_v14  ;;  %7168 = vmatpush.bf16.msrb.mxu1 %v14940_v27  ;;  %v6917_v14 = vpop.f32.mrf.mxu1 }
 0x390   :  { %v15449_v21 = vld [vmem:[#allocation2 + $0x1fe8] sm:$0xf0]  ;;  %v6918_v27 = vadd.f32 %v6917_v14, %v6905_v11 }
 0x391   :  { %v17950_v37 = vld [vmem:[#allocation2 + $0x198c] sm:$0xf]  ;;  %v15452_v43 = vor.u32 %v18150_v8, %v15449_v21  ;;  %7181 = vmatpush.bf16.msrb.mxu2 %v15196_v32 }
 0x392   :  { %v14649_v34 = vld [vmem:[#allocation2 + $0x19a8] sm:$0xf0] }
 0x393   :  { %v18014_v36 = vld [vmem:[#allocation2 + $0x1b8c] sm:$0xf]  ;;  %v14652_v50 = vor.u32 %v17950_v37, %v14649_v34  ;;  %7194 = vmatpush.bf16.msrb.mxu3 %v15452_v43 }
 0x394   :  { %v14905_v45 = vld [vmem:[#allocation2 + $0x1ba8] sm:$0xf0] }
 0x395   :  { %v18078_v46 = vld [vmem:[#allocation2 + $0x1d8c] sm:$0xf]  ;;  %v14908_v51 = vor.u32 %v18014_v36, %v14905_v45  ;;  %7156 = vmatpush.bf16.msrb.mxu0 %v14652_v50 }
 0x396   :  { %v15161_v47 = vld [vmem:[#allocation2 + $0x1da8] sm:$0xf0] }
 0x397   :  { %v18142_v48 = vld [vmem:[#allocation2 + $0x1f8c] sm:$0xf]  ;;  %v15164_v52 = vor.u32 %v18078_v46, %v15161_v47  ;;  %7169 = vmatpush.bf16.msrb.mxu1 %v14908_v51  ;;  %v6930_v51 = vpop.f32.mrf.mxu2 }
 0x398   :  { %v15417_v49 = vld [vmem:[#allocation2 + $0x1fa8] sm:$0xf0] }
 0x399   :  { %v17942_v53 = vld [vmem:[#allocation2 + $0x194c] sm:$0xf]  ;;  %v15420_v55 = vor.u32 %v18142_v48, %v15417_v49  ;;  %7182 = vmatpush.bf16.msrb.mxu2 %v15164_v52 }
 0x39a   :  { %v14617_v16 = vld [vmem:[#allocation2 + $0x1968] sm:$0xf0] }
 0x39b   :  { %v18006_v54 = vld [vmem:[#allocation2 + $0x1b4c] sm:$0xf]  ;;  %v14620_v56 = vor.u32 %v17942_v53, %v14617_v16  ;;  %7195 = vmatpush.bf16.msrb.mxu3 %v15420_v55  ;;  %v6943_v55 = vpop.f32.mrf.mxu3 }
 0x39c   :  { %v14873_v58 = vld [vmem:[#allocation2 + $0x1b68] sm:$0xf0] }
 0x39d   :  { %v18070_v59 = vld [vmem:[#allocation2 + $0x1d4c] sm:$0xf]  ;;  %v14876_v63 = vor.u32 %v18006_v54, %v14873_v58  ;;  %7157 = vmatpush.bf16.msrb.mxu0 %v14620_v56  ;;  %v6931_v54 = vadd.f32 %v6930_v51, %v6918_v27  ;;  %v12383_v51 = vld [vmem:[#allocation2 + $0x7d0] sm:$0xf] }
 0x39e   :  { %v15129_v62 = vld [vmem:[#allocation2 + $0x1d68] sm:$0xf0] }
 0x39f   :  { %v18134_v60 = vld [vmem:[#allocation2 + $0x1f4c] sm:$0xf]  ;;  %v15132_v0 = vor.u32 %v18070_v59, %v15129_v62  ;;  %7170 = vmatpush.bf16.msrb.mxu1 %v14876_v63  ;;  %v6906_v62 = vpop.f32.mrf.mxu0  ;;  %v19030_v56 = vadd.f32 %v6943_v55, %v6931_v54 }
 0x3a0   :  { %v15385_v61 = vld [vmem:[#allocation2 + $0x1f68] sm:$0xf0]  ;;  %v11839_v62 = vld [vmem:[#allocation2 + $0x390] sm:$0xf] }
 0x3a1   :  { %v17934_v1 = vld [vmem:[#allocation2 + $0x190c] sm:$0xf]  ;;  %v15388_v4 = vor.u32 %v18134_v60, %v15385_v61  ;;  %7183 = vmatpush.bf16.msrb.mxu2 %v15132_v0  ;;  %v6919_v61 = vpop.f32.mrf.mxu1 }
 0x3a2   :  { %v14585_v2 = vld [vmem:[#allocation2 + $0x1928] sm:$0xf0]  ;;  %v17251_v61 = vld [vmem:[#allocation2 + $0x3ac] sm:$0xf0] }
 0x3a3   :  { %v17998_v3 = vld [vmem:[#allocation2 + $0x1b0c] sm:$0xf]  ;;  %v14588_v12 = vor.u32 %v17934_v1, %v14585_v2  ;;  %7196 = vmatpush.bf16.msrb.mxu3 %v15388_v4 }
 0x3a4   :  { %v14841_v5 = vld [vmem:[#allocation2 + $0x1b28] sm:$0xf0] }
 0x3a5   :  { %v18062_v6 = vld [vmem:[#allocation2 + $0x1d0c] sm:$0xf]  ;;  %v14844_v15 = vor.u32 %v17998_v3, %v14841_v5  ;;  %7158 = vmatpush.bf16.msrb.mxu0 %v14588_v12 }
 0x3a6   :  { %v15097_v7 = vld [vmem:[#allocation2 + $0x1d28] sm:$0xf0] }
 0x3a7   :  { %v18126_v9 = vld [vmem:[#allocation2 + $0x1f0c] sm:$0xf]  ;;  %v15100_v17 = vor.u32 %v18062_v6, %v15097_v7  ;;  %7171 = vmatpush.bf16.msrb.mxu1 %v14844_v15 }
 0x3a8   :  { %v15353_v10 = vld [vmem:[#allocation2 + $0x1f28] sm:$0xf0] }
 0x3a9   :  { %v17926_v8 = vld [vmem:[#allocation2 + $0x18cc] sm:$0xf]  ;;  %v15356_v26 = vor.u32 %v18126_v9, %v15353_v10  ;;  %7184 = vmatpush.bf16.msrb.mxu2 %v15100_v17 }
 0x3aa   :  { %v14553_v21 = vld [vmem:[#allocation2 + $0x18e8] sm:$0xf0] }
 0x3ab   :  { %v17990_v24 = vld [vmem:[#allocation2 + $0x1acc] sm:$0xf]  ;;  %v14556_v45 = vor.u32 %v17926_v8, %v14553_v21  ;;  %7197 = vmatpush.bf16.msrb.mxu3 %v15356_v26 }
 0x3ac   :  { %v14809_v32 = vld [vmem:[#allocation2 + $0x1ae8] sm:$0xf0] }
 0x3ad   :  { %v18054_v37 = vld [vmem:[#allocation2 + $0x1ccc] sm:$0xf]  ;;  %v14812_v39 = vor.u32 %v17990_v24, %v14809_v32  ;;  %7159 = vmatpush.bf16.msrb.mxu0 %v14556_v45  ;;  %v6945_v45 = vpop.f32.mrf.mxu3 }
 0x3ae   :  { %v15065_v34 = vld [vmem:[#allocation2 + $0x1ce8] sm:$0xf0]  ;;  %v12287_v45 = vld [vmem:[#allocation2 + $0x710] sm:$0xf] }
 0x3af   :  { %v18118_v36 = vld [vmem:[#allocation2 + $0x1ecc] sm:$0xf]  ;;  %v15068_v46 = vor.u32 %v18054_v37, %v15065_v34  ;;  %7172 = vmatpush.bf16.msrb.mxu1 %v14812_v39  ;;  %v6932_v37 = vpop.f32.mrf.mxu2  ;;  %v11615_v34 = vld [vmem:[#allocation2 + $0x1d0] sm:$0xf] }
 0x3b0   :  { %v15321_v43 = vld [vmem:[#allocation2 + $0x1ee8] sm:$0xf0]  ;;  %v17235_v37 = vld [vmem:[#allocation2 + $0x32c] sm:$0xf0] }
 0x3b1   :  { %v17918_v47 = vld [vmem:[#allocation2 + $0x188c] sm:$0xf]  ;;  %v15324_v50 = vor.u32 %v18118_v36, %v15321_v43  ;;  %7185 = vmatpush.bf16.msrb.mxu2 %v15068_v46  ;;  %v17195_v36 = vld [vmem:[#allocation2 + $0x1ec] sm:$0xf0] }
 0x3b2   :  { %v14521_v48 = vld [vmem:[#allocation2 + $0x18a8] sm:$0xf0]  ;;  %v11871_v43 = vld [vmem:[#allocation2 + $0x3d0] sm:$0xf] }
 0x3b3   :  { %v17982_v49 = vld [vmem:[#allocation2 + $0x1a8c] sm:$0xf]  ;;  %v14524_v60 = vor.u32 %v17918_v47, %v14521_v48  ;;  %7198 = vmatpush.bf16.msrb.mxu3 %v15324_v50  ;;  %v17259_v46 = vld [vmem:[#allocation2 + $0x3ec] sm:$0xf0] }
 0x3b4   :  { %v14777_v52 = vld [vmem:[#allocation2 + $0x1aa8] sm:$0xf0]  ;;  %v12127_v47 = vld [vmem:[#allocation2 + $0x5d0] sm:$0xf]  ;;  %v11872_v54 = vor.u32 %v17259_v46, %v11871_v43  ;;  %v6956_v43 = vpop.f32.mrf.mxu0 }
 0x3b5   :  { %v18046_v53 = vld [vmem:[#allocation2 + $0x1c8c] sm:$0xf]  ;;  %v14780_v63 = vor.u32 %v17982_v49, %v14777_v52  ;;  %7160 = vmatpush.bf16.msrb.mxu0 %v14524_v60  ;;  %v17323_v48 = vld [vmem:[#allocation2 + $0x5ec] sm:$0xf0]  ;;  %v6957_v46 = vadd.f32 %v6956_v43, %v19030_v56 }
 0x3b6   :  { %v15033_v16 = vld [vmem:[#allocation2 + $0x1ca8] sm:$0xf0]  ;;  %v17387_v52 = vld [vmem:[#allocation2 + $0x7ec] sm:$0xf0]  ;;  %v12128_v55 = vor.u32 %v17323_v48, %v12127_v47  ;;  %v6969_v48 = vpop.f32.mrf.mxu1 }
 0x3b7   :  { %v18110_v58 = vld [vmem:[#allocation2 + $0x1e8c] sm:$0xf]  ;;  %v15036_v0 = vor.u32 %v18046_v53, %v15033_v16  ;;  %7173 = vmatpush.bf16.msrb.mxu1 %v14780_v63  ;;  %v11616_v16 = vor.u32 %v17195_v36, %v11615_v34  ;;  %v12384_v60 = vor.u32 %v17387_v52, %v12383_v51  ;;  %v12095_v63 = vld [vmem:[#allocation2 + $0x590] sm:$0xf] }
 0x3b8   :  { %v15289_v59 = vld [vmem:[#allocation2 + $0x1ea8] sm:$0xf0]  ;;  %v12031_v34 = vld [vmem:[#allocation2 + $0x510] sm:$0xf] }
 0x3b9   :  { %v17910_v1 = vld [vmem:[#allocation2 + $0x184c] sm:$0xf]  ;;  %v15292_v4 = vor.u32 %v18110_v58, %v15289_v59  ;;  %7186 = vmatpush.bf16.msrb.mxu2 %v15036_v0  ;;  %v11583_v58 = vld [vmem:[#allocation2 + $0x190] sm:$0xf] }
 0x3ba   :  { %v14489_v2 = vld [vmem:[#allocation2 + $0x1868] sm:$0xf0]  ;;  %v17187_v59 = vld [vmem:[#allocation2 + $0x1ac] sm:$0xf0] }
 0x3bb   :  { %v17974_v3 = vld [vmem:[#allocation2 + $0x1a4c] sm:$0xf]  ;;  %v14492_v10 = vor.u32 %v17910_v1, %v14489_v2  ;;  %7199 = vmatpush.bf16.msrb.mxu3 %v15292_v4  ;;  %v17315_v0 = vld [vmem:[#allocation2 + $0x5ac] sm:$0xf0]  ;;  %v11840_v4 = vor.u32 %v17251_v61, %v11839_v62 }
 0x3bc   :  { %v14745_v5 = vld [vmem:[#allocation2 + $0x1a68] sm:$0xf0]  ;;  %v12351_v1 = vld [vmem:[#allocation2 + $0x790] sm:$0xf] }
 0x3bd   :  { %v18038_v6 = vld [vmem:[#allocation2 + $0x1c4c] sm:$0xf]  ;;  %v14748_v14 = vor.u32 %v17974_v3, %v14745_v5  ;;  %7161 = vmatpush.bf16.msrb.mxu0 %v14492_v10  ;;  %v17379_v2 = vld [vmem:[#allocation2 + $0x7ac] sm:$0xf0]  ;;  %v11584_v3 = vor.u32 %v17187_v59, %v11583_v58  ;;  %v12096_v5 = vor.u32 %v17315_v0, %v12095_v63 }
 0x3be   :  { %v15001_v7 = vld [vmem:[#allocation2 + $0x1c68] sm:$0xf0]  ;;  %v17243_v10 = vld [vmem:[#allocation2 + $0x36c] sm:$0xf0] }
 0x3bf   :  { %v18102_v13 = vld [vmem:[#allocation2 + $0x1e4c] sm:$0xf]  ;;  %v15004_v15 = vor.u32 %v18038_v6, %v15001_v7  ;;  %7174 = vmatpush.bf16.msrb.mxu1 %v14748_v14  ;;  %v11551_v6 = vld [vmem:[#allocation2 + $0x150] sm:$0xf] }
 0x3c0   :  { %v15257_v9 = vld [vmem:[#allocation2 + $0x1e68] sm:$0xf0]  ;;  %v17179_v7 = vld [vmem:[#allocation2 + $0x16c] sm:$0xf0] }
 0x3c1   :  { %v17902_v11 = vld [vmem:[#allocation2 + $0x180c] sm:$0xf]  ;;  %v15260_v24 = vor.u32 %v18102_v13, %v15257_v9  ;;  %7187 = vmatpush.bf16.msrb.mxu2 %v15004_v15  ;;  %v11807_v13 = vld [vmem:[#allocation2 + $0x350] sm:$0xf]  ;;  %v12352_v9 = vor.u32 %v17379_v2, %v12351_v1 }
 0x3c2   :  { %v14457_v12 = vld [vmem:[#allocation2 + $0x1828] sm:$0xf0]  ;;  %v12319_v14 = vld [vmem:[#allocation2 + $0x750] sm:$0xf] }
 0x3c3   :  { %v17966_v17 = vld [vmem:[#allocation2 + $0x1a0c] sm:$0xf]  ;;  %v14460_v39 = vor.u32 %v17902_v11, %v14457_v12  ;;  %7200 = vmatpush.bf16.msrb.mxu3 %v15260_v24  ;;  %v12063_v11 = vld [vmem:[#allocation2 + $0x550] sm:$0xf] }
 0x3c4   :  { %v14713_v8 = vld [vmem:[#allocation2 + $0x1a28] sm:$0xf0]  ;;  %v17307_v12 = vld [vmem:[#allocation2 + $0x56c] sm:$0xf0] }
 0x3c5   :  { %v18030_v21 = vld [vmem:[#allocation2 + $0x1c0c] sm:$0xf]  ;;  %v14716_v49 = vor.u32 %v17966_v17, %v14713_v8  ;;  %7162 = vmatpush.bf16.msrb.mxu0 %v14460_v39  ;;  %v17371_v15 = vld [vmem:[#allocation2 + $0x76c] sm:$0xf0]  ;;  %v11552_v17 = vor.u32 %v17179_v7, %v11551_v6  ;;  %v11808_v8 = vor.u32 %v17243_v10, %v11807_v13 }
 0x3c6   :  { %v14969_v26 = vld [vmem:[#allocation2 + $0x1c28] sm:$0xf0]  ;;  %v11519_v24 = vld [vmem:[#allocation2 + $0x110] sm:$0xf] }
 0x3c7   :  { %v18094_v27 = vld [vmem:[#allocation2 + $0x1e0c] sm:$0xf]  ;;  %v14972_v50 = vor.u32 %v18030_v21, %v14969_v26  ;;  %7175 = vmatpush.bf16.msrb.mxu1 %v14716_v49  ;;  %v12064_v21 = vor.u32 %v17307_v12, %v12063_v11  ;;  %v17171_v26 = vld [vmem:[#allocation2 + $0x12c] sm:$0xf0]  ;;  %v6958_v12 = vpop.f32.mrf.mxu0 }
 0x3c8   :  { %v15225_v32 = vld [vmem:[#allocation2 + $0x1e28] sm:$0xf0]  ;;  %7163 = vmatmul.bf16.vlgmr.msrb.gmra.mxu0 %v18946_v23  ;;  %v17299_v36 = vld [vmem:[#allocation2 + $0x52c] sm:$0xf0]  ;;  %v11520_v47 = vor.u32 %v17171_v26, %v11519_v24 }
 0x3c9   :  { %v15228_v53 = vor.u32 %v18094_v27, %v15225_v32  ;;  %7188 = vmatpush.bf16.msrb.mxu2 %v14972_v50  ;;  %7207 = vmatpush.bf16.msra.mxu0 %v11616_v16  ;;  %v11775_v27 = vld [vmem:[#allocation2 + $0x310] sm:$0xf]  ;;  %v12320_v32 = vor.u32 %v17371_v15, %v12319_v14  ;;  %v12032_v50 = vor.u32 %v17299_v36, %v12031_v34  ;;  %v6971_v15 = vpop.f32.mrf.mxu1 }
 0x3ca   :  { %7176 = vmatmul.bf16.vlgmr.msrb.gmra.mxu1 %v18950_v31  ;;  %v17363_v39 = vld [vmem:[#allocation2 + $0x72c] sm:$0xf0]  ;;  %v11776_v49 = vor.u32 %v17235_v37, %v11775_v27 }
 0x3cb   :  { %7201 = vmatpush.bf16.msrb.mxu3 %v15228_v53  ;;  %7220 = vmatpush.bf16.msra.mxu1 %v11872_v54  ;;  %v11487_v51 = vld [vmem:[#allocation2 + $0xd0] sm:$0xf]  ;;  %v12288_v16 = vor.u32 %v17363_v39, %v12287_v45  ;;  %v6970_v54 = vadd.f32 %v6969_v48, %v6957_v46 }
 0x3cc   :  { %7189 = vmatmul.bf16.vlgmr.msrb.gmra.mxu2 %v18948_v28  ;;  %v17163_v52 = vld [vmem:[#allocation2 + $0xec] sm:$0xf0] }
 0x3cd   :  { %7233 = vmatpush.bf16.msra.mxu2 %v12128_v55  ;;  %7208 = vmatpush.bf16.msra.mxu0 %v11584_v3  ;;  %v11743_v53 = vld [vmem:[#allocation2 + $0x2d0] sm:$0xf]  ;;  %v11488_v61 = vor.u32 %v17163_v52, %v11487_v51 }
 0x3ce   :  { %7202 = vmatmul.bf16.vlgmr.msrb.gmra.mxu3 %v18952_v35  ;;  %v17227_v55 = vld [vmem:[#allocation2 + $0x2ec] sm:$0xf0] }
 0x3cf   :  { %7246 = vmatpush.bf16.msra.mxu3 %v12384_v60  ;;  %7221 = vmatpush.bf16.msra.mxu1 %v11840_v4  ;;  %v11999_v58 = vld [vmem:[#allocation2 + $0x4d0] sm:$0xf]  ;;  %v11744_v56 = vor.u32 %v17227_v55, %v11743_v53  ;;  %v6982_v4 = vpop.f32.mrf.mxu2 }
 0x3d0   :  { %v17291_v59 = vld [vmem:[#allocation2 + $0x4ec] sm:$0xf0]  ;;  %v6983_v13 = vadd.f32 %v6982_v4, %v6970_v54 }
 0x3d1   :  { %7234 = vmatpush.bf16.msra.mxu2 %v12096_v5  ;;  %7209 = vmatpush.bf16.msra.mxu0 %v11552_v17  ;;  %v12255_v62 = vld [vmem:[#allocation2 + $0x6d0] sm:$0xf]  ;;  %v12000_v63 = vor.u32 %v17291_v59, %v11999_v58 }
 0x3d2   :  { %v17355_v60 = vld [vmem:[#allocation2 + $0x6ec] sm:$0xf0] }
 0x3d3   :  { %7247 = vmatpush.bf16.msra.mxu3 %v12352_v9  ;;  %7222 = vmatpush.bf16.msra.mxu1 %v11808_v8  ;;  %v11455_v0 = vld [vmem:[#allocation2 + $0x90] sm:$0xf]  ;;  %v12256_v3 = vor.u32 %v17355_v60, %v12255_v62  ;;  %v6995_v9 = vpop.f32.mrf.mxu3 }
 0x3d4   :  { %v17155_v1 = vld [vmem:[#allocation2 + $0xac] sm:$0xf0]  ;;  %v19037_v17 = vadd.f32 %v6995_v9, %v6983_v13 }
 0x3d5   :  { %7235 = vmatpush.bf16.msra.mxu2 %v12064_v21  ;;  %7210 = vmatpush.bf16.msra.mxu0 %v11520_v47  ;;  %v11711_v2 = vld [vmem:[#allocation2 + $0x290] sm:$0xf]  ;;  %v11456_v14 = vor.u32 %v17155_v1, %v11455_v0 }
 0x3d6   :  { %v17219_v5 = vld [vmem:[#allocation2 + $0x2ac] sm:$0xf0]  ;;  %vm8041_vm2 = vcmp.gt.f32.partialorder %v19037_v17, 0.0 }
 0x3d7   :  { %7248 = vmatpush.bf16.msra.mxu3 %v12320_v32  ;;  %7223 = vmatpush.bf16.msra.mxu1 %v11776_v49  ;;  %v11967_v6 = vld [vmem:[#allocation2 + $0x490] sm:$0xf]  ;;  %v11712_v8 = vor.u32 %v17219_v5, %v11711_v2  ;;  %v6984_v58 = vpop.f32.mrf.mxu2 }
 0x3d8   :  { %v17283_v7 = vld [vmem:[#allocation2 + $0x4ac] sm:$0xf0] }
 0x3d9   :  { %7236 = vmatpush.bf16.msra.mxu2 %v12032_v50  ;;  %v12223_v10 = vld [vmem:[#allocation2 + $0x690] sm:$0xf]  ;;  %7211 = vmatpush.bf16.msra.mxu0 %v11488_v61  ;;  %v11968_v21 = vor.u32 %v17283_v7, %v11967_v6 }
 0x3da   :  { %v17347_v11 = vld [vmem:[#allocation2 + $0x6ac] sm:$0xf0] }
 0x3db   :  { %7249 = vmatpush.bf16.msra.mxu3 %v12288_v16  ;;  %7224 = vmatpush.bf16.msra.mxu1 %v11744_v56  ;;  %v11423_v24 = vld [vmem:[#allocation2 + $0x50] sm:$0xf]  ;;  %v12224_v32 = vor.u32 %v17347_v11, %v12223_v10  ;;  %v6997_v61 = vpop.f32.mrf.mxu3 }
 0x3dc   :  { %v17147_v26 = vld [vmem:[#allocation2 + $0x6c] sm:$0xf0] }
 0x3dd   :  { %7237 = vmatpush.bf16.msra.mxu2 %v12000_v63  ;;  %v11679_v27 = vld [vmem:[#allocation2 + $0x250] sm:$0xf]  ;;  %7212 = vmatpush.bf16.msra.mxu0 %v11456_v14  ;;  %v11424_v39 = vor.u32 %v17147_v26, %v11423_v24 }
 0x3de   :  { %v17211_v37 = vld [vmem:[#allocation2 + $0x26c] sm:$0xf0] }
 0x3df   :  { %7250 = vmatpush.bf16.msra.mxu3 %v12256_v3  ;;  %v11935_v34 = vld [vmem:[#allocation2 + $0x450] sm:$0xf]  ;;  %7225 = vmatpush.bf16.msra.mxu1 %v11712_v8  ;;  %v11680_v48 = vor.u32 %v17211_v37, %v11679_v27 }
 0x3e0   :  { %v17275_v36 = vld [vmem:[#allocation2 + $0x46c] sm:$0xf0] }
 0x3e1   :  { %v12191_v43 = vld [vmem:[#allocation2 + $0x650] sm:$0xf]  ;;  %7238 = vmatpush.bf16.msra.mxu2 %v11968_v21  ;;  %v11936_v49 = vor.u32 %v17275_v36, %v11935_v34  ;;  %7213 = vmatpush.bf16.msra.mxu0 %v11424_v39 }
 0x3e2   :  { %v17339_v45 = vld [vmem:[#allocation2 + $0x66c] sm:$0xf0] }
 0x3e3   :  { %v11391_v46 = vld [vmem:[#allocation2 + $0x10] sm:$0xf]  ;;  %7251 = vmatpush.bf16.msra.mxu3 %v12224_v32  ;;  %v12192_v53 = vor.u32 %v17339_v45, %v12191_v43  ;;  %7226 = vmatpush.bf16.msra.mxu1 %v11680_v48 }
 0x3e4   :  { %v17139_v47 = vld [vmem:[#allocation2 + $0x2c] sm:$0xf0] }
 0x3e5   :  { %v11647_v50 = vld [vmem:[#allocation2 + $0x210] sm:$0xf]  ;;  %v11392_v56 = vor.u32 %v17139_v47, %v11391_v46  ;;  %7239 = vmatpush.bf16.msra.mxu2 %v11936_v49 }
 0x3e6   :  { %v17203_v51 = vld [vmem:[#allocation2 + $0x22c] sm:$0xf0] }
 0x3e7   :  { %v11903_v52 = vld [vmem:[#allocation2 + $0x410] sm:$0xf]  ;;  %v11648_v2 = vor.u32 %v17203_v51, %v11647_v50  ;;  %7252 = vmatpush.bf16.msra.mxu3 %v12192_v53  ;;  %7214 = vmatpush.bf16.msra.mxu0 %v11392_v56 }
 0x3e8   :  { %v17267_v16 = vld [vmem:[#allocation2 + $0x42c] sm:$0xf0] }
 0x3e9   :  { %v12159_v54 = vld [vmem:[#allocation2 + $0x610] sm:$0xf]  ;;  %v11904_v3 = vor.u32 %v17267_v16, %v11903_v52  ;;  %7227 = vmatpush.bf16.msra.mxu1 %v11648_v2 }
 0x3ea   :  { %v17331_v55 = vld [vmem:[#allocation2 + $0x62c] sm:$0xf0]  ;;  %7215 = vmatmul.bf16.vlgmr.msra.gmra.mxu0 %v18894_v19 }
 0x3eb   :  { %v12639_v59 = vld [vmem:[#allocation2 + $0x9d0] sm:$0xf]  ;;  %v12160_v6 = vor.u32 %v17331_v55, %v12159_v54  ;;  %7240 = vmatpush.bf16.msra.mxu2 %v11904_v3  ;;  %v18590_v55 = vld [vmem:[#allocation4] sm:$0xff] }
 0x3ec   :  { %v17451_v62 = vld [vmem:[#allocation2 + $0x9ec] sm:$0xf0]  ;;  %7228 = vmatmul.bf16.vlgmr.msra.gmra.mxu1 %v18898_v22  ;;  %v1186_v58 = vperm.slane %v18590_v55, 3 }
 0x3ed   :  { %v12895_v60 = vld [vmem:[#allocation2 + $0xbd0] sm:$0xf]  ;;  %v12640_v7 = vor.u32 %v17451_v62, %v12639_v59  ;;  %7253 = vmatpush.bf16.msra.mxu3 %v12160_v6 }
 0x3ee   :  { %v17515_v63 = vld [vmem:[#allocation2 + $0xbec] sm:$0xf0]  ;;  %7241 = vmatmul.bf16.vlgmr.msra.gmra.mxu2 %v18892_v18 }
 0x3ef   :  { %v13151_v0 = vld [vmem:[#allocation2 + $0xdd0] sm:$0xf]  ;;  %v12896_v13 = vor.u32 %v17515_v63, %v12895_v60  ;;  %7259 = vmatpush.bf16.msrb.mxu0 %v12640_v7 }
 0x3f0   :  { %v17579_v1 = vld [vmem:[#allocation2 + $0xdec] sm:$0xf0]  ;;  %7254 = vmatmul.bf16.vlgmr.msra.gmra.mxu3 %v18896_v20 }
 0x3f1   :  { %v13407_v4 = vld [vmem:[#allocation2 + $0xfd0] sm:$0xf]  ;;  %v13152_v9 = vor.u32 %v17579_v1, %v13151_v0  ;;  %7272 = vmatpush.bf16.msrb.mxu1 %v12896_v13  ;;  %v7008_v1 = vpop.f32.mrf.mxu0  ;;  %v7021_v13 = vpop.f32.mrf.mxu1 }
 0x3f2   :  { %v17643_v5 = vld [vmem:[#allocation2 + $0xfec] sm:$0xf0]  ;;  %v7009_v7 = vadd.f32 %v7008_v1, %v1186_v58 }
 0x3f3   :  { %v12607_v10 = vld [vmem:[#allocation2 + $0x990] sm:$0xf]  ;;  %v13408_v14 = vor.u32 %v17643_v5, %v13407_v4  ;;  %7285 = vmatpush.bf16.msrb.mxu2 %v13152_v9 }
 0x3f4   :  { %v17443_v11 = vld [vmem:[#allocation2 + $0x9ac] sm:$0xf0] }
 0x3f5   :  { %v12863_v12 = vld [vmem:[#allocation2 + $0xb90] sm:$0xf]  ;;  %v12608_v27 = vor.u32 %v17443_v11, %v12607_v10  ;;  %7298 = vmatpush.bf16.msrb.mxu3 %v13408_v14 }
 0x3f6   :  { %v17507_v15 = vld [vmem:[#allocation2 + $0xbac] sm:$0xf0] }
 0x3f7   :  { %v13119_v8 = vld [vmem:[#allocation2 + $0xd90] sm:$0xf]  ;;  %v12864_v32 = vor.u32 %v17507_v15, %v12863_v12  ;;  %7260 = vmatpush.bf16.msrb.mxu0 %v12608_v27 }
 0x3f8   :  { %v17571_v21 = vld [vmem:[#allocation2 + $0xdac] sm:$0xf0] }
 0x3f9   :  { %v13375_v24 = vld [vmem:[#allocation2 + $0xf90] sm:$0xf]  ;;  %v13120_v37 = vor.u32 %v17571_v21, %v13119_v8  ;;  %7273 = vmatpush.bf16.msrb.mxu1 %v12864_v32  ;;  %v7022_v8 = vadd.f32 %v7021_v13, %v7009_v7 }
 0x3fa   :  { %v17635_v26 = vld [vmem:[#allocation2 + $0xfac] sm:$0xf0] }
 0x3fb   :  { %v12575_v34 = vld [vmem:[#allocation2 + $0x950] sm:$0xf]  ;;  %v13376_v45 = vor.u32 %v17635_v26, %v13375_v24  ;;  %7286 = vmatpush.bf16.msrb.mxu2 %v13120_v37 }
 0x3fc   :  { %v17435_v36 = vld [vmem:[#allocation2 + $0x96c] sm:$0xf0] }
 0x3fd   :  { %v12831_v43 = vld [vmem:[#allocation2 + $0xb50] sm:$0xf]  ;;  %v12576_v50 = vor.u32 %v17435_v36, %v12575_v34  ;;  %7299 = vmatpush.bf16.msrb.mxu3 %v13376_v45  ;;  %v7034_v34 = vpop.f32.mrf.mxu2 }
 0x3fe   :  { %v17499_v39 = vld [vmem:[#allocation2 + $0xb6c] sm:$0xf0] }
 0x3ff   :  { %v13087_v46 = vld [vmem:[#allocation2 + $0xd50] sm:$0xf]  ;;  %v12832_v52 = vor.u32 %v17499_v39, %v12831_v43  ;;  %7261 = vmatpush.bf16.msrb.mxu0 %v12576_v50 }
 0x400   :  { %v17563_v47 = vld [vmem:[#allocation2 + $0xd6c] sm:$0xf0] }
 0x401   :  { %v13343_v48 = vld [vmem:[#allocation2 + $0xf50] sm:$0xf]  ;;  %v13088_v53 = vor.u32 %v17563_v47, %v13087_v46  ;;  %7274 = vmatpush.bf16.msrb.mxu1 %v12832_v52  ;;  %v7035_v46 = vadd.f32 %v7034_v34, %v7022_v8  ;;  %v7047_v47 = vpop.f32.mrf.mxu3  ;;  %v7010_v52 = vpop.f32.mrf.mxu0 }
 0x402   :  { %v17627_v49 = vld [vmem:[#allocation2 + $0xf6c] sm:$0xf0] }
 0x403   :  { %v12543_v51 = vld [vmem:[#allocation2 + $0x910] sm:$0xf]  ;;  %v13344_v59 = vor.u32 %v17627_v49, %v13343_v48  ;;  %7287 = vmatpush.bf16.msrb.mxu2 %v13088_v53 }
 0x404   :  { %v17427_v16 = vld [vmem:[#allocation2 + $0x92c] sm:$0xf0] }
 0x405   :  { %v12799_v54 = vld [vmem:[#allocation2 + $0xb10] sm:$0xf]  ;;  %v12544_v0 = vor.u32 %v17427_v16, %v12543_v51  ;;  %7300 = vmatpush.bf16.msrb.mxu3 %v13344_v59  ;;  %v19043_v51 = vadd.f32 %v7047_v47, %v7035_v46  ;;  %v7023_v59 = vpop.f32.mrf.mxu1 }
 0x406   :  { %v17491_v62 = vld [vmem:[#allocation2 + $0xb2c] sm:$0xf0] }
 0x407   :  { %v13055_v60 = vld [vmem:[#allocation2 + $0xd10] sm:$0xf]  ;;  %v12800_v2 = vor.u32 %v17491_v62, %v12799_v54  ;;  %7262 = vmatpush.bf16.msrb.mxu0 %v12544_v0 }
 0x408   :  { %v17555_v61 = vld [vmem:[#allocation2 + $0xd2c] sm:$0xf0] }
 0x409   :  { %v13311_v56 = vld [vmem:[#allocation2 + $0xf10] sm:$0xf]  ;;  %v13056_v3 = vor.u32 %v17555_v61, %v13055_v60  ;;  %7275 = vmatpush.bf16.msrb.mxu1 %v12800_v2 }
 0x40a   :  { %v17619_v63 = vld [vmem:[#allocation2 + $0xf2c] sm:$0xf0] }
 0x40b   :  { %v12511_v4 = vld [vmem:[#allocation2 + $0x8d0] sm:$0xf]  ;;  %v13312_v9 = vor.u32 %v17619_v63, %v13311_v56  ;;  %7288 = vmatpush.bf16.msrb.mxu2 %v13056_v3 }
 0x40c   :  { %v17419_v5 = vld [vmem:[#allocation2 + $0x8ec] sm:$0xf0] }
 0x40d   :  { %v12767_v6 = vld [vmem:[#allocation2 + $0xad0] sm:$0xf]  ;;  %v12512_v21 = vor.u32 %v17419_v5, %v12511_v4  ;;  %7301 = vmatpush.bf16.msrb.mxu3 %v13312_v9  ;;  %v7036_v9 = vpop.f32.mrf.mxu2 }
 0x40e   :  { %v17483_v10 = vld [vmem:[#allocation2 + $0xaec] sm:$0xf0] }
 0x40f   :  { %v13023_v11 = vld [vmem:[#allocation2 + $0xcd0] sm:$0xf]  ;;  %v12768_v24 = vor.u32 %v17483_v10, %v12767_v6  ;;  %7263 = vmatpush.bf16.msrb.mxu0 %v12512_v21 }
 0x410   :  { %v17547_v12 = vld [vmem:[#allocation2 + $0xcec] sm:$0xf0] }
 0x411   :  { %v13279_v14 = vld [vmem:[#allocation2 + $0xed0] sm:$0xf]  ;;  %v13024_v26 = vor.u32 %v17547_v12, %v13023_v11  ;;  %7276 = vmatpush.bf16.msrb.mxu1 %v12768_v24 }
 0x412   :  { %v17611_v15 = vld [vmem:[#allocation2 + $0xeec] sm:$0xf0] }
 0x413   :  { %v12479_v27 = vld [vmem:[#allocation2 + $0x890] sm:$0xf]  ;;  %v13280_v36 = vor.u32 %v17611_v15, %v13279_v14  ;;  %7289 = vmatpush.bf16.msrb.mxu2 %v13024_v26  ;;  %v7049_v15 = vpop.f32.mrf.mxu3 }
 0x414   :  { %v17411_v32 = vld [vmem:[#allocation2 + $0x8ac] sm:$0xf0] }
 0x415   :  { %v12735_v37 = vld [vmem:[#allocation2 + $0xa90] sm:$0xf]  ;;  %v12480_v50 = vor.u32 %v17411_v32, %v12479_v27  ;;  %7302 = vmatpush.bf16.msrb.mxu3 %v13280_v36 }
 0x416   :  { %v17475_v43 = vld [vmem:[#allocation2 + $0xaac] sm:$0xf0] }
 0x417   :  { %v12991_v45 = vld [vmem:[#allocation2 + $0xc90] sm:$0xf]  ;;  %v12736_v53 = vor.u32 %v17475_v43, %v12735_v37  ;;  %7264 = vmatpush.bf16.msrb.mxu0 %v12480_v50 }
 0x418   :  { %v17539_v39 = vld [vmem:[#allocation2 + $0xcac] sm:$0xf0] }
 0x419   :  { %v13247_v48 = vld [vmem:[#allocation2 + $0xe90] sm:$0xf]  ;;  %v12992_v16 = vor.u32 %v17539_v39, %v12991_v45  ;;  %7277 = vmatpush.bf16.msrb.mxu1 %v12736_v53 }
 0x41a   :  { %v17603_v49 = vld [vmem:[#allocation2 + $0xeac] sm:$0xf0] }
 0x41b   :  { %v12447_v54 = vld [vmem:[#allocation2 + $0x850] sm:$0xf]  ;;  %v13248_v62 = vor.u32 %v17603_v49, %v13247_v48  ;;  %7290 = vmatpush.bf16.msrb.mxu2 %v12992_v16 }
 0x41c   :  { %v17403_v55 = vld [vmem:[#allocation2 + $0x86c] sm:$0xf0] }
 0x41d   :  { %v12703_v58 = vld [vmem:[#allocation2 + $0xa50] sm:$0xf]  ;;  %v12448_v1 = vor.u32 %v17403_v55, %v12447_v54  ;;  %7303 = vmatpush.bf16.msrb.mxu3 %v13248_v62 }
 0x41e   :  { %v17467_v60 = vld [vmem:[#allocation2 + $0xa6c] sm:$0xf0] }
 0x41f   :  { %v12959_v61 = vld [vmem:[#allocation2 + $0xc50] sm:$0xf]  ;;  %v12704_v4 = vor.u32 %v17467_v60, %v12703_v58  ;;  %7265 = vmatpush.bf16.msrb.mxu0 %v12448_v1 }
 0x420   :  { %v17531_v56 = vld [vmem:[#allocation2 + $0xc6c] sm:$0xf0] }
 0x421   :  { %v13215_v63 = vld [vmem:[#allocation2 + $0xe50] sm:$0xf]  ;;  %v12960_v5 = vor.u32 %v17531_v56, %v12959_v61  ;;  %7278 = vmatpush.bf16.msrb.mxu1 %v12704_v4 }
 0x422   :  { %v17595_v0 = vld [vmem:[#allocation2 + $0xe6c] sm:$0xf0] }
 0x423   :  { %v12415_v2 = vld [vmem:[#allocation2 + $0x810] sm:$0xf]  ;;  %v13216_v10 = vor.u32 %v17595_v0, %v13215_v63  ;;  %7291 = vmatpush.bf16.msrb.mxu2 %v12960_v5 }
 0x424   :  { %v17395_v3 = vld [vmem:[#allocation2 + $0x82c] sm:$0xf0] }
 0x425   :  { %v12671_v6 = vld [vmem:[#allocation2 + $0xa10] sm:$0xf]  ;;  %v12416_v26 = vor.u32 %v17395_v3, %v12415_v2  ;;  %7304 = vmatpush.bf16.msrb.mxu3 %v13216_v10 }
 0x426   :  { %v17459_v7 = vld [vmem:[#allocation2 + $0xa2c] sm:$0xf0] }
 0x427   :  { %v12927_v13 = vld [vmem:[#allocation2 + $0xc10] sm:$0xf]  ;;  %v12672_v34 = vor.u32 %v17459_v7, %v12671_v6  ;;  %7266 = vmatpush.bf16.msrb.mxu0 %v12416_v26 }
 0x428   :  { %v17523_v11 = vld [vmem:[#allocation2 + $0xc2c] sm:$0xf0] }
 0x429   :  { %v13183_v12 = vld [vmem:[#allocation2 + $0xe10] sm:$0xf]  ;;  %v12928_v36 = vor.u32 %v17523_v11, %v12927_v13  ;;  %7279 = vmatpush.bf16.msrb.mxu1 %v12672_v34 }
 0x42a   :  { %v17587_v14 = vld [vmem:[#allocation2 + $0xe2c] sm:$0xf0]  ;;  %7267 = vmatmul.bf16.vlgmr.msrb.gmra.mxu0 %v18912_v41 }
 0x42b   :  { %v13663_v8 = vld [vmem:[#allocation2 + $0x11d0] sm:$0xf]  ;;  %v13184_v39 = vor.u32 %v17587_v14, %v13183_v12  ;;  %7292 = vmatpush.bf16.msrb.mxu2 %v12928_v36 }
 0x42c   :  { %v17707_v21 = vld [vmem:[#allocation2 + $0x11ec] sm:$0xf0]  ;;  %7280 = vmatmul.bf16.vlgmr.msrb.gmra.mxu1 %v18916_v44 }
 0x42d   :  { %v13919_v24 = vld [vmem:[#allocation2 + $0x13d0] sm:$0xf]  ;;  %v13664_v46 = vor.u32 %v17707_v21, %v13663_v8  ;;  %7305 = vmatpush.bf16.msrb.mxu3 %v13184_v39 }
 0x42e   :  { %v17771_v27 = vld [vmem:[#allocation2 + $0x13ec] sm:$0xf0]  ;;  %7293 = vmatmul.bf16.vlgmr.msrb.gmra.mxu2 %v18910_v38 }
 0x42f   :  { %v14175_v32 = vld [vmem:[#allocation2 + $0x15d0] sm:$0xf]  ;;  %v13920_v47 = vor.u32 %v17771_v27, %v13919_v24  ;;  %7311 = vmatpush.bf16.msra.mxu0 %v13664_v46  ;;  %v7073_v46 = vpop.f32.mrf.mxu1 }
 0x430   :  { %v17835_v37 = vld [vmem:[#allocation2 + $0x15ec] sm:$0xf0]  ;;  %7306 = vmatmul.bf16.vlgmr.msrb.gmra.mxu3 %v18914_v42 }
 0x431   :  { %v14431_v43 = vld [vmem:[#allocation2 + $0x17d0] sm:$0xf]  ;;  %v14176_v48 = vor.u32 %v17835_v37, %v14175_v32  ;;  %7324 = vmatpush.bf16.msra.mxu1 %v13920_v47  ;;  %v7060_v32 = vpop.f32.mrf.mxu0 }
 0x432   :  { %v17899_v45 = vld [vmem:[#allocation2 + $0x17ec] sm:$0xf0]  ;;  %v7061_v39 = vadd.f32 %v7060_v32, %v19043_v51 }
 0x433   :  { %v13631_v49 = vld [vmem:[#allocation2 + $0x1190] sm:$0xf]  ;;  %v14432_v53 = vor.u32 %v17899_v45, %v14431_v43  ;;  %7337 = vmatpush.bf16.msra.mxu2 %v14176_v48 }
 0x434   :  { %v17699_v50 = vld [vmem:[#allocation2 + $0x11ac] sm:$0xf0] }
 0x435   :  { %v13887_v52 = vld [vmem:[#allocation2 + $0x1390] sm:$0xf]  ;;  %v13632_v62 = vor.u32 %v17699_v50, %v13631_v49  ;;  %7350 = vmatpush.bf16.msra.mxu3 %v14432_v53 }
 0x436   :  { %v17763_v16 = vld [vmem:[#allocation2 + $0x13ac] sm:$0xf0] }
 0x437   :  { %v14143_v54 = vld [vmem:[#allocation2 + $0x1590] sm:$0xf]  ;;  %v13888_v60 = vor.u32 %v17763_v16, %v13887_v52  ;;  %7312 = vmatpush.bf16.msra.mxu0 %v13632_v62  ;;  %v7074_v16 = vadd.f32 %v7073_v46, %v7061_v39 }
 0x438   :  { %v17827_v55 = vld [vmem:[#allocation2 + $0x15ac] sm:$0xf0] }
 0x439   :  { %v14399_v58 = vld [vmem:[#allocation2 + $0x1790] sm:$0xf]  ;;  %v14144_v61 = vor.u32 %v17827_v55, %v14143_v54  ;;  %7325 = vmatpush.bf16.msra.mxu1 %v13888_v60 }
 0x43a   :  { %v17891_v59 = vld [vmem:[#allocation2 + $0x17ac] sm:$0xf0] }
 0x43b   :  { %v13599_v56 = vld [vmem:[#allocation2 + $0x1150] sm:$0xf]  ;;  %v14400_v1 = vor.u32 %v17891_v59, %v14399_v58  ;;  %7338 = vmatpush.bf16.msra.mxu2 %v14144_v61  ;;  %v7086_v61 = vpop.f32.mrf.mxu2 }
 0x43c   :  { %v17691_v63 = vld [vmem:[#allocation2 + $0x116c] sm:$0xf0] }
 0x43d   :  { %v13855_v0 = vld [vmem:[#allocation2 + $0x1350] sm:$0xf]  ;;  %v13600_v7 = vor.u32 %v17691_v63, %v13599_v56  ;;  %7351 = vmatpush.bf16.msra.mxu3 %v14400_v1  ;;  %v7087_v1 = vadd.f32 %v7086_v61, %v7074_v16 }
 0x43e   :  { %v17755_v2 = vld [vmem:[#allocation2 + $0x136c] sm:$0xf0] }
 0x43f   :  { %v14111_v3 = vld [vmem:[#allocation2 + $0x1550] sm:$0xf]  ;;  %v13856_v13 = vor.u32 %v17755_v2, %v13855_v0  ;;  %7313 = vmatpush.bf16.msra.mxu0 %v13600_v7  ;;  %v7099_v2 = vpop.f32.mrf.mxu3  ;;  %v7062_v7 = vpop.f32.mrf.mxu0 }
 0x440   :  { %v17819_v4 = vld [vmem:[#allocation2 + $0x156c] sm:$0xf0] }
 0x441   :  { %v14367_v5 = vld [vmem:[#allocation2 + $0x1750] sm:$0xf]  ;;  %v14112_v9 = vor.u32 %v17819_v4, %v14111_v3  ;;  %7326 = vmatpush.bf16.msra.mxu1 %v13856_v13 }
 0x442   :  { %v17883_v6 = vld [vmem:[#allocation2 + $0x176c] sm:$0xf0] }
 0x443   :  { %v13567_v10 = vld [vmem:[#allocation2 + $0x1110] sm:$0xf]  ;;  %v14368_v14 = vor.u32 %v17883_v6, %v14367_v5  ;;  %7339 = vmatpush.bf16.msra.mxu2 %v14112_v9  ;;  %v19050_v6 = vadd.f32 %v7099_v2, %v7087_v1 }
 0x444   :  { %v17683_v11 = vld [vmem:[#allocation2 + $0x112c] sm:$0xf0] }
 0x445   :  { %v13823_v12 = vld [vmem:[#allocation2 + $0x1310] sm:$0xf]  ;;  %v13568_v27 = vor.u32 %v17683_v11, %v13567_v10  ;;  %7352 = vmatpush.bf16.msra.mxu3 %v14368_v14  ;;  %v7075_v14 = vpop.f32.mrf.mxu1 }
 0x446   :  { %v17747_v15 = vld [vmem:[#allocation2 + $0x132c] sm:$0xf0] }
 0x447   :  { %v14079_v8 = vld [vmem:[#allocation2 + $0x1510] sm:$0xf]  ;;  %v13824_v37 = vor.u32 %v17747_v15, %v13823_v12  ;;  %7314 = vmatpush.bf16.msra.mxu0 %v13568_v27 }
 0x448   :  { %v17811_v21 = vld [vmem:[#allocation2 + $0x152c] sm:$0xf0] }
 0x449   :  { %v14335_v24 = vld [vmem:[#allocation2 + $0x1710] sm:$0xf]  ;;  %v14080_v34 = vor.u32 %v17811_v21, %v14079_v8  ;;  %7327 = vmatpush.bf16.msra.mxu1 %v13824_v37 }
 0x44a   :  { %v17875_v26 = vld [vmem:[#allocation2 + $0x172c] sm:$0xf0] }
 0x44b   :  { %v13535_v36 = vld [vmem:[#allocation2 + $0x10d0] sm:$0xf]  ;;  %v14336_v47 = vor.u32 %v17875_v26, %v14335_v24  ;;  %7340 = vmatpush.bf16.msra.mxu2 %v14080_v34 }
 0x44c   :  { %v17675_v43 = vld [vmem:[#allocation2 + $0x10ec] sm:$0xf0] }
 0x44d   :  { %v13791_v45 = vld [vmem:[#allocation2 + $0x12d0] sm:$0xf]  ;;  %v13536_v54 = vor.u32 %v17675_v43, %v13535_v36  ;;  %7353 = vmatpush.bf16.msra.mxu3 %v14336_v47  ;;  %v7088_v47 = vpop.f32.mrf.mxu2 }
 0x44e   :  { %v17739_v48 = vld [vmem:[#allocation2 + $0x12ec] sm:$0xf0] }
 0x44f   :  { %v14047_v49 = vld [vmem:[#allocation2 + $0x14d0] sm:$0xf]  ;;  %v13792_v55 = vor.u32 %v17739_v48, %v13791_v45  ;;  %7315 = vmatpush.bf16.msra.mxu0 %v13536_v54 }
 0x450   :  { %v17803_v50 = vld [vmem:[#allocation2 + $0x14ec] sm:$0xf0] }
 0x451   :  { %v14303_v52 = vld [vmem:[#allocation2 + $0x16d0] sm:$0xf]  ;;  %v14048_v58 = vor.u32 %v17803_v50, %v14047_v49  ;;  %7328 = vmatpush.bf16.msra.mxu1 %v13792_v55 }
 0x452   :  { %v17867_v53 = vld [vmem:[#allocation2 + $0x16ec] sm:$0xf0] }
 0x453   :  { %v13503_v59 = vld [vmem:[#allocation2 + $0x1090] sm:$0xf]  ;;  %v14304_v51 = vor.u32 %v17867_v53, %v14303_v52  ;;  %7341 = vmatpush.bf16.msra.mxu2 %v14048_v58  ;;  %v7101_v53 = vpop.f32.mrf.mxu3 }
 0x454   :  { %v17667_v62 = vld [vmem:[#allocation2 + $0x10ac] sm:$0xf0] }
 0x455   :  { %v13759_v60 = vld [vmem:[#allocation2 + $0x1290] sm:$0xf]  ;;  %v13504_v5 = vor.u32 %v17667_v62, %v13503_v59  ;;  %7354 = vmatpush.bf16.msra.mxu3 %v14304_v51 }
 0x456   :  { %v17731_v56 = vld [vmem:[#allocation2 + $0x12ac] sm:$0xf0] }
 0x457   :  { %v14015_v63 = vld [vmem:[#allocation2 + $0x1490] sm:$0xf]  ;;  %v13760_v13 = vor.u32 %v17731_v56, %v13759_v60  ;;  %7316 = vmatpush.bf16.msra.mxu0 %v13504_v5 }
 0x458   :  { %v17795_v0 = vld [vmem:[#allocation2 + $0x14ac] sm:$0xf0] }
 0x459   :  { %v14271_v3 = vld [vmem:[#allocation2 + $0x1690] sm:$0xf]  ;;  %v14016_v9 = vor.u32 %v17795_v0, %v14015_v63  ;;  %7329 = vmatpush.bf16.msra.mxu1 %v13760_v13 }
 0x45a   :  { %v17859_v4 = vld [vmem:[#allocation2 + $0x16ac] sm:$0xf0] }
 0x45b   :  { %v13471_v10 = vld [vmem:[#allocation2 + $0x1050] sm:$0xf]  ;;  %v14272_v15 = vor.u32 %v17859_v4, %v14271_v3  ;;  %7342 = vmatpush.bf16.msra.mxu2 %v14016_v9 }
 0x45c   :  { %v17659_v11 = vld [vmem:[#allocation2 + $0x106c] sm:$0xf0] }
 0x45d   :  { %v13727_v12 = vld [vmem:[#allocation2 + $0x1250] sm:$0xf]  ;;  %v13472_v32 = vor.u32 %v17659_v11, %v13471_v10  ;;  %7355 = vmatpush.bf16.msra.mxu3 %v14272_v15 }
 0x45e   :  { %v17723_v8 = vld [vmem:[#allocation2 + $0x126c] sm:$0xf0] }
 0x45f   :  { %v13983_v21 = vld [vmem:[#allocation2 + $0x1450] sm:$0xf]  ;;  %v13728_v36 = vor.u32 %v17723_v8, %v13727_v12  ;;  %7317 = vmatpush.bf16.msra.mxu0 %v13472_v32 }
 0x460   :  { %v17787_v24 = vld [vmem:[#allocation2 + $0x146c] sm:$0xf0] }
 0x461   :  { %v14239_v26 = vld [vmem:[#allocation2 + $0x1650] sm:$0xf]  ;;  %v13984_v43 = vor.u32 %v17787_v24, %v13983_v21  ;;  %7330 = vmatpush.bf16.msra.mxu1 %v13728_v36 }
 0x462   :  { %v17851_v27 = vld [vmem:[#allocation2 + $0x166c] sm:$0xf0] }
 0x463   :  { %v13439_v37 = vld [vmem:[#allocation2 + $0x1010] sm:$0xf]  ;;  %v14240_v48 = vor.u32 %v17851_v27, %v14239_v26  ;;  %7343 = vmatpush.bf16.msra.mxu2 %v13984_v43 }
 0x464   :  { %v17651_v34 = vld [vmem:[#allocation2 + $0x102c] sm:$0xf0] }
 0x465   :  { %v13695_v45 = vld [vmem:[#allocation2 + $0x1210] sm:$0xf]  ;;  %v13440_v58 = vor.u32 %v17651_v34, %v13439_v37  ;;  %7356 = vmatpush.bf16.msra.mxu3 %v14240_v48 }
 0x466   :  { %v17715_v39 = vld [vmem:[#allocation2 + $0x122c] sm:$0xf0] }
 0x467   :  { %v13951_v46 = vld [vmem:[#allocation2 + $0x1410] sm:$0xf]  ;;  %v13696_v61 = vor.u32 %v17715_v39, %v13695_v45  ;;  %7318 = vmatpush.bf16.msra.mxu0 %v13440_v58 }
 0x468   :  { %v17779_v49 = vld [vmem:[#allocation2 + $0x142c] sm:$0xf0] }
 0x469   :  { %v14207_v50 = vld [vmem:[#allocation2 + $0x1610] sm:$0xf]  ;;  %v13952_v51 = vor.u32 %v17779_v49, %v13951_v46  ;;  %7331 = vmatpush.bf16.msra.mxu1 %v13696_v61  ;;  %v7125_v61 = vpop.f32.mrf.mxu1 }
 0x46a   :  { %v17843_v52 = vld [vmem:[#allocation2 + $0x162c] sm:$0xf0]  ;;  %7319 = vmatmul.bf16.vlgmr.msra.gmra.mxu0 %v18928_v25 }
 0x46b   :  { %v14687_v16 = vld [vmem:[#allocation2 + $0x19d0] sm:$0xf]  ;;  %v14208_v0 = vor.u32 %v17843_v52, %v14207_v50  ;;  %7344 = vmatpush.bf16.msra.mxu2 %v13952_v51 }
 0x46c   :  { %v17963_v54 = vld [vmem:[#allocation2 + $0x19ec] sm:$0xf0]  ;;  %7332 = vmatmul.bf16.vlgmr.msra.gmra.mxu1 %v18932_v30 }
 0x46d   :  { %v14943_v55 = vld [vmem:[#allocation2 + $0x1bd0] sm:$0xf]  ;;  %v14688_v1 = vor.u32 %v17963_v54, %v14687_v16  ;;  %7357 = vmatpush.bf16.msra.mxu3 %v14208_v0 }
 0x46e   :  { %v18027_v59 = vld [vmem:[#allocation2 + $0x1bec] sm:$0xf0]  ;;  %7345 = vmatmul.bf16.vlgmr.msra.gmra.mxu2 %v18930_v29 }
 0x46f   :  { %v15199_v62 = vld [vmem:[#allocation2 + $0x1dd0] sm:$0xf]  ;;  %v14944_v2 = vor.u32 %v18027_v59, %v14943_v55  ;;  %7363 = vmatpush.bf16.msrb.mxu0 %v14688_v1  ;;  %v7112_v55 = vpop.f32.mrf.mxu0 }
 0x470   :  { %v18091_v60 = vld [vmem:[#allocation2 + $0x1dec] sm:$0xf0]  ;;  %7358 = vmatmul.bf16.vlgmr.msra.gmra.mxu3 %v18934_v33 }
 0x471   :  { %v15455_v56 = vld [vmem:[#allocation2 + $0x1fd0] sm:$0xf]  ;;  %v15200_v3 = vor.u32 %v18091_v60, %v15199_v62  ;;  %7376 = vmatpush.bf16.msrb.mxu1 %v14944_v2  ;;  %v7113_v62 = vadd.f32 %v7112_v55, %v19050_v6 }
 0x472   :  { %v18155_v63 = vld [vmem:[#allocation2 + $0x1fec] sm:$0xf0] }
 0x473   :  { %v14655_v4 = vld [vmem:[#allocation2 + $0x1990] sm:$0xf]  ;;  %v15456_v13 = vor.u32 %v18155_v63, %v15455_v56  ;;  %7389 = vmatpush.bf16.msrb.mxu2 %v15200_v3  ;;  %v7126_v3 = vadd.f32 %v7125_v61, %v7113_v62 }
 0x474   :  { %v17955_v5 = vld [vmem:[#allocation2 + $0x19ac] sm:$0xf0] }
 0x475   :  { %v14911_v7 = vld [vmem:[#allocation2 + $0x1b90] sm:$0xf]  ;;  %v14656_v15 = vor.u32 %v17955_v5, %v14655_v4  ;;  %7402 = vmatpush.bf16.msrb.mxu3 %v15456_v13 }
 0x476   :  { %v18019_v9 = vld [vmem:[#allocation2 + $0x1bac] sm:$0xf0] }
 0x477   :  { %v15167_v10 = vld [vmem:[#allocation2 + $0x1d90] sm:$0xf]  ;;  %v14912_v8 = vor.u32 %v18019_v9, %v14911_v7  ;;  %7364 = vmatpush.bf16.msrb.mxu0 %v14656_v15 }
 0x478   :  { %v18083_v11 = vld [vmem:[#allocation2 + $0x1dac] sm:$0xf0] }
 0x479   :  { %v15423_v12 = vld [vmem:[#allocation2 + $0x1f90] sm:$0xf]  ;;  %v15168_v21 = vor.u32 %v18083_v11, %v15167_v10  ;;  %7377 = vmatpush.bf16.msrb.mxu1 %v14912_v8 }
 0x47a   :  { %v18147_v14 = vld [vmem:[#allocation2 + $0x1fac] sm:$0xf0] }
 0x47b   :  { %v14623_v24 = vld [vmem:[#allocation2 + $0x1950] sm:$0xf]  ;;  %v15424_v32 = vor.u32 %v18147_v14, %v15423_v12  ;;  %7390 = vmatpush.bf16.msrb.mxu2 %v15168_v21  ;;  %v7138_v21 = vpop.f32.mrf.mxu2 }
 0x47c   :  { %v17947_v26 = vld [vmem:[#allocation2 + $0x196c] sm:$0xf0] }
 0x47d   :  { %v14879_v27 = vld [vmem:[#allocation2 + $0x1b50] sm:$0xf]  ;;  %v14624_v39 = vor.u32 %v17947_v26, %v14623_v24  ;;  %7403 = vmatpush.bf16.msrb.mxu3 %v15424_v32  ;;  %v7139_v32 = vadd.f32 %v7138_v21, %v7126_v3 }
 0x47e   :  { %v18011_v37 = vld [vmem:[#allocation2 + $0x1b6c] sm:$0xf0] }
 0x47f   :  { %v15135_v34 = vld [vmem:[#allocation2 + $0x1d50] sm:$0xf]  ;;  %v14880_v46 = vor.u32 %v18011_v37, %v14879_v27  ;;  %7365 = vmatpush.bf16.msrb.mxu0 %v14624_v39  ;;  %v7151_v37 = vpop.f32.mrf.mxu3  ;;  %v7127_v39 = vpop.f32.mrf.mxu1 }
 0x480   :  { %v18075_v36 = vld [vmem:[#allocation2 + $0x1d6c] sm:$0xf0] }
 0x481   :  { %v15391_v43 = vld [vmem:[#allocation2 + $0x1f50] sm:$0xf]  ;;  %v15136_v47 = vor.u32 %v18075_v36, %v15135_v34  ;;  %7378 = vmatpush.bf16.msrb.mxu1 %v14880_v46  ;;  %v19057_v46 = vadd.f32 %v7151_v37, %v7139_v32 }
 0x482   :  { %v18139_v45 = vld [vmem:[#allocation2 + $0x1f6c] sm:$0xf0] }
 0x483   :  { %v14591_v48 = vld [vmem:[#allocation2 + $0x1910] sm:$0xf]  ;;  %v15392_v52 = vor.u32 %v18139_v45, %v15391_v43  ;;  %7391 = vmatpush.bf16.msrb.mxu2 %v15136_v47  ;;  %v7114_v43 = vpop.f32.mrf.mxu0 }
 0x484   :  { %v17939_v49 = vld [vmem:[#allocation2 + $0x192c] sm:$0xf0]  ;;  %v11585_v43 = vld [vmem:[#allocation2 + $0x1b0] sm:$0xf0] }
 0x485   :  { %v14847_v50 = vld [vmem:[#allocation2 + $0x1b10] sm:$0xf]  ;;  %v14592_v60 = vor.u32 %v17939_v49, %v14591_v48  ;;  %7404 = vmatpush.bf16.msrb.mxu3 %v15392_v52 }
 0x486   :  { %v18003_v53 = vld [vmem:[#allocation2 + $0x1b2c] sm:$0xf0] }
 0x487   :  { %v15103_v16 = vld [vmem:[#allocation2 + $0x1d10] sm:$0xf]  ;;  %v14848_v51 = vor.u32 %v18003_v53, %v14847_v50  ;;  %7366 = vmatpush.bf16.msrb.mxu0 %v14592_v60 }
 0x488   :  { %v18067_v54 = vld [vmem:[#allocation2 + $0x1d2c] sm:$0xf0] }
 0x489   :  { %v15359_v58 = vld [vmem:[#allocation2 + $0x1f10] sm:$0xf]  ;;  %v15104_v56 = vor.u32 %v18067_v54, %v15103_v16  ;;  %7379 = vmatpush.bf16.msrb.mxu1 %v14848_v51 }
 0x48a   :  { %v18131_v59 = vld [vmem:[#allocation2 + $0x1f2c] sm:$0xf0] }
 0x48b   :  { %v14559_v63 = vld [vmem:[#allocation2 + $0x18d0] sm:$0xf]  ;;  %v15360_v2 = vor.u32 %v18131_v59, %v15359_v58  ;;  %7392 = vmatpush.bf16.msrb.mxu2 %v15104_v56 }
 0x48c   :  { %v17931_v0 = vld [vmem:[#allocation2 + $0x18ec] sm:$0xf0] }
 0x48d   :  { %v14815_v1 = vld [vmem:[#allocation2 + $0x1ad0] sm:$0xf]  ;;  %v14560_v10 = vor.u32 %v17931_v0, %v14559_v63  ;;  %7405 = vmatpush.bf16.msrb.mxu3 %v15360_v2 }
 0x48e   :  { %v17995_v4 = vld [vmem:[#allocation2 + $0x1aec] sm:$0xf0] }
 0x48f   :  { %v15071_v5 = vld [vmem:[#allocation2 + $0x1cd0] sm:$0xf]  ;;  %v14816_v6 = vor.u32 %v17995_v4, %v14815_v1  ;;  %7367 = vmatpush.bf16.msrb.mxu0 %v14560_v10  ;;  %v17255_v10 = vld [vmem:[#allocation2 + $0x3d4] sm:$0xf] }
 0x490   :  { %v18059_v7 = vld [vmem:[#allocation2 + $0x1cec] sm:$0xf0] }
 0x491   :  { %v15327_v13 = vld [vmem:[#allocation2 + $0x1ed0] sm:$0xf]  ;;  %v15072_v11 = vor.u32 %v18059_v7, %v15071_v5  ;;  %7380 = vmatpush.bf16.msrb.mxu1 %v14816_v6  ;;  %v7140_v7 = vpop.f32.mrf.mxu2  ;;  %v7153_v6 = vpop.f32.mrf.mxu3 }
 0x492   :  { %v18123_v9 = vld [vmem:[#allocation2 + $0x1eec] sm:$0xf0]  ;;  %v7164_v6 = vpop.f32.mrf.mxu0 }
 0x493   :  { %v14527_v12 = vld [vmem:[#allocation2 + $0x1890] sm:$0xf]  ;;  %v15328_v8 = vor.u32 %v18123_v9, %v15327_v13  ;;  %7393 = vmatpush.bf16.msrb.mxu2 %v15072_v11  ;;  %v17191_v13 = vld [vmem:[#allocation2 + $0x1d4] sm:$0xf] }
 0x494   :  { %v17923_v14 = vld [vmem:[#allocation2 + $0x18ac] sm:$0xf0]  ;;  %v11617_v9 = vld [vmem:[#allocation2 + $0x1f0] sm:$0xf0] }
 0x495   :  { %v14783_v15 = vld [vmem:[#allocation2 + $0x1a90] sm:$0xf]  ;;  %v14528_v45 = vor.u32 %v17923_v14, %v14527_v12  ;;  %7406 = vmatpush.bf16.msrb.mxu3 %v15328_v8  ;;  %v11873_v12 = vld [vmem:[#allocation2 + $0x3f0] sm:$0xf0]  ;;  %v11620_v32 = vor.u32 %v17191_v13, %v11617_v9 }
 0x496   :  { %v17987_v24 = vld [vmem:[#allocation2 + $0x1aac] sm:$0xf0]  ;;  %v17319_v14 = vld [vmem:[#allocation2 + $0x5d4] sm:$0xf]  ;;  %v11876_v37 = vor.u32 %v17255_v10, %v11873_v12 }
 0x497   :  { %v15039_v26 = vld [vmem:[#allocation2 + $0x1c90] sm:$0xf]  ;;  %v14784_v47 = vor.u32 %v17987_v24, %v14783_v15  ;;  %7368 = vmatpush.bf16.msrb.mxu0 %v14528_v45  ;;  %v12129_v15 = vld [vmem:[#allocation2 + $0x5f0] sm:$0xf0] }
 0x498   :  { %v18051_v27 = vld [vmem:[#allocation2 + $0x1cac] sm:$0xf0]  ;;  %v17383_v24 = vld [vmem:[#allocation2 + $0x7d4] sm:$0xf] }
 0x499   :  { %v15295_v34 = vld [vmem:[#allocation2 + $0x1e90] sm:$0xf]  ;;  %v15040_v48 = vor.u32 %v18051_v27, %v15039_v26  ;;  %7381 = vmatpush.bf16.msrb.mxu1 %v14784_v47  ;;  %v12385_v26 = vld [vmem:[#allocation2 + $0x7f0] sm:$0xf0] }
 0x49a   :  { %v18115_v36 = vld [vmem:[#allocation2 + $0x1eac] sm:$0xf0]  ;;  %v17247_v45 = vld [vmem:[#allocation2 + $0x394] sm:$0xf]  ;;  %v12388_v39 = vor.u32 %v17383_v24, %v12385_v26 }
 0x49b   :  { %v14495_v49 = vld [vmem:[#allocation2 + $0x1850] sm:$0xf]  ;;  %v15296_v53 = vor.u32 %v18115_v36, %v15295_v34  ;;  %7394 = vmatpush.bf16.msrb.mxu2 %v15040_v48  ;;  %v12132_v34 = vor.u32 %v17319_v14, %v12129_v15  ;;  %v17183_v36 = vld [vmem:[#allocation2 + $0x194] sm:$0xf]  ;;  %v7165_v14 = vadd.f32 %v7164_v6, %v19057_v46 }
 0x49c   :  { %v17915_v50 = vld [vmem:[#allocation2 + $0x186c] sm:$0xf0]  ;;  %v11841_v47 = vld [vmem:[#allocation2 + $0x3b0] sm:$0xf0] }
 0x49d   :  { %v14751_v52 = vld [vmem:[#allocation2 + $0x1a50] sm:$0xf]  ;;  %v14496_v62 = vor.u32 %v17915_v50, %v14495_v49  ;;  %7407 = vmatpush.bf16.msrb.mxu3 %v15296_v53  ;;  %v17311_v48 = vld [vmem:[#allocation2 + $0x594] sm:$0xf]  ;;  %v11588_v53 = vor.u32 %v17183_v36, %v11585_v43 }
 0x49e   :  { %v17979_v16 = vld [vmem:[#allocation2 + $0x1a6c] sm:$0xf0]  ;;  %v12097_v49 = vld [vmem:[#allocation2 + $0x5b0] sm:$0xf0] }
 0x49f   :  { %v15007_v54 = vld [vmem:[#allocation2 + $0x1c50] sm:$0xf]  ;;  %v14752_v51 = vor.u32 %v17979_v16, %v14751_v52  ;;  %7369 = vmatpush.bf16.msrb.mxu0 %v14496_v62  ;;  %v17375_v50 = vld [vmem:[#allocation2 + $0x794] sm:$0xf]  ;;  %v11844_v16 = vor.u32 %v17247_v45, %v11841_v47 }
 0x4a0   :  { %v18043_v55 = vld [vmem:[#allocation2 + $0x1c6c] sm:$0xf0]  ;;  %v12353_v52 = vld [vmem:[#allocation2 + $0x7b0] sm:$0xf0] }
 0x4a1   :  { %v15263_v58 = vld [vmem:[#allocation2 + $0x1e50] sm:$0xf]  ;;  %v15008_v56 = vor.u32 %v18043_v55, %v15007_v54  ;;  %7382 = vmatpush.bf16.msrb.mxu1 %v14752_v51  ;;  %v12100_v54 = vor.u32 %v17311_v48, %v12097_v49  ;;  %v17175_v55 = vld [vmem:[#allocation2 + $0x154] sm:$0xf]  ;;  %v12356_v62 = vor.u32 %v17375_v50, %v12353_v52 }
 0x4a2   :  { %v18107_v59 = vld [vmem:[#allocation2 + $0x1e6c] sm:$0xf0]  ;;  %v12065_v51 = vld [vmem:[#allocation2 + $0x570] sm:$0xf0] }
 0x4a3   :  { %v14463_v60 = vld [vmem:[#allocation2 + $0x1810] sm:$0xf]  ;;  %v15264_v2 = vor.u32 %v18107_v59, %v15263_v58  ;;  %7395 = vmatpush.bf16.msrb.mxu2 %v15008_v56  ;;  %v11553_v58 = vld [vmem:[#allocation2 + $0x170] sm:$0xf0] }
 0x4a4   :  { %v17907_v61 = vld [vmem:[#allocation2 + $0x182c] sm:$0xf0]  ;;  %v17239_v59 = vld [vmem:[#allocation2 + $0x354] sm:$0xf] }
 0x4a5   :  { %v14719_v63 = vld [vmem:[#allocation2 + $0x1a10] sm:$0xf]  ;;  %v14464_v11 = vor.u32 %v17907_v61, %v14463_v60  ;;  %7408 = vmatpush.bf16.msrb.mxu3 %v15264_v2  ;;  %v11809_v60 = vld [vmem:[#allocation2 + $0x370] sm:$0xf0] }
 0x4a6   :  { %v17971_v0 = vld [vmem:[#allocation2 + $0x1a2c] sm:$0xf0]  ;;  %v17303_v61 = vld [vmem:[#allocation2 + $0x554] sm:$0xf] }
 0x4a7   :  { %v14975_v1 = vld [vmem:[#allocation2 + $0x1c10] sm:$0xf]  ;;  %v14720_v8 = vor.u32 %v17971_v0, %v14719_v63  ;;  %7370 = vmatpush.bf16.msrb.mxu0 %v14464_v11  ;;  %v17367_v56 = vld [vmem:[#allocation2 + $0x754] sm:$0xf]  ;;  %v11556_v0 = vor.u32 %v17175_v55, %v11553_v58  ;;  %v12068_v2 = vor.u32 %v17303_v61, %v12065_v51 }
 0x4a8   :  { %v18035_v3 = vld [vmem:[#allocation2 + $0x1c2c] sm:$0xf0]  ;;  %v12321_v63 = vld [vmem:[#allocation2 + $0x770] sm:$0xf0] }
 0x4a9   :  { %v15231_v4 = vld [vmem:[#allocation2 + $0x1e10] sm:$0xf]  ;;  %v14976_v21 = vor.u32 %v18035_v3, %v14975_v1  ;;  %7383 = vmatpush.bf16.msrb.mxu1 %v14720_v8  ;;  %v11812_v1 = vor.u32 %v17239_v59, %v11809_v60  ;;  %v17167_v3 = vld [vmem:[#allocation2 + $0x114] sm:$0xf]  ;;  %v12324_v7 = vor.u32 %v17367_v56, %v12321_v63  ;;  %v7177_v8 = vpop.f32.mrf.mxu1  ;;  %v7203_v60 = vpop.f32.mrf.mxu3 }
 0x4aa   :  { %v18099_v5 = vld [vmem:[#allocation2 + $0x1e2c] sm:$0xf0]  ;;  %7371 = vmatmul.bf16.vlgmr.msrb.gmra.mxu0 %v18946_v23  ;;  %v11777_v13 = vld [vmem:[#allocation2 + $0x330] sm:$0xf0]  ;;  %v7166_v56 = vpop.f32.mrf.mxu0 }
 0x4ab   :  { %v15232_v27 = vor.u32 %v18099_v5, %v15231_v4  ;;  %7396 = vmatpush.bf16.msrb.mxu2 %v14976_v21  ;;  %7415 = vmatpush.bf16.msra.mxu0 %v11620_v32  ;;  %v11521_v4 = vld [vmem:[#allocation2 + $0x130] sm:$0xf0] }
 0x4ac   :  { %7384 = vmatmul.bf16.vlgmr.msrb.gmra.mxu1 %v18950_v31  ;;  %v17231_v5 = vld [vmem:[#allocation2 + $0x314] sm:$0xf]  ;;  %v11524_v15 = vor.u32 %v17167_v3, %v11521_v4 }
 0x4ad   :  { %7409 = vmatpush.bf16.msrb.mxu3 %v15232_v27  ;;  %7428 = vmatpush.bf16.msra.mxu1 %v11876_v37  ;;  %v17295_v9 = vld [vmem:[#allocation2 + $0x514] sm:$0xf]  ;;  %v11780_v21 = vor.u32 %v17231_v5, %v11777_v13 }
 0x4ae   :  { %7397 = vmatmul.bf16.vlgmr.msrb.gmra.mxu2 %v18948_v28  ;;  %v12033_v10 = vld [vmem:[#allocation2 + $0x530] sm:$0xf0] }
 0x4af   :  { %7441 = vmatpush.bf16.msra.mxu2 %v12132_v34  ;;  %7416 = vmatpush.bf16.msra.mxu0 %v11588_v53  ;;  %v17359_v11 = vld [vmem:[#allocation2 + $0x714] sm:$0xf]  ;;  %v12036_v24 = vor.u32 %v17295_v9, %v12033_v10  ;;  %v7178_v34 = vadd.f32 %v7177_v8, %v7165_v14 }
 0x4b0   :  { %7410 = vmatmul.bf16.vlgmr.msrb.gmra.mxu3 %v18952_v35  ;;  %v12289_v12 = vld [vmem:[#allocation2 + $0x730] sm:$0xf0] }
 0x4b1   :  { %7454 = vmatpush.bf16.msra.mxu3 %v12388_v39  ;;  %7429 = vmatpush.bf16.msra.mxu1 %v11844_v16  ;;  %v17159_v26 = vld [vmem:[#allocation2 + $0xd4] sm:$0xf]  ;;  %v12292_v37 = vor.u32 %v17359_v11, %v12289_v12 }
 0x4b2   :  { %v11489_v27 = vld [vmem:[#allocation2 + $0xf0] sm:$0xf0] }
 0x4b3   :  { %7442 = vmatpush.bf16.msra.mxu2 %v12100_v54  ;;  %7417 = vmatpush.bf16.msra.mxu0 %v11556_v0  ;;  %v17223_v32 = vld [vmem:[#allocation2 + $0x2d4] sm:$0xf]  ;;  %v11492_v48 = vor.u32 %v17159_v26, %v11489_v27  ;;  %v7190_v54 = vpop.f32.mrf.mxu2  ;;  %v7179_v0 = vpop.f32.mrf.mxu1 }
 0x4b4   :  { %v11745_v36 = vld [vmem:[#allocation2 + $0x2f0] sm:$0xf0] }
 0x4b5   :  { %7455 = vmatpush.bf16.msra.mxu3 %v12356_v62  ;;  %7430 = vmatpush.bf16.msra.mxu1 %v11812_v1  ;;  %v17287_v43 = vld [vmem:[#allocation2 + $0x4d4] sm:$0xf]  ;;  %v11748_v46 = vor.u32 %v17223_v32, %v11745_v36  ;;  %v7191_v62 = vadd.f32 %v7190_v54, %v7178_v34 }
 0x4b6   :  { %v12001_v45 = vld [vmem:[#allocation2 + $0x4f0] sm:$0xf0] }
 0x4b7   :  { %7443 = vmatpush.bf16.msra.mxu2 %v12068_v2  ;;  %v17351_v39 = vld [vmem:[#allocation2 + $0x6d4] sm:$0xf]  ;;  %7418 = vmatpush.bf16.msra.mxu0 %v11524_v15  ;;  %v12004_v49 = vor.u32 %v17287_v43, %v12001_v45  ;;  %v19064_v1 = vadd.f32 %v7203_v60, %v7191_v62 }
 0x4b8   :  { %v12257_v47 = vld [vmem:[#allocation2 + $0x6f0] sm:$0xf0] }
 0x4b9   :  { %7456 = vmatpush.bf16.msra.mxu3 %v12324_v7  ;;  %7431 = vmatpush.bf16.msra.mxu1 %v11780_v21  ;;  %v17151_v50 = vld [vmem:[#allocation2 + $0x94] sm:$0xf]  ;;  %v12260_v16 = vor.u32 %v17351_v39, %v12257_v47  ;;  %vm8042_vm3 = vcmp.gt.f32.partialorder %v19064_v1, 0.0 }
 0x4ba   :  { %v11457_v52 = vld [vmem:[#allocation2 + $0xb0] sm:$0xf0] }
 0x4bb   :  { %7444 = vmatpush.bf16.msra.mxu2 %v12036_v24  ;;  %v17215_v53 = vld [vmem:[#allocation2 + $0x294] sm:$0xf]  ;;  %7419 = vmatpush.bf16.msra.mxu0 %v11492_v48  ;;  %v11460_v63 = vor.u32 %v17151_v50, %v11457_v52  ;;  %v7192_v45 = vpop.f32.mrf.mxu2 }
 0x4bc   :  { %v11713_v55 = vld [vmem:[#allocation2 + $0x2b0] sm:$0xf0]  ;;  %v18591_v45 = vld [vmem:[#allocation4] sm:$0xff] }
 0x4bd   :  { %7457 = vmatpush.bf16.msra.mxu3 %v12292_v37  ;;  %v17279_v58 = vld [vmem:[#allocation2 + $0x494] sm:$0xf]  ;;  %7432 = vmatpush.bf16.msra.mxu1 %v11748_v46  ;;  %v11716_v2 = vor.u32 %v17215_v53, %v11713_v55  ;;  %v7205_v46 = vpop.f32.mrf.mxu3 }
 0x4be   :  { %v11969_v59 = vld [vmem:[#allocation2 + $0x4b0] sm:$0xf0] }
 0x4bf   :  { %v17343_v61 = vld [vmem:[#allocation2 + $0x694] sm:$0xf]  ;;  %7445 = vmatpush.bf16.msra.mxu2 %v12004_v49  ;;  %v11972_v3 = vor.u32 %v17279_v58, %v11969_v59  ;;  %7420 = vmatpush.bf16.msra.mxu0 %v11460_v63 }
 0x4c0   :  { %v12225_v51 = vld [vmem:[#allocation2 + $0x6b0] sm:$0xf0] }
 0x4c1   :  { %v17143_v4 = vld [vmem:[#allocation2 + $0x54] sm:$0xf]  ;;  %7458 = vmatpush.bf16.msra.mxu3 %v12260_v16  ;;  %v12228_v13 = vor.u32 %v17343_v61, %v12225_v51  ;;  %7433 = vmatpush.bf16.msra.mxu1 %v11716_v2 }
 0x4c2   :  { %v11425_v5 = vld [vmem:[#allocation2 + $0x70] sm:$0xf0] }
 0x4c3   :  { %v17207_v7 = vld [vmem:[#allocation2 + $0x254] sm:$0xf]  ;;  %v11428_v14 = vor.u32 %v17143_v4, %v11425_v5  ;;  %7446 = vmatpush.bf16.msra.mxu2 %v11972_v3 }
 0x4c4   :  { %v11681_v9 = vld [vmem:[#allocation2 + $0x270] sm:$0xf0] }
 0x4c5   :  { %v17271_v10 = vld [vmem:[#allocation2 + $0x454] sm:$0xf]  ;;  %v11684_v21 = vor.u32 %v17207_v7, %v11681_v9  ;;  %7459 = vmatpush.bf16.msra.mxu3 %v12228_v13  ;;  %7421 = vmatpush.bf16.msra.mxu0 %v11428_v14 }
 0x4c6   :  { %v11937_v6 = vld [vmem:[#allocation2 + $0x470] sm:$0xf0] }
 0x4c7   :  { %v17335_v11 = vld [vmem:[#allocation2 + $0x654] sm:$0xf]  ;;  %v11940_v24 = vor.u32 %v17271_v10, %v11937_v6  ;;  %7434 = vmatpush.bf16.msra.mxu1 %v11684_v21 }
 0x4c8   :  { %v12193_v12 = vld [vmem:[#allocation2 + $0x670] sm:$0xf0] }
 0x4c9   :  { %v17135_v15 = vld [vmem:[#allocation2 + $0x14] sm:$0xf]  ;;  %v12196_v37 = vor.u32 %v17335_v11, %v12193_v12  ;;  %7447 = vmatpush.bf16.msra.mxu2 %v11940_v24 }
 0x4ca   :  { %v11393_v8 = vld [vmem:[#allocation2 + $0x30] sm:$0xf0] }
 0x4cb   :  { %v17199_v26 = vld [vmem:[#allocation2 + $0x214] sm:$0xf]  ;;  %v11396_v49 = vor.u32 %v17135_v15, %v11393_v8  ;;  %7460 = vmatpush.bf16.msra.mxu3 %v12196_v37 }
 0x4cc   :  { %v11649_v27 = vld [vmem:[#allocation2 + $0x230] sm:$0xf0] }
 0x4cd   :  { %v17263_v32 = vld [vmem:[#allocation2 + $0x414] sm:$0xf]  ;;  %v11652_v16 = vor.u32 %v17199_v26, %v11649_v27  ;;  %7422 = vmatpush.bf16.msra.mxu0 %v11396_v49 }
 0x4ce   :  { %v11905_v34 = vld [vmem:[#allocation2 + $0x430] sm:$0xf0] }
 0x4cf   :  { %v17327_v36 = vld [vmem:[#allocation2 + $0x614] sm:$0xf]  ;;  %v11908_v54 = vor.u32 %v17263_v32, %v11905_v34  ;;  %7435 = vmatpush.bf16.msra.mxu1 %v11652_v16  ;;  %v7216_v16 = vpop.f32.mrf.mxu0 }
 0x4d0   :  { %v12161_v43 = vld [vmem:[#allocation2 + $0x630] sm:$0xf0]  ;;  %7423 = vmatmul.bf16.vlgmr.msra.gmra.mxu0 %v18894_v19 }
 0x4d1   :  { %v17447_v39 = vld [vmem:[#allocation2 + $0x9d4] sm:$0xf]  ;;  %v12164_v59 = vor.u32 %v17327_v36, %v12161_v43  ;;  %7448 = vmatpush.bf16.msra.mxu2 %v11908_v54 }
 0x4d2   :  { %v12641_v47 = vld [vmem:[#allocation2 + $0x9f0] sm:$0xf0]  ;;  %7436 = vmatmul.bf16.vlgmr.msra.gmra.mxu1 %v18898_v22 }
 0x4d3   :  { %v17511_v48 = vld [vmem:[#allocation2 + $0xbd4] sm:$0xf]  ;;  %v12644_v62 = vor.u32 %v17447_v39, %v12641_v47  ;;  %7461 = vmatpush.bf16.msra.mxu3 %v12164_v59  ;;  %v1187_v39 = vperm.slane %v18591_v45, 4 }
 0x4d4   :  { %v12897_v50 = vld [vmem:[#allocation2 + $0xbf0] sm:$0xf0]  ;;  %7449 = vmatmul.bf16.vlgmr.msra.gmra.mxu2 %v18892_v18 }
 0x4d5   :  { %v17575_v52 = vld [vmem:[#allocation2 + $0xdd4] sm:$0xf]  ;;  %v12900_v60 = vor.u32 %v17511_v48, %v12897_v50  ;;  %7467 = vmatpush.bf16.msrb.mxu0 %v12644_v62 }
 0x4d6   :  { %v13153_v53 = vld [vmem:[#allocation2 + $0xdf0] sm:$0xf0]  ;;  %7462 = vmatmul.bf16.vlgmr.msra.gmra.mxu3 %v18896_v20 }
 0x4d7   :  { %v17639_v55 = vld [vmem:[#allocation2 + $0xfd4] sm:$0xf]  ;;  %v13156_v61 = vor.u32 %v17575_v52, %v13153_v53  ;;  %7480 = vmatpush.bf16.msrb.mxu1 %v12900_v60  ;;  %v7217_v60 = vadd.f32 %v7216_v16, %v1187_v39 }
 0x4d8   :  { %v13409_v58 = vld [vmem:[#allocation2 + $0xff0] sm:$0xf0] }
 0x4d9   :  { %v17439_v51 = vld [vmem:[#allocation2 + $0x994] sm:$0xf]  ;;  %v13412_v0 = vor.u32 %v17639_v55, %v13409_v58  ;;  %7493 = vmatpush.bf16.msrb.mxu2 %v13156_v61  ;;  %v7229_v61 = vpop.f32.mrf.mxu1 }
 0x4da   :  { %v12609_v56 = vld [vmem:[#allocation2 + $0x9b0] sm:$0xf0] }
 0x4db   :  { %v17503_v63 = vld [vmem:[#allocation2 + $0xb94] sm:$0xf]  ;;  %v12612_v13 = vor.u32 %v17439_v51, %v12609_v56  ;;  %7506 = vmatpush.bf16.msrb.mxu3 %v13412_v0 }
 0x4dc   :  { %v12865_v2 = vld [vmem:[#allocation2 + $0xbb0] sm:$0xf0] }
 0x4dd   :  { %v17567_v3 = vld [vmem:[#allocation2 + $0xd94] sm:$0xf]  ;;  %v12868_v9 = vor.u32 %v17503_v63, %v12865_v2  ;;  %7468 = vmatpush.bf16.msrb.mxu0 %v12612_v13 }
 0x4de   :  { %v13121_v4 = vld [vmem:[#allocation2 + $0xdb0] sm:$0xf0] }
 0x4df   :  { %v17631_v5 = vld [vmem:[#allocation2 + $0xf94] sm:$0xf]  ;;  %v13124_v10 = vor.u32 %v17567_v3, %v13121_v4  ;;  %7481 = vmatpush.bf16.msrb.mxu1 %v12868_v9  ;;  %v7230_v4 = vadd.f32 %v7229_v61, %v7217_v60 }
 0x4e0   :  { %v13377_v7 = vld [vmem:[#allocation2 + $0xfb0] sm:$0xf0] }
 0x4e1   :  { %v17431_v6 = vld [vmem:[#allocation2 + $0x954] sm:$0xf]  ;;  %v13380_v14 = vor.u32 %v17631_v5, %v13377_v7  ;;  %7494 = vmatpush.bf16.msrb.mxu2 %v13124_v10 }
 0x4e2   :  { %v12577_v11 = vld [vmem:[#allocation2 + $0x970] sm:$0xf0] }
 0x4e3   :  { %v17495_v12 = vld [vmem:[#allocation2 + $0xb54] sm:$0xf]  ;;  %v12580_v27 = vor.u32 %v17431_v6, %v12577_v11  ;;  %7507 = vmatpush.bf16.msrb.mxu3 %v13380_v14  ;;  %v7242_v11 = vpop.f32.mrf.mxu2 }
 0x4e4   :  { %v12833_v15 = vld [vmem:[#allocation2 + $0xb70] sm:$0xf0] }
 0x4e5   :  { %v17559_v8 = vld [vmem:[#allocation2 + $0xd54] sm:$0xf]  ;;  %v12836_v37 = vor.u32 %v17495_v12, %v12833_v15  ;;  %7469 = vmatpush.bf16.msrb.mxu0 %v12580_v27 }
 0x4e6   :  { %v13089_v21 = vld [vmem:[#allocation2 + $0xd70] sm:$0xf0] }
 0x4e7   :  { %v17623_v24 = vld [vmem:[#allocation2 + $0xf54] sm:$0xf]  ;;  %v13092_v34 = vor.u32 %v17559_v8, %v13089_v21  ;;  %7482 = vmatpush.bf16.msrb.mxu1 %v12836_v37  ;;  %v7243_v21 = vadd.f32 %v7242_v11, %v7230_v4 }
 0x4e8   :  { %v13345_v26 = vld [vmem:[#allocation2 + $0xf70] sm:$0xf0] }
 0x4e9   :  { %v17423_v32 = vld [vmem:[#allocation2 + $0x914] sm:$0xf]  ;;  %v13348_v47 = vor.u32 %v17623_v24, %v13345_v26  ;;  %7495 = vmatpush.bf16.msrb.mxu2 %v13092_v34  ;;  %v7255_v24 = vpop.f32.mrf.mxu3  ;;  %v7218_v34 = vpop.f32.mrf.mxu0 }
 0x4ea   :  { %v12545_v36 = vld [vmem:[#allocation2 + $0x930] sm:$0xf0]  ;;  %v19070_v37 = vadd.f32 %v7255_v24, %v7243_v21 }
 0x4eb   :  { %v17487_v43 = vld [vmem:[#allocation2 + $0xb14] sm:$0xf]  ;;  %v12548_v53 = vor.u32 %v17423_v32, %v12545_v36  ;;  %7508 = vmatpush.bf16.msrb.mxu3 %v13348_v47 }
 0x4ec   :  { %v12801_v48 = vld [vmem:[#allocation2 + $0xb30] sm:$0xf0] }
 0x4ed   :  { %v17551_v46 = vld [vmem:[#allocation2 + $0xd14] sm:$0xf]  ;;  %v12804_v54 = vor.u32 %v17487_v43, %v12801_v48  ;;  %7470 = vmatpush.bf16.msrb.mxu0 %v12548_v53  ;;  %v7231_v48 = vpop.f32.mrf.mxu1 }
 0x4ee   :  { %v13057_v49 = vld [vmem:[#allocation2 + $0xd30] sm:$0xf0] }
 0x4ef   :  { %v17615_v50 = vld [vmem:[#allocation2 + $0xf14] sm:$0xf]  ;;  %v13060_v55 = vor.u32 %v17551_v46, %v13057_v49  ;;  %7483 = vmatpush.bf16.msrb.mxu1 %v12804_v54 }
 0x4f0   :  { %v13313_v52 = vld [vmem:[#allocation2 + $0xf30] sm:$0xf0] }
 0x4f1   :  { %v17415_v58 = vld [vmem:[#allocation2 + $0x8d4] sm:$0xf]  ;;  %v13316_v51 = vor.u32 %v17615_v50, %v13313_v52  ;;  %7496 = vmatpush.bf16.msrb.mxu2 %v13060_v55  ;;  %v7257_v4 = vpop.f32.mrf.mxu3 }
 0x4f2   :  { %v12513_v59 = vld [vmem:[#allocation2 + $0x8f0] sm:$0xf0] }
 0x4f3   :  { %v17479_v62 = vld [vmem:[#allocation2 + $0xad4] sm:$0xf]  ;;  %v12516_v5 = vor.u32 %v17415_v58, %v12513_v59  ;;  %7509 = vmatpush.bf16.msrb.mxu3 %v13316_v51 }
 0x4f4   :  { %v12769_v56 = vld [vmem:[#allocation2 + $0xaf0] sm:$0xf0] }
 0x4f5   :  { %v17543_v63 = vld [vmem:[#allocation2 + $0xcd4] sm:$0xf]  ;;  %v12772_v7 = vor.u32 %v17479_v62, %v12769_v56  ;;  %7471 = vmatpush.bf16.msrb.mxu0 %v12516_v5  ;;  %v7244_v56 = vpop.f32.mrf.mxu2 }
 0x4f6   :  { %v13025_v0 = vld [vmem:[#allocation2 + $0xcf0] sm:$0xf0] }
 0x4f7   :  { %v17607_v2 = vld [vmem:[#allocation2 + $0xed4] sm:$0xf]  ;;  %v13028_v13 = vor.u32 %v17543_v63, %v13025_v0  ;;  %7484 = vmatpush.bf16.msrb.mxu1 %v12772_v7 }
 0x4f8   :  { %v13281_v3 = vld [vmem:[#allocation2 + $0xef0] sm:$0xf0] }
 0x4f9   :  { %v17407_v9 = vld [vmem:[#allocation2 + $0x894] sm:$0xf]  ;;  %v13284_v12 = vor.u32 %v17607_v2, %v13281_v3  ;;  %7497 = vmatpush.bf16.msrb.mxu2 %v13028_v13 }
 0x4fa   :  { %v12481_v10 = vld [vmem:[#allocation2 + $0x8b0] sm:$0xf0] }
 0x4fb   :  { %v17471_v6 = vld [vmem:[#allocation2 + $0xa94] sm:$0xf]  ;;  %v12484_v32 = vor.u32 %v17407_v9, %v12481_v10  ;;  %7510 = vmatpush.bf16.msrb.mxu3 %v13284_v12 }
 0x4fc   :  { %v12737_v14 = vld [vmem:[#allocation2 + $0xab0] sm:$0xf0] }
 0x4fd   :  { %v17535_v15 = vld [vmem:[#allocation2 + $0xc94] sm:$0xf]  ;;  %v12740_v36 = vor.u32 %v17471_v6, %v12737_v14  ;;  %7472 = vmatpush.bf16.msrb.mxu0 %v12484_v32 }
 0x4fe   :  { %v12993_v8 = vld [vmem:[#allocation2 + $0xcb0] sm:$0xf0] }
 0x4ff   :  { %v17599_v26 = vld [vmem:[#allocation2 + $0xe94] sm:$0xf]  ;;  %v12996_v43 = vor.u32 %v17535_v15, %v12993_v8  ;;  %7485 = vmatpush.bf16.msrb.mxu1 %v12740_v36 }
 0x500   :  { %v13249_v27 = vld [vmem:[#allocation2 + $0xeb0] sm:$0xf0] }
 0x501   :  { %v17399_v45 = vld [vmem:[#allocation2 + $0x854] sm:$0xf]  ;;  %v13252_v46 = vor.u32 %v17599_v26, %v13249_v27  ;;  %7498 = vmatpush.bf16.msrb.mxu2 %v12996_v43 }
 0x502   :  { %v12449_v39 = vld [vmem:[#allocation2 + $0x870] sm:$0xf0] }
 0x503   :  { %v17463_v47 = vld [vmem:[#allocation2 + $0xa54] sm:$0xf]  ;;  %v12452_v54 = vor.u32 %v17399_v45, %v12449_v39  ;;  %7511 = vmatpush.bf16.msrb.mxu3 %v13252_v46 }
 0x504   :  { %v12705_v49 = vld [vmem:[#allocation2 + $0xa70] sm:$0xf0] }
 0x505   :  { %v17527_v50 = vld [vmem:[#allocation2 + $0xc54] sm:$0xf]  ;;  %v12708_v59 = vor.u32 %v17463_v47, %v12705_v49  ;;  %7473 = vmatpush.bf16.msrb.mxu0 %v12452_v54 }
 0x506   :  { %v12961_v52 = vld [vmem:[#allocation2 + $0xc70] sm:$0xf0] }
 0x507   :  { %v17591_v53 = vld [vmem:[#allocation2 + $0xe54] sm:$0xf]  ;;  %v12964_v62 = vor.u32 %v17527_v50, %v12961_v52  ;;  %7486 = vmatpush.bf16.msrb.mxu1 %v12708_v59 }
 0x508   :  { %v13217_v16 = vld [vmem:[#allocation2 + $0xe70] sm:$0xf0] }
 0x509   :  { %v17391_v55 = vld [vmem:[#allocation2 + $0x814] sm:$0xf]  ;;  %v13220_v63 = vor.u32 %v17591_v53, %v13217_v16  ;;  %7499 = vmatpush.bf16.msrb.mxu2 %v12964_v62 }
 0x50a   :  { %v12417_v58 = vld [vmem:[#allocation2 + $0x830] sm:$0xf0] }
 0x50b   :  { %v17455_v60 = vld [vmem:[#allocation2 + $0xa14] sm:$0xf]  ;;  %v12420_v9 = vor.u32 %v17391_v55, %v12417_v58  ;;  %7512 = vmatpush.bf16.msrb.mxu3 %v13220_v63 }
 0x50c   :  { %v12673_v61 = vld [vmem:[#allocation2 + $0xa30] sm:$0xf0] }
 0x50d   :  { %v17519_v51 = vld [vmem:[#allocation2 + $0xc14] sm:$0xf]  ;;  %v12676_v12 = vor.u32 %v17455_v60, %v12673_v61  ;;  %7474 = vmatpush.bf16.msrb.mxu0 %v12420_v9 }
 0x50e   :  { %v12929_v0 = vld [vmem:[#allocation2 + $0xc30] sm:$0xf0] }
 0x50f   :  { %v17583_v2 = vld [vmem:[#allocation2 + $0xe14] sm:$0xf]  ;;  %v12932_v14 = vor.u32 %v17519_v51, %v12929_v0  ;;  %7487 = vmatpush.bf16.msrb.mxu1 %v12676_v12 }
 0x510   :  { %v13185_v3 = vld [vmem:[#allocation2 + $0xe30] sm:$0xf0]  ;;  %7475 = vmatmul.bf16.vlgmr.msrb.gmra.mxu0 %v18912_v41 }
 0x511   :  { %v17703_v5 = vld [vmem:[#allocation2 + $0x11d4] sm:$0xf]  ;;  %v13188_v21 = vor.u32 %v17583_v2, %v13185_v3  ;;  %7500 = vmatpush.bf16.msrb.mxu2 %v12932_v14 }
 0x512   :  { %v13665_v7 = vld [vmem:[#allocation2 + $0x11f0] sm:$0xf0]  ;;  %7488 = vmatmul.bf16.vlgmr.msrb.gmra.mxu1 %v18916_v44 }
 0x513   :  { %v17767_v13 = vld [vmem:[#allocation2 + $0x13d4] sm:$0xf]  ;;  %v13668_v24 = vor.u32 %v17703_v5, %v13665_v7  ;;  %7513 = vmatpush.bf16.msrb.mxu3 %v13188_v21 }
 0x514   :  { %v13921_v10 = vld [vmem:[#allocation2 + $0x13f0] sm:$0xf0]  ;;  %7501 = vmatmul.bf16.vlgmr.msrb.gmra.mxu2 %v18910_v38 }
 0x515   :  { %v17831_v6 = vld [vmem:[#allocation2 + $0x15d4] sm:$0xf]  ;;  %v13924_v26 = vor.u32 %v17767_v13, %v13921_v10  ;;  %7519 = vmatpush.bf16.msra.mxu0 %v13668_v24 }
 0x516   :  { %v14177_v11 = vld [vmem:[#allocation2 + $0x15f0] sm:$0xf0]  ;;  %7514 = vmatmul.bf16.vlgmr.msrb.gmra.mxu3 %v18914_v42 }
 0x517   :  { %v17895_v15 = vld [vmem:[#allocation2 + $0x17d4] sm:$0xf]  ;;  %v14180_v27 = vor.u32 %v17831_v6, %v14177_v11  ;;  %7532 = vmatpush.bf16.msra.mxu1 %v13924_v26  ;;  %v7268_v11 = vpop.f32.mrf.mxu0  ;;  %v7281_v26 = vpop.f32.mrf.mxu1 }
 0x518   :  { %v14433_v8 = vld [vmem:[#allocation2 + $0x17f0] sm:$0xf0]  ;;  %v7269_v24 = vadd.f32 %v7268_v11, %v19070_v37 }
 0x519   :  { %v17695_v32 = vld [vmem:[#allocation2 + $0x1194] sm:$0xf]  ;;  %v14436_v43 = vor.u32 %v17895_v15, %v14433_v8  ;;  %7545 = vmatpush.bf16.msra.mxu2 %v14180_v27 }
 0x51a   :  { %v13633_v34 = vld [vmem:[#allocation2 + $0x11b0] sm:$0xf0] }
 0x51b   :  { %v17759_v36 = vld [vmem:[#allocation2 + $0x1394] sm:$0xf]  ;;  %v13636_v49 = vor.u32 %v17695_v32, %v13633_v34  ;;  %7558 = vmatpush.bf16.msra.mxu3 %v14436_v43 }
 0x51c   :  { %v13889_v45 = vld [vmem:[#allocation2 + $0x13b0] sm:$0xf0] }
 0x51d   :  { %v17823_v39 = vld [vmem:[#allocation2 + $0x1594] sm:$0xf]  ;;  %v13892_v50 = vor.u32 %v17759_v36, %v13889_v45  ;;  %7520 = vmatpush.bf16.msra.mxu0 %v13636_v49 }
 0x51e   :  { %v14145_v47 = vld [vmem:[#allocation2 + $0x15b0] sm:$0xf0] }
 0x51f   :  { %v17887_v48 = vld [vmem:[#allocation2 + $0x1794] sm:$0xf]  ;;  %v14148_v52 = vor.u32 %v17823_v39, %v14145_v47  ;;  %7533 = vmatpush.bf16.msra.mxu1 %v13892_v50  ;;  %v7282_v39 = vadd.f32 %v7281_v26, %v7269_v24 }
 0x520   :  { %v14401_v46 = vld [vmem:[#allocation2 + $0x17b0] sm:$0xf0] }
 0x521   :  { %v17687_v53 = vld [vmem:[#allocation2 + $0x1154] sm:$0xf]  ;;  %v14404_v55 = vor.u32 %v17887_v48, %v14401_v46  ;;  %7546 = vmatpush.bf16.msra.mxu2 %v14148_v52 }
 0x522   :  { %v13601_v16 = vld [vmem:[#allocation2 + $0x1170] sm:$0xf0] }
 0x523   :  { %v17751_v54 = vld [vmem:[#allocation2 + $0x1354] sm:$0xf]  ;;  %v13604_v51 = vor.u32 %v17687_v53, %v13601_v16  ;;  %7559 = vmatpush.bf16.msra.mxu3 %v14404_v55  ;;  %v7294_v53 = vpop.f32.mrf.mxu2 }
 0x524   :  { %v13857_v58 = vld [vmem:[#allocation2 + $0x1370] sm:$0xf0] }
 0x525   :  { %v17815_v59 = vld [vmem:[#allocation2 + $0x1554] sm:$0xf]  ;;  %v13860_v56 = vor.u32 %v17751_v54, %v13857_v58  ;;  %7521 = vmatpush.bf16.msra.mxu0 %v13604_v51  ;;  %v7295_v58 = vadd.f32 %v7294_v53, %v7282_v39 }
 0x526   :  { %v14113_v62 = vld [vmem:[#allocation2 + $0x1570] sm:$0xf0] }
 0x527   :  { %v17879_v60 = vld [vmem:[#allocation2 + $0x1754] sm:$0xf]  ;;  %v14116_v63 = vor.u32 %v17815_v59, %v14113_v62  ;;  %7534 = vmatpush.bf16.msra.mxu1 %v13860_v56  ;;  %v7307_v59 = vpop.f32.mrf.mxu3  ;;  %v7270_v56 = vpop.f32.mrf.mxu0 }
 0x528   :  { %v14369_v61 = vld [vmem:[#allocation2 + $0x1770] sm:$0xf0]  ;;  %v19077_v51 = vadd.f32 %v7307_v59, %v7295_v58 }
 0x529   :  { %v17679_v0 = vld [vmem:[#allocation2 + $0x1114] sm:$0xf]  ;;  %v14372_v4 = vor.u32 %v17879_v60, %v14369_v61  ;;  %7547 = vmatpush.bf16.msra.mxu2 %v14116_v63 }
 0x52a   :  { %v13569_v2 = vld [vmem:[#allocation2 + $0x1130] sm:$0xf0] }
 0x52b   :  { %v17743_v3 = vld [vmem:[#allocation2 + $0x1314] sm:$0xf]  ;;  %v13572_v6 = vor.u32 %v17679_v0, %v13569_v2  ;;  %7560 = vmatpush.bf16.msra.mxu3 %v14372_v4 }
 0x52c   :  { %v13825_v5 = vld [vmem:[#allocation2 + $0x1330] sm:$0xf0] }
 0x52d   :  { %v17807_v7 = vld [vmem:[#allocation2 + $0x1514] sm:$0xf]  ;;  %v13828_v12 = vor.u32 %v17743_v3, %v13825_v5  ;;  %7522 = vmatpush.bf16.msra.mxu0 %v13572_v6  ;;  %v7283_v5 = vpop.f32.mrf.mxu1 }
 0x52e   :  { %v14081_v13 = vld [vmem:[#allocation2 + $0x1530] sm:$0xf0] }
 0x52f   :  { %v17871_v9 = vld [vmem:[#allocation2 + $0x1714] sm:$0xf]  ;;  %v14084_v14 = vor.u32 %v17807_v7, %v14081_v13  ;;  %7535 = vmatpush.bf16.msra.mxu1 %v13828_v12  ;;  %v7309_v39 = vpop.f32.mrf.mxu3 }
 0x530   :  { %v14337_v10 = vld [vmem:[#allocation2 + $0x1730] sm:$0xf0] }
 0x531   :  { %v17671_v15 = vld [vmem:[#allocation2 + $0x10d4] sm:$0xf]  ;;  %v14340_v27 = vor.u32 %v17871_v9, %v14337_v10  ;;  %7548 = vmatpush.bf16.msra.mxu2 %v14084_v14 }
 0x532   :  { %v13537_v8 = vld [vmem:[#allocation2 + $0x10f0] sm:$0xf0] }
 0x533   :  { %v17735_v21 = vld [vmem:[#allocation2 + $0x12d4] sm:$0xf]  ;;  %v13540_v47 = vor.u32 %v17671_v15, %v13537_v8  ;;  %7561 = vmatpush.bf16.msra.mxu3 %v14340_v27 }
 0x534   :  { %v13793_v32 = vld [vmem:[#allocation2 + $0x12f0] sm:$0xf0] }
 0x535   :  { %v17799_v34 = vld [vmem:[#allocation2 + $0x14d4] sm:$0xf]  ;;  %v13796_v48 = vor.u32 %v17735_v21, %v13793_v32  ;;  %7523 = vmatpush.bf16.msra.mxu0 %v13540_v47  ;;  %v7296_v32 = vpop.f32.mrf.mxu2 }
 0x536   :  { %v14049_v36 = vld [vmem:[#allocation2 + $0x14f0] sm:$0xf0] }
 0x537   :  { %v17863_v43 = vld [vmem:[#allocation2 + $0x16d4] sm:$0xf]  ;;  %v14052_v46 = vor.u32 %v17799_v34, %v14049_v36  ;;  %7536 = vmatpush.bf16.msra.mxu1 %v13796_v48 }
 0x538   :  { %v14305_v45 = vld [vmem:[#allocation2 + $0x16f0] sm:$0xf0] }
 0x539   :  { %v17663_v49 = vld [vmem:[#allocation2 + $0x1094] sm:$0xf]  ;;  %v14308_v37 = vor.u32 %v17863_v43, %v14305_v45  ;;  %7549 = vmatpush.bf16.msra.mxu2 %v14052_v46 }
 0x53a   :  { %v13505_v50 = vld [vmem:[#allocation2 + $0x10b0] sm:$0xf0] }
 0x53b   :  { %v17727_v52 = vld [vmem:[#allocation2 + $0x1294] sm:$0xf]  ;;  %v13508_v61 = vor.u32 %v17663_v49, %v13505_v50  ;;  %7562 = vmatpush.bf16.msra.mxu3 %v14308_v37 }
 0x53c   :  { %v13761_v16 = vld [vmem:[#allocation2 + $0x12b0] sm:$0xf0] }
 0x53d   :  { %v17791_v54 = vld [vmem:[#allocation2 + $0x1494] sm:$0xf]  ;;  %v13764_v63 = vor.u32 %v17727_v52, %v13761_v16  ;;  %7524 = vmatpush.bf16.msra.mxu0 %v13508_v61 }
 0x53e   :  { %v14017_v55 = vld [vmem:[#allocation2 + $0x14b0] sm:$0xf0] }
 0x53f   :  { %v17855_v62 = vld [vmem:[#allocation2 + $0x1694] sm:$0xf]  ;;  %v14020_v0 = vor.u32 %v17791_v54, %v14017_v55  ;;  %7537 = vmatpush.bf16.msra.mxu1 %v13764_v63 }
 0x540   :  { %v14273_v60 = vld [vmem:[#allocation2 + $0x16b0] sm:$0xf0] }
 0x541   :  { %v17655_v2 = vld [vmem:[#allocation2 + $0x1054] sm:$0xf]  ;;  %v14276_v7 = vor.u32 %v17855_v62, %v14273_v60  ;;  %7550 = vmatpush.bf16.msra.mxu2 %v14020_v0 }
 0x542   :  { %v13473_v3 = vld [vmem:[#allocation2 + $0x1070] sm:$0xf0] }
 0x543   :  { %v17719_v4 = vld [vmem:[#allocation2 + $0x1254] sm:$0xf]  ;;  %v13476_v12 = vor.u32 %v17655_v2, %v13473_v3  ;;  %7563 = vmatpush.bf16.msra.mxu3 %v14276_v7 }
 0x544   :  { %v13729_v13 = vld [vmem:[#allocation2 + $0x1270] sm:$0xf0] }
 0x545   :  { %v17783_v9 = vld [vmem:[#allocation2 + $0x1454] sm:$0xf]  ;;  %v13732_v8 = vor.u32 %v17719_v4, %v13729_v13  ;;  %7525 = vmatpush.bf16.msra.mxu0 %v13476_v12 }
 0x546   :  { %v13985_v10 = vld [vmem:[#allocation2 + $0x1470] sm:$0xf0] }
 0x547   :  { %v17847_v6 = vld [vmem:[#allocation2 + $0x1654] sm:$0xf]  ;;  %v13988_v21 = vor.u32 %v17783_v9, %v13985_v10  ;;  %7538 = vmatpush.bf16.msra.mxu1 %v13732_v8 }
 0x548   :  { %v14241_v11 = vld [vmem:[#allocation2 + $0x1670] sm:$0xf0] }
 0x549   :  { %v17647_v14 = vld [vmem:[#allocation2 + $0x1014] sm:$0xf]  ;;  %v14244_v34 = vor.u32 %v17847_v6, %v14241_v11  ;;  %7551 = vmatpush.bf16.msra.mxu2 %v13988_v21 }
 0x54a   :  { %v13441_v15 = vld [vmem:[#allocation2 + $0x1030] sm:$0xf0] }
 0x54b   :  { %v17711_v24 = vld [vmem:[#allocation2 + $0x1214] sm:$0xf]  ;;  %v13444_v49 = vor.u32 %v17647_v14, %v13441_v15  ;;  %7564 = vmatpush.bf16.msra.mxu3 %v14244_v34 }
 0x54c   :  { %v13697_v26 = vld [vmem:[#allocation2 + $0x1230] sm:$0xf0] }
 0x54d   :  { %v17775_v27 = vld [vmem:[#allocation2 + $0x1414] sm:$0xf]  ;;  %v13700_v37 = vor.u32 %v17711_v24, %v13697_v26  ;;  %7526 = vmatpush.bf16.msra.mxu0 %v13444_v49  ;;  %v7320_v49 = vpop.f32.mrf.mxu0 }
 0x54e   :  { %v13953_v36 = vld [vmem:[#allocation2 + $0x1430] sm:$0xf0] }
 0x54f   :  { %v17839_v43 = vld [vmem:[#allocation2 + $0x1614] sm:$0xf]  ;;  %v13956_v16 = vor.u32 %v17775_v27, %v13953_v36  ;;  %7539 = vmatpush.bf16.msra.mxu1 %v13700_v37 }
 0x550   :  { %v14209_v45 = vld [vmem:[#allocation2 + $0x1630] sm:$0xf0]  ;;  %7527 = vmatmul.bf16.vlgmr.msra.gmra.mxu0 %v18928_v25 }
 0x551   :  { %v17959_v47 = vld [vmem:[#allocation2 + $0x19d4] sm:$0xf]  ;;  %v14212_v58 = vor.u32 %v17839_v43, %v14209_v45  ;;  %7552 = vmatpush.bf16.msra.mxu2 %v13956_v16  ;;  %v7333_v16 = vpop.f32.mrf.mxu1 }
 0x552   :  { %v14689_v48 = vld [vmem:[#allocation2 + $0x19f0] sm:$0xf0]  ;;  %7540 = vmatmul.bf16.vlgmr.msra.gmra.mxu1 %v18932_v30 }
 0x553   :  { %v18023_v46 = vld [vmem:[#allocation2 + $0x1bd4] sm:$0xf]  ;;  %v14692_v59 = vor.u32 %v17959_v47, %v14689_v48  ;;  %7565 = vmatpush.bf16.msra.mxu3 %v14212_v58 }
 0x554   :  { %v14945_v50 = vld [vmem:[#allocation2 + $0x1bf0] sm:$0xf0]  ;;  %7553 = vmatmul.bf16.vlgmr.msra.gmra.mxu2 %v18930_v29 }
 0x555   :  { %v18087_v52 = vld [vmem:[#allocation2 + $0x1dd4] sm:$0xf]  ;;  %v14948_v62 = vor.u32 %v18023_v46, %v14945_v50  ;;  %7571 = vmatpush.bf16.msrb.mxu0 %v14692_v59 }
 0x556   :  { %v15201_v53 = vld [vmem:[#allocation2 + $0x1df0] sm:$0xf0]  ;;  %7566 = vmatmul.bf16.vlgmr.msra.gmra.mxu3 %v18934_v33 }
 0x557   :  { %v18151_v54 = vld [vmem:[#allocation2 + $0x1fd4] sm:$0xf]  ;;  %v15204_v60 = vor.u32 %v18087_v52, %v15201_v53  ;;  %7584 = vmatpush.bf16.msrb.mxu1 %v14948_v62  ;;  %v7321_v53 = vadd.f32 %v7320_v49, %v19077_v51 }
 0x558   :  { %v15457_v55 = vld [vmem:[#allocation2 + $0x1ff0] sm:$0xf0] }
 0x559   :  { %v17951_v61 = vld [vmem:[#allocation2 + $0x1994] sm:$0xf]  ;;  %v15460_v0 = vor.u32 %v18151_v54, %v15457_v55  ;;  %7597 = vmatpush.bf16.msrb.mxu2 %v15204_v60 }
 0x55a   :  { %v14657_v56 = vld [vmem:[#allocation2 + $0x19b0] sm:$0xf0] }
 0x55b   :  { %v18015_v63 = vld [vmem:[#allocation2 + $0x1b94] sm:$0xf]  ;;  %v14660_v13 = vor.u32 %v17951_v61, %v14657_v56  ;;  %7610 = vmatpush.bf16.msrb.mxu3 %v15460_v0  ;;  %v7334_v61 = vadd.f32 %v7333_v16, %v7321_v53 }
 0x55c   :  { %v14913_v2 = vld [vmem:[#allocation2 + $0x1bb0] sm:$0xf0] }
 0x55d   :  { %v18079_v3 = vld [vmem:[#allocation2 + $0x1d94] sm:$0xf]  ;;  %v14916_v9 = vor.u32 %v18015_v63, %v14913_v2  ;;  %7572 = vmatpush.bf16.msrb.mxu0 %v14660_v13 }
 0x55e   :  { %v15169_v4 = vld [vmem:[#allocation2 + $0x1db0] sm:$0xf0] }
 0x55f   :  { %v18143_v5 = vld [vmem:[#allocation2 + $0x1f94] sm:$0xf]  ;;  %v15172_v10 = vor.u32 %v18079_v3, %v15169_v4  ;;  %7585 = vmatpush.bf16.msrb.mxu1 %v14916_v9 }
 0x560   :  { %v15425_v7 = vld [vmem:[#allocation2 + $0x1fb0] sm:$0xf0] }
 0x561   :  { %v17943_v6 = vld [vmem:[#allocation2 + $0x1954] sm:$0xf]  ;;  %v15428_v14 = vor.u32 %v18143_v5, %v15425_v7  ;;  %7598 = vmatpush.bf16.msrb.mxu2 %v15172_v10 }
 0x562   :  { %v14625_v11 = vld [vmem:[#allocation2 + $0x1970] sm:$0xf0] }
 0x563   :  { %v18007_v12 = vld [vmem:[#allocation2 + $0x1b54] sm:$0xf]  ;;  %v14628_v27 = vor.u32 %v17943_v6, %v14625_v11  ;;  %7611 = vmatpush.bf16.msrb.mxu3 %v15428_v14  ;;  %v7346_v6 = vpop.f32.mrf.mxu2 }
 0x564   :  { %v14881_v15 = vld [vmem:[#allocation2 + $0x1b70] sm:$0xf0] }
 0x565   :  { %v18071_v8 = vld [vmem:[#allocation2 + $0x1d54] sm:$0xf]  ;;  %v14884_v32 = vor.u32 %v18007_v12, %v14881_v15  ;;  %7573 = vmatpush.bf16.msrb.mxu0 %v14628_v27  ;;  %v7347_v15 = vadd.f32 %v7346_v6, %v7334_v61 }
 0x566   :  { %v15137_v21 = vld [vmem:[#allocation2 + $0x1d70] sm:$0xf0] }
 0x567   :  { %v18135_v24 = vld [vmem:[#allocation2 + $0x1f54] sm:$0xf]  ;;  %v15140_v34 = vor.u32 %v18071_v8, %v15137_v21  ;;  %7586 = vmatpush.bf16.msrb.mxu1 %v14884_v32  ;;  %v7359_v8 = vpop.f32.mrf.mxu3  ;;  %v7335_v32 = vpop.f32.mrf.mxu1 }
 0x568   :  { %v15393_v26 = vld [vmem:[#allocation2 + $0x1f70] sm:$0xf0]  ;;  %v11847_v32 = vld [vmem:[#allocation2 + $0x398] sm:$0xf] }
 0x569   :  { %v17935_v36 = vld [vmem:[#allocation2 + $0x1914] sm:$0xf]  ;;  %v15396_v39 = vor.u32 %v18135_v24, %v15393_v26  ;;  %7599 = vmatpush.bf16.msrb.mxu2 %v15140_v34  ;;  %v7322_v26 = vpop.f32.mrf.mxu0  ;;  %v19084_v34 = vadd.f32 %v7359_v8, %v7347_v15 }
 0x56a   :  { %v14593_v43 = vld [vmem:[#allocation2 + $0x1930] sm:$0xf0]  ;;  %v11591_v26 = vld [vmem:[#allocation2 + $0x198] sm:$0xf] }
 0x56b   :  { %v17999_v45 = vld [vmem:[#allocation2 + $0x1b14] sm:$0xf]  ;;  %v14596_v37 = vor.u32 %v17935_v36, %v14593_v43  ;;  %7612 = vmatpush.bf16.msrb.mxu3 %v15396_v39 }
 0x56c   :  { %v14849_v47 = vld [vmem:[#allocation2 + $0x1b30] sm:$0xf0] }
 0x56d   :  { %v18063_v48 = vld [vmem:[#allocation2 + $0x1d14] sm:$0xf]  ;;  %v14852_v54 = vor.u32 %v17999_v45, %v14849_v47  ;;  %7574 = vmatpush.bf16.msrb.mxu0 %v14596_v37 }
 0x56e   :  { %v15105_v46 = vld [vmem:[#allocation2 + $0x1d30] sm:$0xf0] }
 0x56f   :  { %v18127_v50 = vld [vmem:[#allocation2 + $0x1f14] sm:$0xf]  ;;  %v15108_v55 = vor.u32 %v18063_v48, %v15105_v46  ;;  %7587 = vmatpush.bf16.msrb.mxu1 %v14852_v54 }
 0x570   :  { %v15361_v52 = vld [vmem:[#allocation2 + $0x1f30] sm:$0xf0] }
 0x571   :  { %v17927_v58 = vld [vmem:[#allocation2 + $0x18d4] sm:$0xf]  ;;  %v15364_v60 = vor.u32 %v18127_v50, %v15361_v52  ;;  %7600 = vmatpush.bf16.msrb.mxu2 %v15108_v55 }
 0x572   :  { %v14561_v59 = vld [vmem:[#allocation2 + $0x18f0] sm:$0xf0] }
 0x573   :  { %v17991_v62 = vld [vmem:[#allocation2 + $0x1ad4] sm:$0xf]  ;;  %v14564_v4 = vor.u32 %v17927_v58, %v14561_v59  ;;  %7613 = vmatpush.bf16.msrb.mxu3 %v15364_v60 }
 0x574   :  { %v14817_v56 = vld [vmem:[#allocation2 + $0x1af0] sm:$0xf0] }
 0x575   :  { %v18055_v63 = vld [vmem:[#allocation2 + $0x1cd4] sm:$0xf]  ;;  %v14820_v51 = vor.u32 %v17991_v62, %v14817_v56  ;;  %7575 = vmatpush.bf16.msrb.mxu0 %v14564_v4  ;;  %v17196_v4 = vld [vmem:[#allocation2 + $0x1f4] sm:$0xf0] }
 0x576   :  { %v15073_v0 = vld [vmem:[#allocation2 + $0x1cf0] sm:$0xf0] }
 0x577   :  { %v18119_v2 = vld [vmem:[#allocation2 + $0x1ed4] sm:$0xf]  ;;  %v15076_v5 = vor.u32 %v18055_v63, %v15073_v0  ;;  %7588 = vmatpush.bf16.msrb.mxu1 %v14820_v51  ;;  %v11879_v51 = vld [vmem:[#allocation2 + $0x3d8] sm:$0xf] }
 0x578   :  { %v15329_v3 = vld [vmem:[#allocation2 + $0x1ef0] sm:$0xf0] }
 0x579   :  { %v17919_v7 = vld [vmem:[#allocation2 + $0x1894] sm:$0xf]  ;;  %v15332_v10 = vor.u32 %v18119_v2, %v15329_v3  ;;  %7601 = vmatpush.bf16.msrb.mxu2 %v15076_v5  ;;  %v7348_v2 = vpop.f32.mrf.mxu2  ;;  %v11623_v3 = vld [vmem:[#allocation2 + $0x1d8] sm:$0xf]  ;;  %v7361_v5 = vpop.f32.mrf.mxu3 }
 0x57a   :  { %v14529_v13 = vld [vmem:[#allocation2 + $0x18b0] sm:$0xf0]  ;;  %v11624_v8 = vor.u32 %v17196_v4, %v11623_v3  ;;  %v11783_v2 = vld [vmem:[#allocation2 + $0x318] sm:$0xf] }
 0x57b   :  { %v17983_v9 = vld [vmem:[#allocation2 + $0x1a94] sm:$0xf]  ;;  %v14532_v27 = vor.u32 %v17919_v7, %v14529_v13  ;;  %7614 = vmatpush.bf16.msrb.mxu3 %v15332_v10  ;;  %v17260_v13 = vld [vmem:[#allocation2 + $0x3f4] sm:$0xf0] }
 0x57c   :  { %v14785_v11 = vld [vmem:[#allocation2 + $0x1ab0] sm:$0xf0]  ;;  %v17324_v10 = vld [vmem:[#allocation2 + $0x5f4] sm:$0xf0] }
 0x57d   :  { %v18047_v12 = vld [vmem:[#allocation2 + $0x1c94] sm:$0xf]  ;;  %v14788_v36 = vor.u32 %v17983_v9, %v14785_v11  ;;  %7576 = vmatpush.bf16.msrb.mxu0 %v14532_v27  ;;  %v12135_v9 = vld [vmem:[#allocation2 + $0x5d8] sm:$0xf] }
 0x57e   :  { %v15041_v14 = vld [vmem:[#allocation2 + $0x1cb0] sm:$0xf0]  ;;  %v17188_v27 = vld [vmem:[#allocation2 + $0x1b4] sm:$0xf0] }
 0x57f   :  { %v18111_v21 = vld [vmem:[#allocation2 + $0x1e94] sm:$0xf]  ;;  %v15044_v43 = vor.u32 %v18047_v12, %v15041_v14  ;;  %7589 = vmatpush.bf16.msrb.mxu1 %v14788_v36  ;;  %v12391_v12 = vld [vmem:[#allocation2 + $0x7d8] sm:$0xf] }
 0x580   :  { %v15297_v24 = vld [vmem:[#allocation2 + $0x1eb0] sm:$0xf0]  ;;  %v17388_v14 = vld [vmem:[#allocation2 + $0x7f4] sm:$0xf0] }
 0x581   :  { %v17911_v45 = vld [vmem:[#allocation2 + $0x1854] sm:$0xf]  ;;  %v15300_v48 = vor.u32 %v18111_v21, %v15297_v24  ;;  %7602 = vmatpush.bf16.msrb.mxu2 %v15044_v43  ;;  %v11880_v21 = vor.u32 %v17260_v13, %v11879_v51  ;;  %v12136_v24 = vor.u32 %v17324_v10, %v12135_v9  ;;  %v12392_v36 = vor.u32 %v17388_v14, %v12391_v12  ;;  %v17252_v43 = vld [vmem:[#allocation2 + $0x3b4] sm:$0xf0] }
 0x582   :  { %v14497_v39 = vld [vmem:[#allocation2 + $0x1870] sm:$0xf0]  ;;  %v17236_v4 = vld [vmem:[#allocation2 + $0x334] sm:$0xf0] }
 0x583   :  { %v17975_v47 = vld [vmem:[#allocation2 + $0x1a54] sm:$0xf]  ;;  %v14500_v37 = vor.u32 %v17911_v45, %v14497_v39  ;;  %7615 = vmatpush.bf16.msrb.mxu3 %v15300_v48  ;;  %v12103_v45 = vld [vmem:[#allocation2 + $0x598] sm:$0xf]  ;;  %v11784_v12 = vor.u32 %v17236_v4, %v11783_v2 }
 0x584   :  { %v14753_v46 = vld [vmem:[#allocation2 + $0x1a70] sm:$0xf0]  ;;  %v17316_v39 = vld [vmem:[#allocation2 + $0x5b4] sm:$0xf0] }
 0x585   :  { %v18039_v49 = vld [vmem:[#allocation2 + $0x1c54] sm:$0xf]  ;;  %v14756_v55 = vor.u32 %v17975_v47, %v14753_v46  ;;  %7577 = vmatpush.bf16.msrb.mxu0 %v14500_v37  ;;  %v12359_v47 = vld [vmem:[#allocation2 + $0x798] sm:$0xf]  ;;  %v11592_v46 = vor.u32 %v17188_v27, %v11591_v26 }
 0x586   :  { %v15009_v50 = vld [vmem:[#allocation2 + $0x1c70] sm:$0xf0]  ;;  %v17380_v48 = vld [vmem:[#allocation2 + $0x7b4] sm:$0xf0] }
 0x587   :  { %v18103_v52 = vld [vmem:[#allocation2 + $0x1e54] sm:$0xf]  ;;  %v15012_v58 = vor.u32 %v18039_v49, %v15009_v50  ;;  %7590 = vmatpush.bf16.msrb.mxu1 %v14756_v55  ;;  %v11848_v49 = vor.u32 %v17252_v43, %v11847_v32  ;;  %v12104_v50 = vor.u32 %v17316_v39, %v12103_v45  ;;  %v11815_v37 = vld [vmem:[#allocation2 + $0x358] sm:$0xf] }
 0x588   :  { %v15265_v53 = vld [vmem:[#allocation2 + $0x1e70] sm:$0xf0]  ;;  %v12071_v55 = vld [vmem:[#allocation2 + $0x558] sm:$0xf] }
 0x589   :  { %v17903_v16 = vld [vmem:[#allocation2 + $0x1814] sm:$0xf]  ;;  %v15268_v61 = vor.u32 %v18103_v52, %v15265_v53  ;;  %7603 = vmatpush.bf16.msrb.mxu2 %v15012_v58  ;;  %v11559_v52 = vld [vmem:[#allocation2 + $0x158] sm:$0xf] }
 0x58a   :  { %v14465_v54 = vld [vmem:[#allocation2 + $0x1830] sm:$0xf0]  ;;  %v17180_v53 = vld [vmem:[#allocation2 + $0x174] sm:$0xf0] }
 0x58b   :  { %v17967_v59 = vld [vmem:[#allocation2 + $0x1a14] sm:$0xf]  ;;  %v14468_v7 = vor.u32 %v17903_v16, %v14465_v54  ;;  %7616 = vmatpush.bf16.msrb.mxu3 %v15268_v61  ;;  %v12360_v16 = vor.u32 %v17380_v48, %v12359_v47  ;;  %v17244_v54 = vld [vmem:[#allocation2 + $0x374] sm:$0xf0] }
 0x58c   :  { %v14721_v62 = vld [vmem:[#allocation2 + $0x1a30] sm:$0xf0]  ;;  %v17308_v58 = vld [vmem:[#allocation2 + $0x574] sm:$0xf0]  ;;  %v11816_v61 = vor.u32 %v17244_v54, %v11815_v37 }
 0x58d   :  { %v18031_v60 = vld [vmem:[#allocation2 + $0x1c14] sm:$0xf]  ;;  %v14724_v6 = vor.u32 %v17967_v59, %v14721_v62  ;;  %7578 = vmatpush.bf16.msrb.mxu0 %v14468_v7  ;;  %v12327_v59 = vld [vmem:[#allocation2 + $0x758] sm:$0xf]  ;;  %v7372_v7 = vpop.f32.mrf.mxu0 }
 0x58e   :  { %v14977_v56 = vld [vmem:[#allocation2 + $0x1c30] sm:$0xf0]  ;;  %v17372_v62 = vld [vmem:[#allocation2 + $0x774] sm:$0xf0]  ;;  %v7373_v10 = vadd.f32 %v7372_v7, %v19084_v34 }
 0x58f   :  { %v18095_v63 = vld [vmem:[#allocation2 + $0x1e14] sm:$0xf]  ;;  %v14980_v11 = vor.u32 %v18031_v60, %v14977_v56  ;;  %7591 = vmatpush.bf16.msrb.mxu1 %v14724_v6  ;;  %v11560_v60 = vor.u32 %v17180_v53, %v11559_v52  ;;  %v12072_v56 = vor.u32 %v17308_v58, %v12071_v55  ;;  %v12328_v3 = vor.u32 %v17372_v62, %v12327_v59  ;;  %v12039_v51 = vld [vmem:[#allocation2 + $0x518] sm:$0xf]  ;;  %v7398_v52 = vpop.f32.mrf.mxu2  ;;  %v7411_v55 = vpop.f32.mrf.mxu3 }
 0x590   :  { %v15233_v0 = vld [vmem:[#allocation2 + $0x1e30] sm:$0xf0]  ;;  %7579 = vmatmul.bf16.vlgmr.msrb.gmra.mxu0 %v18946_v23  ;;  %v17300_v5 = vld [vmem:[#allocation2 + $0x534] sm:$0xf0] }
 0x591   :  { %v15236_v15 = vor.u32 %v18095_v63, %v15233_v0  ;;  %7604 = vmatpush.bf16.msrb.mxu2 %v14980_v11  ;;  %7623 = vmatpush.bf16.msra.mxu0 %v11624_v8  ;;  %v11527_v63 = vld [vmem:[#allocation2 + $0x118] sm:$0xf]  ;;  %v7385_v11 = vpop.f32.mrf.mxu1  ;;  %v12040_v14 = vor.u32 %v17300_v5, %v12039_v51 }
 0x592   :  { %7592 = vmatmul.bf16.vlgmr.msrb.gmra.mxu1 %v18950_v31  ;;  %v17172_v0 = vld [vmem:[#allocation2 + $0x134] sm:$0xf0]  ;;  %v7386_v26 = vadd.f32 %v7385_v11, %v7373_v10 }
 0x593   :  { %7617 = vmatpush.bf16.msrb.mxu3 %v15236_v15  ;;  %7636 = vmatpush.bf16.msra.mxu1 %v11880_v21  ;;  %v12295_v13 = vld [vmem:[#allocation2 + $0x718] sm:$0xf]  ;;  %v11528_v6 = vor.u32 %v17172_v0, %v11527_v63 }
 0x594   :  { %7605 = vmatmul.bf16.vlgmr.msrb.gmra.mxu2 %v18948_v28  ;;  %v17364_v9 = vld [vmem:[#allocation2 + $0x734] sm:$0xf0]  ;;  %v7399_v54 = vadd.f32 %v7398_v52, %v7386_v26 }
 0x595   :  { %7649 = vmatpush.bf16.msra.mxu2 %v12136_v24  ;;  %7624 = vmatpush.bf16.msra.mxu0 %v11592_v46  ;;  %v11495_v15 = vld [vmem:[#allocation2 + $0xd8] sm:$0xf]  ;;  %v12296_v24 = vor.u32 %v17364_v9, %v12295_v13  ;;  %v7374_v62 = vpop.f32.mrf.mxu0 }
 0x596   :  { %7618 = vmatmul.bf16.vlgmr.msrb.gmra.mxu3 %v18952_v35  ;;  %v17164_v8 = vld [vmem:[#allocation2 + $0xf4] sm:$0xf0] }
 0x597   :  { %7662 = vmatpush.bf16.msra.mxu3 %v12392_v36  ;;  %7637 = vmatpush.bf16.msra.mxu1 %v11848_v49  ;;  %v11751_v21 = vld [vmem:[#allocation2 + $0x2d8] sm:$0xf]  ;;  %v11496_v39 = vor.u32 %v17164_v8, %v11495_v15 }
 0x598   :  { %v17228_v27 = vld [vmem:[#allocation2 + $0x2f4] sm:$0xf0] }
 0x599   :  { %7650 = vmatpush.bf16.msra.mxu2 %v12104_v50  ;;  %7625 = vmatpush.bf16.msra.mxu0 %v11560_v60  ;;  %v12007_v32 = vld [vmem:[#allocation2 + $0x4d8] sm:$0xf]  ;;  %v11752_v34 = vor.u32 %v17228_v27, %v11751_v21 }
 0x59a   :  { %v17292_v36 = vld [vmem:[#allocation2 + $0x4f4] sm:$0xf0] }
 0x59b   :  { %7663 = vmatpush.bf16.msra.mxu3 %v12360_v16  ;;  %7638 = vmatpush.bf16.msra.mxu1 %v11816_v61  ;;  %v12263_v43 = vld [vmem:[#allocation2 + $0x6d8] sm:$0xf]  ;;  %v12008_v47 = vor.u32 %v17292_v36, %v12007_v32  ;;  %v7387_v61 = vpop.f32.mrf.mxu1 }
 0x59c   :  { %v17356_v45 = vld [vmem:[#allocation2 + $0x6f4] sm:$0xf0] }
 0x59d   :  { %7651 = vmatpush.bf16.msra.mxu2 %v12072_v56  ;;  %7626 = vmatpush.bf16.msra.mxu0 %v11528_v6  ;;  %v11463_v48 = vld [vmem:[#allocation2 + $0x98] sm:$0xf]  ;;  %v12264_v50 = vor.u32 %v17356_v45, %v12263_v43  ;;  %v19091_v56 = vadd.f32 %v7411_v55, %v7399_v54  ;;  %v7400_v43 = vpop.f32.mrf.mxu2 }
 0x59e   :  { %v17156_v46 = vld [vmem:[#allocation2 + $0xb4] sm:$0xf0] }
 0x59f   :  { %7664 = vmatpush.bf16.msra.mxu3 %v12328_v3  ;;  %7639 = vmatpush.bf16.msra.mxu1 %v11784_v12  ;;  %v11719_v49 = vld [vmem:[#allocation2 + $0x298] sm:$0xf]  ;;  %v11464_v60 = vor.u32 %v17156_v46, %v11463_v48  ;;  %vm8043_vm4 = vcmp.gt.f32.partialorder %v19091_v56, 0.0 }
 0x5a0   :  { %v17220_v53 = vld [vmem:[#allocation2 + $0x2b4] sm:$0xf0] }
 0x5a1   :  { %7652 = vmatpush.bf16.msra.mxu2 %v12040_v14  ;;  %v11975_v37 = vld [vmem:[#allocation2 + $0x498] sm:$0xf]  ;;  %7627 = vmatpush.bf16.msra.mxu0 %v11496_v39  ;;  %v11720_v63 = vor.u32 %v17220_v53, %v11719_v49 }
 0x5a2   :  { %v17284_v16 = vld [vmem:[#allocation2 + $0x4b4] sm:$0xf0] }
 0x5a3   :  { %7665 = vmatpush.bf16.msra.mxu3 %v12296_v24  ;;  %v12231_v58 = vld [vmem:[#allocation2 + $0x698] sm:$0xf]  ;;  %7640 = vmatpush.bf16.msra.mxu1 %v11752_v34  ;;  %v11976_v0 = vor.u32 %v17284_v16, %v11975_v37 }
 0x5a4   :  { %v17348_v59 = vld [vmem:[#allocation2 + $0x6b4] sm:$0xf0] }
 0x5a5   :  { %7653 = vmatpush.bf16.msra.mxu2 %v12008_v47  ;;  %v11431_v2 = vld [vmem:[#allocation2 + $0x58] sm:$0xf]  ;;  %v12232_v51 = vor.u32 %v17348_v59, %v12231_v58  ;;  %7628 = vmatpush.bf16.msra.mxu0 %v11464_v60  ;;  %v7413_v47 = vpop.f32.mrf.mxu3 }
 0x5a6   :  { %v17148_v3 = vld [vmem:[#allocation2 + $0x74] sm:$0xf0] }
 0x5a7   :  { %v11687_v4 = vld [vmem:[#allocation2 + $0x258] sm:$0xf]  ;;  %7666 = vmatpush.bf16.msra.mxu3 %v12264_v50  ;;  %v11432_v6 = vor.u32 %v17148_v3, %v11431_v2  ;;  %7641 = vmatpush.bf16.msra.mxu1 %v11720_v63 }
 0x5a8   :  { %v17212_v5 = vld [vmem:[#allocation2 + $0x274] sm:$0xf0] }
 0x5a9   :  { %v11943_v7 = vld [vmem:[#allocation2 + $0x458] sm:$0xf]  ;;  %7654 = vmatpush.bf16.msra.mxu2 %v11976_v0  ;;  %v11688_v14 = vor.u32 %v17212_v5, %v11687_v4  ;;  %7629 = vmatpush.bf16.msra.mxu0 %v11432_v6 }
 0x5aa   :  { %v17276_v13 = vld [vmem:[#allocation2 + $0x474] sm:$0xf0] }
 0x5ab   :  { %v12199_v9 = vld [vmem:[#allocation2 + $0x658] sm:$0xf]  ;;  %v11944_v15 = vor.u32 %v17276_v13, %v11943_v7  ;;  %7667 = vmatpush.bf16.msra.mxu3 %v12232_v51  ;;  %7642 = vmatpush.bf16.msra.mxu1 %v11688_v14 }
 0x5ac   :  { %v17340_v10 = vld [vmem:[#allocation2 + $0x674] sm:$0xf0] }
 0x5ad   :  { %v11399_v11 = vld [vmem:[#allocation2 + $0x18] sm:$0xf]  ;;  %v12200_v26 = vor.u32 %v17340_v10, %v12199_v9  ;;  %7655 = vmatpush.bf16.msra.mxu2 %v11944_v15 }
 0x5ae   :  { %v17140_v12 = vld [vmem:[#allocation2 + $0x34] sm:$0xf0] }
 0x5af   :  { %v11655_v8 = vld [vmem:[#allocation2 + $0x218] sm:$0xf]  ;;  %v11400_v48 = vor.u32 %v17140_v12, %v11399_v11  ;;  %7668 = vmatpush.bf16.msra.mxu3 %v12200_v26 }
 0x5b0   :  { %v17204_v21 = vld [vmem:[#allocation2 + $0x234] sm:$0xf0] }
 0x5b1   :  { %v11911_v24 = vld [vmem:[#allocation2 + $0x418] sm:$0xf]  ;;  %v11656_v52 = vor.u32 %v17204_v21, %v11655_v8  ;;  %7630 = vmatpush.bf16.msra.mxu0 %v11400_v48 }
 0x5b2   :  { %v17268_v27 = vld [vmem:[#allocation2 + $0x434] sm:$0xf0] }
 0x5b3   :  { %v12167_v32 = vld [vmem:[#allocation2 + $0x618] sm:$0xf]  ;;  %v11912_v53 = vor.u32 %v17268_v27, %v11911_v24  ;;  %7643 = vmatpush.bf16.msra.mxu1 %v11656_v52 }
 0x5b4   :  { %v17332_v36 = vld [vmem:[#allocation2 + $0x634] sm:$0xf0]  ;;  %7631 = vmatmul.bf16.vlgmr.msra.gmra.mxu0 %v18894_v19 }
 0x5b5   :  { %v12647_v45 = vld [vmem:[#allocation2 + $0x9d8] sm:$0xf]  ;;  %v12168_v54 = vor.u32 %v17332_v36, %v12167_v32  ;;  %7656 = vmatpush.bf16.msra.mxu2 %v11912_v53  ;;  %v7424_v53 = vpop.f32.mrf.mxu0 }
 0x5b6   :  { %v17452_v39 = vld [vmem:[#allocation2 + $0x9f4] sm:$0xf0]  ;;  %7644 = vmatmul.bf16.vlgmr.msra.gmra.mxu1 %v18898_v22 }
 0x5b7   :  { %v12903_v34 = vld [vmem:[#allocation2 + $0xbd8] sm:$0xf]  ;;  %v12648_v55 = vor.u32 %v17452_v39, %v12647_v45  ;;  %7669 = vmatpush.bf16.msra.mxu3 %v12168_v54  ;;  %v18592_v45 = vld [vmem:[#allocation4] sm:$0xff] }
 0x5b8   :  { %v17516_v46 = vld [vmem:[#allocation2 + $0xbf4] sm:$0xf0]  ;;  %7657 = vmatmul.bf16.vlgmr.msra.gmra.mxu2 %v18892_v18  ;;  %v1188_v39 = vperm.slane %v18592_v45, 5 }
 0x5b9   :  { %v13159_v49 = vld [vmem:[#allocation2 + $0xdd8] sm:$0xf]  ;;  %v12904_v58 = vor.u32 %v17516_v46, %v12903_v34  ;;  %7675 = vmatpush.bf16.msrb.mxu0 %v12648_v55 }
 0x5ba   :  { %v17580_v50 = vld [vmem:[#allocation2 + $0xdf4] sm:$0xf0]  ;;  %7670 = vmatmul.bf16.vlgmr.msra.gmra.mxu3 %v18896_v20 }
 0x5bb   :  { %v13415_v37 = vld [vmem:[#allocation2 + $0xfd8] sm:$0xf]  ;;  %v13160_v59 = vor.u32 %v17580_v50, %v13159_v49  ;;  %7688 = vmatpush.bf16.msrb.mxu1 %v12904_v58 }
 0x5bc   :  { %v17644_v16 = vld [vmem:[#allocation2 + $0xff4] sm:$0xf0] }
 0x5bd   :  { %v12615_v62 = vld [vmem:[#allocation2 + $0x998] sm:$0xf]  ;;  %v13416_v63 = vor.u32 %v17644_v16, %v13415_v37  ;;  %7701 = vmatpush.bf16.msrb.mxu2 %v13160_v59  ;;  %v7425_v59 = vadd.f32 %v7424_v53, %v1188_v39 }
 0x5be   :  { %v17444_v60 = vld [vmem:[#allocation2 + $0x9b4] sm:$0xf0] }
 0x5bf   :  { %v12871_v61 = vld [vmem:[#allocation2 + $0xb98] sm:$0xf]  ;;  %v12616_v5 = vor.u32 %v17444_v60, %v12615_v62  ;;  %7714 = vmatpush.bf16.msrb.mxu3 %v13416_v63  ;;  %v7437_v62 = vpop.f32.mrf.mxu1 }
 0x5c0   :  { %v17508_v0 = vld [vmem:[#allocation2 + $0xbb4] sm:$0xf0] }
 0x5c1   :  { %v13127_v2 = vld [vmem:[#allocation2 + $0xd98] sm:$0xf]  ;;  %v12872_v7 = vor.u32 %v17508_v0, %v12871_v61  ;;  %7676 = vmatpush.bf16.msrb.mxu0 %v12616_v5 }
 0x5c2   :  { %v17572_v3 = vld [vmem:[#allocation2 + $0xdb4] sm:$0xf0] }
 0x5c3   :  { %v13383_v4 = vld [vmem:[#allocation2 + $0xf98] sm:$0xf]  ;;  %v13128_v13 = vor.u32 %v17572_v3, %v13127_v2  ;;  %7689 = vmatpush.bf16.msrb.mxu1 %v12872_v7 }
 0x5c4   :  { %v17636_v51 = vld [vmem:[#allocation2 + $0xfb4] sm:$0xf0] }
 0x5c5   :  { %v12583_v9 = vld [vmem:[#allocation2 + $0x958] sm:$0xf]  ;;  %v13384_v11 = vor.u32 %v17636_v51, %v13383_v4  ;;  %7702 = vmatpush.bf16.msrb.mxu2 %v13128_v13  ;;  %v7438_v4 = vadd.f32 %v7437_v62, %v7425_v59 }
 0x5c6   :  { %v17436_v10 = vld [vmem:[#allocation2 + $0x974] sm:$0xf0] }
 0x5c7   :  { %v12839_v6 = vld [vmem:[#allocation2 + $0xb58] sm:$0xf]  ;;  %v12584_v24 = vor.u32 %v17436_v10, %v12583_v9  ;;  %7715 = vmatpush.bf16.msrb.mxu3 %v13384_v11 }
 0x5c8   :  { %v17500_v12 = vld [vmem:[#allocation2 + $0xb74] sm:$0xf0] }
 0x5c9   :  { %v13095_v14 = vld [vmem:[#allocation2 + $0xd58] sm:$0xf]  ;;  %v12840_v27 = vor.u32 %v17500_v12, %v12839_v6  ;;  %7677 = vmatpush.bf16.msrb.mxu0 %v12584_v24  ;;  %v7450_v6 = vpop.f32.mrf.mxu2 }
 0x5ca   :  { %v17564_v15 = vld [vmem:[#allocation2 + $0xd74] sm:$0xf0] }
 0x5cb   :  { %v13351_v8 = vld [vmem:[#allocation2 + $0xf58] sm:$0xf]  ;;  %v13096_v32 = vor.u32 %v17564_v15, %v13095_v14  ;;  %7690 = vmatpush.bf16.msrb.mxu1 %v12840_v27 }
 0x5cc   :  { %v17628_v21 = vld [vmem:[#allocation2 + $0xf74] sm:$0xf0] }
 0x5cd   :  { %v12551_v26 = vld [vmem:[#allocation2 + $0x918] sm:$0xf]  ;;  %v13352_v34 = vor.u32 %v17628_v21, %v13351_v8  ;;  %7703 = vmatpush.bf16.msrb.mxu2 %v13096_v32  ;;  %v7451_v8 = vadd.f32 %v7450_v6, %v7438_v4  ;;  %v7463_v21 = vpop.f32.mrf.mxu3 }
 0x5ce   :  { %v17428_v36 = vld [vmem:[#allocation2 + $0x934] sm:$0xf0] }
 0x5cf   :  { %v12807_v43 = vld [vmem:[#allocation2 + $0xb18] sm:$0xf]  ;;  %v12552_v52 = vor.u32 %v17428_v36, %v12551_v26  ;;  %7716 = vmatpush.bf16.msrb.mxu3 %v13352_v34  ;;  %v19097_v32 = vadd.f32 %v7463_v21, %v7451_v8  ;;  %v7426_v36 = vpop.f32.mrf.mxu0 }
 0x5d0   :  { %v17492_v47 = vld [vmem:[#allocation2 + $0xb34] sm:$0xf0] }
 0x5d1   :  { %v13063_v48 = vld [vmem:[#allocation2 + $0xd18] sm:$0xf]  ;;  %v12808_v37 = vor.u32 %v17492_v47, %v12807_v43  ;;  %7678 = vmatpush.bf16.msrb.mxu0 %v12552_v52 }
 0x5d2   :  { %v17556_v46 = vld [vmem:[#allocation2 + $0xd34] sm:$0xf0] }
 0x5d3   :  { %v13319_v49 = vld [vmem:[#allocation2 + $0xf18] sm:$0xf]  ;;  %v13064_v16 = vor.u32 %v17556_v46, %v13063_v48  ;;  %7691 = vmatpush.bf16.msrb.mxu1 %v12808_v37  ;;  %v7439_v48 = vpop.f32.mrf.mxu1 }
 0x5d4   :  { %v17620_v50 = vld [vmem:[#allocation2 + $0xf34] sm:$0xf0] }
 0x5d5   :  { %v12519_v54 = vld [vmem:[#allocation2 + $0x8d8] sm:$0xf]  ;;  %v13320_v60 = vor.u32 %v17620_v50, %v13319_v49  ;;  %7704 = vmatpush.bf16.msrb.mxu2 %v13064_v16 }
 0x5d6   :  { %v17420_v55 = vld [vmem:[#allocation2 + $0x8f4] sm:$0xf0] }
 0x5d7   :  { %v12775_v58 = vld [vmem:[#allocation2 + $0xad8] sm:$0xf]  ;;  %v12520_v51 = vor.u32 %v17420_v55, %v12519_v54  ;;  %7717 = vmatpush.bf16.msrb.mxu3 %v13320_v60 }
 0x5d8   :  { %v17484_v61 = vld [vmem:[#allocation2 + $0xaf4] sm:$0xf0] }
 0x5d9   :  { %v13031_v63 = vld [vmem:[#allocation2 + $0xcd8] sm:$0xf]  ;;  %v12776_v5 = vor.u32 %v17484_v61, %v12775_v58  ;;  %7679 = vmatpush.bf16.msrb.mxu0 %v12520_v51  ;;  %v7465_v51 = vpop.f32.mrf.mxu3 }
 0x5da   :  { %v17548_v0 = vld [vmem:[#allocation2 + $0xcf4] sm:$0xf0] }
 0x5db   :  { %v13287_v2 = vld [vmem:[#allocation2 + $0xed8] sm:$0xf]  ;;  %v13032_v7 = vor.u32 %v17548_v0, %v13031_v63  ;;  %7692 = vmatpush.bf16.msrb.mxu1 %v12776_v5  ;;  %v7452_v63 = vpop.f32.mrf.mxu2 }
 0x5dc   :  { %v17612_v3 = vld [vmem:[#allocation2 + $0xef4] sm:$0xf0] }
 0x5dd   :  { %v12487_v13 = vld [vmem:[#allocation2 + $0x898] sm:$0xf]  ;;  %v13288_v11 = vor.u32 %v17612_v3, %v13287_v2  ;;  %7705 = vmatpush.bf16.msrb.mxu2 %v13032_v7 }
 0x5de   :  { %v17412_v9 = vld [vmem:[#allocation2 + $0x8b4] sm:$0xf0] }
 0x5df   :  { %v12743_v10 = vld [vmem:[#allocation2 + $0xa98] sm:$0xf]  ;;  %v12488_v27 = vor.u32 %v17412_v9, %v12487_v13  ;;  %7718 = vmatpush.bf16.msrb.mxu3 %v13288_v11 }
 0x5e0   :  { %v17476_v12 = vld [vmem:[#allocation2 + $0xab4] sm:$0xf0] }
 0x5e1   :  { %v12999_v14 = vld [vmem:[#allocation2 + $0xc98] sm:$0xf]  ;;  %v12744_v43 = vor.u32 %v17476_v12, %v12743_v10  ;;  %7680 = vmatpush.bf16.msrb.mxu0 %v12488_v27 }
 0x5e2   :  { %v17540_v15 = vld [vmem:[#allocation2 + $0xcb4] sm:$0xf0] }
 0x5e3   :  { %v13255_v24 = vld [vmem:[#allocation2 + $0xe98] sm:$0xf]  ;;  %v13000_v45 = vor.u32 %v17540_v15, %v12999_v14  ;;  %7693 = vmatpush.bf16.msrb.mxu1 %v12744_v43 }
 0x5e4   :  { %v17604_v26 = vld [vmem:[#allocation2 + $0xeb4] sm:$0xf0] }
 0x5e5   :  { %v12455_v39 = vld [vmem:[#allocation2 + $0x858] sm:$0xf]  ;;  %v13256_v46 = vor.u32 %v17604_v26, %v13255_v24  ;;  %7706 = vmatpush.bf16.msrb.mxu2 %v13000_v45 }
 0x5e6   :  { %v17404_v34 = vld [vmem:[#allocation2 + $0x874] sm:$0xf0] }
 0x5e7   :  { %v12711_v47 = vld [vmem:[#allocation2 + $0xa58] sm:$0xf]  ;;  %v12456_v16 = vor.u32 %v17404_v34, %v12455_v39  ;;  %7719 = vmatpush.bf16.msrb.mxu3 %v13256_v46 }
 0x5e8   :  { %v17468_v49 = vld [vmem:[#allocation2 + $0xa74] sm:$0xf0] }
 0x5e9   :  { %v12967_v50 = vld [vmem:[#allocation2 + $0xc58] sm:$0xf]  ;;  %v12712_v58 = vor.u32 %v17468_v49, %v12711_v47  ;;  %7681 = vmatpush.bf16.msrb.mxu0 %v12456_v16 }
 0x5ea   :  { %v17532_v52 = vld [vmem:[#allocation2 + $0xc74] sm:$0xf0] }
 0x5eb   :  { %v13223_v53 = vld [vmem:[#allocation2 + $0xe58] sm:$0xf]  ;;  %v12968_v59 = vor.u32 %v17532_v52, %v12967_v50  ;;  %7694 = vmatpush.bf16.msrb.mxu1 %v12712_v58 }
 0x5ec   :  { %v17596_v37 = vld [vmem:[#allocation2 + $0xe74] sm:$0xf0] }
 0x5ed   :  { %v12423_v54 = vld [vmem:[#allocation2 + $0x818] sm:$0xf]  ;;  %v13224_v0 = vor.u32 %v17596_v37, %v13223_v53  ;;  %7707 = vmatpush.bf16.msrb.mxu2 %v12968_v59 }
 0x5ee   :  { %v17396_v55 = vld [vmem:[#allocation2 + $0x834] sm:$0xf0] }
 0x5ef   :  { %v12679_v62 = vld [vmem:[#allocation2 + $0xa18] sm:$0xf]  ;;  %v12424_v9 = vor.u32 %v17396_v55, %v12423_v54  ;;  %7720 = vmatpush.bf16.msrb.mxu3 %v13224_v0 }
 0x5f0   :  { %v17460_v60 = vld [vmem:[#allocation2 + $0xa34] sm:$0xf0] }
 0x5f1   :  { %v12935_v61 = vld [vmem:[#allocation2 + $0xc18] sm:$0xf]  ;;  %v12680_v12 = vor.u32 %v17460_v60, %v12679_v62  ;;  %7682 = vmatpush.bf16.msrb.mxu0 %v12424_v9 }
 0x5f2   :  { %v17524_v2 = vld [vmem:[#allocation2 + $0xc34] sm:$0xf0] }
 0x5f3   :  { %v13191_v3 = vld [vmem:[#allocation2 + $0xe18] sm:$0xf]  ;;  %v12936_v14 = vor.u32 %v17524_v2, %v12935_v61  ;;  %7695 = vmatpush.bf16.msrb.mxu1 %v12680_v12  ;;  %v7476_v12 = vpop.f32.mrf.mxu0 }
 0x5f4   :  { %v17588_v4 = vld [vmem:[#allocation2 + $0xe34] sm:$0xf0]  ;;  %7683 = vmatmul.bf16.vlgmr.msrb.gmra.mxu0 %v18912_v41 }
 0x5f5   :  { %v13671_v5 = vld [vmem:[#allocation2 + $0x11d8] sm:$0xf]  ;;  %v13192_v21 = vor.u32 %v17588_v4, %v13191_v3  ;;  %7708 = vmatpush.bf16.msrb.mxu2 %v12936_v14 }
 0x5f6   :  { %v17708_v7 = vld [vmem:[#allocation2 + $0x11f4] sm:$0xf0]  ;;  %7696 = vmatmul.bf16.vlgmr.msrb.gmra.mxu1 %v18916_v44 }
 0x5f7   :  { %v13927_v13 = vld [vmem:[#allocation2 + $0x13d8] sm:$0xf]  ;;  %v13672_v24 = vor.u32 %v17708_v7, %v13671_v5  ;;  %7721 = vmatpush.bf16.msrb.mxu3 %v13192_v21 }
 0x5f8   :  { %v17772_v10 = vld [vmem:[#allocation2 + $0x13f4] sm:$0xf0]  ;;  %7709 = vmatmul.bf16.vlgmr.msrb.gmra.mxu2 %v18910_v38 }
 0x5f9   :  { %v14183_v6 = vld [vmem:[#allocation2 + $0x15d8] sm:$0xf]  ;;  %v13928_v26 = vor.u32 %v17772_v10, %v13927_v13  ;;  %7727 = vmatpush.bf16.msra.mxu0 %v13672_v24 }
 0x5fa   :  { %v17836_v11 = vld [vmem:[#allocation2 + $0x15f4] sm:$0xf0]  ;;  %7722 = vmatmul.bf16.vlgmr.msrb.gmra.mxu3 %v18914_v42 }
 0x5fb   :  { %v14439_v15 = vld [vmem:[#allocation2 + $0x17d8] sm:$0xf]  ;;  %v14184_v27 = vor.u32 %v17836_v11, %v14183_v6  ;;  %7740 = vmatpush.bf16.msra.mxu1 %v13928_v26  ;;  %v7477_v26 = vadd.f32 %v7476_v12, %v19097_v32 }
 0x5fc   :  { %v17900_v8 = vld [vmem:[#allocation2 + $0x17f4] sm:$0xf0] }
 0x5fd   :  { %v13639_v36 = vld [vmem:[#allocation2 + $0x1198] sm:$0xf]  ;;  %v14440_v39 = vor.u32 %v17900_v8, %v14439_v15  ;;  %7753 = vmatpush.bf16.msra.mxu2 %v14184_v27  ;;  %v7489_v27 = vpop.f32.mrf.mxu1 }
 0x5fe   :  { %v17700_v43 = vld [vmem:[#allocation2 + $0x11b4] sm:$0xf0] }
 0x5ff   :  { %v13895_v45 = vld [vmem:[#allocation2 + $0x1398] sm:$0xf]  ;;  %v13640_v50 = vor.u32 %v17700_v43, %v13639_v36  ;;  %7766 = vmatpush.bf16.msra.mxu3 %v14440_v39 }
 0x600   :  { %v17764_v34 = vld [vmem:[#allocation2 + $0x13b4] sm:$0xf0] }
 0x601   :  { %v14151_v47 = vld [vmem:[#allocation2 + $0x1598] sm:$0xf]  ;;  %v13896_v52 = vor.u32 %v17764_v34, %v13895_v45  ;;  %7728 = vmatpush.bf16.msra.mxu0 %v13640_v50 }
 0x602   :  { %v17828_v48 = vld [vmem:[#allocation2 + $0x15b4] sm:$0xf0] }
 0x603   :  { %v14407_v46 = vld [vmem:[#allocation2 + $0x1798] sm:$0xf]  ;;  %v14152_v53 = vor.u32 %v17828_v48, %v14151_v47  ;;  %7741 = vmatpush.bf16.msra.mxu1 %v13896_v52  ;;  %v7490_v48 = vadd.f32 %v7489_v27, %v7477_v26 }
 0x604   :  { %v17892_v49 = vld [vmem:[#allocation2 + $0x17b4] sm:$0xf0] }
 0x605   :  { %v13607_v37 = vld [vmem:[#allocation2 + $0x1158] sm:$0xf]  ;;  %v14408_v55 = vor.u32 %v17892_v49, %v14407_v46  ;;  %7754 = vmatpush.bf16.msra.mxu2 %v14152_v53 }
 0x606   :  { %v17692_v16 = vld [vmem:[#allocation2 + $0x1174] sm:$0xf0] }
 0x607   :  { %v13863_v54 = vld [vmem:[#allocation2 + $0x1358] sm:$0xf]  ;;  %v13608_v63 = vor.u32 %v17692_v16, %v13607_v37  ;;  %7767 = vmatpush.bf16.msra.mxu3 %v14408_v55  ;;  %v7502_v16 = vpop.f32.mrf.mxu2 }
 0x608   :  { %v17756_v58 = vld [vmem:[#allocation2 + $0x1374] sm:$0xf0] }
 0x609   :  { %v14119_v59 = vld [vmem:[#allocation2 + $0x1558] sm:$0xf]  ;;  %v13864_v0 = vor.u32 %v17756_v58, %v13863_v54  ;;  %7729 = vmatpush.bf16.msra.mxu0 %v13608_v63 }
 0x60a   :  { %v17820_v62 = vld [vmem:[#allocation2 + $0x1574] sm:$0xf0] }
 0x60b   :  { %v14375_v60 = vld [vmem:[#allocation2 + $0x1758] sm:$0xf]  ;;  %v14120_v2 = vor.u32 %v17820_v62, %v14119_v59  ;;  %7742 = vmatpush.bf16.msra.mxu1 %v13864_v0  ;;  %v7503_v59 = vadd.f32 %v7502_v16, %v7490_v48  ;;  %v7515_v62 = vpop.f32.mrf.mxu3 }
 0x60c   :  { %v17884_v61 = vld [vmem:[#allocation2 + $0x1774] sm:$0xf0] }
 0x60d   :  { %v13575_v3 = vld [vmem:[#allocation2 + $0x1118] sm:$0xf]  ;;  %v14376_v5 = vor.u32 %v17884_v61, %v14375_v60  ;;  %7755 = vmatpush.bf16.msra.mxu2 %v14120_v2  ;;  %v19104_v0 = vadd.f32 %v7515_v62, %v7503_v59  ;;  %v7478_v2 = vpop.f32.mrf.mxu0 }
 0x60e   :  { %v17684_v4 = vld [vmem:[#allocation2 + $0x1134] sm:$0xf0] }
 0x60f   :  { %v13831_v51 = vld [vmem:[#allocation2 + $0x1318] sm:$0xf]  ;;  %v13576_v11 = vor.u32 %v17684_v4, %v13575_v3  ;;  %7768 = vmatpush.bf16.msra.mxu3 %v14376_v5 }
 0x610   :  { %v17748_v7 = vld [vmem:[#allocation2 + $0x1334] sm:$0xf0] }
 0x611   :  { %v14087_v13 = vld [vmem:[#allocation2 + $0x1518] sm:$0xf]  ;;  %v13832_v14 = vor.u32 %v17748_v7, %v13831_v51  ;;  %7730 = vmatpush.bf16.msra.mxu0 %v13576_v11 }
 0x612   :  { %v17812_v9 = vld [vmem:[#allocation2 + $0x1534] sm:$0xf0] }
 0x613   :  { %v14343_v10 = vld [vmem:[#allocation2 + $0x1718] sm:$0xf]  ;;  %v14088_v15 = vor.u32 %v17812_v9, %v14087_v13  ;;  %7743 = vmatpush.bf16.msra.mxu1 %v13832_v14  ;;  %v7491_v13 = vpop.f32.mrf.mxu1 }
 0x614   :  { %v17876_v6 = vld [vmem:[#allocation2 + $0x1734] sm:$0xf0] }
 0x615   :  { %v13543_v8 = vld [vmem:[#allocation2 + $0x10d8] sm:$0xf]  ;;  %v14344_v36 = vor.u32 %v17876_v6, %v14343_v10  ;;  %7756 = vmatpush.bf16.msra.mxu2 %v14088_v15 }
 0x616   :  { %v17676_v21 = vld [vmem:[#allocation2 + $0x10f4] sm:$0xf0] }
 0x617   :  { %v13799_v24 = vld [vmem:[#allocation2 + $0x12d8] sm:$0xf]  ;;  %v13544_v46 = vor.u32 %v17676_v21, %v13543_v8  ;;  %7769 = vmatpush.bf16.msra.mxu3 %v14344_v36 }
 0x618   :  { %v17740_v43 = vld [vmem:[#allocation2 + $0x12f4] sm:$0xf0] }
 0x619   :  { %v14055_v45 = vld [vmem:[#allocation2 + $0x14d8] sm:$0xf]  ;;  %v13800_v49 = vor.u32 %v17740_v43, %v13799_v24  ;;  %7731 = vmatpush.bf16.msra.mxu0 %v13544_v46  ;;  %v7517_v46 = vpop.f32.mrf.mxu3 }
 0x61a   :  { %v17804_v39 = vld [vmem:[#allocation2 + $0x14f4] sm:$0xf0] }
 0x61b   :  { %v14311_v34 = vld [vmem:[#allocation2 + $0x16d8] sm:$0xf]  ;;  %v14056_v50 = vor.u32 %v17804_v39, %v14055_v45  ;;  %7744 = vmatpush.bf16.msra.mxu1 %v13800_v49  ;;  %v7504_v45 = vpop.f32.mrf.mxu2 }
 0x61c   :  { %v17868_v47 = vld [vmem:[#allocation2 + $0x16f4] sm:$0xf0] }
 0x61d   :  { %v13511_v52 = vld [vmem:[#allocation2 + $0x1098] sm:$0xf]  ;;  %v14312_v32 = vor.u32 %v17868_v47, %v14311_v34  ;;  %7757 = vmatpush.bf16.msra.mxu2 %v14056_v50 }
 0x61e   :  { %v17668_v53 = vld [vmem:[#allocation2 + $0x10b4] sm:$0xf0] }
 0x61f   :  { %v13767_v37 = vld [vmem:[#allocation2 + $0x1298] sm:$0xf]  ;;  %v13512_v63 = vor.u32 %v17668_v53, %v13511_v52  ;;  %7770 = vmatpush.bf16.msra.mxu3 %v14312_v32 }
 0x620   :  { %v17732_v54 = vld [vmem:[#allocation2 + $0x12b4] sm:$0xf0] }
 0x621   :  { %v14023_v55 = vld [vmem:[#allocation2 + $0x1498] sm:$0xf]  ;;  %v13768_v3 = vor.u32 %v17732_v54, %v13767_v37  ;;  %7732 = vmatpush.bf16.msra.mxu0 %v13512_v63 }
 0x622   :  { %v17796_v58 = vld [vmem:[#allocation2 + $0x14b4] sm:$0xf0] }
 0x623   :  { %v14279_v60 = vld [vmem:[#allocation2 + $0x1698] sm:$0xf]  ;;  %v14024_v4 = vor.u32 %v17796_v58, %v14023_v55  ;;  %7745 = vmatpush.bf16.msra.mxu1 %v13768_v3 }
 0x624   :  { %v17860_v61 = vld [vmem:[#allocation2 + $0x16b4] sm:$0xf0] }
 0x625   :  { %v13479_v51 = vld [vmem:[#allocation2 + $0x1058] sm:$0xf]  ;;  %v14280_v9 = vor.u32 %v17860_v61, %v14279_v60  ;;  %7758 = vmatpush.bf16.msra.mxu2 %v14024_v4 }
 0x626   :  { %v17660_v5 = vld [vmem:[#allocation2 + $0x1074] sm:$0xf0] }
 0x627   :  { %v13735_v7 = vld [vmem:[#allocation2 + $0x1258] sm:$0xf]  ;;  %v13480_v15 = vor.u32 %v17660_v5, %v13479_v51  ;;  %7771 = vmatpush.bf16.msra.mxu3 %v14280_v9 }
 0x628   :  { %v17724_v10 = vld [vmem:[#allocation2 + $0x1274] sm:$0xf0] }
 0x629   :  { %v13991_v6 = vld [vmem:[#allocation2 + $0x1458] sm:$0xf]  ;;  %v13736_v24 = vor.u32 %v17724_v10, %v13735_v7  ;;  %7733 = vmatpush.bf16.msra.mxu0 %v13480_v15 }
 0x62a   :  { %v17788_v11 = vld [vmem:[#allocation2 + $0x1474] sm:$0xf0] }
 0x62b   :  { %v14247_v12 = vld [vmem:[#allocation2 + $0x1658] sm:$0xf]  ;;  %v13992_v26 = vor.u32 %v17788_v11, %v13991_v6  ;;  %7746 = vmatpush.bf16.msra.mxu1 %v13736_v24 }
 0x62c   :  { %v17852_v14 = vld [vmem:[#allocation2 + $0x1674] sm:$0xf0] }
 0x62d   :  { %v13447_v8 = vld [vmem:[#allocation2 + $0x1018] sm:$0xf]  ;;  %v14248_v39 = vor.u32 %v17852_v14, %v14247_v12  ;;  %7759 = vmatpush.bf16.msra.mxu2 %v13992_v26 }
 0x62e   :  { %v17652_v21 = vld [vmem:[#allocation2 + $0x1034] sm:$0xf0] }
 0x62f   :  { %v13703_v27 = vld [vmem:[#allocation2 + $0x1218] sm:$0xf]  ;;  %v13448_v53 = vor.u32 %v17652_v21, %v13447_v8  ;;  %7772 = vmatpush.bf16.msra.mxu3 %v14248_v39 }
 0x630   :  { %v17716_v36 = vld [vmem:[#allocation2 + $0x1234] sm:$0xf0] }
 0x631   :  { %v13959_v43 = vld [vmem:[#allocation2 + $0x1418] sm:$0xf]  ;;  %v13704_v54 = vor.u32 %v17716_v36, %v13703_v27  ;;  %7734 = vmatpush.bf16.msra.mxu0 %v13448_v53 }
 0x632   :  { %v17780_v34 = vld [vmem:[#allocation2 + $0x1434] sm:$0xf0] }
 0x633   :  { %v14215_v47 = vld [vmem:[#allocation2 + $0x1618] sm:$0xf]  ;;  %v13960_v55 = vor.u32 %v17780_v34, %v13959_v43  ;;  %7747 = vmatpush.bf16.msra.mxu1 %v13704_v54 }
 0x634   :  { %v17844_v48 = vld [vmem:[#allocation2 + $0x1634] sm:$0xf0]  ;;  %7735 = vmatmul.bf16.vlgmr.msra.gmra.mxu0 %v18928_v25 }
 0x635   :  { %v14695_v49 = vld [vmem:[#allocation2 + $0x19d8] sm:$0xf]  ;;  %v14216_v62 = vor.u32 %v17844_v48, %v14215_v47  ;;  %7760 = vmatpush.bf16.msra.mxu2 %v13960_v55 }
 0x636   :  { %v17964_v50 = vld [vmem:[#allocation2 + $0x19f4] sm:$0xf0]  ;;  %7748 = vmatmul.bf16.vlgmr.msra.gmra.mxu1 %v18932_v30 }
 0x637   :  { %v14951_v52 = vld [vmem:[#allocation2 + $0x1bd8] sm:$0xf]  ;;  %v14696_v60 = vor.u32 %v17964_v50, %v14695_v49  ;;  %7773 = vmatpush.bf16.msra.mxu3 %v14216_v62 }
 0x638   :  { %v18028_v37 = vld [vmem:[#allocation2 + $0x1bf4] sm:$0xf0]  ;;  %7761 = vmatmul.bf16.vlgmr.msra.gmra.mxu2 %v18930_v29 }
 0x639   :  { %v15207_v16 = vld [vmem:[#allocation2 + $0x1dd8] sm:$0xf]  ;;  %v14952_v61 = vor.u32 %v18028_v37, %v14951_v52  ;;  %7779 = vmatpush.bf16.msrb.mxu0 %v14696_v60  ;;  %v7528_v37 = vpop.f32.mrf.mxu0 }
 0x63a   :  { %v18092_v32 = vld [vmem:[#allocation2 + $0x1df4] sm:$0xf0]  ;;  %7774 = vmatmul.bf16.vlgmr.msra.gmra.mxu3 %v18934_v33  ;;  %v7529_v54 = vadd.f32 %v7528_v37, %v19104_v0 }
 0x63b   :  { %v15463_v58 = vld [vmem:[#allocation2 + $0x1fd8] sm:$0xf]  ;;  %v15208_v63 = vor.u32 %v18092_v32, %v15207_v16  ;;  %7792 = vmatpush.bf16.msrb.mxu1 %v14952_v61 }
 0x63c   :  { %v18156_v59 = vld [vmem:[#allocation2 + $0x1ff4] sm:$0xf0] }
 0x63d   :  { %v14663_v2 = vld [vmem:[#allocation2 + $0x1998] sm:$0xf]  ;;  %v15464_v51 = vor.u32 %v18156_v59, %v15463_v58  ;;  %7805 = vmatpush.bf16.msrb.mxu2 %v15208_v63  ;;  %v7541_v58 = vpop.f32.mrf.mxu1 }
 0x63e   :  { %v17956_v3 = vld [vmem:[#allocation2 + $0x19b4] sm:$0xf0] }
 0x63f   :  { %v14919_v4 = vld [vmem:[#allocation2 + $0x1b98] sm:$0xf]  ;;  %v14664_v6 = vor.u32 %v17956_v3, %v14663_v2  ;;  %7818 = vmatpush.bf16.msrb.mxu3 %v15464_v51  ;;  %v7542_v3 = vadd.f32 %v7541_v58, %v7529_v54 }
 0x640   :  { %v18020_v5 = vld [vmem:[#allocation2 + $0x1bb4] sm:$0xf0] }
 0x641   :  { %v15175_v7 = vld [vmem:[#allocation2 + $0x1d98] sm:$0xf]  ;;  %v14920_v11 = vor.u32 %v18020_v5, %v14919_v4  ;;  %7780 = vmatpush.bf16.msrb.mxu0 %v14664_v6 }
 0x642   :  { %v18084_v13 = vld [vmem:[#allocation2 + $0x1db4] sm:$0xf0] }
 0x643   :  { %v15431_v9 = vld [vmem:[#allocation2 + $0x1f98] sm:$0xf]  ;;  %v15176_v12 = vor.u32 %v18084_v13, %v15175_v7  ;;  %7793 = vmatpush.bf16.msrb.mxu1 %v14920_v11 }
 0x644   :  { %v18148_v10 = vld [vmem:[#allocation2 + $0x1fb4] sm:$0xf0] }
 0x645   :  { %v14631_v14 = vld [vmem:[#allocation2 + $0x1958] sm:$0xf]  ;;  %v15432_v21 = vor.u32 %v18148_v10, %v15431_v9  ;;  %7806 = vmatpush.bf16.msrb.mxu2 %v15176_v12 }
 0x646   :  { %v17948_v15 = vld [vmem:[#allocation2 + $0x1974] sm:$0xf0] }
 0x647   :  { %v14887_v8 = vld [vmem:[#allocation2 + $0x1b58] sm:$0xf]  ;;  %v14632_v45 = vor.u32 %v17948_v15, %v14631_v14  ;;  %7819 = vmatpush.bf16.msrb.mxu3 %v15432_v21  ;;  %v7554_v15 = vpop.f32.mrf.mxu2 }
 0x648   :  { %v18012_v24 = vld [vmem:[#allocation2 + $0x1b74] sm:$0xf0] }
 0x649   :  { %v15143_v26 = vld [vmem:[#allocation2 + $0x1d58] sm:$0xf]  ;;  %v14888_v39 = vor.u32 %v18012_v24, %v14887_v8  ;;  %7781 = vmatpush.bf16.msrb.mxu0 %v14632_v45  ;;  %v7530_v45 = vpop.f32.mrf.mxu0 }
 0x64a   :  { %v18076_v27 = vld [vmem:[#allocation2 + $0x1d74] sm:$0xf0] }
 0x64b   :  { %v15399_v36 = vld [vmem:[#allocation2 + $0x1f58] sm:$0xf]  ;;  %v15144_v34 = vor.u32 %v18076_v27, %v15143_v26  ;;  %7794 = vmatpush.bf16.msrb.mxu1 %v14888_v39  ;;  %v7555_v26 = vadd.f32 %v7554_v15, %v7542_v3  ;;  %v7567_v27 = vpop.f32.mrf.mxu3  ;;  %v12137_v15 = vld [vmem:[#allocation2 + $0x5f8] sm:$0xf0] }
 0x64c   :  { %v18140_v43 = vld [vmem:[#allocation2 + $0x1f74] sm:$0xf0] }
 0x64d   :  { %v14599_v47 = vld [vmem:[#allocation2 + $0x1918] sm:$0xf]  ;;  %v15400_v49 = vor.u32 %v18140_v43, %v15399_v36  ;;  %7807 = vmatpush.bf16.msrb.mxu2 %v15144_v34  ;;  %v7543_v34 = vpop.f32.mrf.mxu1 }
 0x64e   :  { %v17940_v48 = vld [vmem:[#allocation2 + $0x1934] sm:$0xf0]  ;;  %v11593_v34 = vld [vmem:[#allocation2 + $0x1b8] sm:$0xf0] }
 0x64f   :  { %v14855_v46 = vld [vmem:[#allocation2 + $0x1b18] sm:$0xf]  ;;  %v14600_v55 = vor.u32 %v17940_v48, %v14599_v47  ;;  %7820 = vmatpush.bf16.msrb.mxu3 %v15400_v49  ;;  %v19111_v47 = vadd.f32 %v7567_v27, %v7555_v26  ;;  %v12393_v26 = vld [vmem:[#allocation2 + $0x7f8] sm:$0xf0] }
 0x650   :  { %v18004_v50 = vld [vmem:[#allocation2 + $0x1b34] sm:$0xf0] }
 0x651   :  { %v15111_v52 = vld [vmem:[#allocation2 + $0x1d18] sm:$0xf]  ;;  %v14856_v59 = vor.u32 %v18004_v50, %v14855_v46  ;;  %7782 = vmatpush.bf16.msrb.mxu0 %v14600_v55 }
 0x652   :  { %v18068_v53 = vld [vmem:[#allocation2 + $0x1d34] sm:$0xf0] }
 0x653   :  { %v15367_v16 = vld [vmem:[#allocation2 + $0x1f18] sm:$0xf]  ;;  %v15112_v62 = vor.u32 %v18068_v53, %v15111_v52  ;;  %7795 = vmatpush.bf16.msrb.mxu1 %v14856_v59 }
 0x654   :  { %v18132_v32 = vld [vmem:[#allocation2 + $0x1f34] sm:$0xf0] }
 0x655   :  { %v14567_v60 = vld [vmem:[#allocation2 + $0x18d8] sm:$0xf]  ;;  %v15368_v2 = vor.u32 %v18132_v32, %v15367_v16  ;;  %7808 = vmatpush.bf16.msrb.mxu2 %v15112_v62 }
 0x656   :  { %v17932_v61 = vld [vmem:[#allocation2 + $0x18f4] sm:$0xf0] }
 0x657   :  { %v14823_v63 = vld [vmem:[#allocation2 + $0x1ad8] sm:$0xf]  ;;  %v14568_v9 = vor.u32 %v17932_v61, %v14567_v60  ;;  %7821 = vmatpush.bf16.msrb.mxu3 %v15368_v2 }
 0x658   :  { %v17996_v4 = vld [vmem:[#allocation2 + $0x1af4] sm:$0xf0] }
 0x659   :  { %v15079_v51 = vld [vmem:[#allocation2 + $0x1cd8] sm:$0xf]  ;;  %v14824_v0 = vor.u32 %v17996_v4, %v14823_v63  ;;  %7783 = vmatpush.bf16.msrb.mxu0 %v14568_v9  ;;  %v17192_v9 = vld [vmem:[#allocation2 + $0x1dc] sm:$0xf] }
 0x65a   :  { %v18060_v5 = vld [vmem:[#allocation2 + $0x1cf4] sm:$0xf0] }
 0x65b   :  { %v15335_v7 = vld [vmem:[#allocation2 + $0x1ed8] sm:$0xf]  ;;  %v15080_v10 = vor.u32 %v18060_v5, %v15079_v51  ;;  %7796 = vmatpush.bf16.msrb.mxu1 %v14824_v0  ;;  %v11625_v0 = vld [vmem:[#allocation2 + $0x1f8] sm:$0xf0] }
 0x65c   :  { %v18124_v13 = vld [vmem:[#allocation2 + $0x1ef4] sm:$0xf0] }
 0x65d   :  { %v14535_v6 = vld [vmem:[#allocation2 + $0x1898] sm:$0xf]  ;;  %v15336_v14 = vor.u32 %v18124_v13, %v15335_v7  ;;  %7809 = vmatpush.bf16.msrb.mxu2 %v15080_v10  ;;  %v7556_v13 = vpop.f32.mrf.mxu2  ;;  %v17256_v10 = vld [vmem:[#allocation2 + $0x3dc] sm:$0xf] }
 0x65e   :  { %v17924_v11 = vld [vmem:[#allocation2 + $0x18b4] sm:$0xf0]  ;;  %v11529_v13 = vld [vmem:[#allocation2 + $0x138] sm:$0xf0] }
 0x65f   :  { %v14791_v12 = vld [vmem:[#allocation2 + $0x1a98] sm:$0xf]  ;;  %v14536_v39 = vor.u32 %v17924_v11, %v14535_v6  ;;  %7822 = vmatpush.bf16.msrb.mxu3 %v15336_v14  ;;  %v7569_v6 = vpop.f32.mrf.mxu3  ;;  %v17320_v14 = vld [vmem:[#allocation2 + $0x5dc] sm:$0xf] }
 0x660   :  { %v17988_v8 = vld [vmem:[#allocation2 + $0x1ab4] sm:$0xf0]  ;;  %v12140_v45 = vor.u32 %v17320_v14, %v12137_v15  ;;  %v17296_v6 = vld [vmem:[#allocation2 + $0x51c] sm:$0xf] }
 0x661   :  { %v15047_v21 = vld [vmem:[#allocation2 + $0x1c98] sm:$0xf]  ;;  %v14792_v48 = vor.u32 %v17988_v8, %v14791_v12  ;;  %7784 = vmatpush.bf16.msrb.mxu0 %v14536_v39  ;;  %v11881_v12 = vld [vmem:[#allocation2 + $0x3f8] sm:$0xf0] }
 0x662   :  { %v18052_v24 = vld [vmem:[#allocation2 + $0x1cb4] sm:$0xf0]  ;;  %v17184_v39 = vld [vmem:[#allocation2 + $0x19c] sm:$0xf] }
 0x663   :  { %v15303_v36 = vld [vmem:[#allocation2 + $0x1e98] sm:$0xf]  ;;  %v15048_v46 = vor.u32 %v18052_v24, %v15047_v21  ;;  %7797 = vmatpush.bf16.msrb.mxu1 %v14792_v48  ;;  %v17384_v24 = vld [vmem:[#allocation2 + $0x7dc] sm:$0xf] }
 0x664   :  { %v18116_v43 = vld [vmem:[#allocation2 + $0x1eb4] sm:$0xf0]  ;;  %v17248_v48 = vld [vmem:[#allocation2 + $0x39c] sm:$0xf] }
 0x665   :  { %v14503_v49 = vld [vmem:[#allocation2 + $0x1858] sm:$0xf]  ;;  %v15304_v53 = vor.u32 %v18116_v43, %v15303_v36  ;;  %7810 = vmatpush.bf16.msrb.mxu2 %v15048_v46  ;;  %v11628_v36 = vor.u32 %v17192_v9, %v11625_v0  ;;  %v11884_v43 = vor.u32 %v17256_v10, %v11881_v12  ;;  %v12396_v46 = vor.u32 %v17384_v24, %v12393_v26  ;;  %v17232_v9 = vld [vmem:[#allocation2 + $0x31c] sm:$0xf]  ;;  %v7580_v12 = vpop.f32.mrf.mxu0  ;;  %v7593_v24 = vpop.f32.mrf.mxu1 }
 0x666   :  { %v17916_v50 = vld [vmem:[#allocation2 + $0x1874] sm:$0xf0]  ;;  %v11785_v10 = vld [vmem:[#allocation2 + $0x338] sm:$0xf0] }
 0x667   :  { %v14759_v52 = vld [vmem:[#allocation2 + $0x1a58] sm:$0xf]  ;;  %v14504_v58 = vor.u32 %v17916_v50, %v14503_v49  ;;  %7823 = vmatpush.bf16.msrb.mxu3 %v15304_v53  ;;  %v11849_v49 = vld [vmem:[#allocation2 + $0x3b8] sm:$0xf0]  ;;  %v11788_v26 = vor.u32 %v17232_v9, %v11785_v10 }
 0x668   :  { %v17980_v37 = vld [vmem:[#allocation2 + $0x1a74] sm:$0xf0]  ;;  %v17312_v50 = vld [vmem:[#allocation2 + $0x59c] sm:$0xf] }
 0x669   :  { %v15015_v16 = vld [vmem:[#allocation2 + $0x1c58] sm:$0xf]  ;;  %v14760_v60 = vor.u32 %v17980_v37, %v14759_v52  ;;  %7785 = vmatpush.bf16.msrb.mxu0 %v14504_v58  ;;  %v12105_v52 = vld [vmem:[#allocation2 + $0x5b8] sm:$0xf0] }
 0x66a   :  { %v18044_v32 = vld [vmem:[#allocation2 + $0x1c74] sm:$0xf0]  ;;  %v17376_v53 = vld [vmem:[#allocation2 + $0x79c] sm:$0xf] }
 0x66b   :  { %v15271_v54 = vld [vmem:[#allocation2 + $0x1e58] sm:$0xf]  ;;  %v15016_v61 = vor.u32 %v18044_v32, %v15015_v16  ;;  %7798 = vmatpush.bf16.msrb.mxu1 %v14760_v60  ;;  %v12361_v37 = vld [vmem:[#allocation2 + $0x7b8] sm:$0xf0]  ;;  %v11596_v16 = vor.u32 %v17184_v39, %v11593_v34  ;;  %v11852_v32 = vor.u32 %v17248_v48, %v11849_v49 }
 0x66c   :  { %v18108_v55 = vld [vmem:[#allocation2 + $0x1e74] sm:$0xf0]  ;;  %v11561_v58 = vld [vmem:[#allocation2 + $0x178] sm:$0xf0] }
 0x66d   :  { %v14471_v59 = vld [vmem:[#allocation2 + $0x1818] sm:$0xf]  ;;  %v15272_v4 = vor.u32 %v18108_v55, %v15271_v54  ;;  %7811 = vmatpush.bf16.msrb.mxu2 %v15016_v61  ;;  %v12108_v54 = vor.u32 %v17312_v50, %v12105_v52  ;;  %v17176_v55 = vld [vmem:[#allocation2 + $0x15c] sm:$0xf] }
 0x66e   :  { %v17908_v62 = vld [vmem:[#allocation2 + $0x1834] sm:$0xf0]  ;;  %v11817_v60 = vld [vmem:[#allocation2 + $0x378] sm:$0xf0] }
 0x66f   :  { %v14727_v63 = vld [vmem:[#allocation2 + $0x1a18] sm:$0xf]  ;;  %v14472_v11 = vor.u32 %v17908_v62, %v14471_v59  ;;  %7824 = vmatpush.bf16.msrb.mxu3 %v15272_v4  ;;  %v17240_v59 = vld [vmem:[#allocation2 + $0x35c] sm:$0xf]  ;;  %v12364_v62 = vor.u32 %v17376_v53, %v12361_v37  ;;  %v11564_v4 = vor.u32 %v17176_v55, %v11561_v58  ;;  %v7606_v58 = vpop.f32.mrf.mxu2 }
 0x670   :  { %v17972_v2 = vld [vmem:[#allocation2 + $0x1a34] sm:$0xf0]  ;;  %v17304_v61 = vld [vmem:[#allocation2 + $0x55c] sm:$0xf] }
 0x671   :  { %v14983_v3 = vld [vmem:[#allocation2 + $0x1c18] sm:$0xf]  ;;  %v14728_v8 = vor.u32 %v17972_v2, %v14727_v63  ;;  %7786 = vmatpush.bf16.msrb.mxu0 %v14472_v11  ;;  %v12073_v63 = vld [vmem:[#allocation2 + $0x578] sm:$0xf0] }
 0x672   :  { %v18036_v51 = vld [vmem:[#allocation2 + $0x1c34] sm:$0xf0]  ;;  %v17368_v2 = vld [vmem:[#allocation2 + $0x75c] sm:$0xf] }
 0x673   :  { %v15239_v5 = vld [vmem:[#allocation2 + $0x1e18] sm:$0xf]  ;;  %v14984_v21 = vor.u32 %v18036_v51, %v14983_v3  ;;  %7799 = vmatpush.bf16.msrb.mxu1 %v14728_v8  ;;  %v12329_v3 = vld [vmem:[#allocation2 + $0x778] sm:$0xf0]  ;;  %v11820_v51 = vor.u32 %v17240_v59, %v11817_v60  ;;  %v7581_v8 = vadd.f32 %v7580_v12, %v19111_v47 }
 0x674   :  { %v18100_v7 = vld [vmem:[#allocation2 + $0x1e34] sm:$0xf0]  ;;  %7787 = vmatmul.bf16.vlgmr.msrb.gmra.mxu0 %v18946_v23  ;;  %v12332_v0 = vor.u32 %v17368_v2, %v12329_v3  ;;  %v12041_v11 = vld [vmem:[#allocation2 + $0x538] sm:$0xf0] }
 0x675   :  { %v15240_v27 = vor.u32 %v18100_v7, %v15239_v5  ;;  %7812 = vmatpush.bf16.msrb.mxu2 %v14984_v21  ;;  %7831 = vmatpush.bf16.msra.mxu0 %v11628_v36  ;;  %v12076_v5 = vor.u32 %v17304_v61, %v12073_v63  ;;  %v17168_v7 = vld [vmem:[#allocation2 + $0x11c] sm:$0xf]  ;;  %v7594_v34 = vadd.f32 %v7593_v24, %v7581_v8  ;;  %v7619_v63 = vpop.f32.mrf.mxu3 }
 0x676   :  { %7800 = vmatmul.bf16.vlgmr.msrb.gmra.mxu1 %v18950_v31  ;;  %v17360_v14 = vld [vmem:[#allocation2 + $0x71c] sm:$0xf]  ;;  %v11532_v21 = vor.u32 %v17168_v7, %v11529_v13 }
 0x677   :  { %7825 = vmatpush.bf16.msrb.mxu3 %v15240_v27  ;;  %7844 = vmatpush.bf16.msra.mxu1 %v11884_v43  ;;  %v12297_v15 = vld [vmem:[#allocation2 + $0x738] sm:$0xf0]  ;;  %v12044_v27 = vor.u32 %v17296_v6, %v12041_v11  ;;  %v7607_v61 = vadd.f32 %v7606_v58, %v7594_v34 }
 0x678   :  { %7813 = vmatmul.bf16.vlgmr.msrb.gmra.mxu2 %v18948_v28  ;;  %v17160_v36 = vld [vmem:[#allocation2 + $0xdc] sm:$0xf]  ;;  %v12300_v39 = vor.u32 %v17360_v14, %v12297_v15 }
 0x679   :  { %7857 = vmatpush.bf16.msra.mxu2 %v12140_v45  ;;  %7832 = vmatpush.bf16.msra.mxu0 %v11596_v16  ;;  %v11497_v43 = vld [vmem:[#allocation2 + $0xf8] sm:$0xf0]  ;;  %v19118_v7 = vadd.f32 %v7619_v63, %v7607_v61 }
 0x67a   :  { %7826 = vmatmul.bf16.vlgmr.msrb.gmra.mxu3 %v18952_v35  ;;  %v17224_v45 = vld [vmem:[#allocation2 + $0x2dc] sm:$0xf]  ;;  %v11500_v53 = vor.u32 %v17160_v36, %v11497_v43 }
 0x67b   :  { %7870 = vmatpush.bf16.msra.mxu3 %v12396_v46  ;;  %7845 = vmatpush.bf16.msra.mxu1 %v11852_v32  ;;  %v11753_v48 = vld [vmem:[#allocation2 + $0x2f8] sm:$0xf0]  ;;  %vm8044_vm5 = vcmp.gt.f32.partialorder %v19118_v7, 0.0 }
 0x67c   :  { %v17288_v46 = vld [vmem:[#allocation2 + $0x4dc] sm:$0xf]  ;;  %v11756_v47 = vor.u32 %v17224_v45, %v11753_v48 }
 0x67d   :  { %7858 = vmatpush.bf16.msra.mxu2 %v12108_v54  ;;  %7833 = vmatpush.bf16.msra.mxu0 %v11564_v4  ;;  %v12009_v49 = vld [vmem:[#allocation2 + $0x4f8] sm:$0xf0]  ;;  %v7582_v4 = vpop.f32.mrf.mxu0 }
 0x67e   :  { %v17352_v50 = vld [vmem:[#allocation2 + $0x6dc] sm:$0xf]  ;;  %v12012_v37 = vor.u32 %v17288_v46, %v12009_v49 }
 0x67f   :  { %7871 = vmatpush.bf16.msra.mxu3 %v12364_v62  ;;  %7846 = vmatpush.bf16.msra.mxu1 %v11820_v51  ;;  %v12265_v52 = vld [vmem:[#allocation2 + $0x6f8] sm:$0xf0] }
 0x680   :  { %v17152_v16 = vld [vmem:[#allocation2 + $0x9c] sm:$0xf]  ;;  %v12268_v55 = vor.u32 %v17352_v50, %v12265_v52  ;;  %v7608_v52 = vpop.f32.mrf.mxu2 }
 0x681   :  { %7859 = vmatpush.bf16.msra.mxu2 %v12076_v5  ;;  %7834 = vmatpush.bf16.msra.mxu0 %v11532_v21  ;;  %v11465_v32 = vld [vmem:[#allocation2 + $0xb8] sm:$0xf0]  ;;  %v7595_v5 = vpop.f32.mrf.mxu1 }
 0x682   :  { %v17216_v54 = vld [vmem:[#allocation2 + $0x29c] sm:$0xf]  ;;  %v11468_v51 = vor.u32 %v17152_v16, %v11465_v32  ;;  %v7621_v16 = vpop.f32.mrf.mxu3 }
 0x683   :  { %7872 = vmatpush.bf16.msra.mxu3 %v12332_v0  ;;  %7847 = vmatpush.bf16.msra.mxu1 %v11788_v26  ;;  %v11721_v59 = vld [vmem:[#allocation2 + $0x2b8] sm:$0xf0] }
 0x684   :  { %v17280_v62 = vld [vmem:[#allocation2 + $0x49c] sm:$0xf]  ;;  %v11724_v13 = vor.u32 %v17216_v54, %v11721_v59 }
 0x685   :  { %7860 = vmatpush.bf16.msra.mxu2 %v12044_v27  ;;  %v11977_v60 = vld [vmem:[#allocation2 + $0x4b8] sm:$0xf0]  ;;  %7835 = vmatpush.bf16.msra.mxu0 %v11500_v53 }
 0x686   :  { %v17344_v2 = vld [vmem:[#allocation2 + $0x69c] sm:$0xf]  ;;  %v11980_v9 = vor.u32 %v17280_v62, %v11977_v60 }
 0x687   :  { %7873 = vmatpush.bf16.msra.mxu3 %v12300_v39  ;;  %v12233_v3 = vld [vmem:[#allocation2 + $0x6b8] sm:$0xf0]  ;;  %7848 = vmatpush.bf16.msra.mxu1 %v11756_v47 }
 0x688   :  { %v17144_v0 = vld [vmem:[#allocation2 + $0x5c] sm:$0xf]  ;;  %v12236_v11 = vor.u32 %v17344_v2, %v12233_v3 }
 0x689   :  { %7861 = vmatpush.bf16.msra.mxu2 %v12012_v37  ;;  %v11433_v10 = vld [vmem:[#allocation2 + $0x78] sm:$0xf0]  ;;  %7836 = vmatpush.bf16.msra.mxu0 %v11468_v51 }
 0x68a   :  { %v17208_v6 = vld [vmem:[#allocation2 + $0x25c] sm:$0xf]  ;;  %v11436_v24 = vor.u32 %v17144_v0, %v11433_v10 }
 0x68b   :  { %7874 = vmatpush.bf16.msra.mxu3 %v12268_v55  ;;  %v11689_v12 = vld [vmem:[#allocation2 + $0x278] sm:$0xf0]  ;;  %7849 = vmatpush.bf16.msra.mxu1 %v11724_v13 }
 0x68c   :  { %v17272_v14 = vld [vmem:[#allocation2 + $0x45c] sm:$0xf]  ;;  %v11692_v36 = vor.u32 %v17208_v6, %v11689_v12 }
 0x68d   :  { %v11945_v15 = vld [vmem:[#allocation2 + $0x478] sm:$0xf0]  ;;  %7862 = vmatpush.bf16.msra.mxu2 %v11980_v9  ;;  %7837 = vmatpush.bf16.msra.mxu0 %v11436_v24 }
 0x68e   :  { %v17336_v8 = vld [vmem:[#allocation2 + $0x65c] sm:$0xf]  ;;  %v11948_v43 = vor.u32 %v17272_v14, %v11945_v15 }
 0x68f   :  { %v12201_v21 = vld [vmem:[#allocation2 + $0x678] sm:$0xf0]  ;;  %7875 = vmatpush.bf16.msra.mxu3 %v12236_v11  ;;  %7850 = vmatpush.bf16.msra.mxu1 %v11692_v36 }
 0x690   :  { %v17136_v26 = vld [vmem:[#allocation2 + $0x1c] sm:$0xf]  ;;  %v12204_v48 = vor.u32 %v17336_v8, %v12201_v21 }
 0x691   :  { %v11401_v27 = vld [vmem:[#allocation2 + $0x38] sm:$0xf0]  ;;  %7863 = vmatpush.bf16.msra.mxu2 %v11948_v43 }
 0x692   :  { %v17200_v45 = vld [vmem:[#allocation2 + $0x21c] sm:$0xf]  ;;  %v11404_v32 = vor.u32 %v17136_v26, %v11401_v27 }
 0x693   :  { %v11657_v39 = vld [vmem:[#allocation2 + $0x238] sm:$0xf0]  ;;  %7876 = vmatpush.bf16.msra.mxu3 %v12204_v48 }
 0x694   :  { %v17264_v34 = vld [vmem:[#allocation2 + $0x41c] sm:$0xf]  ;;  %v11660_v59 = vor.u32 %v17200_v45, %v11657_v39  ;;  %7838 = vmatpush.bf16.msra.mxu0 %v11404_v32 }
 0x695   :  { %v11913_v46 = vld [vmem:[#allocation2 + $0x438] sm:$0xf0] }
 0x696   :  { %v17328_v49 = vld [vmem:[#allocation2 + $0x61c] sm:$0xf]  ;;  %v11916_v62 = vor.u32 %v17264_v34, %v11913_v46  ;;  %7851 = vmatpush.bf16.msra.mxu1 %v11660_v59 }
 0x697   :  { %v12169_v50 = vld [vmem:[#allocation2 + $0x638] sm:$0xf0]  ;;  %7839 = vmatmul.bf16.vlgmr.msra.gmra.mxu0 %v18894_v19 }
 0x698   :  { %v17448_v53 = vld [vmem:[#allocation2 + $0x9dc] sm:$0xf]  ;;  %v12172_v63 = vor.u32 %v17328_v49, %v12169_v50  ;;  %7864 = vmatpush.bf16.msra.mxu2 %v11916_v62 }
 0x699   :  { %v12649_v47 = vld [vmem:[#allocation2 + $0x9f8] sm:$0xf0]  ;;  %7852 = vmatmul.bf16.vlgmr.msra.gmra.mxu1 %v18898_v22 }
 0x69a   :  { %v17512_v37 = vld [vmem:[#allocation2 + $0xbdc] sm:$0xf]  ;;  %v12652_v2 = vor.u32 %v17448_v53, %v12649_v47  ;;  %7877 = vmatpush.bf16.msra.mxu3 %v12172_v63  ;;  %v18593_v47 = vld [vmem:[#allocation4] sm:$0xff] }
 0x69b   :  { %v12905_v54 = vld [vmem:[#allocation2 + $0xbf8] sm:$0xf0]  ;;  %7865 = vmatmul.bf16.vlgmr.msra.gmra.mxu2 %v18892_v18 }
 0x69c   :  { %v17576_v55 = vld [vmem:[#allocation2 + $0xddc] sm:$0xf]  ;;  %v12908_v3 = vor.u32 %v17512_v37, %v12905_v54  ;;  %7883 = vmatpush.bf16.msrb.mxu0 %v12652_v2  ;;  %v1189_v37 = vperm.slane %v18593_v47, 6  ;;  %v7645_v2 = vpop.f32.mrf.mxu1 }
 0x69d   :  { %v13161_v58 = vld [vmem:[#allocation2 + $0xdf8] sm:$0xf0]  ;;  %7878 = vmatmul.bf16.vlgmr.msra.gmra.mxu3 %v18896_v20 }
 0x69e   :  { %v17640_v60 = vld [vmem:[#allocation2 + $0xfdc] sm:$0xf]  ;;  %v13164_v4 = vor.u32 %v17576_v55, %v13161_v58  ;;  %7896 = vmatpush.bf16.msrb.mxu1 %v12908_v3  ;;  %v7632_v58 = vpop.f32.mrf.mxu0 }
 0x69f   :  { %v13417_v61 = vld [vmem:[#allocation2 + $0xff8] sm:$0xf0]  ;;  %v7633_v63 = vadd.f32 %v7632_v58, %v1189_v37 }
 0x6a0   :  { %v17440_v51 = vld [vmem:[#allocation2 + $0x99c] sm:$0xf]  ;;  %v13420_v9 = vor.u32 %v17640_v60, %v13417_v61  ;;  %7909 = vmatpush.bf16.msrb.mxu2 %v13164_v4 }
 0x6a1   :  { %v12617_v5 = vld [vmem:[#allocation2 + $0x9b8] sm:$0xf0] }
 0x6a2   :  { %v17504_v13 = vld [vmem:[#allocation2 + $0xb9c] sm:$0xf]  ;;  %v12620_v14 = vor.u32 %v17440_v51, %v12617_v5  ;;  %7922 = vmatpush.bf16.msrb.mxu3 %v13420_v9 }
 0x6a3   :  { %v12873_v0 = vld [vmem:[#allocation2 + $0xbb8] sm:$0xf0] }
 0x6a4   :  { %v17568_v10 = vld [vmem:[#allocation2 + $0xd9c] sm:$0xf]  ;;  %v12876_v15 = vor.u32 %v17504_v13, %v12873_v0  ;;  %7884 = vmatpush.bf16.msrb.mxu0 %v12620_v14  ;;  %v7646_v0 = vadd.f32 %v7645_v2, %v7633_v63  ;;  %v7647_v37 = vpop.f32.mrf.mxu1 }
 0x6a5   :  { %v13129_v6 = vld [vmem:[#allocation2 + $0xdb8] sm:$0xf0] }
 0x6a6   :  { %v17632_v11 = vld [vmem:[#allocation2 + $0xf9c] sm:$0xf]  ;;  %v13132_v8 = vor.u32 %v17568_v10, %v13129_v6  ;;  %7897 = vmatpush.bf16.msrb.mxu1 %v12876_v15 }
 0x6a7   :  { %v13385_v12 = vld [vmem:[#allocation2 + $0xfb8] sm:$0xf0] }
 0x6a8   :  { %v17432_v21 = vld [vmem:[#allocation2 + $0x95c] sm:$0xf]  ;;  %v13388_v27 = vor.u32 %v17632_v11, %v13385_v12  ;;  %7910 = vmatpush.bf16.msrb.mxu2 %v13132_v8  ;;  %v7658_v8 = vpop.f32.mrf.mxu2 }
 0x6a9   :  { %v12585_v24 = vld [vmem:[#allocation2 + $0x978] sm:$0xf0] }
 0x6aa   :  { %v17496_v26 = vld [vmem:[#allocation2 + $0xb5c] sm:$0xf]  ;;  %v12588_v48 = vor.u32 %v17432_v21, %v12585_v24  ;;  %7923 = vmatpush.bf16.msrb.mxu3 %v13388_v27 }
 0x6ab   :  { %v12841_v36 = vld [vmem:[#allocation2 + $0xb78] sm:$0xf0] }
 0x6ac   :  { %v17560_v43 = vld [vmem:[#allocation2 + $0xd5c] sm:$0xf]  ;;  %v12844_v49 = vor.u32 %v17496_v26, %v12841_v36  ;;  %7885 = vmatpush.bf16.msrb.mxu0 %v12588_v48  ;;  %v7659_v36 = vadd.f32 %v7658_v8, %v7646_v0 }
 0x6ad   :  { %v13097_v45 = vld [vmem:[#allocation2 + $0xd78] sm:$0xf0] }
 0x6ae   :  { %v17624_v39 = vld [vmem:[#allocation2 + $0xf5c] sm:$0xf]  ;;  %v13100_v50 = vor.u32 %v17560_v43, %v13097_v45  ;;  %7898 = vmatpush.bf16.msrb.mxu1 %v12844_v49  ;;  %v7671_v43 = vpop.f32.mrf.mxu3 }
 0x6af   :  { %v13353_v34 = vld [vmem:[#allocation2 + $0xf78] sm:$0xf0]  ;;  %v19124_v48 = vadd.f32 %v7671_v43, %v7659_v36 }
 0x6b0   :  { %v17424_v46 = vld [vmem:[#allocation2 + $0x91c] sm:$0xf]  ;;  %v13356_v18 = vor.u32 %v17624_v39, %v13353_v34  ;;  %7911 = vmatpush.bf16.msrb.mxu2 %v13100_v50  ;;  %v7660_v2 = vpop.f32.mrf.mxu2 }
 0x6b1   :  { %v12553_v52 = vld [vmem:[#allocation2 + $0x938] sm:$0xf0] }
 0x6b2   :  { %v17488_v53 = vld [vmem:[#allocation2 + $0xb1c] sm:$0xf]  ;;  %v12556_v55 = vor.u32 %v17424_v46, %v12553_v52  ;;  %7924 = vmatpush.bf16.msrb.mxu3 %v13356_v18  ;;  %v7634_v46 = vpop.f32.mrf.mxu0 }
 0x6b3   :  { %v12809_v16 = vld [vmem:[#allocation2 + $0xb38] sm:$0xf0] }
 0x6b4   :  { %v17552_v32 = vld [vmem:[#allocation2 + $0xd1c] sm:$0xf]  ;;  %v12812_v22 = vor.u32 %v17488_v53, %v12809_v16  ;;  %7886 = vmatpush.bf16.msrb.mxu0 %v12556_v55 }
 0x6b5   :  { %v13065_v19 = vld [vmem:[#allocation2 + $0xd38] sm:$0xf0] }
 0x6b6   :  { %v17616_v54 = vld [vmem:[#allocation2 + $0xf1c] sm:$0xf]  ;;  %v13068_v59 = vor.u32 %v17552_v32, %v13065_v19  ;;  %7899 = vmatpush.bf16.msrb.mxu1 %v12812_v22 }
 0x6b7   :  { %v13321_v20 = vld [vmem:[#allocation2 + $0xf38] sm:$0xf0] }
 0x6b8   :  { %v17416_v62 = vld [vmem:[#allocation2 + $0x8dc] sm:$0xf]  ;;  %v13324_v3 = vor.u32 %v17616_v54, %v13321_v20  ;;  %7912 = vmatpush.bf16.msrb.mxu2 %v13068_v59 }
 0x6b9   :  { %v12521_v60 = vld [vmem:[#allocation2 + $0x8f8] sm:$0xf0] }
 0x6ba   :  { %v17480_v61 = vld [vmem:[#allocation2 + $0xadc] sm:$0xf]  ;;  %v12524_v10 = vor.u32 %v17416_v62, %v12521_v60  ;;  %7925 = vmatpush.bf16.msrb.mxu3 %v13324_v3 }
 0x6bb   :  { %v12777_v4 = vld [vmem:[#allocation2 + $0xaf8] sm:$0xf0] }
 0x6bc   :  { %v17544_v51 = vld [vmem:[#allocation2 + $0xcdc] sm:$0xf]  ;;  %v12780_v6 = vor.u32 %v17480_v61, %v12777_v4  ;;  %7887 = vmatpush.bf16.msrb.mxu0 %v12524_v10 }
 0x6bd   :  { %v13033_v5 = vld [vmem:[#allocation2 + $0xcf8] sm:$0xf0] }
 0x6be   :  { %v17608_v13 = vld [vmem:[#allocation2 + $0xedc] sm:$0xf]  ;;  %v13036_v11 = vor.u32 %v17544_v51, %v13033_v5  ;;  %7900 = vmatpush.bf16.msrb.mxu1 %v12780_v6 }
 0x6bf   :  { %v13289_v9 = vld [vmem:[#allocation2 + $0xef8] sm:$0xf0] }
 0x6c0   :  { %v17408_v12 = vld [vmem:[#allocation2 + $0x89c] sm:$0xf]  ;;  %v13292_v21 = vor.u32 %v17608_v13, %v13289_v9  ;;  %7913 = vmatpush.bf16.msrb.mxu2 %v13036_v11  ;;  %v7673_v13 = vpop.f32.mrf.mxu3 }
 0x6c1   :  { %v12489_v14 = vld [vmem:[#allocation2 + $0x8b8] sm:$0xf0] }
 0x6c2   :  { %v17472_v15 = vld [vmem:[#allocation2 + $0xa9c] sm:$0xf]  ;;  %v12492_v34 = vor.u32 %v17408_v12, %v12489_v14  ;;  %7926 = vmatpush.bf16.msrb.mxu3 %v13292_v21 }
 0x6c3   :  { %v12745_v24 = vld [vmem:[#allocation2 + $0xab8] sm:$0xf0] }
 0x6c4   :  { %v17536_v26 = vld [vmem:[#allocation2 + $0xc9c] sm:$0xf]  ;;  %v12748_v49 = vor.u32 %v17472_v15, %v12745_v24  ;;  %7888 = vmatpush.bf16.msrb.mxu0 %v12492_v34 }
 0x6c5   :  { %v13001_v27 = vld [vmem:[#allocation2 + $0xcb8] sm:$0xf0] }
 0x6c6   :  { %v17600_v45 = vld [vmem:[#allocation2 + $0xe9c] sm:$0xf]  ;;  %v13004_v50 = vor.u32 %v17536_v26, %v13001_v27  ;;  %7901 = vmatpush.bf16.msrb.mxu1 %v12748_v49 }
 0x6c7   :  { %v13257_v39 = vld [vmem:[#allocation2 + $0xeb8] sm:$0xf0] }
 0x6c8   :  { %v17400_v52 = vld [vmem:[#allocation2 + $0x85c] sm:$0xf]  ;;  %v13260_v18 = vor.u32 %v17600_v45, %v13257_v39  ;;  %7914 = vmatpush.bf16.msrb.mxu2 %v13004_v50 }
 0x6c9   :  { %v12457_v53 = vld [vmem:[#allocation2 + $0x878] sm:$0xf0] }
 0x6ca   :  { %v17464_v47 = vld [vmem:[#allocation2 + $0xa5c] sm:$0xf]  ;;  %v12460_v55 = vor.u32 %v17400_v52, %v12457_v53  ;;  %7927 = vmatpush.bf16.msrb.mxu3 %v13260_v18 }
 0x6cb   :  { %v12713_v16 = vld [vmem:[#allocation2 + $0xa78] sm:$0xf0] }
 0x6cc   :  { %v17528_v32 = vld [vmem:[#allocation2 + $0xc5c] sm:$0xf]  ;;  %v12716_v59 = vor.u32 %v17464_v47, %v12713_v16  ;;  %7889 = vmatpush.bf16.msrb.mxu0 %v12460_v55 }
 0x6cd   :  { %v12969_v19 = vld [vmem:[#allocation2 + $0xc78] sm:$0xf0] }
 0x6ce   :  { %v17592_v54 = vld [vmem:[#allocation2 + $0xe5c] sm:$0xf]  ;;  %v12972_v62 = vor.u32 %v17528_v32, %v12969_v19  ;;  %7902 = vmatpush.bf16.msrb.mxu1 %v12716_v59 }
 0x6cf   :  { %v13225_v20 = vld [vmem:[#allocation2 + $0xe78] sm:$0xf0] }
 0x6d0   :  { %v17392_v58 = vld [vmem:[#allocation2 + $0x81c] sm:$0xf]  ;;  %v13228_v3 = vor.u32 %v17592_v54, %v13225_v20  ;;  %7915 = vmatpush.bf16.msrb.mxu2 %v12972_v62 }
 0x6d1   :  { %v12425_v22 = vld [vmem:[#allocation2 + $0x838] sm:$0xf0] }
 0x6d2   :  { %v17456_v60 = vld [vmem:[#allocation2 + $0xa1c] sm:$0xf]  ;;  %v12428_v6 = vor.u32 %v17392_v58, %v12425_v22  ;;  %7928 = vmatpush.bf16.msrb.mxu3 %v13228_v3 }
 0x6d3   :  { %v12681_v61 = vld [vmem:[#allocation2 + $0xa38] sm:$0xf0] }
 0x6d4   :  { %v17520_v63 = vld [vmem:[#allocation2 + $0xc1c] sm:$0xf]  ;;  %v12684_v15 = vor.u32 %v17456_v60, %v12681_v61  ;;  %7890 = vmatpush.bf16.msrb.mxu0 %v12428_v6 }
 0x6d5   :  { %v12937_v4 = vld [vmem:[#allocation2 + $0xc38] sm:$0xf0] }
 0x6d6   :  { %v17584_v51 = vld [vmem:[#allocation2 + $0xe1c] sm:$0xf]  ;;  %v12940_v8 = vor.u32 %v17520_v63, %v12937_v4  ;;  %7903 = vmatpush.bf16.msrb.mxu1 %v12684_v15  ;;  %v7697_v15 = vpop.f32.mrf.mxu1 }
 0x6d7   :  { %v13193_v5 = vld [vmem:[#allocation2 + $0xe38] sm:$0xf0]  ;;  %7891 = vmatmul.bf16.vlgmr.msrb.gmra.mxu0 %v18912_v41 }
 0x6d8   :  { %v17704_v9 = vld [vmem:[#allocation2 + $0x11dc] sm:$0xf]  ;;  %v13196_v26 = vor.u32 %v17584_v51, %v13193_v5  ;;  %7916 = vmatpush.bf16.msrb.mxu2 %v12940_v8 }
 0x6d9   :  { %v13673_v0 = vld [vmem:[#allocation2 + $0x11f8] sm:$0xf0]  ;;  %7904 = vmatmul.bf16.vlgmr.msrb.gmra.mxu1 %v18916_v44 }
 0x6da   :  { %v17768_v10 = vld [vmem:[#allocation2 + $0x13dc] sm:$0xf]  ;;  %v13676_v27 = vor.u32 %v17704_v9, %v13673_v0  ;;  %7929 = vmatpush.bf16.msrb.mxu3 %v13196_v26  ;;  %v7684_v0 = vpop.f32.mrf.mxu0 }
 0x6db   :  { %v13929_v11 = vld [vmem:[#allocation2 + $0x13f8] sm:$0xf0]  ;;  %7917 = vmatmul.bf16.vlgmr.msrb.gmra.mxu2 %v18910_v38 }
 0x6dc   :  { %v17832_v12 = vld [vmem:[#allocation2 + $0x15dc] sm:$0xf]  ;;  %v13932_v36 = vor.u32 %v17768_v10, %v13929_v11  ;;  %7935 = vmatpush.bf16.msra.mxu0 %v13676_v27 }
 0x6dd   :  { %v14185_v14 = vld [vmem:[#allocation2 + $0x15f8] sm:$0xf0]  ;;  %7930 = vmatmul.bf16.vlgmr.msrb.gmra.mxu3 %v18914_v42 }
 0x6de   :  { %v17896_v21 = vld [vmem:[#allocation2 + $0x17dc] sm:$0xf]  ;;  %v14188_v43 = vor.u32 %v17832_v12, %v14185_v14  ;;  %7948 = vmatpush.bf16.msra.mxu1 %v13932_v36  ;;  %v7685_v14 = vadd.f32 %v7684_v0, %v19124_v48 }
 0x6df   :  { %v14441_v24 = vld [vmem:[#allocation2 + $0x17f8] sm:$0xf0] }
 0x6e0   :  { %v17696_v45 = vld [vmem:[#allocation2 + $0x119c] sm:$0xf]  ;;  %v14444_v46 = vor.u32 %v17896_v21, %v14441_v24  ;;  %7961 = vmatpush.bf16.msra.mxu2 %v14188_v43  ;;  %v7698_v43 = vadd.f32 %v7697_v15, %v7685_v14 }
 0x6e1   :  { %v13641_v39 = vld [vmem:[#allocation2 + $0x11b8] sm:$0xf0] }
 0x6e2   :  { %v17760_v34 = vld [vmem:[#allocation2 + $0x139c] sm:$0xf]  ;;  %v13644_v37 = vor.u32 %v17696_v45, %v13641_v39  ;;  %7974 = vmatpush.bf16.msra.mxu3 %v14444_v46 }
 0x6e3   :  { %v13897_v49 = vld [vmem:[#allocation2 + $0x13b8] sm:$0xf0] }
 0x6e4   :  { %v17824_v50 = vld [vmem:[#allocation2 + $0x159c] sm:$0xf]  ;;  %v13900_v18 = vor.u32 %v17760_v34, %v13897_v49  ;;  %7936 = vmatpush.bf16.msra.mxu0 %v13644_v37 }
 0x6e5   :  { %v14153_v52 = vld [vmem:[#allocation2 + $0x15b8] sm:$0xf0] }
 0x6e6   :  { %v17888_v53 = vld [vmem:[#allocation2 + $0x179c] sm:$0xf]  ;;  %v14156_v16 = vor.u32 %v17824_v50, %v14153_v52  ;;  %7949 = vmatpush.bf16.msra.mxu1 %v13900_v18  ;;  %v7710_v52 = vpop.f32.mrf.mxu2 }
 0x6e7   :  { %v14409_v47 = vld [vmem:[#allocation2 + $0x17b8] sm:$0xf0]  ;;  %v7711_v18 = vadd.f32 %v7710_v52, %v7698_v43 }
 0x6e8   :  { %v17688_v32 = vld [vmem:[#allocation2 + $0x115c] sm:$0xf]  ;;  %v14412_v20 = vor.u32 %v17888_v53, %v14409_v47  ;;  %7962 = vmatpush.bf16.msra.mxu2 %v14156_v16  ;;  %v7723_v16 = vpop.f32.mrf.mxu3 }
 0x6e9   :  { %v13609_v19 = vld [vmem:[#allocation2 + $0x1178] sm:$0xf0] }
 0x6ea   :  { %v17752_v54 = vld [vmem:[#allocation2 + $0x135c] sm:$0xf]  ;;  %v13612_v60 = vor.u32 %v17688_v32, %v13609_v19  ;;  %7975 = vmatpush.bf16.msra.mxu3 %v14412_v20  ;;  %v19131_v20 = vadd.f32 %v7723_v16, %v7711_v18 }
 0x6eb   :  { %v13865_v55 = vld [vmem:[#allocation2 + $0x1378] sm:$0xf0] }
 0x6ec   :  { %v17816_v58 = vld [vmem:[#allocation2 + $0x155c] sm:$0xf]  ;;  %v13868_v61 = vor.u32 %v17752_v54, %v13865_v55  ;;  %7937 = vmatpush.bf16.msra.mxu0 %v13612_v60  ;;  %v7686_v55 = vpop.f32.mrf.mxu0 }
 0x6ed   :  { %v14121_v22 = vld [vmem:[#allocation2 + $0x1578] sm:$0xf0] }
 0x6ee   :  { %v17880_v59 = vld [vmem:[#allocation2 + $0x175c] sm:$0xf]  ;;  %v14124_v63 = vor.u32 %v17816_v58, %v14121_v22  ;;  %7950 = vmatpush.bf16.msra.mxu1 %v13868_v61  ;;  %v7699_v61 = vpop.f32.mrf.mxu1 }
 0x6ef   :  { %v14377_v62 = vld [vmem:[#allocation2 + $0x1778] sm:$0xf0] }
 0x6f0   :  { %v17680_v2 = vld [vmem:[#allocation2 + $0x111c] sm:$0xf]  ;;  %v14380_v4 = vor.u32 %v17880_v59, %v14377_v62  ;;  %7963 = vmatpush.bf16.msra.mxu2 %v14124_v63 }
 0x6f1   :  { %v13577_v3 = vld [vmem:[#allocation2 + $0x1138] sm:$0xf0] }
 0x6f2   :  { %v17744_v38 = vld [vmem:[#allocation2 + $0x131c] sm:$0xf]  ;;  %v13580_v42 = vor.u32 %v17680_v2, %v13577_v3  ;;  %7976 = vmatpush.bf16.msra.mxu3 %v14380_v4 }
 0x6f3   :  { %v13833_v51 = vld [vmem:[#allocation2 + $0x1338] sm:$0xf0] }
 0x6f4   :  { %v17808_v5 = vld [vmem:[#allocation2 + $0x151c] sm:$0xf]  ;;  %v13836_v44 = vor.u32 %v17744_v38, %v13833_v51  ;;  %7938 = vmatpush.bf16.msra.mxu0 %v13580_v42 }
 0x6f5   :  { %v14089_v13 = vld [vmem:[#allocation2 + $0x1538] sm:$0xf0] }
 0x6f6   :  { %v17872_v9 = vld [vmem:[#allocation2 + $0x171c] sm:$0xf]  ;;  %v14092_v10 = vor.u32 %v17808_v5, %v14089_v13  ;;  %7951 = vmatpush.bf16.msra.mxu1 %v13836_v44 }
 0x6f7   :  { %v14345_v41 = vld [vmem:[#allocation2 + $0x1738] sm:$0xf0] }
 0x6f8   :  { %v17672_v6 = vld [vmem:[#allocation2 + $0x10dc] sm:$0xf]  ;;  %v14348_v8 = vor.u32 %v17872_v9, %v14345_v41  ;;  %7964 = vmatpush.bf16.msra.mxu2 %v14092_v10 }
 0x6f9   :  { %v13545_v11 = vld [vmem:[#allocation2 + $0x10f8] sm:$0xf0] }
 0x6fa   :  { %v17736_v12 = vld [vmem:[#allocation2 + $0x12dc] sm:$0xf]  ;;  %v13548_v45 = vor.u32 %v17672_v6, %v13545_v11  ;;  %7977 = vmatpush.bf16.msra.mxu3 %v14348_v8  ;;  %v7712_v6 = vpop.f32.mrf.mxu2  ;;  %v7725_v8 = vpop.f32.mrf.mxu3 }
 0x6fb   :  { %v13801_v21 = vld [vmem:[#allocation2 + $0x12f8] sm:$0xf0] }
 0x6fc   :  { %v17800_v24 = vld [vmem:[#allocation2 + $0x14dc] sm:$0xf]  ;;  %v13804_v39 = vor.u32 %v17736_v12, %v13801_v21  ;;  %7939 = vmatpush.bf16.msra.mxu0 %v13548_v45 }
 0x6fd   :  { %v14057_v26 = vld [vmem:[#allocation2 + $0x14f8] sm:$0xf0] }
 0x6fe   :  { %v17864_v27 = vld [vmem:[#allocation2 + $0x16dc] sm:$0xf]  ;;  %v14060_v34 = vor.u32 %v17800_v24, %v14057_v26  ;;  %7952 = vmatpush.bf16.msra.mxu1 %v13804_v39 }
 0x6ff   :  { %v14313_v36 = vld [vmem:[#allocation2 + $0x16f8] sm:$0xf0] }
 0x700   :  { %v17664_v46 = vld [vmem:[#allocation2 + $0x109c] sm:$0xf]  ;;  %v14316_v48 = vor.u32 %v17864_v27, %v14313_v36  ;;  %7965 = vmatpush.bf16.msra.mxu2 %v14060_v34 }
 0x701   :  { %v13513_v49 = vld [vmem:[#allocation2 + $0x10b8] sm:$0xf0] }
 0x702   :  { %v17728_v50 = vld [vmem:[#allocation2 + $0x129c] sm:$0xf]  ;;  %v13516_v54 = vor.u32 %v17664_v46, %v13513_v49  ;;  %7978 = vmatpush.bf16.msra.mxu3 %v14316_v48 }
 0x703   :  { %v13769_v53 = vld [vmem:[#allocation2 + $0x12b8] sm:$0xf0] }
 0x704   :  { %v17792_v47 = vld [vmem:[#allocation2 + $0x149c] sm:$0xf]  ;;  %v13772_v58 = vor.u32 %v17728_v50, %v13769_v53  ;;  %7940 = vmatpush.bf16.msra.mxu0 %v13516_v54 }
 0x705   :  { %v14025_v37 = vld [vmem:[#allocation2 + $0x14b8] sm:$0xf0] }
 0x706   :  { %v17856_v32 = vld [vmem:[#allocation2 + $0x169c] sm:$0xf]  ;;  %v14028_v22 = vor.u32 %v17792_v47, %v14025_v37  ;;  %7953 = vmatpush.bf16.msra.mxu1 %v13772_v58 }
 0x707   :  { %v14281_v19 = vld [vmem:[#allocation2 + $0x16b8] sm:$0xf0] }
 0x708   :  { %v17656_v59 = vld [vmem:[#allocation2 + $0x105c] sm:$0xf]  ;;  %v14284_v63 = vor.u32 %v17856_v32, %v14281_v19  ;;  %7966 = vmatpush.bf16.msra.mxu2 %v14028_v22 }
 0x709   :  { %v13481_v62 = vld [vmem:[#allocation2 + $0x1078] sm:$0xf0] }
 0x70a   :  { %v17720_v60 = vld [vmem:[#allocation2 + $0x125c] sm:$0xf]  ;;  %v13484_v5 = vor.u32 %v17656_v59, %v13481_v62  ;;  %7979 = vmatpush.bf16.msra.mxu3 %v14284_v63 }
 0x70b   :  { %v13737_v2 = vld [vmem:[#allocation2 + $0x1278] sm:$0xf0] }
 0x70c   :  { %v17784_v3 = vld [vmem:[#allocation2 + $0x145c] sm:$0xf]  ;;  %v13740_v41 = vor.u32 %v17720_v60, %v13737_v2  ;;  %7941 = vmatpush.bf16.msra.mxu0 %v13484_v5 }
 0x70d   :  { %v13993_v38 = vld [vmem:[#allocation2 + $0x1478] sm:$0xf0] }
 0x70e   :  { %v17848_v4 = vld [vmem:[#allocation2 + $0x165c] sm:$0xf]  ;;  %v13996_v42 = vor.u32 %v17784_v3, %v13993_v38  ;;  %7954 = vmatpush.bf16.msra.mxu1 %v13740_v41 }
 0x70f   :  { %v14249_v51 = vld [vmem:[#allocation2 + $0x1678] sm:$0xf0] }
 0x710   :  { %v17648_v13 = vld [vmem:[#allocation2 + $0x101c] sm:$0xf]  ;;  %v14252_v11 = vor.u32 %v17848_v4, %v14249_v51  ;;  %7967 = vmatpush.bf16.msra.mxu2 %v13996_v42 }
 0x711   :  { %v13449_v9 = vld [vmem:[#allocation2 + $0x1038] sm:$0xf0] }
 0x712   :  { %v17712_v0 = vld [vmem:[#allocation2 + $0x121c] sm:$0xf]  ;;  %v13452_v27 = vor.u32 %v17648_v13, %v13449_v9  ;;  %7980 = vmatpush.bf16.msra.mxu3 %v14252_v11  ;;  %v7736_v11 = vpop.f32.mrf.mxu0 }
 0x713   :  { %v13705_v44 = vld [vmem:[#allocation2 + $0x1238] sm:$0xf0] }
 0x714   :  { %v17776_v10 = vld [vmem:[#allocation2 + $0x141c] sm:$0xf]  ;;  %v13708_v39 = vor.u32 %v17712_v0, %v13705_v44  ;;  %7942 = vmatpush.bf16.msra.mxu0 %v13452_v27 }
 0x715   :  { %v13961_v12 = vld [vmem:[#allocation2 + $0x1438] sm:$0xf0] }
 0x716   :  { %v17840_v14 = vld [vmem:[#allocation2 + $0x161c] sm:$0xf]  ;;  %v13964_v34 = vor.u32 %v17776_v10, %v13961_v12  ;;  %7955 = vmatpush.bf16.msra.mxu1 %v13708_v39 }
 0x717   :  { %v14217_v15 = vld [vmem:[#allocation2 + $0x1638] sm:$0xf0]  ;;  %7943 = vmatmul.bf16.vlgmr.msra.gmra.mxu0 %v18928_v25 }
 0x718   :  { %v17960_v21 = vld [vmem:[#allocation2 + $0x19dc] sm:$0xf]  ;;  %v14220_v50 = vor.u32 %v17840_v14, %v14217_v15  ;;  %7968 = vmatpush.bf16.msra.mxu2 %v13964_v34  ;;  %v7749_v15 = vpop.f32.mrf.mxu1 }
 0x719   :  { %v14697_v24 = vld [vmem:[#allocation2 + $0x19f8] sm:$0xf0]  ;;  %7956 = vmatmul.bf16.vlgmr.msra.gmra.mxu1 %v18932_v30 }
 0x71a   :  { %v18024_v26 = vld [vmem:[#allocation2 + $0x1bdc] sm:$0xf]  ;;  %v14700_v52 = vor.u32 %v17960_v21, %v14697_v24  ;;  %7981 = vmatpush.bf16.msra.mxu3 %v14220_v50 }
 0x71b   :  { %v14953_v36 = vld [vmem:[#allocation2 + $0x1bf8] sm:$0xf0]  ;;  %7969 = vmatmul.bf16.vlgmr.msra.gmra.mxu2 %v18930_v29 }
 0x71c   :  { %v18088_v43 = vld [vmem:[#allocation2 + $0x1ddc] sm:$0xf]  ;;  %v14956_v48 = vor.u32 %v18024_v26, %v14953_v36  ;;  %7987 = vmatpush.bf16.msrb.mxu0 %v14700_v52 }
 0x71d   :  { %v15209_v45 = vld [vmem:[#allocation2 + $0x1df8] sm:$0xf0]  ;;  %7982 = vmatmul.bf16.vlgmr.msra.gmra.mxu3 %v18934_v33  ;;  %v7737_v33 = vadd.f32 %v7736_v11, %v19131_v20 }
 0x71e   :  { %v18152_v46 = vld [vmem:[#allocation2 + $0x1fdc] sm:$0xf]  ;;  %v15212_v53 = vor.u32 %v18088_v43, %v15209_v45  ;;  %8000 = vmatpush.bf16.msrb.mxu1 %v14956_v48 }
 0x71f   :  { %v15465_v49 = vld [vmem:[#allocation2 + $0x1ff8] sm:$0xf0]  ;;  %v19138_v43 = vadd.f32 %v7749_v15, %v7737_v33  ;;  %v15583_v15 = vld [vmem:[#allocation6 + $0xe0] sm:$0xf] }
 0x720   :  { %v17952_v47 = vld [vmem:[#allocation2 + $0x199c] sm:$0xf]  ;;  %v15468_v16 = vor.u32 %v18152_v46, %v15465_v49  ;;  %8013 = vmatpush.bf16.msrb.mxu2 %v15212_v53 }
 0x721   :  { %v14665_v37 = vld [vmem:[#allocation2 + $0x19b8] sm:$0xf0] }
 0x722   :  { %v18016_v18 = vld [vmem:[#allocation2 + $0x1b9c] sm:$0xf]  ;;  %v14668_v22 = vor.u32 %v17952_v47, %v14665_v37  ;;  %8026 = vmatpush.bf16.msrb.mxu3 %v15468_v16 }
 0x723   :  { %v14921_v32 = vld [vmem:[#allocation2 + $0x1bb8] sm:$0xf0] }
 0x724   :  { %v18080_v19 = vld [vmem:[#allocation2 + $0x1d9c] sm:$0xf]  ;;  %v14924_v59 = vor.u32 %v18016_v18, %v14921_v32  ;;  %7988 = vmatpush.bf16.msrb.mxu0 %v14668_v22  ;;  %v19140_v18 = vpop.f32.mrf.mxu2  ;;  %v7738_v22 = vpop.f32.mrf.mxu0 }
 0x725   :  { %v15177_v54 = vld [vmem:[#allocation2 + $0x1db8] sm:$0xf0]  ;;  %v18279_v22 = vld [vmem:[#allocation6 + $0x3cc] sm:$0xf0] }
 0x726   :  { %v18144_v55 = vld [vmem:[#allocation2 + $0x1f9c] sm:$0xf]  ;;  %v15180_v62 = vor.u32 %v18080_v19, %v15177_v54  ;;  %8001 = vmatpush.bf16.msrb.mxu1 %v14924_v59  ;;  %v19142_v54 = vpop.f32.mrf.mxu3 }
 0x727   :  { %v15433_v58 = vld [vmem:[#allocation2 + $0x1fb8] sm:$0xf0] }
 0x728   :  { %v17944_v60 = vld [vmem:[#allocation2 + $0x195c] sm:$0xf]  ;;  %v15436_v2 = vor.u32 %v18144_v55, %v15433_v58  ;;  %8014 = vmatpush.bf16.msrb.mxu2 %v15180_v62  ;;  %v7751_v62 = vpop.f32.mrf.mxu1 }
 0x729   :  { %v14633_v61 = vld [vmem:[#allocation2 + $0x1978] sm:$0xf0] }
 0x72a   :  { %v18008_v63 = vld [vmem:[#allocation2 + $0x1b5c] sm:$0xf]  ;;  %v14636_v13 = vor.u32 %v17944_v60, %v14633_v61  ;;  %8027 = vmatpush.bf16.msrb.mxu3 %v15436_v2 }
 0x72b   :  { %v14889_v3 = vld [vmem:[#allocation2 + $0x1b78] sm:$0xf0] }
 0x72c   :  { %v18072_v38 = vld [vmem:[#allocation2 + $0x1d5c] sm:$0xf]  ;;  %v14892_v9 = vor.u32 %v18008_v63, %v14889_v3  ;;  %7989 = vmatpush.bf16.msrb.mxu0 %v14636_v13 }
 0x72d   :  { %v15145_v4 = vld [vmem:[#allocation2 + $0x1d78] sm:$0xf0] }
 0x72e   :  { %v18136_v51 = vld [vmem:[#allocation2 + $0x1f5c] sm:$0xf]  ;;  %v15148_v41 = vor.u32 %v18072_v38, %v15145_v4  ;;  %8002 = vmatpush.bf16.msrb.mxu1 %v14892_v9 }
 0x72f   :  { %v15401_v5 = vld [vmem:[#allocation2 + $0x1f78] sm:$0xf0] }
 0x730   :  { %v17936_v42 = vld [vmem:[#allocation2 + $0x191c] sm:$0xf]  ;;  %v15404_v44 = vor.u32 %v18136_v51, %v15401_v5  ;;  %8015 = vmatpush.bf16.msrb.mxu2 %v15148_v41 }
 0x731   :  { %v14601_v25 = vld [vmem:[#allocation2 + $0x1938] sm:$0xf0] }
 0x732   :  { %v18000_v0 = vld [vmem:[#allocation2 + $0x1b1c] sm:$0xf]  ;;  %v14604_v14 = vor.u32 %v17936_v42, %v14601_v25  ;;  %8028 = vmatpush.bf16.msrb.mxu3 %v15404_v44 }
 0x733   :  { %v14857_v10 = vld [vmem:[#allocation2 + $0x1b38] sm:$0xf0] }
 0x734   :  { %v18064_v6 = vld [vmem:[#allocation2 + $0x1d1c] sm:$0xf]  ;;  %v14860_v8 = vor.u32 %v18000_v0, %v14857_v10  ;;  %7990 = vmatpush.bf16.msrb.mxu0 %v14604_v14  ;;  %v7764_v14 = vpop.f32.mrf.mxu2 }
 0x735   :  { %v15113_v29 = vld [vmem:[#allocation2 + $0x1d38] sm:$0xf0]  ;;  %v15519_v14 = vld [vmem:[#allocation6 + $0x60] sm:$0xf] }
 0x736   :  { %v18128_v30 = vld [vmem:[#allocation2 + $0x1f1c] sm:$0xf]  ;;  %v15116_v21 = vor.u32 %v18064_v6, %v15113_v29  ;;  %8003 = vmatpush.bf16.msrb.mxu1 %v14860_v8  ;;  %v18187_v8 = vld [vmem:[#allocation6 + $0xec] sm:$0xf0] }
 0x737   :  { %v15369_v12 = vld [vmem:[#allocation2 + $0x1f38] sm:$0xf0] }
 0x738   :  { %v17928_v24 = vld [vmem:[#allocation2 + $0x18dc] sm:$0xf]  ;;  %v15372_v36 = vor.u32 %v18128_v30, %v15369_v12  ;;  %8016 = vmatpush.bf16.msrb.mxu2 %v15116_v21  ;;  %v15711_v21 = vld [vmem:[#allocation6 + $0x1e0] sm:$0xf] }
 0x739   :  { %v14569_v26 = vld [vmem:[#allocation2 + $0x18f8] sm:$0xf0] }
 0x73a   :  { %v17992_v27 = vld [vmem:[#allocation2 + $0x1adc] sm:$0xf]  ;;  %v14572_v20 = vor.u32 %v17928_v24, %v14569_v26  ;;  %8029 = vmatpush.bf16.msrb.mxu3 %v15372_v36  ;;  %v7777_v24 = vpop.f32.mrf.mxu3  ;;  %v15839_v36 = vld [vmem:[#allocation6 + $0x2e0] sm:$0xf] }
 0x73b   :  { %v14825_v45 = vld [vmem:[#allocation2 + $0x1af8] sm:$0xf0]  ;;  %v18203_v24 = vld [vmem:[#allocation6 + $0x16c] sm:$0xf0] }
 0x73c   :  { %v18056_v39 = vld [vmem:[#allocation2 + $0x1cdc] sm:$0xf]  ;;  %v14828_v50 = vor.u32 %v17992_v27, %v14825_v45  ;;  %7991 = vmatpush.bf16.msrb.mxu0 %v14572_v20  ;;  %v18219_v27 = vld [vmem:[#allocation6 + $0x1ec] sm:$0xf0] }
 0x73d   :  { %v15081_v34 = vld [vmem:[#allocation2 + $0x1cf8] sm:$0xf0]  ;;  %v18251_v45 = vld [vmem:[#allocation6 + $0x2ec] sm:$0xf0] }
 0x73e   :  { %v18120_v46 = vld [vmem:[#allocation2 + $0x1edc] sm:$0xf]  ;;  %v15084_v52 = vor.u32 %v18056_v39, %v15081_v34  ;;  %8004 = vmatpush.bf16.msrb.mxu1 %v14828_v50  ;;  %v15584_v50 = vor.u32 %v18187_v8, %v15583_v15  ;;  %v18171_v15 = vld [vmem:[#allocation6 + $0x6c] sm:$0xf0]  ;;  %v15647_v8 = vld [vmem:[#allocation6 + $0x160] sm:$0xf] }
 0x73f   :  { %v15337_v49 = vld [vmem:[#allocation2 + $0x1ef8] sm:$0xf0] }
 0x740   :  { %v17920_v48 = vld [vmem:[#allocation2 + $0x189c] sm:$0xf]  ;;  %v15340_v37 = vor.u32 %v18120_v46, %v15337_v49  ;;  %8017 = vmatpush.bf16.msrb.mxu2 %v15084_v52  ;;  %v15967_v46 = vld [vmem:[#allocation6 + $0x3e0] sm:$0xf]  ;;  %v18283_v49 = vld [vmem:[#allocation6 + $0x3ec] sm:$0xf0]  ;;  %v15712_v52 = vor.u32 %v18219_v27, %v15711_v21 }
 0x741   :  { %v14537_v53 = vld [vmem:[#allocation2 + $0x18b8] sm:$0xf0]  ;;  %v18235_v27 = vld [vmem:[#allocation6 + $0x26c] sm:$0xf0] }
 0x742   :  { %v17984_v47 = vld [vmem:[#allocation2 + $0x1a9c] sm:$0xf]  ;;  %v14540_v59 = vor.u32 %v17920_v48, %v14537_v53  ;;  %8030 = vmatpush.bf16.msrb.mxu3 %v15340_v37  ;;  %v15840_v48 = vor.u32 %v18251_v45, %v15839_v36  ;;  %v15567_v53 = vld [vmem:[#allocation6 + $0xc0] sm:$0xf]  ;;  %v18267_v45 = vld [vmem:[#allocation6 + $0x36c] sm:$0xf0] }
 0x743   :  { %v14793_v16 = vld [vmem:[#allocation2 + $0x1ab8] sm:$0xf0]  ;;  %v15695_v37 = vld [vmem:[#allocation6 + $0x1c0] sm:$0xf] }
 0x744   :  { %v18048_v32 = vld [vmem:[#allocation2 + $0x1c9c] sm:$0xf]  ;;  %v14796_v60 = vor.u32 %v17984_v47, %v14793_v16  ;;  %7992 = vmatpush.bf16.msrb.mxu0 %v14540_v59  ;;  %v18183_v47 = vld [vmem:[#allocation6 + $0xcc] sm:$0xf0]  ;;  %v15968_v16 = vor.u32 %v18283_v49, %v15967_v46  ;;  %v15903_v36 = vld [vmem:[#allocation6 + $0x360] sm:$0xf] }
 0x745   :  { %v15049_v19 = vld [vmem:[#allocation2 + $0x1cb8] sm:$0xf0]  ;;  %v15568_v59 = vor.u32 %v18183_v47, %v15567_v53  ;;  %v15503_v49 = vld [vmem:[#allocation6 + $0x40] sm:$0xf]  ;;  %v18199_v53 = vld [vmem:[#allocation6 + $0x14c] sm:$0xf0] }
 0x746   :  { %v18112_v55 = vld [vmem:[#allocation2 + $0x1e9c] sm:$0xf]  ;;  %v15052_v61 = vor.u32 %v18048_v32, %v15049_v19  ;;  %8005 = vmatpush.bf16.msrb.mxu1 %v14796_v60  ;;  %v18215_v32 = vld [vmem:[#allocation6 + $0x1cc] sm:$0xf0]  ;;  %v15823_v19 = vld [vmem:[#allocation6 + $0x2c0] sm:$0xf] }
 0x747   :  { %v15305_v58 = vld [vmem:[#allocation2 + $0x1eb8] sm:$0xf0]  ;;  %v15696_v62 = vor.u32 %v18215_v32, %v15695_v37  ;;  %v15759_v47 = vld [vmem:[#allocation6 + $0x240] sm:$0xf]  ;;  %v18231_v37 = vld [vmem:[#allocation6 + $0x24c] sm:$0xf0]  ;;  %v19156_v32 = vpop.f32.mrf.mxu3 }
 0x748   :  { %v17912_v63 = vld [vmem:[#allocation2 + $0x185c] sm:$0xf]  ;;  %v15308_v38 = vor.u32 %v18112_v55, %v15305_v58  ;;  %8018 = vmatpush.bf16.msrb.mxu2 %v15052_v61  ;;  %v18247_v55 = vld [vmem:[#allocation6 + $0x2cc] sm:$0xf0]  ;;  %v15951_v58 = vld [vmem:[#allocation6 + $0x3c0] sm:$0xf] }
 0x749   :  { %v14505_v2 = vld [vmem:[#allocation2 + $0x1878] sm:$0xf0]  ;;  %v15824_v60 = vor.u32 %v18247_v55, %v15823_v19  ;;  %v15551_v61 = vld [vmem:[#allocation6 + $0xa0] sm:$0xf]  ;;  %v18263_v55 = vld [vmem:[#allocation6 + $0x34c] sm:$0xf0] }
 0x74a   :  { %v17976_v3 = vld [vmem:[#allocation2 + $0x1a5c] sm:$0xf]  ;;  %v14508_v41 = vor.u32 %v17912_v63, %v14505_v2  ;;  %8031 = vmatpush.bf16.msrb.mxu3 %v15308_v38  ;;  %v18179_v63 = vld [vmem:[#allocation6 + $0xac] sm:$0xf0]  ;;  %v15679_v2 = vld [vmem:[#allocation6 + $0x1a0] sm:$0xf] }
 0x74b   :  { %v14761_v4 = vld [vmem:[#allocation2 + $0x1a78] sm:$0xf0]  ;;  %v18211_v38 = vld [vmem:[#allocation6 + $0x1ac] sm:$0xf0]  ;;  %v15887_v19 = vld [vmem:[#allocation6 + $0x340] sm:$0xf] }
 0x74c   :  { %v18040_v51 = vld [vmem:[#allocation2 + $0x1c5c] sm:$0xf]  ;;  %v14764_v0 = vor.u32 %v17976_v3, %v14761_v4  ;;  %7993 = vmatpush.bf16.msrb.mxu0 %v14508_v41  ;;  %v15952_v3 = vor.u32 %v18279_v22, %v15951_v58  ;;  %v15807_v4 = vld [vmem:[#allocation6 + $0x2a0] sm:$0xf]  ;;  %v15680_v41 = vor.u32 %v18211_v38, %v15679_v2  ;;  %v8048_v22 = vmul.f32 0.1, %v19010_v57 }
 0x74d   :  { %v15017_v5 = vld [vmem:[#allocation2 + $0x1c78] sm:$0xf0]  ;;  %v18163_v2 = vld [vmem:[#allocation6 + $0x2c] sm:$0xf0]  ;;  %v15888_v38 = vor.u32 %v18263_v55, %v15887_v19  ;;  %v16207_v55 = vld [vmem:[#allocation6 + $0x5c0] sm:$0xf] }
 0x74e   :  { %v18104_v13 = vld [vmem:[#allocation2 + $0x1e5c] sm:$0xf]  ;;  %v15020_v44 = vor.u32 %v18040_v51, %v15017_v5  ;;  %8006 = vmatpush.bf16.msrb.mxu1 %v14764_v0  ;;  %v18243_v51 = vld [vmem:[#allocation6 + $0x2ac] sm:$0xf0]  ;;  %v15935_v5 = vld [vmem:[#allocation6 + $0x3a0] sm:$0xf] }
 0x74f   :  { %v15273_v9 = vld [vmem:[#allocation2 + $0x1e78] sm:$0xf0]  ;;  %v15663_v0 = vld [vmem:[#allocation6 + $0x180] sm:$0xf]  ;;  %v18311_v19 = vld [vmem:[#allocation6 + $0x4cc] sm:$0xf0] }
 0x750   :  { %v17904_v42 = vld [vmem:[#allocation2 + $0x181c] sm:$0xf]  ;;  %v15276_v11 = vor.u32 %v18104_v13, %v15273_v9  ;;  %8019 = vmatpush.bf16.msrb.mxu2 %v15020_v44  ;;  %v18275_v13 = vld [vmem:[#allocation6 + $0x3ac] sm:$0xf0]  ;;  %v15552_v9 = vor.u32 %v18179_v63, %v15551_v61  ;;  %v15760_v61 = vor.u32 %v18231_v37, %v15759_v47  ;;  %v15487_v63 = vld [vmem:[#allocation6 + $0x20] sm:$0xf] }
 0x751   :  { %v14473_v25 = vld [vmem:[#allocation2 + $0x1838] sm:$0xf0]  ;;  %v15936_v44 = vor.u32 %v18275_v13, %v15935_v5  ;;  %v18227_v5 = vld [vmem:[#allocation6 + $0x22c] sm:$0xf0]  ;;  %v8049_v13 = vmul.f32 0.1, %v19037_v17 }
 0x752   :  { %v17968_v10 = vld [vmem:[#allocation2 + $0x1a1c] sm:$0xf]  ;;  %v14476_v26 = vor.u32 %v17904_v42, %v14473_v25  ;;  %8032 = vmatpush.bf16.msrb.mxu3 %v15276_v11  ;;  %v15808_v42 = vor.u32 %v18243_v51, %v15807_v4  ;;  %v15535_v25 = vld [vmem:[#allocation6 + $0x80] sm:$0xf]  ;;  %v18271_v11 = vld [vmem:[#allocation6 + $0x38c] sm:$0xf0] }
 0x753   :  { %v14729_v6 = vld [vmem:[#allocation2 + $0x1a38] sm:$0xf0]  ;;  %v18195_v4 = vld [vmem:[#allocation6 + $0x12c] sm:$0xf0]  ;;  %v15743_v51 = vld [vmem:[#allocation6 + $0x220] sm:$0xf] }
 0x754   :  { %v18032_v29 = vld [vmem:[#allocation2 + $0x1c1c] sm:$0xf]  ;;  %v14732_v39 = vor.u32 %v17968_v10, %v14729_v6  ;;  %7994 = vmatpush.bf16.msrb.mxu0 %v14476_v26  ;;  %v18207_v10 = vld [vmem:[#allocation6 + $0x18c] sm:$0xf0]  ;;  %v15791_v6 = vld [vmem:[#allocation6 + $0x280] sm:$0xf] }
 0x755   :  { %v14985_v30 = vld [vmem:[#allocation2 + $0x1c38] sm:$0xf0]  ;;  %v15775_v26 = vld [vmem:[#allocation6 + $0x260] sm:$0xf] }
 0x756   :  { %v18096_v12 = vld [vmem:[#allocation2 + $0x1e1c] sm:$0xf]  ;;  %v14988_v34 = vor.u32 %v18032_v29, %v14985_v30  ;;  %8007 = vmatpush.bf16.msrb.mxu1 %v14732_v39  ;;  %v19148_v29 = vpop.f32.mrf.mxu0  ;;  %v19150_v30 = vpop.f32.mrf.mxu1  ;;  %v15520_v39 = vor.u32 %v18171_v15, %v15519_v14  ;;  %v15776_v46 = vor.u32 %v18235_v27, %v15775_v26  ;;  %v16095_v15 = vld [vmem:[#allocation6 + $0x4e0] sm:$0xf]  ;;  %v18347_v27 = vld [vmem:[#allocation6 + $0x5ec] sm:$0xf0] }
 0x757   :  { %v15241_v33 = vld [vmem:[#allocation2 + $0x1e38] sm:$0xf0]  ;;  %7995 = vmatmul.bf16.vlgmr.msrb.gmra.mxu0 %v18946_v23  ;;  %v18175_v23 = vld [vmem:[#allocation6 + $0x8c] sm:$0xf0]  ;;  %v16079_v37 = vld [vmem:[#allocation6 + $0x4c0] sm:$0xf] }
 0x758   :  { %v15244_v20 = vor.u32 %v18096_v12, %v15241_v33  ;;  %8020 = vmatpush.bf16.msrb.mxu2 %v14988_v34  ;;  %9617 = vmatpush.bf16.msra.mxu0 %v15584_v50  ;;  %v15664_v12 = vor.u32 %v18207_v10, %v15663_v0  ;;  %v15648_v34 = vor.u32 %v18203_v24, %v15647_v8  ;;  %v15631_v50 = vld [vmem:[#allocation6 + $0x140] sm:$0xf]  ;;  %v18159_v0 = vld [vmem:[#allocation6 + $0xc] sm:$0xf0]  ;;  %v7829_v24 = vpop.f32.mrf.mxu3 }
 0x759   :  { %8008 = vmatmul.bf16.vlgmr.msrb.gmra.mxu1 %v18950_v31  ;;  %v18239_v31 = vld [vmem:[#allocation6 + $0x28c] sm:$0xf0]  ;;  %v15744_v10 = vor.u32 %v18227_v5, %v15743_v51  ;;  %v16287_v24 = vld [vmem:[#allocation6 + $0x660] sm:$0xf] }
 0x75a   :  { %8033 = vmatpush.bf16.msrb.mxu3 %v15244_v20  ;;  %9630 = vmatpush.bf16.msra.mxu1 %v15712_v52  ;;  %v15792_v33 = vor.u32 %v18239_v31, %v15791_v6  ;;  %v18167_v20 = vld [vmem:[#allocation6 + $0x4c] sm:$0xf0]  ;;  %v15904_v52 = vor.u32 %v18267_v45, %v15903_v36  ;;  %v15599_v6 = vld [vmem:[#allocation6 + $0x100] sm:$0xf] }
 0x75b   :  { %8021 = vmatmul.bf16.vlgmr.msrb.gmra.mxu2 %v18948_v28  ;;  %v15919_v28 = vld [vmem:[#allocation6 + $0x380] sm:$0xf]  ;;  %v18191_v31 = vld [vmem:[#allocation6 + $0x10c] sm:$0xf0] }
 0x75c   :  { %9643 = vmatpush.bf16.msra.mxu2 %v15840_v48  ;;  %9618 = vmatpush.bf16.msra.mxu0 %v15568_v59  ;;  %v15920_v21 = vor.u32 %v18271_v11, %v15919_v28  ;;  %v19152_v48 = vpop.f32.mrf.mxu2  ;;  %v15504_v59 = vor.u32 %v18167_v20, %v15503_v49  ;;  %v15727_v28 = vld [vmem:[#allocation6 + $0x200] sm:$0xf]  ;;  %v18315_v8 = vld [vmem:[#allocation6 + $0x4ec] sm:$0xf0] }
 0x75d   :  { %8034 = vmatmul.bf16.vlgmr.msrb.gmra.mxu3 %v18952_v35  ;;  %v15536_v35 = vor.u32 %v18175_v23, %v15535_v25  ;;  %v15488_v25 = vor.u32 %v18163_v2, %v15487_v63  ;;  %v15471_v23 = vld [vmem:[#allocation6] sm:$0xf]  ;;  %v18379_v45 = vld [vmem:[#allocation6 + $0x6ec] sm:$0xf0]  ;;  %v16096_v20 = vor.u32 %v18315_v8, %v16095_v15 }
 0x75e   :  { %9656 = vmatpush.bf16.msra.mxu3 %v15968_v16  ;;  %9631 = vmatpush.bf16.msra.mxu1 %v15696_v62  ;;  %v8047_v16 = vmul.f32 0.1, %v18983_v40  ;;  %v7790_v58 = vpop.f32.mrf.mxu0  ;;  %v7803_v62 = vpop.f32.mrf.mxu1  ;;  %v15472_v26 = vor.u32 %v18159_v0, %v15471_v23  ;;  %v16351_v36 = vld [vmem:[#allocation6 + $0x6e0] sm:$0xf]  ;;  %v18335_v0 = vld [vmem:[#allocation6 + $0x58c] sm:$0xf0] }
 0x75f   :  { %v16352_v47 = vor.u32 %v18379_v45, %v16351_v36  ;;  %v16335_v58 = vld [vmem:[#allocation6 + $0x6c0] sm:$0xf] }
 0x760   :  { %9644 = vmatpush.bf16.msra.mxu2 %v15824_v60  ;;  %9619 = vmatpush.bf16.msra.mxu0 %v15552_v9  ;;  %v15632_v60 = vor.u32 %v18199_v53, %v15631_v50  ;;  %v15871_v9 = vld [vmem:[#allocation6 + $0x320] sm:$0xf]  ;;  %v8056_v50 = vsel %vm8040_vm1, %v19010_v57, %v8048_v22  ;;  %v7763_v57 = vadd.f32 %v19140_v18, %v19138_v43  ;;  %v18339_v43 = vld [vmem:[#allocation6 + $0x5ac] sm:$0xf0] }
 0x761   :  { %v16063_v2 = vld [vmem:[#allocation6 + $0x4a0] sm:$0xf] }
 0x762   :  { %9657 = vmatpush.bf16.msra.mxu3 %v15952_v3  ;;  %9632 = vmatpush.bf16.msra.mxu1 %v15680_v41  ;;  %v15615_v3 = vld [vmem:[#allocation6 + $0x120] sm:$0xf]  ;;  %v18259_v41 = vld [vmem:[#allocation6 + $0x32c] sm:$0xf0]  ;;  %v7776_v51 = vadd.f32 %v19142_v54, %v7763_v57 }
 0x763   :  { %v15872_v11 = vor.u32 %v18259_v41, %v15871_v9  ;;  %v16319_v18 = vld [vmem:[#allocation6 + $0x6a0] sm:$0xf]  ;;  %v18303_v9 = vld [vmem:[#allocation6 + $0x48c] sm:$0xf0] }
 0x764   :  { %9645 = vmatpush.bf16.msra.mxu2 %v15808_v42  ;;  %9620 = vmatpush.bf16.msra.mxu0 %v15536_v35  ;;  %v8050_v42 = vmul.f32 0.1, %v19064_v1  ;;  %v18223_v35 = vld [vmem:[#allocation6 + $0x20c] sm:$0xf0]  ;;  %v7816_v14 = vpop.f32.mrf.mxu2  ;;  %v7789_v41 = vadd.f32 %v19148_v29, %v7776_v51  ;;  %v16175_v23 = vld [vmem:[#allocation6 + $0x580] sm:$0xf] }
 0x765   :  { %v18367_v54 = vld [vmem:[#allocation6 + $0x68c] sm:$0xf0]  ;;  %v16031_v29 = vld [vmem:[#allocation6 + $0x460] sm:$0xf] }
 0x766   :  { %9658 = vmatpush.bf16.msra.mxu3 %v15936_v44  ;;  %9633 = vmatpush.bf16.msra.mxu1 %v15664_v12  ;;  %v15616_v44 = vor.u32 %v18195_v4, %v15615_v3  ;;  %v15855_v12 = vld [vmem:[#allocation6 + $0x300] sm:$0xf]  ;;  %v18307_v3 = vld [vmem:[#allocation6 + $0x4ac] sm:$0xf0]  ;;  %v7853_v8 = vpop.f32.mrf.mxu1 }
 0x767   :  { %v18371_v4 = vld [vmem:[#allocation6 + $0x6ac] sm:$0xf0]  ;;  %v16064_v5 = vor.u32 %v18307_v3, %v16063_v2  ;;  %v16159_v14 = vld [vmem:[#allocation6 + $0x560] sm:$0xf] }
 0x768   :  { %9646 = vmatpush.bf16.msra.mxu2 %v15792_v33  ;;  %9621 = vmatpush.bf16.msra.mxu0 %v15520_v39  ;;  %v18255_v33 = vld [vmem:[#allocation6 + $0x30c] sm:$0xf0]  ;;  %v15600_v39 = vor.u32 %v18191_v31, %v15599_v6  ;;  %v16303_v6 = vld [vmem:[#allocation6 + $0x680] sm:$0xf] }
 0x769   :  { %v15856_v49 = vor.u32 %v18255_v33, %v15855_v12  ;;  %v16304_v12 = vor.u32 %v18367_v54, %v16303_v6  ;;  %v18299_v33 = vld [vmem:[#allocation6 + $0x46c] sm:$0xf0]  ;;  %v15999_v57 = vld [vmem:[#allocation6 + $0x420] sm:$0xf]  ;;  %v15713_v54 = vld [vmem:[#allocation6 + $0x1f0] sm:$0xf0] }
 0x76a   :  { %9659 = vmatpush.bf16.msra.mxu3 %v15920_v21  ;;  %9634 = vmatpush.bf16.msra.mxu1 %v15648_v34  ;;  %v16223_v21 = vld [vmem:[#allocation6 + $0x5e0] sm:$0xf]  ;;  %v15728_v34 = vor.u32 %v18223_v35, %v15727_v28  ;;  %v16176_v28 = vor.u32 %v18335_v0, %v16175_v23  ;;  %v7802_v35 = vadd.f32 %v19150_v30, %v7789_v41  ;;  %v18323_v2 = vld [vmem:[#allocation6 + $0x52c] sm:$0xf0]  ;;  %v18185_v0 = vld [vmem:[#allocation6 + $0xe4] sm:$0xf] }
 0x76b   :  { %v16224_v53 = vor.u32 %v18347_v27, %v16223_v21  ;;  %v18331_v21 = vld [vmem:[#allocation6 + $0x56c] sm:$0xf0]  ;;  %v16032_v45 = vor.u32 %v18299_v33, %v16031_v29  ;;  %v16255_v3 = vld [vmem:[#allocation6 + $0x620] sm:$0xf] }
 0x76c   :  { %9647 = vmatpush.bf16.msra.mxu2 %v15776_v46  ;;  %9622 = vmatpush.bf16.msra.mxu0 %v15504_v59  ;;  %v8055_v46 = vsel %vm8039_vm0, %v18983_v40, %v8047_v16  ;;  %v8058_v40 = vsel %vm8042_vm3, %v19064_v1, %v8050_v42  ;;  %v18343_v16 = vld [vmem:[#allocation6 + $0x5cc] sm:$0xf0]  ;;  %v7815_v27 = vadd.f32 %v19152_v48, %v7802_v35  ;;  %v8051_v48 = vmul.f32 0.1, %v19091_v56  ;;  %v18249_v35 = vld [vmem:[#allocation6 + $0x2e4] sm:$0xf] }
 0x76d   :  { %v18375_v59 = vld [vmem:[#allocation6 + $0x6cc] sm:$0xf0]  ;;  %v19176_v62 = vpack.c.bf16 %v8055_v46, %v8055_v46  ;;  %v16208_v1 = vor.u32 %v18343_v16, %v16207_v55 }
 0x76e   :  { %9660 = vmatpush.bf16.msra.mxu3 %v15904_v52  ;;  %9635 = vmatpush.bf16.msra.mxu1 %v15632_v60  ;;  %v8057_v52 = vsel %vm8041_vm2, %v19037_v17, %v8049_v13  ;;  %v19180_v17 = vpack.c.bf16 %v8056_v50, %v8056_v50  ;;  %v16080_v60 = vor.u32 %v18311_v19, %v16079_v37  ;;  %v16047_v13 = vld [vmem:[#allocation6 + $0x480] sm:$0xf]  ;;  %v18295_v46 = vld [vmem:[#allocation6 + $0x44c] sm:$0xf0]  ;;  %v7879_v37 = vpop.f32.mrf.mxu3 }
 0x76f   :  { %v19182_v22 = vpack.c.bf16 %v8057_v52, %v8057_v52  ;;  %v16336_v63 = vor.u32 %v18375_v59, %v16335_v58  ;;  %v16048_v31 = vor.u32 %v18303_v9, %v16047_v13  ;;  %v18327_v50 = vld [vmem:[#allocation6 + $0x54c] sm:$0xf0]  ;;  %v16271_v52 = vld [vmem:[#allocation6 + $0x640] sm:$0xf]  ;;  %v7828_v19 = vadd.f32 %v19156_v32, %v7815_v27  ;;  %v15569_v27 = vld [vmem:[#allocation6 + $0xd0] sm:$0xf0] }
 0x770   :  { %9648 = vmatpush.bf16.msra.mxu2 %v15760_v61  ;;  %9623 = vmatpush.bf16.msra.mxu0 %v15488_v25  ;;  %v19184_v61 = vpack.c.bf16 %v8058_v40, %v8058_v40  ;;  %v16320_v25 = vor.u32 %v18371_v4, %v16319_v18  ;;  %v8052_v32 = vmul.f32 0.1, %v19118_v7  ;;  %v15983_v4 = vld [vmem:[#allocation6 + $0x400] sm:$0xf]  ;;  %v18287_v51 = vld [vmem:[#allocation6 + $0x40c] sm:$0xf0] }
 0x771   :  { %v18319_v41 = vld [vmem:[#allocation6 + $0x50c] sm:$0xf0]  ;;  %vm8045_vm6 = vcmp.gt.f32.partialorder %v7828_v19, 0.0 }
 0x772   :  { %9661 = vmatpush.bf16.msra.mxu3 %v15888_v38  ;;  %9636 = vmatpush.bf16.msra.mxu1 %v15616_v44  ;;  %v16191_v38 = vld [vmem:[#allocation6 + $0x5a0] sm:$0xf]  ;;  %v18594_v44 = vld [vmem:[#allocation4] sm:$0xff] }
 0x773   :  { %v16192_v42 = vor.u32 %v18339_v43, %v16191_v38  ;;  %v18355_v38 = vld [vmem:[#allocation6 + $0x62c] sm:$0xf0]  ;;  %v8053_v43 = vmul.f32 0.1, %v7828_v19 }
 0x774   :  { %9649 = vmatpush.bf16.msra.mxu2 %v15744_v10  ;;  %9624 = vmatpush.bf16.msra.mxu0 %v15472_v26  ;;  %v1190_v10 = vperm.slane %v18594_v44, 7  ;;  %v18363_v26 = vld [vmem:[#allocation6 + $0x66c] sm:$0xf0]  ;;  %v16256_v9 = vor.u32 %v18355_v38, %v16255_v3  ;;  %v15585_v44 = vld [vmem:[#allocation6 + $0xf0] sm:$0xf0] }
 0x775   :  { %v16288_v30 = vor.u32 %v18363_v26, %v16287_v24  ;;  %v18181_v26 = vld [vmem:[#allocation6 + $0xc4] sm:$0xf]  ;;  %v15537_v38 = vld [vmem:[#allocation6 + $0x90] sm:$0xf0] }
 0x776   :  { %9662 = vmatpush.bf16.msra.mxu3 %v15872_v11  ;;  %9637 = vmatpush.bf16.msra.mxu1 %v15600_v39  ;;  %v7840_v11 = vpop.f32.mrf.mxu0  ;;  %v16160_v39 = vor.u32 %v18331_v21, %v16159_v14  ;;  %v7881_v6 = vpop.f32.mrf.mxu3  ;;  %v15588_v21 = vor.u32 %v18185_v0, %v15585_v44  ;;  %v18173_v3 = vld [vmem:[#allocation6 + $0x84] sm:$0xf] }
 0x777   :  { %9625 = vmatmul.bf16.vlgmr.msra.gmra.mxu0 %v19176_v62  ;;  %v7841_v15 = vadd.f32 %v7840_v11, %v1190_v10  ;;  %v18217_v10 = vld [vmem:[#allocation6 + $0x1e4] sm:$0xf]  ;;  %v15984_v11 = vor.u32 %v18287_v51, %v15983_v4  ;;  %v16431_v4 = vld [vmem:[#allocation6 + $0x780] sm:$0xf]  ;;  %v18399_v51 = vld [vmem:[#allocation6 + $0x78c] sm:$0xf0] }
 0x778   :  { %9650 = vmatpush.bf16.msra.mxu2 %v15728_v34  ;;  %9669 = vmatpush.bf16.msrb.mxu0 %v16096_v20  ;;  %v16015_v34 = vld [vmem:[#allocation6 + $0x440] sm:$0xf]  ;;  %v7866_v20 = vpop.f32.mrf.mxu2  ;;  %v15716_v24 = vor.u32 %v18217_v10, %v15713_v54  ;;  %v18201_v0 = vld [vmem:[#allocation6 + $0x164] sm:$0xf]  ;;  %v15649_v6 = vld [vmem:[#allocation6 + $0x170] sm:$0xf0] }
 0x779   :  { %9638 = vmatmul.bf16.vlgmr.msra.gmra.mxu1 %v19180_v17  ;;  %v7854_v36 = vadd.f32 %v7853_v8, %v7841_v15  ;;  %v16016_v55 = vor.u32 %v18295_v46, %v16015_v34  ;;  %v8059_v15 = vsel %vm8043_vm4, %v19091_v56, %v8051_v48  ;;  %v8060_v8 = vsel %vm8044_vm5, %v19118_v7, %v8052_v32  ;;  %v16463_v34 = vld [vmem:[#allocation6 + $0x7c0] sm:$0xf]  ;;  %v18245_v46 = vld [vmem:[#allocation6 + $0x2c4] sm:$0xf] }
 0x77a   :  { %9663 = vmatpush.bf16.msra.mxu3 %v15856_v49  ;;  %9682 = vmatpush.bf16.msrb.mxu1 %v16224_v53  ;;  %v16143_v49 = vld [vmem:[#allocation6 + $0x540] sm:$0xf]  ;;  %v18359_v53 = vld [vmem:[#allocation6 + $0x64c] sm:$0xf0]  ;;  %v19208_v56 = vpack.c.bf16 %v8059_v15, %v8059_v15  ;;  %v18209_v48 = vld [vmem:[#allocation6 + $0x1a4] sm:$0xf] }
 0x77b   :  { %9651 = vmatmul.bf16.vlgmr.msra.gmra.mxu2 %v19182_v22  ;;  %v16144_v58 = vor.u32 %v18327_v50, %v16143_v49  ;;  %v16272_v59 = vor.u32 %v18359_v53, %v16271_v52  ;;  %v15825_v49 = vld [vmem:[#allocation6 + $0x2d0] sm:$0xf0]  ;;  %v19210_v50 = vpack.c.bf16 %v8060_v8, %v8060_v8  ;;  %v15572_v53 = vor.u32 %v18181_v26, %v15569_v27  ;;  %v18205_v32 = vld [vmem:[#allocation6 + $0x184] sm:$0xf]  ;;  %v16399_v27 = vld [vmem:[#allocation6 + $0x740] sm:$0xf] }
 0x77c   :  { %9695 = vmatpush.bf16.msrb.mxu2 %v16352_v47  ;;  %9670 = vmatpush.bf16.msrb.mxu0 %v16080_v60  ;;  %v7867_v47 = vadd.f32 %v7866_v20, %v7854_v36  ;;  %v18291_v60 = vld [vmem:[#allocation6 + $0x42c] sm:$0xf0]  ;;  %v8061_v36 = vsel %vm8045_vm6, %v7828_v19, %v8053_v43  ;;  %v15553_v19 = vld [vmem:[#allocation6 + $0xb0] sm:$0xf0]  ;;  %v18197_v8 = vld [vmem:[#allocation6 + $0x144] sm:$0xf] }
 0x77d   :  { %9664 = vmatmul.bf16.vlgmr.msra.gmra.mxu3 %v19184_v61  ;;  %v16000_v18 = vor.u32 %v18291_v60, %v15999_v57  ;;  %v18407_v20 = vld [vmem:[#allocation6 + $0x7cc] sm:$0xf0]  ;;  %v19212_v52 = vpack.c.bf16 %v8061_v36, %v8061_v36  ;;  %v18241_v57 = vld [vmem:[#allocation6 + $0x2a4] sm:$0xf]  ;;  %v15809_v60 = vld [vmem:[#allocation6 + $0x2b0] sm:$0xf0] }
 0x77e   :  { %9683 = vmatpush.bf16.msrb.mxu1 %v16208_v1  ;;  %v19196_v40 = vadd.f32 %v7879_v37, %v7867_v47  ;;  %v7842_v16 = vpop.f32.mrf.mxu0  ;;  %v16127_v1 = vld [vmem:[#allocation6 + $0x520] sm:$0xf]  ;;  %v16464_v7 = vor.u32 %v18407_v20, %v16463_v34  ;;  %v18177_v37 = vld [vmem:[#allocation6 + $0xa4] sm:$0xf]  ;;  %v15812_v43 = vor.u32 %v18241_v57, %v15809_v60  ;;  %v15505_v15 = vld [vmem:[#allocation6 + $0x50] sm:$0xf0] }
 0x77f   :  { %v16128_v13 = vor.u32 %v18323_v2, %v16127_v1  ;;  %v15681_v16 = vld [vmem:[#allocation6 + $0x1b0] sm:$0xf0]  ;;  %v18391_v36 = vld [vmem:[#allocation6 + $0x74c] sm:$0xf0]  ;;  %v18161_v20 = vld [vmem:[#allocation6 + $0x24] sm:$0xf] }
 0x780   :  { %9696 = vmatpush.bf16.msrb.mxu2 %v16336_v63  ;;  %9671 = vmatpush.bf16.msrb.mxu0 %v16064_v5  ;;  %v7855_v63 = vpop.f32.mrf.mxu1  ;;  %v16111_v5 = vld [vmem:[#allocation6 + $0x500] sm:$0xf]  ;;  %v7868_v23 = vpop.f32.mrf.mxu2  ;;  %v15684_v2 = vor.u32 %v18209_v48, %v15681_v16  ;;  %v16400_v34 = vor.u32 %v18391_v36, %v16399_v27  ;;  %v18387_v16 = vld [vmem:[#allocation6 + $0x72c] sm:$0xf0]  ;;  %v18157_v57 = vld [vmem:[#allocation6 + $0x4] sm:$0xf] }
 0x781   :  { %v16112_v33 = vor.u32 %v18319_v41, %v16111_v5  ;;  %v15556_v63 = vor.u32 %v18177_v37, %v15553_v19  ;;  %v18237_v5 = vld [vmem:[#allocation6 + $0x284] sm:$0xf]  ;;  %v15540_v41 = vor.u32 %v18173_v3, %v15537_v38  ;;  %v15521_v23 = vld [vmem:[#allocation6 + $0x70] sm:$0xf0] }
 0x782   :  { %9684 = vmatpush.bf16.msrb.mxu1 %v16192_v42  ;;  %v16239_v42 = vld [vmem:[#allocation6 + $0x600] sm:$0xf]  ;;  %v15617_v19 = vld [vmem:[#allocation6 + $0x130] sm:$0xf0]  ;;  %v18189_v3 = vld [vmem:[#allocation6 + $0x104] sm:$0xf] }
 0x783   :  { %v15473_v60 = vld [vmem:[#allocation6 + $0x10] sm:$0xf0] }
 0x784   :  { %9697 = vmatpush.bf16.msrb.mxu2 %v16320_v25  ;;  %9672 = vmatpush.bf16.msrb.mxu0 %v16048_v31  ;;  %v18351_v25 = vld [vmem:[#allocation6 + $0x60c] sm:$0xf0]  ;;  %v16479_v31 = vld [vmem:[#allocation6 + $0x7e0] sm:$0xf]  ;;  %v15601_v38 = vld [vmem:[#allocation6 + $0x110] sm:$0xf0] }
 0x785   :  { %v16240_v14 = vor.u32 %v18351_v25, %v16239_v42  ;;  %v18169_v25 = vld [vmem:[#allocation6 + $0x64] sm:$0xf]  ;;  %v16337_v27 = vld [vmem:[#allocation6 + $0x6d0] sm:$0xf0] }
 0x786   :  { %9685 = vmatpush.bf16.msrb.mxu1 %v16176_v28  ;;  %v18411_v28 = vld [vmem:[#allocation6 + $0x7ec] sm:$0xf0]  ;;  %v19217_v44 = vpop.f32.mrf.mxu0 }
 0x787   :  { %v16480_v29 = vor.u32 %v18411_v28, %v16479_v31  ;;  %v16415_v31 = vld [vmem:[#allocation6 + $0x760] sm:$0xf]  ;;  %v18395_v28 = vld [vmem:[#allocation6 + $0x76c] sm:$0xf0] }
 0x788   :  { %9698 = vmatpush.bf16.msrb.mxu2 %v16304_v12  ;;  %9673 = vmatpush.bf16.msrb.mxu0 %v16032_v45  ;;  %v15841_v12 = vld [vmem:[#allocation6 + $0x2f0] sm:$0xf0]  ;;  %v19219_v54 = vpop.f32.mrf.mxu1  ;;  %v19221_v26 = vpop.f32.mrf.mxu2 }
 0x789   :  { %9708 = vmatpush.bf16.msrb.mxu3 %v16480_v29  ;;  %v15844_v45 = vor.u32 %v18249_v35, %v15841_v12  ;;  %v15777_v35 = vld [vmem:[#allocation6 + $0x270] sm:$0xf0]  ;;  %v16416_v12 = vor.u32 %v18395_v28, %v16415_v31  ;;  %v15524_v29 = vor.u32 %v18169_v25, %v15521_v23  ;;  %v18377_v23 = vld [vmem:[#allocation6 + $0x6e4] sm:$0xf]  ;;  %v15604_v31 = vor.u32 %v18189_v3, %v15601_v38 }
 0x78a   :  { %9686 = vmatpush.bf16.msrb.mxu1 %v16160_v39  ;;  %v18213_v39 = vld [vmem:[#allocation6 + $0x1c4] sm:$0xf]  ;;  %v16225_v25 = vld [vmem:[#allocation6 + $0x5f0] sm:$0xf0] }
 0x78b   :  { %v18365_v3 = vld [vmem:[#allocation6 + $0x684] sm:$0xf]  ;;  %v16305_v38 = vld [vmem:[#allocation6 + $0x690] sm:$0xf0] }
 0x78c   :  { %9699 = vmatpush.bf16.msrb.mxu2 %v16288_v30  ;;  %9674 = vmatpush.bf16.msrb.mxu0 %v16016_v55  ;;  %v15697_v30 = vld [vmem:[#allocation6 + $0x1d0] sm:$0xf0]  ;;  %v15828_v55 = vor.u32 %v18245_v46, %v15825_v49 }
 0x78d   :  { %v15700_v47 = vor.u32 %v18213_v39, %v15697_v30  ;;  %9709 = vmatpush.bf16.msrb.mxu3 %v16464_v7  ;;  %v15761_v39 = vld [vmem:[#allocation6 + $0x250] sm:$0xf0]  ;;  %v19223_v30 = vpop.f32.mrf.mxu3 }
 0x78e   :  { %9687 = vmatpush.bf16.msrb.mxu1 %v16144_v58  ;;  %v16447_v58 = vld [vmem:[#allocation6 + $0x7a0] sm:$0xf]  ;;  %v15489_v7 = vld [vmem:[#allocation6 + $0x30] sm:$0xf0] }
 0x790   :  { %9700 = vmatpush.bf16.msrb.mxu2 %v16272_v59  ;;  %9675 = vmatpush.bf16.msrb.mxu0 %v16000_v18  ;;  %v18403_v59 = vld [vmem:[#allocation6 + $0x7ac] sm:$0xf0]  ;;  %v15665_v18 = vld [vmem:[#allocation6 + $0x190] sm:$0xf0]  ;;  %v7907_v48 = vpop.f32.mrf.mxu1 }
 0x791   :  { %v16448_v1 = vor.u32 %v18403_v59, %v16447_v58  ;;  %v15668_v42 = vor.u32 %v18205_v32, %v15665_v18  ;;  %v18225_v58 = vld [vmem:[#allocation6 + $0x224] sm:$0xf]  ;;  %v15745_v59 = vld [vmem:[#allocation6 + $0x230] sm:$0xf0] }
 0x792   :  { %9688 = vmatpush.bf16.msrb.mxu1 %v16128_v13  ;;  %v15793_v13 = vld [vmem:[#allocation6 + $0x290] sm:$0xf0]  ;;  %v18221_v32 = vld [vmem:[#allocation6 + $0x204] sm:$0xf] }
 0x793   :  { %9710 = vmatpush.bf16.msrb.mxu3 %v16448_v1  ;;  %v15796_v10 = vor.u32 %v18237_v5, %v15793_v13  ;;  %v15729_v18 = vld [vmem:[#allocation6 + $0x210] sm:$0xf0]  ;;  %v18383_v5 = vld [vmem:[#allocation6 + $0x70c] sm:$0xf0]  ;;  %v18313_v13 = vld [vmem:[#allocation6 + $0x4e4] sm:$0xf] }
 0x794   :  { %9701 = vmatpush.bf16.msrb.mxu2 %v16256_v9  ;;  %9676 = vmatpush.bf16.msrb.mxu0 %v15984_v11  ;;  %v16432_v9 = vor.u32 %v18399_v51, %v16431_v4  ;;  %v18233_v11 = vld [vmem:[#allocation6 + $0x264] sm:$0xf]  ;;  %v7920_v4 = vpop.f32.mrf.mxu2  ;;  %v16367_v51 = vld [vmem:[#allocation6 + $0x700] sm:$0xf]  ;;  %v15732_v28 = vor.u32 %v18221_v32, %v15729_v18 }
 0x795   :  { %v18269_v4 = vld [vmem:[#allocation6 + $0x384] sm:$0xf] }
 0x796   :  { %9689 = vmatpush.bf16.msrb.mxu1 %v16112_v33  ;;  %v15652_v33 = vor.u32 %v18201_v0, %v15649_v6  ;;  %v16353_v0 = vld [vmem:[#allocation6 + $0x6f0] sm:$0xf0]  ;;  %v15476_v6 = vor.u32 %v18157_v57, %v15473_v60  ;;  %v18301_v60 = vld [vmem:[#allocation6 + $0x484] sm:$0xf] }
 0x797   :  { %9677 = vmatmul.bf16.vlgmr.msrb.gmra.mxu0 %v19208_v56  ;;  %9711 = vmatpush.bf16.msrb.mxu3 %v16432_v9  ;;  %v16097_v9 = vld [vmem:[#allocation6 + $0x4f0] sm:$0xf0] }
 0x798   :  { %9702 = vmatpush.bf16.msrb.mxu2 %v16240_v14  ;;  %9721 = vmatpush.bf16.msra.mxu0 %v15588_v21  ;;  %v18165_v14 = vld [vmem:[#allocation6 + $0x44] sm:$0xf]  ;;  %v15780_v21 = vor.u32 %v18233_v11, %v15777_v35  ;;  %v16100_v11 = vor.u32 %v18313_v13, %v16097_v9  ;;  %v16308_v13 = vor.u32 %v18365_v3, %v16305_v38  ;;  %v19230_v9 = vpop.f32.mrf.mxu1  ;;  %v16113_v38 = vld [vmem:[#allocation6 + $0x510] sm:$0xf0] }
 0x799   :  { %9690 = vmatmul.bf16.vlgmr.msrb.gmra.mxu1 %v19210_v50  ;;  %v15508_v46 = vor.u32 %v18165_v14, %v15505_v15  ;;  %v18281_v35 = vld [vmem:[#allocation6 + $0x3e4] sm:$0xf]  ;;  %v16081_v15 = vld [vmem:[#allocation6 + $0x4d0] sm:$0xf0] }
 0x79a   :  { %9734 = vmatpush.bf16.msra.mxu1 %v15716_v24  ;;  %v15633_v24 = vld [vmem:[#allocation6 + $0x150] sm:$0xf0]  ;;  %v18309_v14 = vld [vmem:[#allocation6 + $0x4c4] sm:$0xf] }
 0x79b   :  { %9703 = vmatmul.bf16.vlgmr.msrb.gmra.mxu2 %v19212_v52  ;;  %9712 = vmatpush.bf16.msrb.mxu3 %v16416_v12  ;;  %v15636_v49 = vor.u32 %v18197_v8, %v15633_v24  ;;  %v15969_v12 = vld [vmem:[#allocation6 + $0x3f0] sm:$0xf0]  ;;  %v18341_v8 = vld [vmem:[#allocation6 + $0x5c4] sm:$0xf] }
 0x79c   :  { %9747 = vmatpush.bf16.msra.mxu2 %v15844_v45  ;;  %9722 = vmatpush.bf16.msra.mxu0 %v15572_v53  ;;  %v18229_v45 = vld [vmem:[#allocation6 + $0x244] sm:$0xf]  ;;  %v15972_v36 = vor.u32 %v18281_v35, %v15969_v12 }
 0x79d   :  { %v18193_v53 = vld [vmem:[#allocation6 + $0x124] sm:$0xf]  ;;  %v15764_v37 = vor.u32 %v18229_v45, %v15761_v39  ;;  %v16084_v45 = vor.u32 %v18309_v14, %v16081_v15  ;;  %v7893_v15 = vadd.f32 %v19217_v44, %v19196_v40  ;;  %v16001_v40 = vld [vmem:[#allocation6 + $0x430] sm:$0xf0] }
 0x79e   :  { %9735 = vmatpush.bf16.msra.mxu1 %v15700_v47  ;;  %v7894_v47 = vpop.f32.mrf.mxu0  ;;  %v18373_v24 = vld [vmem:[#allocation6 + $0x6c4] sm:$0xf] }
 0x79f   :  { %9713 = vmatpush.bf16.msrb.mxu3 %v16400_v34  ;;  %v18277_v39 = vld [vmem:[#allocation6 + $0x3c4] sm:$0xf]  ;;  %v15953_v34 = vld [vmem:[#allocation6 + $0x3d0] sm:$0xf0] }
 0x7a0   :  { %9748 = vmatpush.bf16.msra.mxu2 %v15828_v55  ;;  %9723 = vmatpush.bf16.msra.mxu0 %v15556_v63  ;;  %v16383_v55 = vld [vmem:[#allocation6 + $0x720] sm:$0xf]  ;;  %v15492_v63 = vor.u32 %v18161_v20, %v15489_v7  ;;  %v18305_v20 = vld [vmem:[#allocation6 + $0x4a4] sm:$0xf]  ;;  %v16065_v7 = vld [vmem:[#allocation6 + $0x4b0] sm:$0xf0]  ;;  %v15956_v48 = vor.u32 %v18277_v39, %v15953_v34 }
 0x7a1   :  { %v16384_v1 = vor.u32 %v18387_v16, %v16383_v55  ;;  %v16193_v47 = vld [vmem:[#allocation6 + $0x5b0] sm:$0xf0]  ;;  %v16068_v55 = vor.u32 %v18305_v20, %v16065_v7  ;;  %v18273_v16 = vld [vmem:[#allocation6 + $0x3a4] sm:$0xf] }
 0x7a2   :  { %9736 = vmatpush.bf16.msra.mxu1 %v15684_v2  ;;  %v15620_v2 = vor.u32 %v18193_v53, %v15617_v19  ;;  %v18337_v53 = vld [vmem:[#allocation6 + $0x5a4] sm:$0xf]  ;;  %v16321_v19 = vld [vmem:[#allocation6 + $0x6b0] sm:$0xf0] }
 0x7a3   :  { %9714 = vmatpush.bf16.msrb.mxu3 %v16384_v1  ;;  %v16049_v1 = vld [vmem:[#allocation6 + $0x490] sm:$0xf0]  ;;  %v18325_v14 = vld [vmem:[#allocation6 + $0x544] sm:$0xf] }
 0x7a4   :  { %9749 = vmatpush.bf16.msra.mxu2 %v15812_v43  ;;  %9724 = vmatpush.bf16.msra.mxu0 %v15540_v41  ;;  %v15748_v43 = vor.u32 %v18225_v58, %v15745_v59  ;;  %v18345_v41 = vld [vmem:[#allocation6 + $0x5e4] sm:$0xf]  ;;  %v15937_v58 = vld [vmem:[#allocation6 + $0x3b0] sm:$0xf0]  ;;  %v16196_v59 = vor.u32 %v18337_v53, %v16193_v47  ;;  %v16052_v18 = vor.u32 %v18301_v60, %v16049_v1  ;;  %v7959_v47 = vpop.f32.mrf.mxu1 }
 0x7a5   :  { %v15940_v32 = vor.u32 %v18273_v16, %v15937_v58  ;;  %v18289_v53 = vld [vmem:[#allocation6 + $0x424] sm:$0xf]  ;;  %v15873_v60 = vld [vmem:[#allocation6 + $0x330] sm:$0xf0] }
 0x7a6   :  { %9737 = vmatpush.bf16.msra.mxu1 %v15668_v42  ;;  %v7933_v42 = vpop.f32.mrf.mxu3  ;;  %v18321_v44 = vld [vmem:[#allocation6 + $0x524] sm:$0xf]  ;;  %v16004_v58 = vor.u32 %v18289_v53, %v16001_v40  ;;  %v18212_v53 = vld [vmem:[#allocation6 + $0x1b4] sm:$0xf0]  ;;  %v15815_v40 = vld [vmem:[#allocation6 + $0x2a8] sm:$0xf] }
 0x7a7   :  { %v16033_v42 = vld [vmem:[#allocation6 + $0x470] sm:$0xf0]  ;;  %v18317_v3 = vld [vmem:[#allocation6 + $0x504] sm:$0xf] }
 0x7a8   :  { %9750 = vmatpush.bf16.msra.mxu2 %v15796_v10  ;;  %9725 = vmatpush.bf16.msra.mxu0 %v15524_v29  ;;  %v16368_v10 = vor.u32 %v18383_v5, %v16367_v51  ;;  %v16228_v29 = vor.u32 %v18345_v41, %v16225_v25  ;;  %v15921_v51 = vld [vmem:[#allocation6 + $0x390] sm:$0xf0]  ;;  %v18297_v41 = vld [vmem:[#allocation6 + $0x464] sm:$0xf] }
 0x7a9   :  { %v18329_v25 = vld [vmem:[#allocation6 + $0x564] sm:$0xf] }
 0x7aa   :  { %9738 = vmatpush.bf16.msra.mxu1 %v15652_v33  ;;  %v16356_v33 = vor.u32 %v18377_v23, %v16353_v0  ;;  %9715 = vmatpush.bf16.msrb.mxu3 %v16368_v10  ;;  %v16161_v23 = vld [vmem:[#allocation6 + $0x570] sm:$0xf0]  ;;  %v18361_v0 = vld [vmem:[#allocation6 + $0x664] sm:$0xf] }
 0x7ab   :  { %v16289_v10 = vld [vmem:[#allocation6 + $0x670] sm:$0xf0]  ;;  %v16164_v35 = vor.u32 %v18329_v25, %v16161_v23  ;;  %v15847_v23 = vld [vmem:[#allocation6 + $0x2e8] sm:$0xf] }
 0x7ac   :  { %9751 = vmatpush.bf16.msra.mxu2 %v15780_v21  ;;  %9726 = vmatpush.bf16.msra.mxu0 %v15508_v46  ;;  %v16209_v21 = vld [vmem:[#allocation6 + $0x5d0] sm:$0xf0]  ;;  %v16292_v12 = vor.u32 %v18361_v0, %v16289_v10  ;;  %v18252_v0 = vld [vmem:[#allocation6 + $0x2f4] sm:$0xf0] }
 0x7ad   :  { %v16212_v46 = vor.u32 %v18341_v8, %v16209_v21  ;;  %v16145_v8 = vld [vmem:[#allocation6 + $0x550] sm:$0xf0]  ;;  %v18357_v21 = vld [vmem:[#allocation6 + $0x644] sm:$0xf] }
 0x7ae   :  { %9739 = vmatpush.bf16.msra.mxu1 %v15636_v49  ;;  %v16340_v49 = vor.u32 %v18373_v24, %v16337_v27  ;;  %9760 = vmatpush.bf16.msra.mxu3 %v15972_v36  ;;  %v16273_v24 = vld [vmem:[#allocation6 + $0x650] sm:$0xf0]  ;;  %v19234_v27 = vpop.f32.mrf.mxu2  ;;  %v16148_v20 = vor.u32 %v18325_v14, %v16145_v8  ;;  %v18184_v14 = vld [vmem:[#allocation6 + $0xd4] sm:$0xf0] }
 0x7af   :  { %v16276_v7 = vor.u32 %v18357_v21, %v16273_v24  ;;  %v18216_v8 = vld [vmem:[#allocation6 + $0x1d4] sm:$0xf0]  ;;  %v15831_v24 = vld [vmem:[#allocation6 + $0x2c8] sm:$0xf] }
 0x7b0   :  { %9752 = vmatpush.bf16.msra.mxu2 %v15764_v37  ;;  %9727 = vmatpush.bf16.msra.mxu0 %v15492_v63  ;;  %v18369_v37 = vld [vmem:[#allocation6 + $0x6a4] sm:$0xf] }
 0x7b1   :  { %v16324_v57 = vor.u32 %v18369_v37, %v16321_v19  ;;  %v18333_v63 = vld [vmem:[#allocation6 + $0x584] sm:$0xf]  ;;  %v7906_v37 = vadd.f32 %v19219_v54, %v7893_v15  ;;  %v16129_v19 = vld [vmem:[#allocation6 + $0x530] sm:$0xf0]  ;;  %v15703_v15 = vld [vmem:[#allocation6 + $0x1c8] sm:$0xf] }
 0x7b2   :  { %9740 = vmatpush.bf16.msra.mxu1 %v15620_v2  ;;  %v16177_v2 = vld [vmem:[#allocation6 + $0x590] sm:$0xf0]  ;;  %9761 = vmatpush.bf16.msra.mxu3 %v15956_v48  ;;  %v18353_v48 = vld [vmem:[#allocation6 + $0x624] sm:$0xf]  ;;  %v16132_v1 = vor.u32 %v18321_v44, %v16129_v19  ;;  %v18244_v44 = vld [vmem:[#allocation6 + $0x2b4] sm:$0xf0] }
 0x7b3   :  { %v16180_v5 = vor.u32 %v18333_v63, %v16177_v2  ;;  %v15985_v2 = vld [vmem:[#allocation6 + $0x410] sm:$0xf0]  ;;  %v18349_v54 = vld [vmem:[#allocation6 + $0x604] sm:$0xf] }
 0x7b4   :  { %9753 = vmatpush.bf16.msra.mxu2 %v15748_v43  ;;  %9728 = vmatpush.bf16.msra.mxu0 %v15476_v6  ;;  %v19228_v43 = vpop.f32.mrf.mxu0  ;;  %v15924_v6 = vor.u32 %v18269_v4, %v15921_v51  ;;  %v15591_v4 = vld [vmem:[#allocation6 + $0xe8] sm:$0xf]  ;;  %v18188_v51 = vld [vmem:[#allocation6 + $0xf4] sm:$0xf0] }
 0x7b6   :  { %9741 = vmatpush.bf16.msra.mxu1 %v15604_v31  ;;  %9762 = vmatpush.bf16.msra.mxu3 %v15940_v32  ;;  %v16036_v31 = vor.u32 %v18297_v41, %v16033_v42  ;;  %v7919_v32 = vadd.f32 %v19221_v26, %v7906_v37  ;;  %v7972_v41 = vpop.f32.mrf.mxu2 }
 0x7b7   :  { %9729 = vmatmul.bf16.vlgmr.msra.gmra.mxu0 %v19176_v62 }
 0x7b8   :  { %9754 = vmatpush.bf16.msra.mxu2 %v15732_v28  ;;  %9773 = vmatpush.bf16.msrb.mxu0 %v16100_v11  ;;  %v18265_v28 = vld [vmem:[#allocation6 + $0x364] sm:$0xf]  ;;  %v15905_v11 = vld [vmem:[#allocation6 + $0x370] sm:$0xf0]  ;;  %v7932_v26 = vadd.f32 %v19223_v30, %v7919_v32  ;;  %v18172_v32 = vld [vmem:[#allocation6 + $0x74] sm:$0xf0] }
 0x7b9   :  { %9742 = vmatmul.bf16.vlgmr.msra.gmra.mxu1 %v19180_v17  ;;  %v15908_v36 = vor.u32 %v18265_v28, %v15905_v11  ;;  %v15592_v28 = vor.u32 %v18188_v51, %v15591_v4  ;;  %v15783_v51 = vld [vmem:[#allocation6 + $0x268] sm:$0xf] }
 0x7ba   :  { %9786 = vmatpush.bf16.msrb.mxu1 %v16228_v29  ;;  %v18293_v29 = vld [vmem:[#allocation6 + $0x444] sm:$0xf]  ;;  %9763 = vmatpush.bf16.msra.mxu3 %v15924_v6  ;;  %v16116_v6 = vor.u32 %v18317_v3, %v16113_v38  ;;  %v7945_v21 = vadd.f32 %v19228_v43, %v7932_v26 }
 0x7bb   :  { %9755 = vmatmul.bf16.vlgmr.msra.gmra.mxu2 %v19182_v22 }
 0x7bc   :  { %9799 = vmatpush.bf16.msrb.mxu2 %v16356_v33  ;;  %9774 = vmatpush.bf16.msrb.mxu0 %v16084_v45  ;;  %v16017_v33 = vld [vmem:[#allocation6 + $0x450] sm:$0xf0]  ;;  %v19236_v45 = vpop.f32.mrf.mxu3  ;;  %v7946_v34 = vpop.f32.mrf.mxu0  ;;  %v7958_v43 = vadd.f32 %v19230_v9, %v7945_v21  ;;  %v15799_v9 = vld [vmem:[#allocation6 + $0x288] sm:$0xf] }
 0x7bd   :  { %v16020_v39 = vor.u32 %v18293_v29, %v16017_v33  ;;  %v15857_v29 = vld [vmem:[#allocation6 + $0x310] sm:$0xf0]  ;;  %v15848_v33 = vor.u32 %v18252_v0, %v15847_v23  ;;  %v15704_v34 = vor.u32 %v18216_v8, %v15703_v15  ;;  %v15639_v23 = vld [vmem:[#allocation6 + $0x148] sm:$0xf]  ;;  %v18200_v0 = vld [vmem:[#allocation6 + $0x154] sm:$0xf0] }
 0x7be   :  { %9787 = vmatpush.bf16.msrb.mxu1 %v16212_v46  ;;  %v18261_v46 = vld [vmem:[#allocation6 + $0x344] sm:$0xf]  ;;  %9764 = vmatpush.bf16.msra.mxu3 %v15908_v36  ;;  %v18248_v36 = vld [vmem:[#allocation6 + $0x2d4] sm:$0xf0]  ;;  %v7971_v47 = vadd.f32 %v19234_v27, %v7958_v43  ;;  %v15527_v27 = vld [vmem:[#allocation6 + $0x68] sm:$0xf] }
 0x7bf   :  { %v18164_v8 = vld [vmem:[#allocation6 + $0x34] sm:$0xf0]  ;;  %v15623_v21 = vld [vmem:[#allocation6 + $0x128] sm:$0xf] }
 0x7c0   :  { %9800 = vmatpush.bf16.msrb.mxu2 %v16340_v49  ;;  %9775 = vmatpush.bf16.msrb.mxu0 %v16068_v55  ;;  %v15889_v49 = vld [vmem:[#allocation6 + $0x350] sm:$0xf0] }
 0x7c1   :  { %v16257_v55 = vld [vmem:[#allocation6 + $0x630] sm:$0xf0]  ;;  %v15892_v16 = vor.u32 %v18261_v46, %v15889_v49  ;;  %v15559_v46 = vld [vmem:[#allocation6 + $0xa8] sm:$0xf]  ;;  %v15832_v49 = vor.u32 %v18248_v36, %v15831_v24  ;;  %v18196_v24 = vld [vmem:[#allocation6 + $0x134] sm:$0xf0] }
 0x7c2   :  { %9788 = vmatpush.bf16.msrb.mxu1 %v16196_v59  ;;  %v18285_v59 = vld [vmem:[#allocation6 + $0x404] sm:$0xf]  ;;  %v16260_v63 = vor.u32 %v18353_v48, %v16257_v55  ;;  %v15543_v48 = vld [vmem:[#allocation6 + $0x88] sm:$0xf]  ;;  %v15816_v55 = vor.u32 %v18244_v44, %v15815_v40  ;;  %v15624_v43 = vor.u32 %v18196_v24, %v15623_v21  ;;  %v16433_v21 = vld [vmem:[#allocation6 + $0x790] sm:$0xf0] }
 0x7c3   :  { %9765 = vmatpush.bf16.msra.mxu3 %v15892_v16  ;;  %v15988_v25 = vor.u32 %v18285_v59, %v15985_v2  ;;  %v18176_v16 = vld [vmem:[#allocation6 + $0x94] sm:$0xf0]  ;;  %v15607_v40 = vld [vmem:[#allocation6 + $0x108] sm:$0xf] }
 0x7c4   :  { %9801 = vmatpush.bf16.msrb.mxu2 %v16324_v57  ;;  %9776 = vmatpush.bf16.msrb.mxu0 %v16052_v18  ;;  %v18257_v57 = vld [vmem:[#allocation6 + $0x324] sm:$0xf]  ;;  %v16241_v18 = vld [vmem:[#allocation6 + $0x610] sm:$0xf0]  ;;  %v7985_v10 = vpop.f32.mrf.mxu3  ;;  %v18208_v59 = vld [vmem:[#allocation6 + $0x194] sm:$0xf0] }
 0x7c5   :  { %v15876_v42 = vor.u32 %v18257_v57, %v15873_v60  ;;  %v18240_v57 = vld [vmem:[#allocation6 + $0x294] sm:$0xf0]  ;;  %v7984_v60 = vadd.f32 %v19236_v45, %v7971_v47  ;;  %v15511_v45 = vld [vmem:[#allocation6 + $0x48] sm:$0xf] }
 0x7c6   :  { %9789 = vmatpush.bf16.msrb.mxu1 %v16180_v5  ;;  %v15719_v5 = vld [vmem:[#allocation6 + $0x1e8] sm:$0xf]  ;;  %v15800_v38 = vor.u32 %v18240_v57, %v15799_v9  ;;  %v18192_v47 = vld [vmem:[#allocation6 + $0x114] sm:$0xf0] }
 0x7c7   :  { %9766 = vmatpush.bf16.msra.mxu3 %v15876_v42 }
 0x7c8   :  { %9802 = vmatpush.bf16.msrb.mxu2 %v16308_v13  ;;  %9777 = vmatpush.bf16.msrb.mxu0 %v16036_v31  ;;  %v18220_v13 = vld [vmem:[#allocation6 + $0x1f4] sm:$0xf0]  ;;  %v16244_v31 = vor.u32 %v18349_v54, %v16241_v18  ;;  %v15655_v54 = vld [vmem:[#allocation6 + $0x168] sm:$0xf] }
 0x7c9   :  { %v15720_v11 = vor.u32 %v18220_v13, %v15719_v5  ;;  %v18204_v18 = vld [vmem:[#allocation6 + $0x174] sm:$0xf0]  ;;  %v15528_v13 = vor.u32 %v18172_v32, %v15527_v27  ;;  %v16465_v32 = vld [vmem:[#allocation6 + $0x7d0] sm:$0xf0] }
 0x7ca   :  { %9790 = vmatpush.bf16.msrb.mxu1 %v16164_v35  ;;  %v15575_v35 = vld [vmem:[#allocation6 + $0xc8] sm:$0xf]  ;;  %v18236_v5 = vld [vmem:[#allocation6 + $0x274] sm:$0xf0]  ;;  %v15656_v41 = vor.u32 %v18204_v18, %v15655_v54 }
 0x7cb   :  { %v15576_v30 = vor.u32 %v18184_v14, %v15575_v35  ;;  %v15784_v42 = vor.u32 %v18236_v5, %v15783_v51  ;;  %v16087_v5 = vld [vmem:[#allocation6 + $0x4c8] sm:$0xf] }
 0x7cc   :  { %9803 = vmatpush.bf16.msrb.mxu2 %v16292_v12  ;;  %9778 = vmatpush.bf16.msrb.mxu0 %v16020_v39  ;;  %v18253_v12 = vld [vmem:[#allocation6 + $0x304] sm:$0xf] }
 0x7cd   :  { %v15860_v39 = vor.u32 %v18253_v12, %v15857_v29  ;;  %v15640_v29 = vor.u32 %v18200_v0, %v15639_v23  ;;  %v18376_v23 = vld [vmem:[#allocation6 + $0x6d4] sm:$0xf0]  ;;  %v18401_v0 = vld [vmem:[#allocation6 + $0x7a4] sm:$0xf] }
 0x7ce   :  { %9791 = vmatpush.bf16.msrb.mxu1 %v16148_v20  ;;  %v18180_v20 = vld [vmem:[#allocation6 + $0xb4] sm:$0xf0] }
 0x7cf   :  { %9767 = vmatpush.bf16.msra.mxu3 %v15860_v39  ;;  %v15560_v37 = vor.u32 %v18180_v20, %v15559_v46  ;;  %v15751_v39 = vld [vmem:[#allocation6 + $0x228] sm:$0xf]  ;;  %v16481_v46 = vld [vmem:[#allocation6 + $0x7f0] sm:$0xf0]  ;;  %v18160_v20 = vld [vmem:[#allocation6 + $0x14] sm:$0xf0] }
 0x7d0   :  { %9804 = vmatpush.bf16.msrb.mxu2 %v16276_v7  ;;  %9779 = vmatpush.bf16.msrb.mxu0 %v16004_v58  ;;  %v15687_v7 = vld [vmem:[#allocation6 + $0x1a8] sm:$0xf] }
 0x7d1   :  { %v15688_v19 = vor.u32 %v18212_v53, %v15687_v7  ;;  %v15671_v58 = vld [vmem:[#allocation6 + $0x188] sm:$0xf] }
 0x7d2   :  { %9792 = vmatpush.bf16.msrb.mxu1 %v16132_v1  ;;  %v15672_v2 = vor.u32 %v18208_v59, %v15671_v58  ;;  %v18316_v58 = vld [vmem:[#allocation6 + $0x4f4] sm:$0xf0]  ;;  %v16231_v59 = vld [vmem:[#allocation6 + $0x5e8] sm:$0xf] }
 0x7d4   :  { %9805 = vmatpush.bf16.msrb.mxu2 %v16260_v63  ;;  %9780 = vmatpush.bf16.msrb.mxu0 %v15988_v25  ;;  %v7996_v1 = vpop.f32.mrf.mxu0  ;;  %v15544_v63 = vor.u32 %v18176_v16, %v15543_v48  ;;  %v18168_v25 = vld [vmem:[#allocation6 + $0x54] sm:$0xf0]  ;;  %v16103_v16 = vld [vmem:[#allocation6 + $0x4e8] sm:$0xf] }
 0x7d5   :  { %v7997_v4 = vadd.f32 %v7996_v1, %v7984_v60  ;;  %v15512_v12 = vor.u32 %v18168_v25, %v15511_v45  ;;  %v18348_v60 = vld [vmem:[#allocation6 + $0x5f4] sm:$0xf0]  ;;  %v16359_v1 = vld [vmem:[#allocation6 + $0x6e8] sm:$0xf]  ;;  %v16104_v18 = vor.u32 %v18316_v58, %v16103_v16 }
 0x7d6   :  { %9793 = vmatpush.bf16.msrb.mxu1 %v16116_v6  ;;  %v8009_v3 = vpop.f32.mrf.mxu1  ;;  %v15767_v6 = vld [vmem:[#allocation6 + $0x248] sm:$0xf]  ;;  %v18300_v58 = vld [vmem:[#allocation6 + $0x474] sm:$0xf0] }
 0x7d7   :  { %9781 = vmatmul.bf16.vlgmr.msrb.gmra.mxu0 %v19208_v56  ;;  %v8010_v10 = vadd.f32 %v8009_v3, %v7997_v4  ;;  %v15608_v3 = vor.u32 %v18192_v47, %v15607_v40  ;;  %v16232_v4 = vor.u32 %v18348_v60, %v16231_v59  ;;  %v16343_v25 = vld [vmem:[#allocation6 + $0x6c8] sm:$0xf]  ;;  %v18393_v40 = vld [vmem:[#allocation6 + $0x764] sm:$0xf] }
 0x7d8   :  { %9806 = vmatpush.bf16.msrb.mxu2 %v16244_v31  ;;  %9825 = vmatpush.bf16.msra.mxu0 %v15592_v28  ;;  %v18232_v31 = vld [vmem:[#allocation6 + $0x254] sm:$0xf0]  ;;  %v16039_v16 = vld [vmem:[#allocation6 + $0x468] sm:$0xf] }
 0x7d9   :  { %9794 = vmatmul.bf16.vlgmr.msrb.gmra.mxu1 %v19210_v50  ;;  %v15768_v15 = vor.u32 %v18232_v31, %v15767_v6  ;;  %v16071_v31 = vld [vmem:[#allocation6 + $0x4a8] sm:$0xf] }
 0x7da   :  { %9838 = vmatpush.bf16.msra.mxu1 %v15720_v11  ;;  %v16167_v59 = vld [vmem:[#allocation6 + $0x568] sm:$0xf] }
 0x7db   :  { %9807 = vmatmul.bf16.vlgmr.msrb.gmra.mxu2 %v19212_v52 }
 0x7dc   :  { %9851 = vmatpush.bf16.msra.mxu2 %v15848_v33  ;;  %9826 = vmatpush.bf16.msra.mxu0 %v15576_v30  ;;  %v7998_v35 = vpop.f32.mrf.mxu0  ;;  %v15495_v33 = vld [vmem:[#allocation6 + $0x28] sm:$0xf]  ;;  %v18228_v30 = vld [vmem:[#allocation6 + $0x234] sm:$0xf0] }
 0x7dd   :  { %v15496_v53 = vor.u32 %v18164_v8, %v15495_v33  ;;  %v15752_v44 = vor.u32 %v18228_v30, %v15751_v39  ;;  %v16199_v35 = vld [vmem:[#allocation6 + $0x5a8] sm:$0xf]  ;;  %v18397_v8 = vld [vmem:[#allocation6 + $0x784] sm:$0xf] }
 0x7de   :  { %9839 = vmatpush.bf16.msra.mxu1 %v15704_v34  ;;  %v8022_v26 = vpop.f32.mrf.mxu2  ;;  %v8011_v14 = vpop.f32.mrf.mxu1  ;;  %v18409_v34 = vld [vmem:[#allocation6 + $0x7e4] sm:$0xf]  ;;  %v16327_v33 = vld [vmem:[#allocation6 + $0x6a8] sm:$0xf] }
 0x7df   :  { %v8023_v28 = vadd.f32 %v8022_v26, %v8010_v10  ;;  %v16449_v10 = vld [vmem:[#allocation6 + $0x7b0] sm:$0xf0]  ;;  %v18372_v14 = vld [vmem:[#allocation6 + $0x6b4] sm:$0xf0] }
 0x7e0   :  { %9852 = vmatpush.bf16.msra.mxu2 %v15832_v49  ;;  %9827 = vmatpush.bf16.msra.mxu0 %v15560_v37  ;;  %v8035_v11 = vpop.f32.mrf.mxu3  ;;  %v15479_v49 = vld [vmem:[#allocation6 + $0x8] sm:$0xf]  ;;  %v16328_v30 = vor.u32 %v18372_v14, %v16327_v33 }
 0x7e1   :  { %v8036_v36 = vadd.f32 %v8035_v11, %v8023_v28  ;;  %v15735_v37 = vld [vmem:[#allocation6 + $0x208] sm:$0xf]  ;;  %v15480_v27 = vor.u32 %v18160_v20, %v15479_v49  ;;  %v16344_v28 = vor.u32 %v18376_v23, %v16343_v25  ;;  %v18308_v11 = vld [vmem:[#allocation6 + $0x4b4] sm:$0xf0]  ;;  %v16436_v20 = vor.u32 %v18397_v8, %v16433_v21  ;;  %v18385_v25 = vld [vmem:[#allocation6 + $0x724] sm:$0xf] }
 0x7e2   :  { %9840 = vmatpush.bf16.msra.mxu1 %v15688_v19  ;;  %v18224_v19 = vld [vmem:[#allocation6 + $0x214] sm:$0xf0]  ;;  %v16072_v24 = vor.u32 %v18308_v11, %v16071_v31  ;;  %v16183_v49 = vld [vmem:[#allocation6 + $0x588] sm:$0xf]  ;;  %v16385_v23 = vld [vmem:[#allocation6 + $0x730] sm:$0xf0] }
 0x7e3   :  { %vm8046_vm7 = vcmp.gt.f32.partialorder %v8036_v36, 0.0  ;;  %v8054_v7 = vmul.f32 0.1, %v8036_v36  ;;  %v15736_v54 = vor.u32 %v18224_v19, %v15735_v37  ;;  %v16135_v33 = vld [vmem:[#allocation6 + $0x528] sm:$0xf]  ;;  %v16388_v14 = vor.u32 %v18385_v25, %v16385_v23 }
 0x7e4   :  { %9853 = vmatpush.bf16.msra.mxu2 %v15816_v55  ;;  %9828 = vmatpush.bf16.msra.mxu0 %v15544_v63  ;;  %v16484_v55 = vor.u32 %v18409_v34, %v16481_v46  ;;  %v18380_v63 = vld [vmem:[#allocation6 + $0x6f4] sm:$0xf0]  ;;  %v16263_v21 = vld [vmem:[#allocation6 + $0x628] sm:$0xf]  ;;  %v15833_v25 = vld [vmem:[#allocation6 + $0x2d8] sm:$0xf0] }
 0x7e5   :  { %v8062_v48 = vsel %vm8046_vm7, %v8036_v36, %v8054_v7  ;;  %v16360_v51 = vor.u32 %v18380_v63, %v16359_v1  ;;  %v16055_v36 = vld [vmem:[#allocation6 + $0x488] sm:$0xf]  ;;  %v18304_v46 = vld [vmem:[#allocation6 + $0x494] sm:$0xf0] }
 0x7e6   :  { %9841 = vmatpush.bf16.msra.mxu1 %v15672_v2  ;;  %v19248_v9 = vpack.c.bf16 %v8062_v48, %v8062_v48  ;;  %v8024_v57 = vpop.f32.mrf.mxu2  ;;  %v18336_v7 = vld [vmem:[#allocation6 + $0x594] sm:$0xf0]  ;;  %v16056_v47 = vor.u32 %v18304_v46, %v16055_v36  ;;  %v16295_v63 = vld [vmem:[#allocation6 + $0x668] sm:$0xf] }
 0x7e7   :  { %v16184_v48 = vor.u32 %v18336_v7, %v16183_v49  ;;  %v18332_v1 = vld [vmem:[#allocation6 + $0x574] sm:$0xf0]  ;;  %v15975_v46 = vld [vmem:[#allocation6 + $0x3e8] sm:$0xf] }
 0x7e8   :  { %9854 = vmatpush.bf16.msra.mxu2 %v15800_v38  ;;  %9829 = vmatpush.bf16.msra.mxu0 %v15528_v13  ;;  %v8037_v2 = vpop.f32.mrf.mxu3  ;;  %v18405_v38 = vld [vmem:[#allocation6 + $0x7c4] sm:$0xf]  ;;  %v18312_v13 = vld [vmem:[#allocation6 + $0x4d4] sm:$0xf0]  ;;  %v15943_v23 = vld [vmem:[#allocation6 + $0x3a8] sm:$0xf] }
 0x7e9   :  { %9716 = vmatmul.bf16.vlgmr.msrb.gmra.mxu3 %v19248_v9  ;;  %v16468_v45 = vor.u32 %v18405_v38, %v16465_v32  ;;  %v16088_v6 = vor.u32 %v18312_v13, %v16087_v5  ;;  %v18364_v2 = vld [vmem:[#allocation6 + $0x674] sm:$0xf0]  ;;  %v16040_v32 = vor.u32 %v18300_v58, %v16039_v16  ;;  %v16151_v5 = vld [vmem:[#allocation6 + $0x548] sm:$0xf]  ;;  %v15593_v16 = vld [vmem:[#allocation6 + $0xf8] sm:$0xf0] }
 0x7ea   :  { %9842 = vmatpush.bf16.msra.mxu1 %v15656_v41  ;;  %9812 = vmatpush.bf16.msrb.mxu3 %v16484_v55  ;;  %v16215_v41 = vld [vmem:[#allocation6 + $0x5c8] sm:$0xf]  ;;  %v18324_v8 = vld [vmem:[#allocation6 + $0x534] sm:$0xf0]  ;;  %v18218_v58 = vld [vmem:[#allocation6 + $0x1ec] sm:$0xf] }
 0x7eb   :  { %v18284_v49 = vld [vmem:[#allocation6 + $0x3f4] sm:$0xf0]  ;;  %v16136_v7 = vor.u32 %v18324_v8, %v16135_v33  ;;  %v15817_v33 = vld [vmem:[#allocation6 + $0x2b8] sm:$0xf0] }
 0x7ec   :  { %9855 = vmatpush.bf16.msra.mxu2 %v15784_v42  ;;  %9830 = vmatpush.bf16.msra.mxu0 %v15512_v12  ;;  %v18344_v42 = vld [vmem:[#allocation6 + $0x5d4] sm:$0xf0] }
 0x7ed   :  { %v16216_v26 = vor.u32 %v18344_v42, %v16215_v41  ;;  %v18340_v12 = vld [vmem:[#allocation6 + $0x5b4] sm:$0xf0] }
 0x7ee   :  { %9843 = vmatpush.bf16.msra.mxu1 %v15640_v29  ;;  %9813 = vmatpush.bf16.msrb.mxu3 %v16468_v45  ;;  %v16452_v29 = vor.u32 %v18401_v0, %v16449_v10  ;;  %v16200_v39 = vor.u32 %v18340_v12, %v16199_v35  ;;  %v18328_v41 = vld [vmem:[#allocation6 + $0x554] sm:$0xf0]  ;;  %v16279_v45 = vld [vmem:[#allocation6 + $0x648] sm:$0xf] }
 0x7ef   :  { %v18360_v42 = vld [vmem:[#allocation6 + $0x654] sm:$0xf0]  ;;  %v16152_v11 = vor.u32 %v18328_v41, %v16151_v5  ;;  %v16007_v12 = vld [vmem:[#allocation6 + $0x428] sm:$0xf]  ;;  %v15577_v5 = vld [vmem:[#allocation6 + $0xd8] sm:$0xf0] }
 0x7f0   :  { %9856 = vmatpush.bf16.msra.mxu2 %v15768_v15  ;;  %9831 = vmatpush.bf16.msra.mxu0 %v15496_v53  ;;  %v19252_v15 = vld [vmem:[#allocation7] sm:$0xf]  ;;  %v16311_v53 = vld [vmem:[#allocation6 + $0x688] sm:$0xf]  ;;  %v16280_v35 = vor.u32 %v18360_v42, %v16279_v45  ;;  %v15705_v41 = vld [vmem:[#allocation6 + $0x1d8] sm:$0xf0] }
 0x7f1   :  { %v8329_v34 = vperm.slane %v19252_v15, 0  ;;  %v18246_v42 = vld [vmem:[#allocation6 + $0x2cc] sm:$0xf]  ;;  %v18272_v8 = vld [vmem:[#allocation6 + $0x394] sm:$0xf0] }
 0x7f2   :  { %9844 = vmatpush.bf16.msra.mxu1 %v15624_v43  ;;  %9814 = vmatpush.bf16.msrb.mxu3 %v16452_v29  ;;  %v18368_v43 = vld [vmem:[#allocation6 + $0x694] sm:$0xf0] }
 0x7f3   :  { %v16312_v55 = vor.u32 %v18368_v43, %v16311_v53  ;;  %v18292_v29 = vld [vmem:[#allocation6 + $0x434] sm:$0xf0] }
 0x7f4   :  { %9857 = vmatpush.bf16.msra.mxu2 %v15752_v44  ;;  %9832 = vmatpush.bf16.msra.mxu0 %v15480_v27  ;;  %v16417_v44 = vld [vmem:[#allocation6 + $0x770] sm:$0xf0]  ;;  %v9626_v37 = vpop.f32.mrf.mxu0  ;;  %v18389_v27 = vld [vmem:[#allocation6 + $0x744] sm:$0xf]  ;;  %v18288_v43 = vld [vmem:[#allocation6 + $0x414] sm:$0xf0] }
 0x7f5   :  { %v9627_v57 = vadd.f32 %v9626_v37, %v8329_v34  ;;  %v16420_v60 = vor.u32 %v18393_v40, %v16417_v44  ;;  %v16008_v34 = vor.u32 %v18292_v29, %v16007_v12  ;;  %v16119_v40 = vld [vmem:[#allocation6 + $0x508] sm:$0xf]  ;;  %v18320_v44 = vld [vmem:[#allocation6 + $0x514] sm:$0xf0]  ;;  %v18242_v29 = vld [vmem:[#allocation6 + $0x2ac] sm:$0xf] }
 0x7f6   :  { %9845 = vmatpush.bf16.msra.mxu1 %v15608_v3  ;;  %v9639_v19 = vpop.f32.mrf.mxu1  ;;  %9815 = vmatpush.bf16.msrb.mxu3 %v16436_v20  ;;  %v16401_v3 = vld [vmem:[#allocation6 + $0x750] sm:$0xf0]  ;;  %v15991_v20 = vld [vmem:[#allocation6 + $0x408] sm:$0xf] }
 0x7f7   :  { %9833 = vmatmul.bf16.vlgmr.msra.gmra.mxu0 %v19176_v62  ;;  %v9640_v38 = vadd.f32 %v9639_v19, %v9627_v57  ;;  %v16404_v13 = vor.u32 %v18389_v27, %v16401_v3  ;;  %v16247_v37 = vld [vmem:[#allocation6 + $0x608] sm:$0xf]  ;;  %v18352_v19 = vld [vmem:[#allocation6 + $0x614] sm:$0xf0]  ;;  %v16120_v27 = vor.u32 %v18320_v44, %v16119_v40 }
 0x7f8   :  { %9858 = vmatpush.bf16.msra.mxu2 %v15736_v54  ;;  %9877 = vmatpush.bf16.msrb.mxu0 %v16104_v18  ;;  %v16168_v54 = vor.u32 %v18332_v1, %v16167_v59  ;;  %v16296_v18 = vor.u32 %v18364_v2, %v16295_v63  ;;  %v15721_v59 = vld [vmem:[#allocation6 + $0x1f8] sm:$0xf0]  ;;  %v15992_v1 = vor.u32 %v18288_v43, %v15991_v20  ;;  %v18250_v63 = vld [vmem:[#allocation6 + $0x2ec] sm:$0xf]  ;;  %v15911_v43 = vld [vmem:[#allocation6 + $0x368] sm:$0xf] }
 0x7f9   :  { %9846 = vmatmul.bf16.vlgmr.msra.gmra.mxu1 %v19180_v17  ;;  %9768 = vmatmul.bf16.vlgmr.msra.gmra.mxu3 %v19184_v61  ;;  %v15849_v2 = vld [vmem:[#allocation6 + $0x2f8] sm:$0xf0]  ;;  %v16248_v3 = vor.u32 %v18352_v19, %v16247_v37  ;;  %v18268_v40 = vld [vmem:[#allocation6 + $0x374] sm:$0xf0]  ;;  %v18170_v19 = vld [vmem:[#allocation6 + $0x6c] sm:$0xf] }
 0x7fa   :  { %9890 = vmatpush.bf16.msrb.mxu1 %v16232_v4  ;;  %v16023_v4 = vld [vmem:[#allocation6 + $0x448] sm:$0xf]  ;;  %9816 = vmatpush.bf16.msrb.mxu3 %v16420_v60 }
 0x7fb   :  { %9859 = vmatmul.bf16.vlgmr.msra.gmra.mxu2 %v19182_v22 }
 0x7fc   :  { %9903 = vmatpush.bf16.msrb.mxu2 %v16360_v51  ;;  %9878 = vmatpush.bf16.msrb.mxu0 %v16088_v6  ;;  %v18296_v51 = vld [vmem:[#allocation6 + $0x454] sm:$0xf0] }
 0x7fd   :  { %v16024_v6 = vor.u32 %v18296_v51, %v16023_v4  ;;  %v18182_v4 = vld [vmem:[#allocation6 + $0xcc] sm:$0xf]  ;;  %v15852_v51 = vor.u32 %v18250_v63, %v15849_v2  ;;  %v15785_v63 = vld [vmem:[#allocation6 + $0x278] sm:$0xf0] }
 0x7fe   :  { %9891 = vmatpush.bf16.msrb.mxu1 %v16216_v26  ;;  %v9652_v0 = vpop.f32.mrf.mxu2  ;;  %v9628_v26 = vpop.f32.mrf.mxu0  ;;  %9817 = vmatpush.bf16.msrb.mxu3 %v16404_v13  ;;  %v18214_v13 = vld [vmem:[#allocation6 + $0x1cc] sm:$0xf] }
 0x7ff   :  { %v9653_v31 = vadd.f32 %v9652_v0, %v9640_v38  ;;  %v15959_v38 = vld [vmem:[#allocation6 + $0x3c8] sm:$0xf]  ;;  %v18276_v0 = vld [vmem:[#allocation6 + $0x3b4] sm:$0xf0]  ;;  %v15836_v26 = vor.u32 %v18246_v42, %v15833_v25 }
 0x800   :  { %9904 = vmatpush.bf16.msrb.mxu2 %v16344_v28  ;;  %9879 = vmatpush.bf16.msrb.mxu0 %v16072_v24  ;;  %v9665_v10 = vpop.f32.mrf.mxu3  ;;  %v9641_v28 = vpop.f32.mrf.mxu1  ;;  %v18356_v24 = vld [vmem:[#allocation6 + $0x634] sm:$0xf0]  ;;  %v15944_v12 = vor.u32 %v18276_v0, %v15943_v23  ;;  %v15879_v42 = vld [vmem:[#allocation6 + $0x328] sm:$0xf] }
 0x801   :  { %v19258_v36 = vadd.f32 %v9665_v10, %v9653_v31  ;;  %v16264_v53 = vor.u32 %v18356_v24, %v16263_v21  ;;  %v15580_v10 = vor.u32 %v18182_v4, %v15577_v5  ;;  %v18178_v31 = vld [vmem:[#allocation6 + $0xac] sm:$0xf]  ;;  %v15561_v28 = vld [vmem:[#allocation6 + $0xb8] sm:$0xf0]  ;;  %v18260_v25 = vld [vmem:[#allocation6 + $0x334] sm:$0xf0] }
 0x802   :  { %9892 = vmatpush.bf16.msrb.mxu1 %v16200_v39  ;;  %v18381_v39 = vld [vmem:[#allocation6 + $0x704] sm:$0xf]  ;;  %9818 = vmatpush.bf16.msrb.mxu3 %v16388_v14  ;;  %v15927_v14 = vld [vmem:[#allocation6 + $0x388] sm:$0xf]  ;;  %v15564_v21 = vor.u32 %v18178_v31, %v15561_v28  ;;  %v18198_v4 = vld [vmem:[#allocation6 + $0x14c] sm:$0xf] }
 0x803   :  { %v15928_v20 = vor.u32 %v18272_v8, %v15927_v14  ;;  %v18162_v31 = vld [vmem:[#allocation6 + $0x2c] sm:$0xf]  ;;  %v15753_v14 = vld [vmem:[#allocation6 + $0x238] sm:$0xf0]  ;;  %v15863_v8 = vld [vmem:[#allocation6 + $0x308] sm:$0xf] }
 0x804   :  { %9905 = vmatpush.bf16.msrb.mxu2 %v16328_v30  ;;  %9880 = vmatpush.bf16.msrb.mxu0 %v16056_v47  ;;  %v16369_v30 = vld [vmem:[#allocation6 + $0x710] sm:$0xf0] }
 0x805   :  { %v16372_v47 = vor.u32 %v18381_v39, %v16369_v30  ;;  %v18174_v39 = vld [vmem:[#allocation6 + $0x8c] sm:$0xf]  ;;  %v15820_v30 = vor.u32 %v18242_v29, %v15817_v33  ;;  %v15880_v29 = vor.u32 %v18260_v25, %v15879_v42 }
 0x806   :  { %9893 = vmatpush.bf16.msrb.mxu1 %v16184_v48  ;;  %v18186_v48 = vld [vmem:[#allocation6 + $0xec] sm:$0xf]  ;;  %v9654_v57 = vpop.f32.mrf.mxu2 }
 0x807   :  { %9819 = vmatpush.bf16.msrb.mxu3 %v16372_v47  ;;  %v15657_v57 = vld [vmem:[#allocation6 + $0x178] sm:$0xf0]  ;;  %v18226_v33 = vld [vmem:[#allocation6 + $0x22c] sm:$0xf] }
 0x808   :  { %9906 = vmatpush.bf16.msrb.mxu2 %v16312_v55  ;;  %9881 = vmatpush.bf16.msrb.mxu0 %v16040_v32  ;;  %v15976_v55 = vor.u32 %v18284_v49, %v15975_v46  ;;  %v9667_v60 = vpop.f32.mrf.mxu3  ;;  %v18280_v32 = vld [vmem:[#allocation6 + $0x3d4] sm:$0xf0]  ;;  %v18206_v46 = vld [vmem:[#allocation6 + $0x18c] sm:$0xf]  ;;  %v15673_v49 = vld [vmem:[#allocation6 + $0x198] sm:$0xf0] }
 0x809   :  { %v15960_v45 = vor.u32 %v18280_v32, %v15959_v38  ;;  %v15676_v37 = vor.u32 %v18206_v46, %v15673_v49  ;;  %v15912_v60 = vor.u32 %v18268_v40, %v15911_v43  ;;  %v18158_v46 = vld [vmem:[#allocation6 + $0xc] sm:$0xf]  ;;  %v15481_v49 = vld [vmem:[#allocation6 + $0x18] sm:$0xf0] }
 0x80a   :  { %9894 = vmatpush.bf16.msrb.mxu1 %v16168_v54  ;;  %v15596_v54 = vor.u32 %v18186_v48, %v15593_v16  ;;  %9820 = vmatmul.bf16.vlgmr.msrb.gmra.mxu3 %v19248_v9  ;;  %v18222_v43 = vld [vmem:[#allocation6 + $0x20c] sm:$0xf] }
 0x80b   :  { %9864 = vmatpush.bf16.msra.mxu3 %v15976_v55  ;;  %v18306_v25 = vld [vmem:[#allocation6 + $0x4ac] sm:$0xf] }
 0x80c   :  { %9907 = vmatpush.bf16.msrb.mxu2 %v16296_v18  ;;  %9882 = vmatpush.bf16.msrb.mxu0 %v16024_v6  ;;  %v15724_v18 = vor.u32 %v18218_v58, %v15721_v59  ;;  %v15708_v6 = vor.u32 %v18214_v13, %v15705_v41  ;;  %v15529_v58 = vld [vmem:[#allocation6 + $0x78] sm:$0xf0]  ;;  %v18202_v59 = vld [vmem:[#allocation6 + $0x16c] sm:$0xf] }
 0x80d   :  { %v15532_v38 = vor.u32 %v18170_v19, %v15529_v58  ;;  %v15660_v32 = vor.u32 %v18202_v59, %v15657_v57  ;;  %v18230_v13 = vld [vmem:[#allocation6 + $0x24c] sm:$0xf]  ;;  %v15769_v41 = vld [vmem:[#allocation6 + $0x258] sm:$0xf0]  ;;  %v15484_v59 = vor.u32 %v18158_v46, %v15481_v49  ;;  %v16423_v46 = vld [vmem:[#allocation6 + $0x768] sm:$0xf] }
 0x80e   :  { %9895 = vmatpush.bf16.msrb.mxu1 %v16152_v11  ;;  %v18210_v11 = vld [vmem:[#allocation6 + $0x1ac] sm:$0xf]  ;;  %v15772_v28 = vor.u32 %v18230_v13, %v15769_v41  ;;  %v16455_v13 = vld [vmem:[#allocation6 + $0x7a8] sm:$0xf]  ;;  %v18404_v41 = vld [vmem:[#allocation6 + $0x7b4] sm:$0xf0] }
 0x80f   :  { %9865 = vmatpush.bf16.msra.mxu3 %v15960_v45  ;;  %v18378_v58 = vld [vmem:[#allocation6 + $0x6ec] sm:$0xf]  ;;  %v18396_v49 = vld [vmem:[#allocation6 + $0x774] sm:$0xf0] }
 0x810   :  { %9908 = vmatpush.bf16.msrb.mxu2 %v16280_v35  ;;  %9883 = vmatpush.bf16.msrb.mxu0 %v16008_v34  ;;  %v15689_v35 = vld [vmem:[#allocation6 + $0x1b8] sm:$0xf0] }
 0x811   :  { %v15692_v24 = vor.u32 %v18210_v11, %v15689_v35  ;;  %v15545_v34 = vld [vmem:[#allocation6 + $0x98] sm:$0xf0]  ;;  %v18194_v35 = vld [vmem:[#allocation6 + $0x12c] sm:$0xf] }
 0x812   :  { %9896 = vmatpush.bf16.msrb.mxu1 %v16136_v7  ;;  %v18238_v7 = vld [vmem:[#allocation6 + $0x28c] sm:$0xf]  ;;  %v15548_v47 = vor.u32 %v18174_v39, %v15545_v34  ;;  %v15497_v11 = vld [vmem:[#allocation6 + $0x38] sm:$0xf0]  ;;  %v18412_v34 = vld [vmem:[#allocation6 + $0x7f4] sm:$0xf0] }
 0x813   :  { %9866 = vmatpush.bf16.msra.mxu3 %v15944_v12  ;;  %v15625_v12 = vld [vmem:[#allocation6 + $0x138] sm:$0xf0]  ;;  %v15500_v39 = vor.u32 %v18162_v31, %v15497_v11  ;;  %v18338_v31 = vld [vmem:[#allocation6 + $0x5ac] sm:$0xf] }
 0x814   :  { %9909 = vmatpush.bf16.msrb.mxu2 %v16264_v53  ;;  %9884 = vmatpush.bf16.msrb.mxu0 %v15992_v1  ;;  %v15801_v53 = vld [vmem:[#allocation6 + $0x298] sm:$0xf0]  ;;  %v9678_v44 = vpop.f32.mrf.mxu0  ;;  %v18234_v1 = vld [vmem:[#allocation6 + $0x26c] sm:$0xf] }
 0x815   :  { %v9679_v48 = vadd.f32 %v9678_v44, %v19258_v36  ;;  %v15804_v16 = vor.u32 %v18238_v7, %v15801_v53  ;;  %v15513_v36 = vld [vmem:[#allocation6 + $0x58] sm:$0xf0]  ;;  %v18190_v7 = vld [vmem:[#allocation6 + $0x10c] sm:$0xf] }
 0x816   :  { %9897 = vmatpush.bf16.msrb.mxu1 %v16120_v27  ;;  %v9691_v55 = vpop.f32.mrf.mxu1  ;;  %v15895_v27 = vld [vmem:[#allocation6 + $0x348] sm:$0xf]  ;;  %v15609_v53 = vld [vmem:[#allocation6 + $0x118] sm:$0xf0] }
 0x817   :  { %9885 = vmatmul.bf16.vlgmr.msrb.gmra.mxu0 %v19208_v56  ;;  %9867 = vmatpush.bf16.msra.mxu3 %v15928_v20  ;;  %v9692_v2 = vadd.f32 %v9691_v55, %v9679_v48  ;;  %v15756_v20 = vor.u32 %v18226_v33, %v15753_v14  ;;  %v15737_v44 = vld [vmem:[#allocation6 + $0x218] sm:$0xf0]  ;;  %v18346_v55 = vld [vmem:[#allocation6 + $0x5ec] sm:$0xf]  ;;  %v15612_v57 = vor.u32 %v18190_v7, %v15609_v53  ;;  %v8330_v14 = vperm.slane %v19252_v15, 1 }
 0x818   :  { %9910 = vmatpush.bf16.msrb.mxu2 %v16248_v3  ;;  %9929 = vmatpush.bf16.msra.mxu0 %v15596_v54  ;;  %v18264_v3 = vld [vmem:[#allocation6 + $0x354] sm:$0xf0]  ;;  %v18166_v54 = vld [vmem:[#allocation6 + $0x4c] sm:$0xf]  ;;  %v16329_v11 = vld [vmem:[#allocation6 + $0x6b8] sm:$0xf0] }
 0x819   :  { %9898 = vmatmul.bf16.vlgmr.msrb.gmra.mxu1 %v19210_v50  ;;  %v15896_v5 = vor.u32 %v18264_v3, %v15895_v27  ;;  %v16041_v15 = vld [vmem:[#allocation6 + $0x478] sm:$0xf0] }
 0x81a   :  { %9942 = vmatpush.bf16.msra.mxu1 %v15724_v18  ;;  %v15788_v18 = vor.u32 %v18234_v1, %v15785_v63  ;;  %v16471_v1 = vld [vmem:[#allocation6 + $0x7c8] sm:$0xf]  ;;  %v18408_v63 = vld [vmem:[#allocation6 + $0x7d4] sm:$0xf0] }
 0x81b   :  { %9911 = vmatmul.bf16.vlgmr.msrb.gmra.mxu2 %v19212_v52  ;;  %9868 = vmatpush.bf16.msra.mxu3 %v15912_v60  ;;  %v16361_v60 = vld [vmem:[#allocation6 + $0x6f8] sm:$0xf0] }
 0x81c   :  { %9955 = vmatpush.bf16.msra.mxu2 %v15852_v51  ;;  %9930 = vmatpush.bf16.msra.mxu0 %v15580_v10  ;;  %v15641_v51 = vld [vmem:[#allocation6 + $0x158] sm:$0xf0]  ;;  %v9680_v0 = vpop.f32.mrf.mxu0  ;;  %v15516_v10 = vor.u32 %v18166_v54, %v15513_v36  ;;  %v16364_v54 = vor.u32 %v18378_v58, %v16361_v60  ;;  %v18342_v36 = vld [vmem:[#allocation6 + $0x5cc] sm:$0xf]  ;;  %v18392_v58 = vld [vmem:[#allocation6 + $0x754] sm:$0xf0] }
 0x81d   :  { %v16073_v0 = vld [vmem:[#allocation6 + $0x4b8] sm:$0xf0] }
 0x81e   :  { %9943 = vmatpush.bf16.msra.mxu1 %v15708_v6  ;;  %v9704_v45 = vpop.f32.mrf.mxu2  ;;  %v15644_v6 = vor.u32 %v18198_v4, %v15641_v51  ;;  %v16217_v4 = vld [vmem:[#allocation6 + $0x5d8] sm:$0xf0]  ;;  %v18374_v51 = vld [vmem:[#allocation6 + $0x6cc] sm:$0xf] }
 0x81f   :  { %v19265_v23 = vadd.f32 %v9704_v45, %v9692_v2  ;;  %9869 = vmatpush.bf16.msra.mxu3 %v15896_v5  ;;  %v15740_v2 = vor.u32 %v18222_v43, %v15737_v44  ;;  %v16345_v5 = vld [vmem:[#allocation6 + $0x6d8] sm:$0xf0]  ;;  %v16220_v42 = vor.u32 %v18342_v36, %v16217_v4  ;;  %v18298_v43 = vld [vmem:[#allocation6 + $0x46c] sm:$0xf]  ;;  %v18388_v36 = vld [vmem:[#allocation6 + $0x734] sm:$0xf0] }
 0x820   :  { %9956 = vmatpush.bf16.msra.mxu2 %v15836_v26  ;;  %9931 = vmatpush.bf16.msra.mxu0 %v15564_v21  ;;  %v9693_v26 = vpop.f32.mrf.mxu1  ;;  %v18256_v21 = vld [vmem:[#allocation6 + $0x314] sm:$0xf0] }
 0x821   :  { %v15864_v40 = vor.u32 %v18256_v21, %v15863_v8  ;;  %v16201_v26 = vld [vmem:[#allocation6 + $0x5b8] sm:$0xf0]  ;;  %v18302_v8 = vld [vmem:[#allocation6 + $0x48c] sm:$0xf] }
 0x822   :  { %9944 = vmatpush.bf16.msra.mxu1 %v15692_v24  ;;  %v16487_v24 = vld [vmem:[#allocation6 + $0x7e8] sm:$0xf]  ;;  %v16204_v33 = vor.u32 %v18338_v31, %v16201_v26  ;;  %v16057_v21 = vld [vmem:[#allocation6 + $0x498] sm:$0xf0]  ;;  %v18354_v26 = vld [vmem:[#allocation6 + $0x62c] sm:$0xf] }
 0x823   :  { %9870 = vmatpush.bf16.msra.mxu3 %v15880_v29  ;;  %v16488_v48 = vor.u32 %v18412_v34, %v16487_v24  ;;  %v16076_v29 = vor.u32 %v18306_v25, %v16073_v0  ;;  %v16313_v34 = vld [vmem:[#allocation6 + $0x698] sm:$0xf0]  ;;  %v16060_v7 = vor.u32 %v18302_v8, %v16057_v21  ;;  %v18286_v8 = vld [vmem:[#allocation6 + $0x40c] sm:$0xf] }
 0x824   :  { %9957 = vmatpush.bf16.msra.mxu2 %v15820_v30  ;;  %9932 = vmatpush.bf16.msra.mxu0 %v15548_v47  ;;  %v15628_v30 = vor.u32 %v18194_v35, %v15625_v12  ;;  %v18314_v47 = vld [vmem:[#allocation6 + $0x4ec] sm:$0xf]  ;;  %v16439_v35 = vld [vmem:[#allocation6 + $0x788] sm:$0xf]  ;;  %v18400_v12 = vld [vmem:[#allocation6 + $0x794] sm:$0xf0] }
 0x825   :  { %v16009_v25 = vld [vmem:[#allocation6 + $0x438] sm:$0xf0] }
 0x826   :  { %9945 = vmatpush.bf16.msra.mxu1 %v15676_v37  ;;  %v16105_v37 = vld [vmem:[#allocation6 + $0x4f8] sm:$0xf0]  ;;  %v9706_v19 = vpop.f32.mrf.mxu2 }
 0x827   :  { %9871 = vmatpush.bf16.msra.mxu3 %v15864_v40  ;;  %v16108_v27 = vor.u32 %v18314_v47, %v16105_v37  ;;  %v16424_v47 = vor.u32 %v18396_v49, %v16423_v46  ;;  %v18330_v37 = vld [vmem:[#allocation6 + $0x56c] sm:$0xf]  ;;  %v16169_v19 = vld [vmem:[#allocation6 + $0x578] sm:$0xf0]  ;;  %v16607_v49 = vld [vmem:[#allocation9 + $0xe0] sm:$0xf] }
 0x828   :  { %9958 = vmatpush.bf16.msra.mxu2 %v15804_v16  ;;  %9933 = vmatpush.bf16.msra.mxu0 %v15532_v38  ;;  %v16233_v16 = vld [vmem:[#allocation6 + $0x5f8] sm:$0xf0]  ;;  %v18310_v38 = vld [vmem:[#allocation6 + $0x4cc] sm:$0xf]  ;;  %v16172_v60 = vor.u32 %v18330_v37, %v16169_v19 }
 0x829   :  { %v16236_v3 = vor.u32 %v18346_v55, %v16233_v16  ;;  %v16297_v55 = vld [vmem:[#allocation6 + $0x678] sm:$0xf0]  ;;  %v16407_v16 = vld [vmem:[#allocation6 + $0x748] sm:$0xf] }
 0x82a   :  { %9946 = vmatpush.bf16.msra.mxu1 %v15660_v32  ;;  %v16089_v32 = vld [vmem:[#allocation6 + $0x4d8] sm:$0xf0]  ;;  %9872 = vmatmul.bf16.vlgmr.msra.gmra.mxu3 %v19184_v61 }
 0x82b   :  { %9916 = vmatpush.bf16.msrb.mxu3 %v16488_v48  ;;  %v16092_v45 = vor.u32 %v18310_v38, %v16089_v32  ;;  %v18362_v48 = vld [vmem:[#allocation6 + $0x66c] sm:$0xf]  ;;  %v16153_v38 = vld [vmem:[#allocation6 + $0x558] sm:$0xf0] }
 0x82c   :  { %9959 = vmatpush.bf16.msra.mxu2 %v15788_v18  ;;  %9934 = vmatpush.bf16.msra.mxu0 %v15516_v10  ;;  %v16472_v18 = vor.u32 %v18408_v63, %v16471_v1  ;;  %v16348_v10 = vor.u32 %v18374_v51, %v16345_v5  ;;  %v18294_v1 = vld [vmem:[#allocation6 + $0x44c] sm:$0xf]  ;;  %v16025_v63 = vld [vmem:[#allocation6 + $0x458] sm:$0xf0] }
 0x82d   :  { %v18358_v32 = vld [vmem:[#allocation6 + $0x64c] sm:$0xf]  ;;  %v16137_v31 = vld [vmem:[#allocation6 + $0x538] sm:$0xf0] }
 0x82e   :  { %9947 = vmatpush.bf16.msra.mxu1 %v15644_v6  ;;  %v16456_v6 = vor.u32 %v18404_v41, %v16455_v13  ;;  %v16028_v41 = vor.u32 %v18294_v1, %v16025_v63  ;;  %v16249_v46 = vld [vmem:[#allocation6 + $0x618] sm:$0xf0] }
 0x82f   :  { %9917 = vmatpush.bf16.msrb.mxu3 %v16472_v18  ;;  %v16391_v18 = vld [vmem:[#allocation6 + $0x728] sm:$0xf] }
 0x830   :  { %9960 = vmatpush.bf16.msra.mxu2 %v15772_v28  ;;  %9935 = vmatpush.bf16.msra.mxu0 %v15500_v39  ;;  %v18370_v28 = vld [vmem:[#allocation6 + $0x6ac] sm:$0xf]  ;;  %v16440_v39 = vor.u32 %v18400_v12, %v16439_v35  ;;  %v18384_v35 = vld [vmem:[#allocation6 + $0x714] sm:$0xf0] }
 0x831   :  { %v16332_v24 = vor.u32 %v18370_v28, %v16329_v11  ;;  %v16265_v28 = vld [vmem:[#allocation6 + $0x638] sm:$0xf0]  ;;  %v16375_v11 = vld [vmem:[#allocation6 + $0x708] sm:$0xf]  ;;  %v18282_v12 = vld [vmem:[#allocation6 + $0x3ec] sm:$0xf] }
 0x832   :  { %9948 = vmatpush.bf16.msra.mxu1 %v15628_v30  ;;  %v16185_v30 = vld [vmem:[#allocation6 + $0x598] sm:$0xf0]  ;;  %v16268_v21 = vor.u32 %v18354_v26, %v16265_v28  ;;  %v18262_v26 = vld [vmem:[#allocation6 + $0x34c] sm:$0xf] }
 0x833   :  { %9918 = vmatpush.bf16.msrb.mxu3 %v16456_v6  ;;  %v18322_v6 = vld [vmem:[#allocation6 + $0x52c] sm:$0xf]  ;;  %v15897_v28 = vld [vmem:[#allocation6 + $0x358] sm:$0xf0] }
 0x834   :  { %9961 = vmatpush.bf16.msra.mxu2 %v15756_v20  ;;  %9936 = vmatpush.bf16.msra.mxu0 %v15484_v59 }
 0x836   :  { %9949 = vmatpush.bf16.msra.mxu1 %v15612_v57  ;;  %v9743_v20 = vpop.f32.mrf.mxu1  ;;  %v16044_v57 = vor.u32 %v18298_v43, %v16041_v15 }
 0x837   :  { %9937 = vmatmul.bf16.vlgmr.msra.gmra.mxu0 %v19176_v62  ;;  %v18334_v62 = vld [vmem:[#allocation6 + $0x58c] sm:$0xf]  ;;  %9919 = vmatpush.bf16.msrb.mxu3 %v16440_v39  ;;  %v15993_v39 = vld [vmem:[#allocation6 + $0x418] sm:$0xf0] }
 0x838   :  { %9962 = vmatpush.bf16.msra.mxu2 %v15740_v2  ;;  %9981 = vmatpush.bf16.msrb.mxu0 %v16108_v27  ;;  %v16188_v53 = vor.u32 %v18334_v62, %v16185_v30  ;;  %v16300_v2 = vor.u32 %v18362_v48, %v16297_v55  ;;  %v16408_v27 = vor.u32 %v18392_v58, %v16407_v16  ;;  %v18318_v62 = vld [vmem:[#allocation6 + $0x50c] sm:$0xf]  ;;  %v16121_v30 = vld [vmem:[#allocation6 + $0x518] sm:$0xf0]  ;;  %v16591_v48 = vld [vmem:[#allocation9 + $0xc0] sm:$0xf] }
 0x839   :  { %9950 = vmatmul.bf16.vlgmr.msra.gmra.mxu1 %v19180_v17  ;;  %v18366_v17 = vld [vmem:[#allocation6 + $0x68c] sm:$0xf]  ;;  %v15996_v43 = vor.u32 %v18286_v8, %v15993_v39  ;;  %v16124_v15 = vor.u32 %v18318_v62, %v16121_v30  ;;  %v18439_v55 = vld [vmem:[#allocation9 + $0xcc] sm:$0xf0]  ;;  %v15945_v58 = vld [vmem:[#allocation6 + $0x3b8] sm:$0xf0] }
 0x83a   :  { %9994 = vmatpush.bf16.msrb.mxu1 %v16236_v3  ;;  %v16316_v44 = vor.u32 %v18366_v17, %v16313_v34  ;;  %v18326_v3 = vld [vmem:[#allocation6 + $0x54c] sm:$0xf]  ;;  %v16592_v1 = vor.u32 %v18439_v55, %v16591_v48  ;;  %v18423_v8 = vld [vmem:[#allocation9 + $0x4c] sm:$0xf0] }
 0x83b   :  { %9963 = vmatmul.bf16.vlgmr.msra.gmra.mxu2 %v19182_v22  ;;  %v9730_v22 = vpop.f32.mrf.mxu0  ;;  %9920 = vmatpush.bf16.msrb.mxu3 %v16424_v47  ;;  %v18350_v34 = vld [vmem:[#allocation6 + $0x60c] sm:$0xf]  ;;  %v18475_v47 = vld [vmem:[#allocation9 + $0x1ec] sm:$0xf0] }
 0x83c   :  { %10007 = vmatpush.bf16.msrb.mxu2 %v16364_v54  ;;  %9982 = vmatpush.bf16.msrb.mxu0 %v16092_v45  ;;  %v9731_v40 = vadd.f32 %v9730_v22, %v8330_v14  ;;  %v16281_v54 = vld [vmem:[#allocation6 + $0x658] sm:$0xf0]  ;;  %v16156_v45 = vor.u32 %v18326_v3, %v16153_v38  ;;  %v16140_v14 = vor.u32 %v18322_v6, %v16137_v31  ;;  %v18274_v16 = vld [vmem:[#allocation6 + $0x3ac] sm:$0xf]  ;;  %v16543_v6 = vld [vmem:[#allocation9 + $0x60] sm:$0xf] }
 0x83d   :  { %v16284_v0 = vor.u32 %v18358_v32, %v16281_v54  ;;  %v15948_v63 = vor.u32 %v18274_v16, %v15945_v58  ;;  %v18270_v3 = vld [vmem:[#allocation6 + $0x38c] sm:$0xf]  ;;  %v15929_v38 = vld [vmem:[#allocation6 + $0x398] sm:$0xf0]  ;;  %v16703_v54 = vld [vmem:[#allocation9 + $0x1a0] sm:$0xf] }
 0x83e   :  { %9995 = vmatpush.bf16.msrb.mxu1 %v16220_v42  ;;  %v9744_v59 = vadd.f32 %v9743_v20, %v9731_v40  ;;  %v9756_v4 = vpop.f32.mrf.mxu2  ;;  %v9745_v13 = vpop.f32.mrf.mxu1  ;;  %v18290_v42 = vld [vmem:[#allocation6 + $0x42c] sm:$0xf]  ;;  %v18443_v20 = vld [vmem:[#allocation9 + $0xec] sm:$0xf0]  ;;  %v16252_v40 = vor.u32 %v18350_v34, %v16249_v46  ;;  %v16495_v16 = vld [vmem:[#allocation9] sm:$0xf] }
 0x83f   :  { %9921 = vmatpush.bf16.msrb.mxu3 %v16408_v27  ;;  %v16608_v37 = vor.u32 %v18443_v20, %v16607_v49  ;;  %v18435_v27 = vld [vmem:[#allocation9 + $0xac] sm:$0xf0]  ;;  %v16511_v20 = vld [vmem:[#allocation9 + $0x20] sm:$0xf] }
 0x840   :  { %10008 = vmatpush.bf16.msrb.mxu2 %v16348_v10  ;;  %9983 = vmatpush.bf16.msrb.mxu0 %v16076_v29  ;;  %v19272_v51 = vadd.f32 %v9756_v4, %v9744_v59  ;;  %v16392_v10 = vor.u32 %v18388_v36, %v16391_v18  ;;  %v15977_v29 = vld [vmem:[#allocation6 + $0x3f8] sm:$0xf0]  ;;  %v18467_v18 = vld [vmem:[#allocation9 + $0x1ac] sm:$0xf0]  ;;  %v15932_v4 = vor.u32 %v18270_v3, %v15929_v38 }
 0x841   :  { %v15980_v17 = vor.u32 %v18282_v12, %v15977_v29  ;;  %v18431_v13 = vld [vmem:[#allocation9 + $0x8c] sm:$0xf0] }
 0x842   :  { %9996 = vmatpush.bf16.msrb.mxu1 %v16204_v33  ;;  %v16012_v33 = vor.u32 %v18290_v42, %v16009_v25  ;;  %v16687_v42 = vld [vmem:[#allocation9 + $0x180] sm:$0xf]  ;;  %v18463_v25 = vld [vmem:[#allocation9 + $0x18c] sm:$0xf0] }
 0x843   :  { %v9732_v5 = vpop.f32.mrf.mxu0  ;;  %9922 = vmatpush.bf16.msrb.mxu3 %v16392_v10  ;;  %v18427_v31 = vld [vmem:[#allocation9 + $0x6c] sm:$0xf0] }
 0x844   :  { %10009 = vmatpush.bf16.msrb.mxu2 %v16332_v24  ;;  %9984 = vmatpush.bf16.msrb.mxu0 %v16060_v7  ;;  %v16376_v24 = vor.u32 %v18384_v35, %v16375_v11  ;;  %v18278_v7 = vld [vmem:[#allocation6 + $0x3cc] sm:$0xf]  ;;  %v16559_v5 = vld [vmem:[#allocation9 + $0x80] sm:$0xf]  ;;  %v16688_v11 = vor.u32 %v18463_v25, %v16687_v42  ;;  %v18459_v12 = vld [vmem:[#allocation9 + $0x16c] sm:$0xf0]  ;;  %v16544_v29 = vor.u32 %v18427_v31, %v16543_v6 }
 0x845   :  { %v16671_v35 = vld [vmem:[#allocation9 + $0x160] sm:$0xf]  ;;  %v18455_v34 = vld [vmem:[#allocation9 + $0x14c] sm:$0xf0]  ;;  %v18469_v42 = vld [vmem:[#allocation9 + $0x1c4] sm:$0xf] }
 0x846   :  { %9997 = vmatpush.bf16.msrb.mxu1 %v16188_v53  ;;  %v9758_v22 = vpop.f32.mrf.mxu2  ;;  %v15961_v53 = vld [vmem:[#allocation6 + $0x3d8] sm:$0xf0]  ;;  %v16672_v62 = vor.u32 %v18459_v12, %v16671_v35  ;;  %v18415_v58 = vld [vmem:[#allocation9 + $0xc] sm:$0xf0]  ;;  %v16721_v25 = vld [vmem:[#allocation9 + $0x1d0] sm:$0xf0] }
 0x847   :  { %9923 = vmatpush.bf16.msrb.mxu3 %v16376_v24  ;;  %v15964_v19 = vor.u32 %v18278_v7, %v15961_v53  ;;  %v15881_v24 = vld [vmem:[#allocation6 + $0x338] sm:$0xf0]  ;;  %v18419_v7 = vld [vmem:[#allocation9 + $0x2c] sm:$0xf0]  ;;  %v18254_v53 = vld [vmem:[#allocation6 + $0x30c] sm:$0xf]  ;;  %v16496_v38 = vor.u32 %v18415_v58, %v16495_v16 }
 0x848   :  { %10010 = vmatpush.bf16.msrb.mxu2 %v16316_v44  ;;  %9985 = vmatpush.bf16.msrb.mxu0 %v16044_v57  ;;  %v16735_v44 = vld [vmem:[#allocation9 + $0x1e0] sm:$0xf]  ;;  %v18447_v3 = vld [vmem:[#allocation9 + $0x10c] sm:$0xf0]  ;;  %v18433_v6 = vld [vmem:[#allocation9 + $0xa4] sm:$0xf] }
 0x849   :  { %v16736_v59 = vor.u32 %v18475_v47, %v16735_v44  ;;  %v16719_v57 = vld [vmem:[#allocation9 + $0x1c0] sm:$0xf]  ;;  %v16577_v31 = vld [vmem:[#allocation9 + $0xb0] sm:$0xf0]  ;;  %v18465_v35 = vld [vmem:[#allocation9 + $0x1a4] sm:$0xf] }
 0x84a   :  { %9998 = vmatpush.bf16.msrb.mxu1 %v16172_v60  ;;  %9924 = vmatmul.bf16.vlgmr.msrb.gmra.mxu3 %v19248_v9  ;;  %v18471_v60 = vld [vmem:[#allocation9 + $0x1cc] sm:$0xf0]  ;;  %v16639_v47 = vld [vmem:[#allocation9 + $0x120] sm:$0xf]  ;;  %v16705_v12 = vld [vmem:[#allocation9 + $0x1b0] sm:$0xf0] }
 0x84b   :  { %9968 = vmatpush.bf16.msra.mxu3 %v15980_v17  ;;  %v16720_v32 = vor.u32 %v18471_v60, %v16719_v57  ;;  %v16655_v17 = vld [vmem:[#allocation9 + $0x140] sm:$0xf]  ;;  %v16609_v60 = vld [vmem:[#allocation9 + $0xf0] sm:$0xf0] }
 0x84c   :  { %10011 = vmatpush.bf16.msrb.mxu2 %v16300_v2  ;;  %9986 = vmatpush.bf16.msrb.mxu0 %v16028_v41  ;;  %v16575_v2 = vld [vmem:[#allocation9 + $0xa0] sm:$0xf]  ;;  %v18266_v41 = vld [vmem:[#allocation6 + $0x36c] sm:$0xf]  ;;  %v16656_v44 = vor.u32 %v18455_v34, %v16655_v17  ;;  %v18461_v17 = vld [vmem:[#allocation9 + $0x184] sm:$0xf] }
 0x84d   :  { %v16576_v36 = vor.u32 %v18435_v27, %v16575_v2  ;;  %v16623_v27 = vld [vmem:[#allocation9 + $0x100] sm:$0xf]  ;;  %v16689_v34 = vld [vmem:[#allocation9 + $0x190] sm:$0xf0] }
 0x84e   :  { %9999 = vmatpush.bf16.msrb.mxu1 %v16156_v45  ;;  %v15913_v45 = vld [vmem:[#allocation6 + $0x378] sm:$0xf0]  ;;  %v16673_v16 = vld [vmem:[#allocation9 + $0x170] sm:$0xf0] }
 0x84f   :  { %9969 = vmatpush.bf16.msra.mxu3 %v15964_v19  ;;  %v15916_v10 = vor.u32 %v18266_v41, %v15913_v45  ;;  %v16512_v19 = vor.u32 %v18419_v7, %v16511_v20  ;;  %v16457_v41 = vld [vmem:[#allocation6 + $0x7b8] sm:$0xf0]  ;;  %v16624_v45 = vor.u32 %v18447_v3, %v16623_v27  ;;  %v18425_v7 = vld [vmem:[#allocation9 + $0x64] sm:$0xf] }
 0x850   :  { %10012 = vmatpush.bf16.msrb.mxu2 %v16284_v0  ;;  %9987 = vmatpush.bf16.msrb.mxu0 %v16012_v33  ;;  %v16560_v0 = vor.u32 %v18431_v13, %v16559_v5  ;;  %v15900_v33 = vor.u32 %v18262_v26, %v15897_v28  ;;  %v16593_v5 = vld [vmem:[#allocation9 + $0xd0] sm:$0xf0]  ;;  %v18402_v13 = vld [vmem:[#allocation6 + $0x7ac] sm:$0xf]  ;;  %v16441_v28 = vld [vmem:[#allocation6 + $0x798] sm:$0xf0] }
 0x851   :  { %v18398_v26 = vld [vmem:[#allocation6 + $0x78c] sm:$0xf] }
 0x852   :  { %10000 = vmatpush.bf16.msrb.mxu1 %v16140_v14  ;;  %v16527_v14 = vld [vmem:[#allocation9 + $0x40] sm:$0xf] }
 0x853   :  { %9970 = vmatpush.bf16.msra.mxu3 %v15948_v63  ;;  %v16528_v49 = vor.u32 %v18423_v8, %v16527_v14  ;;  %v16473_v63 = vld [vmem:[#allocation6 + $0x7d8] sm:$0xf0]  ;;  %v18429_v8 = vld [vmem:[#allocation9 + $0x84] sm:$0xf] }
 0x854   :  { %10013 = vmatpush.bf16.msrb.mxu2 %v16268_v21  ;;  %9988 = vmatpush.bf16.msrb.mxu0 %v15996_v43  ;;  %v18258_v21 = vld [vmem:[#allocation6 + $0x32c] sm:$0xf]  ;;  %v15865_v43 = vld [vmem:[#allocation6 + $0x318] sm:$0xf0] }
 0x855   :  { %v15884_v22 = vor.u32 %v18258_v21, %v15881_v24  ;;  %v15868_v48 = vor.u32 %v18254_v53, %v15865_v43  ;;  %v16561_v21 = vld [vmem:[#allocation9 + $0x90] sm:$0xf0]  ;;  %v18394_v24 = vld [vmem:[#allocation6 + $0x76c] sm:$0xf] }
 0x856   :  { %10001 = vmatpush.bf16.msrb.mxu1 %v16124_v15  ;;  %v18410_v15 = vld [vmem:[#allocation6 + $0x7ec] sm:$0xf] }
 0x857   :  { %9989 = vmatmul.bf16.vlgmr.msrb.gmra.mxu0 %v19208_v56  ;;  %v16704_v56 = vor.u32 %v18467_v18, %v16703_v54  ;;  %9971 = vmatpush.bf16.msra.mxu3 %v15932_v4  ;;  %v16737_v54 = vld [vmem:[#allocation9 + $0x1f0] sm:$0xf0]  ;;  %v18437_v4 = vld [vmem:[#allocation9 + $0xc4] sm:$0xf] }
 0x858   :  { %10014 = vmatpush.bf16.msrb.mxu2 %v16252_v40  ;;  %10827 = vmatpush.bf16.msra.mxu0 %v16608_v37  ;;  %v16489_v40 = vld [vmem:[#allocation6 + $0x7f8] sm:$0xf0]  ;;  %v18451_v37 = vld [vmem:[#allocation9 + $0x12c] sm:$0xf0] }
 0x859   :  { %10002 = vmatmul.bf16.vlgmr.msrb.gmra.mxu1 %v19210_v50  ;;  %v19278_v50 = vpop.f32.mrf.mxu0  ;;  %v16492_v55 = vor.u32 %v18410_v15, %v16489_v40  ;;  %v16640_v2 = vor.u32 %v18451_v37, %v16639_v47  ;;  %v16545_v40 = vld [vmem:[#allocation9 + $0x70] sm:$0xf0]  ;;  %v16409_v47 = vld [vmem:[#allocation6 + $0x758] sm:$0xf0]  ;;  %v16692_v37 = vor.u32 %v18461_v17, %v16689_v34 }
 0x85a   :  { %10840 = vmatpush.bf16.msra.mxu1 %v16736_v59  ;;  %v18441_v59 = vld [vmem:[#allocation9 + $0xe4] sm:$0xf]  ;;  %v16548_v58 = vor.u32 %v18425_v7, %v16545_v40  ;;  %v16625_v17 = vld [vmem:[#allocation9 + $0x110] sm:$0xf0]  ;;  %v16599_v7 = vld [vmem:[#allocation9 + $0xc8] sm:$0xf] }
 0x85b   :  { %10015 = vmatmul.bf16.vlgmr.msrb.gmra.mxu2 %v19212_v52  ;;  %v19280_v52 = vpop.f32.mrf.mxu1  ;;  %9972 = vmatpush.bf16.msra.mxu3 %v15916_v10  ;;  %v16612_v18 = vor.u32 %v18441_v59, %v16609_v60  ;;  %v16460_v10 = vor.u32 %v18402_v13, %v16457_v41  ;;  %v18417_v13 = vld [vmem:[#allocation9 + $0x24] sm:$0xf]  ;;  %v16513_v41 = vld [vmem:[#allocation9 + $0x30] sm:$0xf0] }
 0x85c   :  { %10828 = vmatpush.bf16.msra.mxu0 %v16592_v1  ;;  %v18406_v1 = vld [vmem:[#allocation6 + $0x7cc] sm:$0xf] }
 0x85e   :  { %10841 = vmatpush.bf16.msra.mxu1 %v16720_v32  ;;  %v19282_v39 = vpop.f32.mrf.mxu2  ;;  %v18473_v32 = vld [vmem:[#allocation9 + $0x1e4] sm:$0xf] }
 0x85f   :  { %9973 = vmatpush.bf16.msra.mxu3 %v15900_v33  ;;  %v19285_v33 = vld [vmem:[#allocation7] sm:$0xf] }
 0x860   :  { %10829 = vmatpush.bf16.msra.mxu0 %v16576_v36  ;;  %v16476_v36 = vor.u32 %v18406_v1, %v16473_v63  ;;  %v8331_v14 = vperm.slane %v19285_v33, 2  ;;  %v16529_v1 = vld [vmem:[#allocation9 + $0x50] sm:$0xf0]  ;;  %v18386_v63 = vld [vmem:[#allocation6 + $0x72c] sm:$0xf] }
 0x861   :  { %v9784_v30 = vpop.f32.mrf.mxu0 }
 0x862   :  { %10842 = vmatpush.bf16.msra.mxu1 %v16704_v56  ;;  %v16740_v56 = vor.u32 %v18473_v32, %v16737_v54  ;;  %v16708_v30 = vor.u32 %v18465_v35, %v16705_v12  ;;  %v16657_v32 = vld [vmem:[#allocation9 + $0x150] sm:$0xf0]  ;;  %v18413_v35 = vld [vmem:[#allocation9 + $0x4] sm:$0xf] }
 0x863   :  { %v9797_v46 = vpop.f32.mrf.mxu1  ;;  %9974 = vmatpush.bf16.msra.mxu3 %v15884_v22  ;;  %v16497_v12 = vld [vmem:[#allocation9 + $0x10] sm:$0xf0] }
 0x864   :  { %10830 = vmatpush.bf16.msra.mxu0 %v16560_v0  ;;  %v16596_v0 = vor.u32 %v18437_v4, %v16593_v5  ;;  %v16500_v34 = vor.u32 %v18413_v35, %v16497_v12  ;;  %v18479_v35 = vld [vmem:[#allocation9 + $0x20c] sm:$0xf0] }
 0x866   :  { %10843 = vmatpush.bf16.msra.mxu1 %v16688_v11  ;;  %v9810_v57 = vpop.f32.mrf.mxu2  ;;  %v16724_v11 = vor.u32 %v18469_v42, %v16721_v25  ;;  %v16377_v42 = vld [vmem:[#allocation6 + $0x718] sm:$0xf0]  ;;  %v16863_v25 = vld [vmem:[#allocation9 + $0x2e0] sm:$0xf] }
 0x867   :  { %9975 = vmatpush.bf16.msra.mxu3 %v15868_v48  ;;  %v18421_v57 = vld [vmem:[#allocation9 + $0x44] sm:$0xf] }
 0x868   :  { %10831 = vmatpush.bf16.msra.mxu0 %v16544_v29  ;;  %v16444_v29 = vor.u32 %v18398_v26, %v16441_v28  ;;  %v16641_v26 = vld [vmem:[#allocation9 + $0x130] sm:$0xf0]  ;;  %v16516_v28 = vor.u32 %v18417_v13, %v16513_v41  ;;  %v18483_v13 = vld [vmem:[#allocation9 + $0x22c] sm:$0xf0] }
 0x86a   :  { %10844 = vmatpush.bf16.msra.mxu1 %v16672_v62  ;;  %9976 = vmatmul.bf16.vlgmr.msra.gmra.mxu3 %v19184_v61  ;;  %v16580_v61 = vor.u32 %v18433_v6, %v16577_v31  ;;  %v16425_v62 = vld [vmem:[#allocation6 + $0x778] sm:$0xf0]  ;;  %v18449_v31 = vld [vmem:[#allocation9 + $0x124] sm:$0xf] }
 0x86b   :  { %10020 = vmatpush.bf16.msrb.mxu3 %v16492_v55  ;;  %v16428_v20 = vor.u32 %v18394_v24, %v16425_v62 }
 0x86c   :  { %10832 = vmatpush.bf16.msra.mxu0 %v16528_v49  ;;  %v16564_v49 = vor.u32 %v18429_v8, %v16561_v21  ;;  %v9717_v22 = vpop.f32.mrf.mxu3  ;;  %v18444_v8 = vld [vmem:[#allocation9 + $0xf4] sm:$0xf0]  ;;  %v16644_v21 = vor.u32 %v18449_v31, %v16641_v26 }
 0x86d   :  { %v9718_v15 = vadd.f32 %v9717_v22, %v19265_v23  ;;  %v16831_v22 = vld [vmem:[#allocation9 + $0x2a0] sm:$0xf] }
 0x86e   :  { %10845 = vmatpush.bf16.msra.mxu1 %v16656_v44  ;;  %v18390_v44 = vld [vmem:[#allocation6 + $0x74c] sm:$0xf] }
 0x86f   :  { %10021 = vmatpush.bf16.msrb.mxu3 %v16476_v36  ;;  %vm10033_vm8 = vcmp.gt.f32.partialorder %v9718_v15, 0.0  ;;  %v10037_v55 = vmul.f32 0.1, %v9718_v15  ;;  %v16412_v59 = vor.u32 %v18390_v44, %v16409_v47  ;;  %v16532_v36 = vor.u32 %v18421_v57, %v16529_v1  ;;  %v16815_v44 = vld [vmem:[#allocation9 + $0x280] sm:$0xf] }
 0x870   :  { %10833 = vmatpush.bf16.msra.mxu0 %v16512_v19  ;;  %v18457_v19 = vld [vmem:[#allocation9 + $0x164] sm:$0xf]  ;;  %v18495_v47 = vld [vmem:[#allocation9 + $0x28c] sm:$0xf0]  ;;  %v18432_v1 = vld [vmem:[#allocation9 + $0x94] sm:$0xf0] }
 0x871   :  { %v10041_v60 = vsel %vm10033_vm8, %v9718_v15, %v10037_v55  ;;  %v16676_v27 = vor.u32 %v18457_v19, %v16673_v16  ;;  %v16583_v19 = vld [vmem:[#allocation9 + $0xa8] sm:$0xf]  ;;  %v16816_v55 = vor.u32 %v18495_v47, %v16815_v44  ;;  %v18491_v57 = vld [vmem:[#allocation9 + $0x26c] sm:$0xf0] }
 0x872   :  { %10846 = vmatpush.bf16.msra.mxu1 %v16640_v2  ;;  %v16393_v2 = vld [vmem:[#allocation6 + $0x738] sm:$0xf0]  ;;  %v19289_v23 = vpack.c.bf16 %v10041_v60, %v10041_v60  ;;  %v16567_v60 = vld [vmem:[#allocation9 + $0x88] sm:$0xf] }
 0x873   :  { %10022 = vmatpush.bf16.msrb.mxu3 %v16460_v10  ;;  %v16396_v5 = vor.u32 %v18386_v63, %v16393_v2  ;;  %v16568_v2 = vor.u32 %v18432_v1, %v16567_v60  ;;  %v16695_v1 = vld [vmem:[#allocation9 + $0x188] sm:$0xf] }
 0x874   :  { %10834 = vmatpush.bf16.msra.mxu0 %v16496_v38  ;;  %v9834_v46 = vpop.f32.mrf.mxu0  ;;  %v18453_v38 = vld [vmem:[#allocation9 + $0x144] sm:$0xf]  ;;  %v9719_v4 = vpop.f32.mrf.mxu3 }
 0x875   :  { %v9835_v53 = vadd.f32 %v9834_v46, %v8331_v14  ;;  %v16660_v10 = vor.u32 %v18453_v38, %v16657_v32  ;;  %v16615_v14 = vld [vmem:[#allocation9 + $0xe8] sm:$0xf] }
 0x876   :  { %10847 = vmatpush.bf16.msra.mxu1 %v16624_v45  ;;  %v9847_v43 = vpop.f32.mrf.mxu1  ;;  %v18382_v45 = vld [vmem:[#allocation6 + $0x70c] sm:$0xf] }
 0x877   :  { %10023 = vmatpush.bf16.msrb.mxu3 %v16444_v29  ;;  %v9848_v48 = vadd.f32 %v9847_v43, %v9835_v53  ;;  %10835 = vmatmul.bf16.vlgmr.msra.gmra.mxu0 %v19289_v23  ;;  %v18503_v29 = vld [vmem:[#allocation9 + $0x2cc] sm:$0xf0]  ;;  %v18440_v53 = vld [vmem:[#allocation9 + $0xd4] sm:$0xf0]  ;;  %v16551_v32 = vld [vmem:[#allocation9 + $0x68] sm:$0xf] }
 0x878   :  { %10879 = vmatpush.bf16.msrb.mxu0 %v16612_v18  ;;  %v16600_v40 = vor.u32 %v18440_v53, %v16599_v7  ;;  %v16849_v7 = vld [vmem:[#allocation9 + $0x2d0] sm:$0xf0] }
 0x87a   :  { %10892 = vmatpush.bf16.msrb.mxu1 %v16740_v56 }
 0x87b   :  { %10024 = vmatpush.bf16.msrb.mxu3 %v16428_v20  ;;  %v18499_v20 = vld [vmem:[#allocation9 + $0x2ac] sm:$0xf0] }
 0x87c   :  { %10880 = vmatpush.bf16.msrb.mxu0 %v16596_v0  ;;  %v9836_v18 = vpop.f32.mrf.mxu0  ;;  %v18507_v0 = vld [vmem:[#allocation9 + $0x2ec] sm:$0xf0]  ;;  %v9769_v46 = vpop.f32.mrf.mxu3  ;;  %v16832_v15 = vor.u32 %v18499_v20, %v16831_v22  ;;  %v18416_v22 = vld [vmem:[#allocation9 + $0x14] sm:$0xf0]  ;;  %v18501_v20 = vld [vmem:[#allocation9 + $0x2c4] sm:$0xf] }
 0x87d   :  { %v16864_v6 = vor.u32 %v18507_v0, %v16863_v25  ;;  %v18428_v18 = vld [vmem:[#allocation9 + $0x74] sm:$0xf0] }
 0x87e   :  { %10893 = vmatpush.bf16.msrb.mxu1 %v16724_v11  ;;  %v9860_v3 = vpop.f32.mrf.mxu2  ;;  %v9849_v56 = vpop.f32.mrf.mxu1  ;;  %v16380_v11 = vor.u32 %v18382_v45, %v16377_v42  ;;  %v16535_v45 = vld [vmem:[#allocation9 + $0x48] sm:$0xf] }
 0x87f   :  { %v19291_v54 = vadd.f32 %v9860_v3, %v9848_v48  ;;  %10025 = vmatpush.bf16.msrb.mxu3 %v16412_v59  ;;  %10853 = vmatpush.bf16.msra.mxu2 %v16864_v6  ;;  %v18436_v48 = vld [vmem:[#allocation9 + $0xb4] sm:$0xf0]  ;;  %v16799_v59 = vld [vmem:[#allocation9 + $0x260] sm:$0xf] }
 0x880   :  { %10881 = vmatpush.bf16.msrb.mxu0 %v16580_v61  ;;  %v16847_v61 = vld [vmem:[#allocation9 + $0x2c0] sm:$0xf]  ;;  %v16800_v63 = vor.u32 %v18491_v57, %v16799_v59  ;;  %v18424_v56 = vld [vmem:[#allocation9 + $0x54] sm:$0xf0]  ;;  %v18438_v59 = vld [vmem:[#allocation9 + $0xcc] sm:$0xf] }
 0x881   :  { %v16848_v24 = vor.u32 %v18503_v29, %v16847_v61  ;;  %v18420_v6 = vld [vmem:[#allocation9 + $0x34] sm:$0xf0]  ;;  %v16536_v26 = vor.u32 %v18424_v56, %v16535_v45  ;;  %v18505_v29 = vld [vmem:[#allocation9 + $0x2e4] sm:$0xf]  ;;  %v16601_v57 = vld [vmem:[#allocation9 + $0xd8] sm:$0xf0] }
 0x882   :  { %10894 = vmatpush.bf16.msrb.mxu1 %v16708_v30  ;;  %v18445_v30 = vld [vmem:[#allocation9 + $0x104] sm:$0xf] }
 0x883   :  { %10026 = vmatpush.bf16.msrb.mxu3 %v16396_v5  ;;  %10854 = vmatpush.bf16.msra.mxu2 %v16848_v24  ;;  %v16628_v43 = vor.u32 %v18445_v30, %v16625_v17  ;;  %v16767_v5 = vld [vmem:[#allocation9 + $0x220] sm:$0xf] }
 0x884   :  { %10882 = vmatpush.bf16.msrb.mxu0 %v16564_v49  ;;  %v16616_v49 = vor.u32 %v18444_v8, %v16615_v14  ;;  %v9771_v16 = vpop.f32.mrf.mxu3  ;;  %v16768_v42 = vor.u32 %v18483_v13, %v16767_v5  ;;  %v16865_v8 = vld [vmem:[#allocation9 + $0x2f0] sm:$0xf0]  ;;  %v18460_v5 = vld [vmem:[#allocation9 + $0x174] sm:$0xf0]  ;;  %v18489_v13 = vld [vmem:[#allocation9 + $0x264] sm:$0xf] }
 0x885   :  { %v18497_v16 = vld [vmem:[#allocation9 + $0x2a4] sm:$0xf] }
 0x886   :  { %10895 = vmatpush.bf16.msrb.mxu1 %v16692_v37  ;;  %v9862_v62 = vpop.f32.mrf.mxu2  ;;  %v9770_v37 = vadd.f32 %v9769_v46, %v19272_v51  ;;  %v16783_v51 = vld [vmem:[#allocation9 + $0x240] sm:$0xf]  ;;  %v16727_v46 = vld [vmem:[#allocation9 + $0x1c8] sm:$0xf] }
 0x887   :  { %10027 = vmatpush.bf16.msrb.mxu3 %v16380_v11  ;;  %10855 = vmatpush.bf16.msra.mxu2 %v16832_v15  ;;  %v16751_v11 = vld [vmem:[#allocation9 + $0x200] sm:$0xf]  ;;  %v16868_v62 = vor.u32 %v18505_v29, %v16865_v8  ;;  %v16617_v15 = vld [vmem:[#allocation9 + $0xf8] sm:$0xf0] }
 0x888   :  { %10883 = vmatpush.bf16.msrb.mxu0 %v16548_v58  ;;  %v16584_v58 = vor.u32 %v18436_v48, %v16583_v19  ;;  %v16711_v19 = vld [vmem:[#allocation9 + $0x1a8] sm:$0xf]  ;;  %v18468_v48 = vld [vmem:[#allocation9 + $0x1b4] sm:$0xf0] }
 0x889   :  { %v16712_v60 = vor.u32 %v18468_v48, %v16711_v19  ;;  %v16753_v19 = vld [vmem:[#allocation9 + $0x210] sm:$0xf0] }
 0x88a   :  { %10896 = vmatpush.bf16.msrb.mxu1 %v16676_v27  ;;  %10028 = vmatmul.bf16.vlgmr.msrb.gmra.mxu3 %v19248_v9  ;;  %v9783_v9 = vadd.f32 %v19278_v50, %v9770_v37  ;;  %v18487_v27 = vld [vmem:[#allocation9 + $0x24c] sm:$0xf0]  ;;  %v16552_v50 = vor.u32 %v18428_v18, %v16551_v32  ;;  %v18434_v32 = vld [vmem:[#allocation9 + $0xac] sm:$0xf]  ;;  %v16585_v18 = vld [vmem:[#allocation9 + $0xb8] sm:$0xf0] }
 0x88b   :  { %10856 = vmatpush.bf16.msra.mxu2 %v16816_v55  ;;  %v16588_v45 = vor.u32 %v18434_v32, %v16585_v18  ;;  %v16729_v32 = vld [vmem:[#allocation9 + $0x1d8] sm:$0xf0] }
 0x88c   :  { %10884 = vmatpush.bf16.msrb.mxu0 %v16532_v36  ;;  %v9796_v38 = vadd.f32 %v19280_v52, %v9783_v9  ;;  %v16784_v36 = vor.u32 %v18487_v27, %v16783_v51  ;;  %v16743_v52 = vld [vmem:[#allocation9 + $0x1e8] sm:$0xf]  ;;  %v16817_v51 = vld [vmem:[#allocation9 + $0x290] sm:$0xf0]  ;;  %v16604_v27 = vor.u32 %v18438_v59, %v16601_v57  ;;  %v18539_v59 = vld [vmem:[#allocation9 + $0x3ec] sm:$0xf0] }
 0x88d   :  { %v9821_v25 = vpop.f32.mrf.mxu3 }
 0x88e   :  { %10897 = vmatpush.bf16.msrb.mxu1 %v16660_v10  ;;  %v9809_v41 = vadd.f32 %v19282_v39, %v9796_v38  ;;  %v16519_v10 = vld [vmem:[#allocation9 + $0x28] sm:$0xf]  ;;  %v16752_v39 = vor.u32 %v18479_v35, %v16751_v11 }
 0x88f   :  { %10857 = vmatpush.bf16.msra.mxu2 %v16800_v63  ;;  %v16520_v17 = vor.u32 %v18420_v6, %v16519_v10  ;;  %v18464_v63 = vld [vmem:[#allocation9 + $0x194] sm:$0xf0]  ;;  %v16663_v6 = vld [vmem:[#allocation9 + $0x148] sm:$0xf] }
 0x890   :  { %10885 = vmatpush.bf16.msrb.mxu0 %v16516_v28  ;;  %v9822_v0 = vadd.f32 %v9821_v25, %v9809_v41  ;;  %v18476_v28 = vld [vmem:[#allocation9 + $0x1f4] sm:$0xf0]  ;;  %v16801_v41 = vld [vmem:[#allocation9 + $0x270] sm:$0xf0]  ;;  %v16569_v25 = vld [vmem:[#allocation9 + $0x98] sm:$0xf0] }
 0x891   :  { %v16744_v24 = vor.u32 %v18476_v28, %v16743_v52  ;;  %v16804_v56 = vor.u32 %v18489_v13, %v16801_v41  ;;  %v18456_v52 = vld [vmem:[#allocation9 + $0x154] sm:$0xf0]  ;;  %v16785_v28 = vld [vmem:[#allocation9 + $0x250] sm:$0xf0] }
 0x892   :  { %10898 = vmatpush.bf16.msrb.mxu1 %v16644_v21  ;;  %vm10034_vm9 = vcmp.gt.f32.partialorder %v9822_v0, 0.0  ;;  %v10038_v12 = vmul.f32 0.1, %v9822_v0 }
 0x893   :  { %10858 = vmatpush.bf16.msra.mxu2 %v16784_v36  ;;  %v16696_v36 = vor.u32 %v18464_v63, %v16695_v1 }
 0x894   :  { %10886 = vmatpush.bf16.msrb.mxu0 %v16500_v34  ;;  %v19298_v3 = vpop.f32.mrf.mxu0  ;;  %v10042_v21 = vsel %vm10034_vm9, %v9822_v0, %v10038_v12  ;;  %v16503_v34 = vld [vmem:[#allocation9 + $0x8] sm:$0xf]  ;;  %v8332_v0 = vperm.slane %v19285_v33, 3  ;;  %v18426_v12 = vld [vmem:[#allocation9 + $0x6c] sm:$0xf] }
 0x895   :  { %v19306_v30 = vpack.c.bf16 %v10042_v21, %v10042_v21  ;;  %v9823_v53 = vpop.f32.mrf.mxu3  ;;  %v16504_v37 = vor.u32 %v18416_v22, %v16503_v34  ;;  %v16647_v21 = vld [vmem:[#allocation9 + $0x128] sm:$0xf]  ;;  %v18452_v33 = vld [vmem:[#allocation9 + $0x134] sm:$0xf0]  ;;  %v16537_v22 = vld [vmem:[#allocation9 + $0x58] sm:$0xf0] }
 0x896   :  { %10899 = vmatpush.bf16.msrb.mxu1 %v16628_v43  ;;  %v19301_v4 = vpop.f32.mrf.mxu1  ;;  %v18442_v43 = vld [vmem:[#allocation9 + $0xec] sm:$0xf]  ;;  %v16631_v53 = vld [vmem:[#allocation9 + $0x108] sm:$0xf] }
 0x897   :  { %10887 = vmatmul.bf16.vlgmr.msrb.gmra.mxu0 %v19289_v23  ;;  %10859 = vmatpush.bf16.msra.mxu2 %v16768_v42  ;;  %v16620_v55 = vor.u32 %v18442_v43, %v16617_v15  ;;  %v18430_v42 = vld [vmem:[#allocation9 + $0x8c] sm:$0xf]  ;;  %v18448_v43 = vld [vmem:[#allocation9 + $0x114] sm:$0xf0] }
 0x898   :  { %10931 = vmatpush.bf16.msra.mxu0 %v16616_v49  ;;  %v18472_v49 = vld [vmem:[#allocation9 + $0x1d4] sm:$0xf0]  ;;  %10848 = vmatmul.bf16.vlgmr.msra.gmra.mxu1 %v19306_v30  ;;  %v16572_v11 = vor.u32 %v18430_v42, %v16569_v25  ;;  %v18418_v15 = vld [vmem:[#allocation9 + $0x2c] sm:$0xf]  ;;  %v16632_v1 = vor.u32 %v18448_v43, %v16631_v53  ;;  %v16713_v42 = vld [vmem:[#allocation9 + $0x1b8] sm:$0xf0] }
 0x899   :  { %v16728_v44 = vor.u32 %v18472_v49, %v16727_v46  ;;  %v18422_v49 = vld [vmem:[#allocation9 + $0x4c] sm:$0xf]  ;;  %v16959_v25 = vld [vmem:[#allocation9 + $0x3a0] sm:$0xf]  ;;  %v16649_v43 = vld [vmem:[#allocation9 + $0x138] sm:$0xf0] }
 0x89a   :  { %10944 = vmatpush.bf16.msra.mxu1 %v16744_v24  ;;  %v18450_v53 = vld [vmem:[#allocation9 + $0x12c] sm:$0xf] }
 0x89b   :  { %10860 = vmatpush.bf16.msra.mxu2 %v16752_v39 }
 0x89c   :  { %10932 = vmatpush.bf16.msra.mxu0 %v16600_v40  ;;  %v9888_v61 = vpop.f32.mrf.mxu0  ;;  %v16852_v40 = vor.u32 %v18501_v20, %v16849_v7  ;;  %v16648_v7 = vor.u32 %v18452_v33, %v16647_v21  ;;  %v18523_v21 = vld [vmem:[#allocation9 + $0x36c] sm:$0xf0] }
 0x89d   :  { %v16553_v61 = vld [vmem:[#allocation9 + $0x78] sm:$0xf0] }
 0x89e   :  { %v19304_v31 = vpop.f32.mrf.mxu2  ;;  %v9901_v14 = vpop.f32.mrf.mxu1  ;;  %10945 = vmatpush.bf16.msra.mxu1 %v16728_v44  ;;  %v16556_v24 = vor.u32 %v18426_v12, %v16553_v61  ;;  %v16540_v44 = vor.u32 %v18422_v49, %v16537_v22  ;;  %v16911_v49 = vld [vmem:[#allocation9 + $0x340] sm:$0xf]  ;;  %v18519_v22 = vld [vmem:[#allocation9 + $0x34c] sm:$0xf0] }
 0x89f   :  { %10905 = vmatpush.bf16.msrb.mxu2 %v16868_v62  ;;  %v16664_v14 = vor.u32 %v18456_v52, %v16663_v6  ;;  %v18481_v62 = vld [vmem:[#allocation9 + $0x224] sm:$0xf] }
 0x8a0   :  { %10933 = vmatpush.bf16.msra.mxu0 %v16584_v58  ;;  %v16833_v58 = vld [vmem:[#allocation9 + $0x2b0] sm:$0xf0] }
 0x8a1   :  { %v16836_v9 = vor.u32 %v18497_v16, %v16833_v58  ;;  %v16991_v58 = vld [vmem:[#allocation9 + $0x3e0] sm:$0xf] }
 0x8a2   :  { %10946 = vmatpush.bf16.msra.mxu1 %v16712_v60  ;;  %v16992_v63 = vor.u32 %v18539_v59, %v16991_v58  ;;  %v16871_v58 = vld [vmem:[#allocation9 + $0x2e8] sm:$0xf]  ;;  %v18508_v59 = vld [vmem:[#allocation9 + $0x2f4] sm:$0xf0] }
 0x8a3   :  { %10906 = vmatpush.bf16.msrb.mxu2 %v16852_v40  ;;  %v18474_v40 = vld [vmem:[#allocation9 + $0x1ec] sm:$0xf] }
 0x8a4   :  { %10934 = vmatpush.bf16.msra.mxu0 %v16568_v2  ;;  %v18493_v2 = vld [vmem:[#allocation9 + $0x284] sm:$0xf]  ;;  %10866 = vmatpush.bf16.msra.mxu3 %v16992_v63 }
 0x8a5   :  { %v16820_v38 = vor.u32 %v18493_v2, %v16817_v51  ;;  %v18537_v63 = vld [vmem:[#allocation9 + $0x3e4] sm:$0xf] }
 0x8a6   :  { %v9914_v47 = vpop.f32.mrf.mxu2  ;;  %10947 = vmatpush.bf16.msra.mxu1 %v16696_v36  ;;  %v16505_v36 = vld [vmem:[#allocation9 + $0x18] sm:$0xf0] }
 0x8a7   :  { %10907 = vmatpush.bf16.msrb.mxu2 %v16836_v9  ;;  %v16745_v47 = vld [vmem:[#allocation9 + $0x1f8] sm:$0xf0] }
 0x8a8   :  { %10935 = vmatpush.bf16.msra.mxu0 %v16552_v50  ;;  %v16679_v50 = vld [vmem:[#allocation9 + $0x168] sm:$0xf]  ;;  %10900 = vmatmul.bf16.vlgmr.msrb.gmra.mxu1 %v19306_v30  ;;  %v16748_v2 = vor.u32 %v18474_v40, %v16745_v47 }
 0x8a9   :  { %v16680_v10 = vor.u32 %v18460_v5, %v16679_v50  ;;  %v16975_v50 = vld [vmem:[#allocation9 + $0x3c0] sm:$0xf]  ;;  %v18535_v5 = vld [vmem:[#allocation9 + $0x3cc] sm:$0xf0] }
 0x8aa   :  { %v16976_v13 = vor.u32 %v18535_v5, %v16975_v50  ;;  %v16855_v50 = vld [vmem:[#allocation9 + $0x2c8] sm:$0xf]  ;;  %v18504_v5 = vld [vmem:[#allocation9 + $0x2d4] sm:$0xf0] }
 0x8ab   :  { %10908 = vmatpush.bf16.msrb.mxu2 %v16820_v38  ;;  %10948 = vmatpush.bf16.msra.mxu1 %v16680_v10  ;;  %v18470_v38 = vld [vmem:[#allocation9 + $0x1cc] sm:$0xf] }
 0x8ac   :  { %10936 = vmatpush.bf16.msra.mxu0 %v16536_v26  ;;  %v18485_v26 = vld [vmem:[#allocation9 + $0x244] sm:$0xf]  ;;  %v16732_v41 = vor.u32 %v18470_v38, %v16729_v32  ;;  %10867 = vmatpush.bf16.msra.mxu3 %v16976_v13  ;;  %v16872_v32 = vor.u32 %v18508_v59, %v16871_v58  ;;  %v18502_v59 = vld [vmem:[#allocation9 + $0x2cc] sm:$0xf] }
 0x8ad   :  { %v16788_v35 = vor.u32 %v18485_v26, %v16785_v28  ;;  %v9873_v46 = vpop.f32.mrf.mxu3  ;;  %v18462_v26 = vld [vmem:[#allocation9 + $0x18c] sm:$0xf]  ;;  %v16697_v28 = vld [vmem:[#allocation9 + $0x198] sm:$0xf0]  ;;  %v18533_v13 = vld [vmem:[#allocation9 + $0x3c4] sm:$0xf] }
 0x8ae   :  { %v9874_v61 = vadd.f32 %v9873_v46, %v19291_v54  ;;  %v16912_v54 = vor.u32 %v18519_v22, %v16911_v49  ;;  %v16913_v49 = vld [vmem:[#allocation9 + $0x350] sm:$0xf0] }
 0x8af   :  { %10909 = vmatpush.bf16.msrb.mxu2 %v16804_v56  ;;  %10949 = vmatpush.bf16.msra.mxu1 %v16664_v14  ;;  %v16681_v14 = vld [vmem:[#allocation9 + $0x178] sm:$0xf0] }
 0x8b0   :  { %10937 = vmatpush.bf16.msra.mxu0 %v16520_v17  ;;  %v16769_v17 = vld [vmem:[#allocation9 + $0x230] sm:$0xf0] }
 0x8b1   :  { %v16772_v20 = vor.u32 %v18481_v62, %v16769_v17  ;;  %v18454_v17 = vld [vmem:[#allocation9 + $0x14c] sm:$0xf] }
 0x8b3   :  { %10910 = vmatpush.bf16.msrb.mxu2 %v16788_v35  ;;  %10950 = vmatpush.bf16.msra.mxu1 %v16648_v7  ;;  %v18527_v35 = vld [vmem:[#allocation9 + $0x38c] sm:$0xf0] }
 0x8b4   :  { %10938 = vmatpush.bf16.msra.mxu0 %v16504_v37  ;;  %v9938_v39 = vpop.f32.mrf.mxu0  ;;  %v18477_v37 = vld [vmem:[#allocation9 + $0x204] sm:$0xf] }
 0x8b5   :  { %v9939_v8 = vadd.f32 %v9938_v39, %v8332_v0  ;;  %v16756_v16 = vor.u32 %v18477_v37, %v16753_v19  ;;  %v9875_v18 = vpop.f32.mrf.mxu3  ;;  %v18531_v0 = vld [vmem:[#allocation9 + $0x3ac] sm:$0xf0]  ;;  %v16700_v39 = vor.u32 %v18462_v26, %v16697_v28  ;;  %v16652_v37 = vor.u32 %v18450_v53, %v16649_v43  ;;  %v18446_v19 = vld [vmem:[#allocation9 + $0x10c] sm:$0xf]  ;;  %v18513_v53 = vld [vmem:[#allocation9 + $0x324] sm:$0xf] }
 0x8b6   :  { %v9951_v29 = vpop.f32.mrf.mxu1  ;;  %v16960_v6 = vor.u32 %v18531_v0, %v16959_v25  ;;  %v16839_v25 = vld [vmem:[#allocation9 + $0x2a8] sm:$0xf]  ;;  %v18500_v0 = vld [vmem:[#allocation9 + $0x2b4] sm:$0xf0]  ;;  %v16897_v43 = vld [vmem:[#allocation9 + $0x330] sm:$0xf0] }
 0x8b7   :  { %10939 = vmatmul.bf16.vlgmr.msra.gmra.mxu0 %v19289_v23  ;;  %v9952_v34 = vadd.f32 %v9951_v29, %v9939_v8  ;;  %10911 = vmatpush.bf16.msrb.mxu2 %v16772_v20  ;;  %v18458_v29 = vld [vmem:[#allocation9 + $0x16c] sm:$0xf]  ;;  %v16927_v8 = vld [vmem:[#allocation9 + $0x360] sm:$0xf]  ;;  %v16840_v28 = vor.u32 %v18500_v0, %v16839_v25  ;;  %v16793_v25 = vld [vmem:[#allocation9 + $0x258] sm:$0xf0] }
 0x8b8   :  { %10983 = vmatpush.bf16.msrb.mxu0 %v16620_v55  ;;  %v16521_v55 = vld [vmem:[#allocation9 + $0x38] sm:$0xf0]  ;;  %10951 = vmatpush.bf16.msra.mxu1 %v16632_v1  ;;  %v16928_v33 = vor.u32 %v18523_v21, %v16927_v8  ;;  %v16684_v62 = vor.u32 %v18458_v29, %v16681_v14  ;;  %v16807_v14 = vld [vmem:[#allocation9 + $0x268] sm:$0xf]  ;;  %v18492_v8 = vld [vmem:[#allocation9 + $0x274] sm:$0xf0] }
 0x8b9   :  { %v16524_v51 = vor.u32 %v18418_v15, %v16521_v55  ;;  %10868 = vmatpush.bf16.msra.mxu3 %v16960_v6  ;;  %v18515_v15 = vld [vmem:[#allocation9 + $0x32c] sm:$0xf0]  ;;  %v16879_v55 = vld [vmem:[#allocation9 + $0x300] sm:$0xf]  ;;  %v16961_v6 = vld [vmem:[#allocation9 + $0x3b0] sm:$0xf0] }
 0x8ba   :  { %v18521_v21 = vld [vmem:[#allocation9 + $0x364] sm:$0xf] }
 0x8bb   :  { %10912 = vmatpush.bf16.msrb.mxu2 %v16756_v16  ;;  %10952 = vmatmul.bf16.vlgmr.msra.gmra.mxu1 %v19306_v30  ;;  %v18511_v16 = vld [vmem:[#allocation9 + $0x30c] sm:$0xf0] }
 0x8bc   :  { %10984 = vmatpush.bf16.msrb.mxu0 %v16604_v27  ;;  %v9940_v9 = vpop.f32.mrf.mxu0  ;;  %v18414_v27 = vld [vmem:[#allocation9 + $0xc] sm:$0xf]  ;;  %10996 = vmatpush.bf16.msrb.mxu1 %v16748_v2 }
 0x8bd   :  { %v16508_v56 = vor.u32 %v18414_v27, %v16505_v36  ;;  %v16880_v9 = vor.u32 %v18511_v16, %v16879_v55  ;;  %v16993_v27 = vld [vmem:[#allocation9 + $0x3f0] sm:$0xf0] }
 0x8be   :  { %v9964_v48 = vpop.f32.mrf.mxu2  ;;  %v9953_v60 = vpop.f32.mrf.mxu1  ;;  %v16996_v18 = vor.u32 %v18537_v63, %v16993_v27 }
 0x8bf   :  { %v19312_v57 = vadd.f32 %v9964_v48, %v9952_v34  ;;  %v16665_v34 = vld [vmem:[#allocation9 + $0x158] sm:$0xf0] }
 0x8c0   :  { %10985 = vmatpush.bf16.msrb.mxu0 %v16588_v45  ;;  %v18466_v45 = vld [vmem:[#allocation9 + $0x1ac] sm:$0xf]  ;;  %10997 = vmatpush.bf16.msrb.mxu1 %v16732_v41  ;;  %v16668_v7 = vor.u32 %v18454_v17, %v16665_v34  ;;  %v16977_v41 = vld [vmem:[#allocation9 + $0x3d0] sm:$0xf0]  ;;  %v18488_v17 = vld [vmem:[#allocation9 + $0x254] sm:$0xf0] }
 0x8c1   :  { %v16716_v52 = vor.u32 %v18466_v45, %v16713_v42  ;;  %v16856_v42 = vor.u32 %v18504_v5, %v16855_v50  ;;  %v18517_v34 = vld [vmem:[#allocation9 + $0x344] sm:$0xf]  ;;  %v18490_v5 = vld [vmem:[#allocation9 + $0x26c] sm:$0xf] }
 0x8c2   :  { %v16916_v22 = vor.u32 %v18517_v34, %v16913_v49  ;;  %v16967_v34 = vld [vmem:[#allocation9 + $0x3a8] sm:$0xf]  ;;  %v18532_v49 = vld [vmem:[#allocation9 + $0x3b4] sm:$0xf0] }
 0x8c4   :  { %10986 = vmatpush.bf16.msrb.mxu0 %v16572_v11  ;;  %v16943_v11 = vld [vmem:[#allocation9 + $0x380] sm:$0xf]  ;;  %10998 = vmatpush.bf16.msrb.mxu1 %v16716_v52 }
 0x8c5   :  { %v16944_v12 = vor.u32 %v18527_v35, %v16943_v11  ;;  %v16823_v11 = vld [vmem:[#allocation9 + $0x288] sm:$0xf]  ;;  %v18496_v35 = vld [vmem:[#allocation9 + $0x294] sm:$0xf0] }
 0x8c6   :  { %v9966_v10 = vpop.f32.mrf.mxu2  ;;  %v16824_v29 = vor.u32 %v18496_v35, %v16823_v11 }
 0x8c7   :  { %10869 = vmatpush.bf16.msra.mxu3 %v16944_v12  ;;  %v18529_v10 = vld [vmem:[#allocation9 + $0x3a4] sm:$0xf] }
 0x8c8   :  { %10987 = vmatpush.bf16.msrb.mxu0 %v16556_v24  ;;  %v9887_v24 = vadd.f32 %v19298_v3, %v9874_v61  ;;  %10999 = vmatpush.bf16.msrb.mxu1 %v16700_v39  ;;  %v16895_v3 = vld [vmem:[#allocation9 + $0x320] sm:$0xf]  ;;  %v16964_v26 = vor.u32 %v18529_v10, %v16961_v6  ;;  %v18525_v12 = vld [vmem:[#allocation9 + $0x384] sm:$0xf]  ;;  %v16945_v61 = vld [vmem:[#allocation9 + $0x390] sm:$0xf0] }
 0x8c9   :  { %v16948_v39 = vor.u32 %v18525_v12, %v16945_v61  ;;  %v18482_v6 = vld [vmem:[#allocation9 + $0x22c] sm:$0xf]  ;;  %v16999_v61 = vld [vmem:[#allocation9 + $0x3e8] sm:$0xf] }
 0x8ca   :  { %v18478_v12 = vld [vmem:[#allocation9 + $0x20c] sm:$0xf] }
 0x8cb   :  { %10870 = vmatpush.bf16.msra.mxu3 %v16928_v33  ;;  %v16929_v33 = vld [vmem:[#allocation9 + $0x370] sm:$0xf0] }
 0x8cc   :  { %10988 = vmatpush.bf16.msrb.mxu0 %v16540_v44  ;;  %11000 = vmatpush.bf16.msrb.mxu1 %v16684_v62  ;;  %v16896_v44 = vor.u32 %v18515_v15, %v16895_v3  ;;  %v16791_v62 = vld [vmem:[#allocation9 + $0x248] sm:$0xf]  ;;  %v16900_v15 = vor.u32 %v18513_v53, %v16897_v43 }
 0x8cd   :  { %v9925_v47 = vpop.f32.mrf.mxu3 }
 0x8cf   :  { %10871 = vmatpush.bf16.msra.mxu3 %v16912_v54  ;;  %v16792_v54 = vor.u32 %v18488_v17, %v16791_v62  ;;  %v19339_v17 = vld [vmem:[#allocation10] sm:$0xf] }
 0x8d0   :  { %10989 = vmatpush.bf16.msrb.mxu0 %v16524_v51  ;;  %11001 = vmatpush.bf16.msrb.mxu1 %v16668_v7  ;;  %v18484_v7 = vld [vmem:[#allocation9 + $0x234] sm:$0xf0] }
 0x8d3   :  { %10872 = vmatpush.bf16.msra.mxu3 %v16896_v44  ;;  %v16759_v44 = vld [vmem:[#allocation9 + $0x208] sm:$0xf] }
 0x8d4   :  { %10990 = vmatpush.bf16.msrb.mxu0 %v16508_v56  ;;  %v19319_v46 = vpop.f32.mrf.mxu0  ;;  %11002 = vmatpush.bf16.msrb.mxu1 %v16652_v37  ;;  %v16980_v56 = vor.u32 %v18533_v13, %v16977_v41  ;;  %v18506_v37 = vld [vmem:[#allocation9 + $0x2ec] sm:$0xf]  ;;  %v16809_v13 = vld [vmem:[#allocation9 + $0x278] sm:$0xf0] }
 0x8d5   :  { %v9927_v45 = vpop.f32.mrf.mxu3 }
 0x8d6   :  { %v19321_v20 = vpop.f32.mrf.mxu1 }
 0x8d7   :  { %10991 = vmatmul.bf16.vlgmr.msrb.gmra.mxu0 %v19289_v23  ;;  %v9900_v23 = vadd.f32 %v19301_v4, %v9887_v24  ;;  %v16633_v4 = vld [vmem:[#allocation9 + $0x118] sm:$0xf0]  ;;  %10873 = vmatpush.bf16.msra.mxu3 %v16880_v9  ;;  %v16932_v24 = vor.u32 %v18521_v21, %v16929_v33  ;;  %v16983_v33 = vld [vmem:[#allocation9 + $0x3c8] sm:$0xf] }
 0x8d8   :  { %v16636_v51 = vor.u32 %v18446_v19, %v16633_v4  ;;  %v16873_v19 = vld [vmem:[#allocation9 + $0x2f8] sm:$0xf0]  ;;  %v16881_v4 = vld [vmem:[#allocation9 + $0x310] sm:$0xf0] }
 0x8d9   :  { %v9913_v40 = vadd.f32 %v19304_v31, %v9900_v23  ;;  %v16775_v23 = vld [vmem:[#allocation9 + $0x228] sm:$0xf]  ;;  %v16876_v58 = vor.u32 %v18506_v37, %v16873_v19  ;;  %v16857_v9 = vld [vmem:[#allocation9 + $0x2d8] sm:$0xf0]  ;;  %v18520_v19 = vld [vmem:[#allocation9 + $0x354] sm:$0xf0] }
 0x8da   :  { %11003 = vmatpush.bf16.msrb.mxu1 %v16636_v51  ;;  %v16860_v63 = vor.u32 %v18502_v59, %v16857_v9  ;;  %v16919_v37 = vld [vmem:[#allocation9 + $0x348] sm:$0xf] }
 0x8db   :  { %v9926_v48 = vadd.f32 %v9925_v47, %v9913_v40  ;;  %10918 = vmatpush.bf16.msrb.mxu3 %v16996_v18  ;;  %v16776_v40 = vor.u32 %v18484_v7, %v16775_v23  ;;  %v18480_v47 = vld [vmem:[#allocation9 + $0x214] sm:$0xf0]  ;;  %v16951_v23 = vld [vmem:[#allocation9 + $0x388] sm:$0xf] }
 0x8dc   :  { %v9992_v2 = vpop.f32.mrf.mxu0  ;;  %v16760_v16 = vor.u32 %v18480_v47, %v16759_v44  ;;  %v18528_v7 = vld [vmem:[#allocation9 + $0x394] sm:$0xf0]  ;;  %v16887_v9 = vld [vmem:[#allocation9 + $0x308] sm:$0xf] }
 0x8dd   :  { %vm10035_vm10 = vcmp.gt.f32.partialorder %v9926_v48, 0.0  ;;  %v10039_v60 = vmul.f32 0.1, %v9926_v48  ;;  %11004 = vmatmul.bf16.vlgmr.msrb.gmra.mxu1 %v19306_v30  ;;  %v16808_v30 = vor.u32 %v18492_v8, %v16807_v14  ;;  %v18498_v2 = vld [vmem:[#allocation9 + $0x2ac] sm:$0xf]  ;;  %v16952_v43 = vor.u32 %v18528_v7, %v16951_v23  ;;  %v18548_v23 = vld [vmem:[#allocation12 + $0x38] sm:$0xff] }
 0x8de   :  { %v19324_v1 = vpop.f32.mrf.mxu2  ;;  %v10005_v31 = vpop.f32.mrf.mxu1  ;;  %11311 = vmatpush.bf16.msra.mxu0 %v18548_v23  ;;  %v18547_v7 = vld [vmem:[#allocation12 + $0x30] sm:$0xff] }
 0x8df   :  { %v10043_v38 = vsel %vm10035_vm10, %v9926_v48, %v10039_v60  ;;  %10919 = vmatpush.bf16.msrb.mxu3 %v16980_v56  ;;  %v18509_v48 = vld [vmem:[#allocation9 + $0x304] sm:$0xf]  ;;  %v16841_v31 = vld [vmem:[#allocation9 + $0x2b8] sm:$0xf0]  ;;  %v16812_v56 = vor.u32 %v18490_v5, %v16809_v13 }
 0x8e0   :  { %v19326_v36 = vpack.c.bf16 %v10043_v38, %v10043_v38  ;;  %v16884_v55 = vor.u32 %v18509_v48, %v16881_v4  ;;  %v16844_v27 = vor.u32 %v18498_v2, %v16841_v31  ;;  %v18494_v38 = vld [vmem:[#allocation9 + $0x28c] sm:$0xf]  ;;  %v16903_v4 = vld [vmem:[#allocation9 + $0x328] sm:$0xf]  ;;  %v17001_v2 = vld [vmem:[#allocation9 + $0x3f8] sm:$0xf0] }
 0x8e1   :  { %v16985_v5 = vld [vmem:[#allocation9 + $0x3d8] sm:$0xf0] }
 0x8e2   :  { %10861 = vmatmul.bf16.vlgmr.msra.gmra.mxu2 %v19326_v36  ;;  %11312 = vmatpush.bf16.msra.mxu0 %v18547_v7 }
 0x8e3   :  { %10957 = vmatpush.bf16.msra.mxu2 %v16872_v32  ;;  %10920 = vmatpush.bf16.msrb.mxu3 %v16964_v26  ;;  %v16825_v32 = vld [vmem:[#allocation9 + $0x298] sm:$0xf0] }
 0x8e4   :  { %v16828_v50 = vor.u32 %v18494_v38, %v16825_v32 }
 0x8e6   :  { %v10018_v52 = vpop.f32.mrf.mxu2 }
 0x8e7   :  { %10958 = vmatpush.bf16.msra.mxu2 %v16856_v42  ;;  %10921 = vmatpush.bf16.msrb.mxu3 %v16948_v39  ;;  %v18486_v42 = vld [vmem:[#allocation9 + $0x24c] sm:$0xf]  ;;  %v16777_v52 = vld [vmem:[#allocation9 + $0x238] sm:$0xf0]  ;;  %v18540_v39 = vld [vmem:[#allocation9 + $0x3f4] sm:$0xf0] }
 0x8e8   :  { %v16796_v10 = vor.u32 %v18486_v42, %v16793_v25  ;;  %v16780_v35 = vor.u32 %v18482_v6, %v16777_v52  ;;  %v17000_v8 = vor.u32 %v18540_v39, %v16999_v61  ;;  %v18526_v25 = vld [vmem:[#allocation9 + $0x38c] sm:$0xf] }
 0x8e9   :  { %v18522_v52 = vld [vmem:[#allocation9 + $0x36c] sm:$0xf] }
 0x8ea   :  { %v18514_v39 = vld [vmem:[#allocation9 + $0x32c] sm:$0xf] }
 0x8eb   :  { %10959 = vmatpush.bf16.msra.mxu2 %v16840_v28  ;;  %10922 = vmatpush.bf16.msrb.mxu3 %v16932_v24  ;;  %v18536_v24 = vld [vmem:[#allocation9 + $0x3d4] sm:$0xf0] }
 0x8ec   :  { %v16984_v62 = vor.u32 %v18536_v24, %v16983_v33  ;;  %v18510_v33 = vld [vmem:[#allocation9 + $0x30c] sm:$0xf]  ;;  %v16889_v24 = vld [vmem:[#allocation9 + $0x318] sm:$0xf0] }
 0x8ed   :  { %v9977_v3 = vpop.f32.mrf.mxu3 }
 0x8ee   :  { %v9978_v18 = vadd.f32 %v9977_v3, %v19312_v57 }
 0x8ef   :  { %10960 = vmatpush.bf16.msra.mxu2 %v16824_v29  ;;  %10923 = vmatpush.bf16.msrb.mxu3 %v16916_v22  ;;  %v10179_v22 = vperm.slane %v19339_v17, 0 }
 0x8f0   :  { %v9991_v41 = vadd.f32 %v19319_v46, %v9978_v18  ;;  %v16761_v46 = vld [vmem:[#allocation9 + $0x218] sm:$0xf0] }
 0x8f2   :  { %10913 = vmatmul.bf16.vlgmr.msrb.gmra.mxu2 %v19326_v36  ;;  %v10004_v0 = vadd.f32 %v19321_v20, %v9991_v41  ;;  %v16764_v20 = vor.u32 %v18478_v12, %v16761_v46  ;;  %v18530_v41 = vld [vmem:[#allocation9 + $0x3ac] sm:$0xf]  ;;  %v16921_v46 = vld [vmem:[#allocation9 + $0x358] sm:$0xf0] }
 0x8f3   :  { %10961 = vmatpush.bf16.msra.mxu2 %v16808_v30  ;;  %10924 = vmatpush.bf16.msrb.mxu3 %v16900_v15  ;;  %v16935_v15 = vld [vmem:[#allocation9 + $0x368] sm:$0xf]  ;;  %v18518_v12 = vld [vmem:[#allocation9 + $0x34c] sm:$0xf] }
 0x8f4   :  { %v10836_v51 = vpop.f32.mrf.mxu0  ;;  %v10017_v26 = vadd.f32 %v19324_v1, %v10004_v0  ;;  %v16953_v0 = vld [vmem:[#allocation9 + $0x398] sm:$0xf0]  ;;  %v16924_v61 = vor.u32 %v18518_v12, %v16921_v46 }
 0x8f5   :  { %v9979_v60 = vpop.f32.mrf.mxu3  ;;  %v10837_v53 = vadd.f32 %v10836_v51, %v10179_v22  ;;  %v16956_v6 = vor.u32 %v18526_v25, %v16953_v0  ;;  %v18557_v25 = vld [vmem:[#allocation12 + $0x80] sm:$0xff]  ;;  %v18572_v0 = vld [vmem:[#allocation12 + $0xf8] sm:$0xff] }
 0x8f6   :  { %v18512_v60 = vld [vmem:[#allocation9 + $0x314] sm:$0xf0] }
 0x8f7   :  { %10962 = vmatpush.bf16.msra.mxu2 %v16792_v54  ;;  %10925 = vmatpush.bf16.msrb.mxu3 %v16884_v55  ;;  %v16968_v54 = vor.u32 %v18532_v49, %v16967_v34  ;;  %v18516_v55 = vld [vmem:[#allocation9 + $0x334] sm:$0xf0]  ;;  %v16888_v51 = vor.u32 %v18512_v60, %v16887_v9 }
 0x8f8   :  { %v16904_v59 = vor.u32 %v18516_v55, %v16903_v4  ;;  %v18541_v4 = vld [vmem:[#allocation12] sm:$0xff]  ;;  %v18551_v9 = vld [vmem:[#allocation12 + $0x50] sm:$0xff] }
 0x8f9   :  { %v18553_v55 = vld [vmem:[#allocation12 + $0x60] sm:$0xff]  ;;  %v18563_v60 = vld [vmem:[#allocation12 + $0xb0] sm:$0xff] }
 0x8fb   :  { %10963 = vmatpush.bf16.msra.mxu2 %v16776_v40  ;;  %v18524_v40 = vld [vmem:[#allocation9 + $0x374] sm:$0xf0] }
 0x8fc   :  { %v10838_v45 = vpop.f32.mrf.mxu0  ;;  %v16936_v47 = vor.u32 %v18524_v40, %v16935_v15  ;;  %v18556_v15 = vld [vmem:[#allocation12 + $0x78] sm:$0xff]  ;;  %v18545_v40 = vld [vmem:[#allocation12 + $0x20] sm:$0xff] }
 0x8fd   :  { %v16969_v45 = vld [vmem:[#allocation9 + $0x3b8] sm:$0xf0]  ;;  %11324 = vmatpush.bf16.msra.mxu1 %v18556_v15 }
 0x8fe   :  { %v16972_v42 = vor.u32 %v18530_v41, %v16969_v45  ;;  %v18558_v41 = vld [vmem:[#allocation12 + $0x88] sm:$0xff] }
 0x8ff   :  { %10964 = vmatpush.bf16.msra.mxu2 %v16760_v16 }
 0x902   :  { %10965 = vmatmul.bf16.vlgmr.msra.gmra.mxu2 %v19326_v36 }
 0x903   :  { %11009 = vmatpush.bf16.msrb.mxu2 %v16876_v58  ;;  %v10180_v58 = vperm.slane %v19339_v17, 1 }
 0x907   :  { %11010 = vmatpush.bf16.msrb.mxu2 %v16860_v63  ;;  %v18538_v63 = vld [vmem:[#allocation9 + $0x3ec] sm:$0xf] }
 0x908   :  { %v17004_v38 = vor.u32 %v18538_v63, %v17001_v2  ;;  %v18550_v2 = vld [vmem:[#allocation12 + $0x48] sm:$0xff] }
 0x90b   :  { %11011 = vmatpush.bf16.msrb.mxu2 %v16844_v27 }
 0x90d   :  { %v10029_v57 = vpop.f32.mrf.mxu3 }
 0x90e   :  { %v10030_v28 = vadd.f32 %v10029_v57, %v10017_v26  ;;  %v16937_v26 = vld [vmem:[#allocation9 + $0x378] sm:$0xf0] }
 0x90f   :  { %11012 = vmatpush.bf16.msrb.mxu2 %v16828_v50  ;;  %v18534_v50 = vld [vmem:[#allocation9 + $0x3cc] sm:$0xf] }
 0x910   :  { %vm10036_vm11 = vcmp.gt.f32.partialorder %v10030_v28, 0.0  ;;  %v10040_v29 = vmul.f32 0.1, %v10030_v28  ;;  %v16988_v13 = vor.u32 %v18534_v50, %v16985_v5 }
 0x912   :  { %v10044_v14 = vsel %vm10036_vm11, %v10030_v28, %v10040_v29  ;;  %v16905_v29 = vld [vmem:[#allocation9 + $0x338] sm:$0xf0] }
 0x913   :  { %11013 = vmatpush.bf16.msrb.mxu2 %v16812_v56  ;;  %v19336_v21 = vpack.c.bf16 %v10044_v14, %v10044_v14 }
 0x914   :  { %v10888_v11 = vpop.f32.mrf.mxu0 }
 0x915   :  { %v10031_v1 = vpop.f32.mrf.mxu3  ;;  %10874 = vmatmul.bf16.vlgmr.msra.gmra.mxu3 %v19336_v21  ;;  %v10849_v3 = vpop.f32.mrf.mxu1  ;;  %v10889_v31 = vadd.f32 %v10888_v11, %v10180_v58  ;;  %v16940_v11 = vor.u32 %v18522_v52, %v16937_v26  ;;  %v18552_v58 = vld [vmem:[#allocation12 + $0x58] sm:$0xff]  ;;  %v18571_v52 = vld [vmem:[#allocation12 + $0xf0] sm:$0xff]  ;;  %v18570_v26 = vld [vmem:[#allocation12 + $0xe8] sm:$0xff] }
 0x916   :  { %10970 = vmatpush.bf16.msra.mxu3 %v17000_v8  ;;  %v19343_v44 = vadd.f32 %v10849_v3, %v10837_v53  ;;  %v16908_v8 = vor.u32 %v18514_v39, %v16905_v29  ;;  %v16892_v1 = vor.u32 %v18510_v33, %v16889_v24  ;;  %v18546_v3 = vld [vmem:[#allocation12 + $0x28] sm:$0xff] }
 0x917   :  { %11014 = vmatpush.bf16.msrb.mxu2 %v16796_v10  ;;  %v10181_v10 = vperm.slane %v19339_v17, 2  ;;  %11313 = vmatpush.bf16.msra.mxu0 %v18546_v3 }
 0x91a   :  { %10971 = vmatpush.bf16.msra.mxu3 %v16984_v62  ;;  %v10182_v62 = vperm.slane %v19339_v17, 3 }
 0x91b   :  { %11015 = vmatpush.bf16.msrb.mxu2 %v16780_v35  ;;  %11314 = vmatpush.bf16.msra.mxu0 %v18545_v40 }
 0x91c   :  { %v10890_v30 = vpop.f32.mrf.mxu0 }
 0x91d   :  { %v10851_v48 = vpop.f32.mrf.mxu1 }
 0x91e   :  { %10972 = vmatpush.bf16.msra.mxu3 %v16968_v54  ;;  %v18554_v48 = vld [vmem:[#allocation12 + $0x68] sm:$0xff] }
 0x91f   :  { %11016 = vmatpush.bf16.msrb.mxu2 %v16764_v20 }
 0x922   :  { %11017 = vmatmul.bf16.vlgmr.msrb.gmra.mxu2 %v19326_v36  ;;  %10973 = vmatpush.bf16.msra.mxu3 %v16952_v43  ;;  %v16920_v36 = vor.u32 %v18520_v19, %v16919_v37  ;;  %v18543_v37 = vld [vmem:[#allocation12 + $0x10] sm:$0xff] }
 0x925   :  { %10926 = vmatmul.bf16.vlgmr.msrb.gmra.mxu3 %v19336_v21  ;;  %v10901_v27 = vpop.f32.mrf.mxu1 }
 0x926   :  { %10974 = vmatpush.bf16.msra.mxu3 %v16936_v47  ;;  %v19347_v18 = vadd.f32 %v10901_v27, %v10889_v31  ;;  %v18555_v47 = vld [vmem:[#allocation12 + $0x70] sm:$0xff]  ;;  %v18562_v31 = vld [vmem:[#allocation12 + $0xa8] sm:$0xff]  ;;  %v18561_v27 = vld [vmem:[#allocation12 + $0xa0] sm:$0xff] }
 0x927   :  { %11325 = vmatpush.bf16.msra.mxu1 %v18555_v47 }
 0x92a   :  { %10975 = vmatpush.bf16.msra.mxu3 %v16920_v36  ;;  %v18542_v36 = vld [vmem:[#allocation12 + $0x8] sm:$0xff] }
 0x92b   :  { %11326 = vmatpush.bf16.msra.mxu1 %v18554_v48 }
 0x92d   :  { %v10903_v56 = vpop.f32.mrf.mxu1 }
 0x92e   :  { %10976 = vmatpush.bf16.msra.mxu3 %v16904_v59  ;;  %v18564_v59 = vld [vmem:[#allocation12 + $0xb8] sm:$0xff] }
 0x92f   :  { %11327 = vmatpush.bf16.msra.mxu1 %v18553_v55  ;;  %11337 = vmatpush.bf16.msra.mxu2 %v18564_v59 }
 0x932   :  { %10977 = vmatpush.bf16.msra.mxu3 %v16888_v51  ;;  %v18549_v51 = vld [vmem:[#allocation12 + $0x40] sm:$0xff] }
 0x933   :  { %11328 = vmatpush.bf16.msra.mxu1 %v18552_v58  ;;  %11338 = vmatpush.bf16.msra.mxu2 %v18563_v60 }
 0x934   :  { %v10940_v16 = vpop.f32.mrf.mxu0 }
 0x935   :  { %10978 = vmatmul.bf16.vlgmr.msra.gmra.mxu3 %v19336_v21  ;;  %v10941_v57 = vadd.f32 %v10940_v16, %v10181_v10 }
 0x936   :  { %11022 = vmatpush.bf16.msrb.mxu3 %v17004_v38  ;;  %v18560_v38 = vld [vmem:[#allocation12 + $0x98] sm:$0xff] }
 0x937   :  { %11329 = vmatpush.bf16.msra.mxu1 %v18551_v9  ;;  %11339 = vmatpush.bf16.msra.mxu2 %v18562_v31 }
 0x938   :  { %v10953_v28 = vpop.f32.mrf.mxu1 }
 0x939   :  { %v19351_v35 = vadd.f32 %v10953_v28, %v10941_v57  ;;  %v18569_v28 = vld [vmem:[#allocation12 + $0xe0] sm:$0xff] }
 0x93a   :  { %11023 = vmatpush.bf16.msrb.mxu3 %v16988_v13 }
 0x93b   :  { %11330 = vmatpush.bf16.msra.mxu1 %v18550_v2  ;;  %11340 = vmatpush.bf16.msra.mxu2 %v18561_v27 }
 0x93c   :  { %v10942_v32 = vpop.f32.mrf.mxu0 }
 0x93d   :  { %v18559_v32 = vld [vmem:[#allocation12 + $0x90] sm:$0xff] }
 0x93e   :  { %11024 = vmatpush.bf16.msrb.mxu3 %v16972_v42 }
 0x93f   :  { %11331 = vmatpush.bf16.msra.mxu1 %v18549_v51  ;;  %11341 = vmatpush.bf16.msra.mxu2 %v18560_v38 }
 0x940   :  { %v10955_v20 = vpop.f32.mrf.mxu1 }
 0x942   :  { %11025 = vmatpush.bf16.msrb.mxu3 %v16956_v6 }
 0x943   :  { %11342 = vmatpush.bf16.msra.mxu2 %v18559_v32 }
 0x946   :  { %11026 = vmatpush.bf16.msrb.mxu3 %v16940_v11 }
 0x947   :  { %11343 = vmatpush.bf16.msra.mxu2 %v18558_v41 }
 0x94a   :  { %11027 = vmatpush.bf16.msrb.mxu3 %v16924_v61  ;;  %v18568_v61 = vld [vmem:[#allocation12 + $0xd8] sm:$0xff] }
 0x94b   :  { %11344 = vmatpush.bf16.msra.mxu2 %v18557_v25 }
 0x94e   :  { %11028 = vmatpush.bf16.msrb.mxu3 %v16908_v8  ;;  %v18566_v8 = vld [vmem:[#allocation12 + $0xc8] sm:$0xff] }
 0x952   :  { %11029 = vmatpush.bf16.msrb.mxu3 %v16892_v1  ;;  %v18565_v1 = vld [vmem:[#allocation12 + $0xc0] sm:$0xff] }
 0x954   :  { %v10992_v14 = vpop.f32.mrf.mxu0 }
 0x955   :  { %11030 = vmatmul.bf16.vlgmr.msrb.gmra.mxu3 %v19336_v21  ;;  %v10993_v34 = vadd.f32 %v10992_v14, %v10182_v62  ;;  %v18544_v21 = vld [vmem:[#allocation12 + $0x18] sm:$0xff]  ;;  %v18567_v14 = vld [vmem:[#allocation12 + $0xd0] sm:$0xff] }
 0x956   :  { %11315 = vmatpush.bf16.msra.mxu0 %v18544_v21  ;;  %11350 = vmatpush.bf16.msra.mxu3 %v18572_v0 }
 0x95a   :  { %v11005_v49 = vpop.f32.mrf.mxu1  ;;  %11316 = vmatpush.bf16.msra.mxu0 %v18543_v37  ;;  %11351 = vmatpush.bf16.msra.mxu3 %v18571_v52 }
 0x95b   :  { %v19355_v22 = vadd.f32 %v11005_v49, %v10993_v34 }
 0x95c   :  { %v10994_v30 = vpop.f32.mrf.mxu0 }
 0x95e   :  { %11317 = vmatpush.bf16.msra.mxu0 %v18542_v36  ;;  %11352 = vmatpush.bf16.msra.mxu3 %v18570_v26 }
 0x962   :  { %v11007_v53 = vpop.f32.mrf.mxu1  ;;  %11318 = vmatpush.bf16.msra.mxu0 %v18541_v4  ;;  %11353 = vmatpush.bf16.msra.mxu3 %v18569_v28 }
 0x965   :  { %v10862_v54 = vpop.f32.mrf.mxu2 }
 0x966   :  { %v10863_v50 = vadd.f32 %v10862_v54, %v19343_v44  ;;  %11354 = vmatpush.bf16.msra.mxu3 %v18568_v61 }
 0x96a   :  { %11355 = vmatpush.bf16.msra.mxu3 %v18567_v14 }
 0x96d   :  { %v10864_v43 = vpop.f32.mrf.mxu2 }
 0x96e   :  { %11356 = vmatpush.bf16.msra.mxu3 %v18566_v8 }
 0x972   :  { %11357 = vmatpush.bf16.msra.mxu3 %v18565_v1 }
 0x975   :  { %v10914_v17 = vpop.f32.mrf.mxu2 }
 0x976   :  { %v10915_v57 = vadd.f32 %v10914_v17, %v19347_v18 }
 0x97d   :  { %v10916_v19 = vpop.f32.mrf.mxu2 }
 0x97e   :  { %v18587_v19 = vld [vmem:[#allocation13] ss:$0 sm:$0xff] }
 0x985   :  { %v10966_v16 = vpop.f32.mrf.mxu2 }
 0x986   :  { %v10967_v33 = vadd.f32 %v10966_v16, %v19351_v35 }
 0x98d   :  { %v10968_v63 = vpop.f32.mrf.mxu2 }
 0x998   :  { %v10875_v5 = vpop.f32.mrf.mxu3 }
 0x999   :  { %v10876_v13 = vadd.f32 %v10875_v5, %v10863_v50 }
 0x99b   :  { %vm11035_vm12 = vcmp.gt.f32.partialorder %v10876_v13, 0.0  ;;  %v11039_v45 = vmul.f32 0.1, %v10876_v13 }
 0x99d   :  { %v11043_v42 = vsel %vm11035_vm12, %v10876_v13, %v11039_v45 }
 0x99e   :  { %v11047_v10 = vpack.c.bf16 %v11043_v42, %v11043_v42 }
 0x9a0   :  { %v10877_v6 = vpop.f32.mrf.mxu3  ;;  %11319 = vmatmul.bf16.vlgmr.msra.gmra.mxu0 %v11047_v10 }
 0x9a5   :  { %v11018_v56 = vpop.f32.mrf.mxu2 }
 0x9a6   :  { %v11019_v54 = vadd.f32 %v11018_v56, %v19355_v22 }
 0x9a8   :  { %v10927_v11 = vpop.f32.mrf.mxu3 }
 0x9a9   :  { %v10928_v12 = vadd.f32 %v10927_v11, %v10915_v57 }
 0x9ab   :  { %vm11036_vm13 = vcmp.gt.f32.partialorder %v10928_v12, 0.0  ;;  %v11040_v46 = vmul.f32 0.1, %v10928_v12 }
 0x9ad   :  { %v11020_v44 = vpop.f32.mrf.mxu2  ;;  %v11044_v39 = vsel %vm11036_vm13, %v10928_v12, %v11040_v46 }
 0x9ae   :  { %v11048_v29 = vpack.c.bf16 %v11044_v39, %v11044_v39 }
 0x9b0   :  { %v10929_v20 = vpop.f32.mrf.mxu3  ;;  %11332 = vmatmul.bf16.vlgmr.msra.gmra.mxu1 %v11048_v29 }
 0x9b8   :  { %v10979_v18 = vpop.f32.mrf.mxu3 }
 0x9b9   :  { %v10980_v24 = vadd.f32 %v10979_v18, %v10967_v33 }
 0x9bb   :  { %vm11037_vm14 = vcmp.gt.f32.partialorder %v10980_v24, 0.0  ;;  %v11041_v30 = vmul.f32 0.1, %v10980_v24 }
 0x9bd   :  { %v11045_v62 = vsel %vm11037_vm14, %v10980_v24, %v11041_v30 }
 0x9be   :  { %v11049_v34 = vpack.c.bf16 %v11045_v62, %v11045_v62 }
 0x9c0   :  { %v10981_v49 = vpop.f32.mrf.mxu3  ;;  %11345 = vmatmul.bf16.vlgmr.msra.gmra.mxu2 %v11049_v34 }
 0x9d8   :  { %v11031_v23 = vpop.f32.mrf.mxu3 }
 0x9d9   :  { %v11032_v7 = vadd.f32 %v11031_v23, %v11019_v54 }
 0x9db   :  { %vm11038_vm15 = vcmp.gt.f32.partialorder %v11032_v7, 0.0  ;;  %v11042_v53 = vmul.f32 0.1, %v11032_v7 }
 0x9dd   :  { %v11046_v43 = vsel %vm11038_vm15, %v11032_v7, %v11042_v53 }
 0x9de   :  { %v11050_v3 = vpack.c.bf16 %v11046_v43, %v11046_v43 }
 0x9e0   :  { %v11033_v35 = vpop.f32.mrf.mxu3  ;;  %11358 = vmatmul.bf16.vlgmr.msra.gmra.mxu3 %v11050_v3 }
 0xa1d   :  { %v11320_v15 = vpop.f32.mrf.mxu0 }
 0xa1e   :  { %v11321_v36 = vadd.f32 %v18587_v19, %v11320_v15 }
 0xa25   :  { %v11322_v40 = vpop.f32.mrf.mxu0 }
 0xa2d   :  { %v11333_v47 = vpop.f32.mrf.mxu1 }
 0xa2e   :  { %v11334_v48 = vadd.f32 %v11333_v47, %v11321_v36 }
 0xa35   :  { %v11335_v21 = vpop.f32.mrf.mxu1 }
 0xa43   :  { %v11346_v17 = vpop.f32.mrf.mxu2 }
 0xa44   :  { %v11347_v4 = vadd.f32 %v11346_v17, %v11334_v48 }
 0xa4b   :  { %v11348_v37 = vpop.f32.mrf.mxu2 }
 0xa63   :  { %v11359_v55 = vpop.f32.mrf.mxu3 }
 0xa64   :  { %v11360_v22 = vadd.f32 %v11359_v55, %v11347_v4 }
 0xa66   :  { %11363 = vst [vmem:[%s19373_s9] sm:$0xff] %v11360_v22 }
 0xa6b   :  { %v11361_v16 = vpop.f32.mrf.mxu3 }
 0xa6c   :  { %11368 = vsyncpa [#allocation3], 1 }
 0xa6d   :  { %11369 = vsyncpa [#allocation5], 1 }
 0xa6e   :  { %11370 = vsyncpa [#allocation8], 1 }
 0xa6f   :  { %11371 = vsyncpa [#allocation11], 1 }
 0xa70   :  { %11372 = vsyncpa [#allocation14], 1 }

</bundles_post_ra>
